<compile_context>
chip_gen: v7x
topology: tpu7x:2x2x1
jax: 0.10.0
libtpu: 0.0.40
codegen_flags: <defaults>
</compile_context>

<pallas_src>
import functools

import jax
import jax.numpy as jnp
from jax.experimental import pallas as pl
from jax.experimental.pallas import tpu as pltpu

EPS = 1e-5                      # nn.BatchNorm3d default eps
M_TILE = 2048                   # lanes per grid step (multiple of 512, sweepable)
VMEM_LIMIT = 32 * 1024 * 1024   # explicit scoped-VMEM budget (safe on v5e/v6e/v7x)


def _compiler_params():
    return pltpu.CompilerParams(dimension_semantics=("parallel",),
                                vmem_limit_bytes=VMEM_LIMIT)


# ----------------------------------------------------------------------------
# Pass A kernel: in-kernel 27-tap conv (bf16 MXU, f32 accumulation) + masked
# per-tile BN partial sums.  `shifts` are the 27 static lane offsets of the
# taps in the input-strided layout (kd*Hs*Ws + kh*Ws + kw).
# ----------------------------------------------------------------------------
def _conv_stats_kernel(w_ref, x_ref, h_ref, mask_ref, conv_ref, stat_ref, *, shifts):
    mt = conv_ref.shape[1]
    # Slab = this tile's activation block plus its halo block (lane concat at
    # a 128-aligned boundary -> cheap placement, stays in VMEM/vregs).
    slab = jnp.concatenate([x_ref[...], h_ref[...]], axis=1)        # (Cp, mt+ht)

    acc = None
    for t, s in enumerate(shifts):                                   # 27 static taps
        part = jnp.dot(w_ref[t], slab[:, s:s + mt],
                       preferred_element_type=jnp.float32)           # (P, mt) f32
        acc = part if acc is None else acc + part

    conv_ref[...] = acc.astype(conv_ref.dtype)

    # BN partials: only columns flagged valid (d<Do, h<Ho, w<Wo) contribute.
    am = acc * mask_ref[...]                                         # (P, mt)
    s1 = jnp.sum(am, axis=1, keepdims=True)                          # (P, 1)
    s2 = jnp.sum(am * acc, axis=1, keepdims=True)                    # (P, 1)
    stat_ref[0] = jnp.concatenate([s1, s2], axis=1)                  # single (P,2) store


# ----------------------------------------------------------------------------
# Pass B kernel: folded BN (y*scale + shift) + residual add + ReLU.
# Residual arrives channel-padded to P rows -> one unmasked full-tile store.
# ----------------------------------------------------------------------------
def _bn_res_relu_kernel(*refs, has_res):
    if has_res:
        y_ref, scale_ref, shift_ref, res_ref, o_ref = refs
    else:
        y_ref, scale_ref, shift_ref, o_ref = refs
        res_ref = None

    y = y_ref[...].astype(jnp.float32) * scale_ref[...] + shift_ref[...]
    if has_res:
        y = y + res_ref[...]
    o_ref[...] = jnp.maximum(y, 0.0).astype(o_ref.dtype)


# ----------------------------------------------------------------------------
# One conv3d(3x3x3, valid, bias=False) + BatchNorm3d(train) [+ residual] + ReLU.
#   x_cf : (Cin, N, Ds, Hs, Ws) channels-first activation
#   w    : (P, Cin, 3, 3, 3) PyTorch-layout weight
#   res  : optional (Cres, N, Ds, Hs, Ws), already aligned so res[..., d,h,w]
#          is added (first Cres channels) to the conv output at (d, h, w).
# Returns the compact (P, N, Do, Ho, Wo) activation in `out_dtype`.
# ----------------------------------------------------------------------------
def conv3d_bn_relu(x_cf, w, gamma, beta, res=None, out_dtype=jnp.float32,
                   m_tile=M_TILE, stage_dtype=jnp.float32):
    Cin, N, Ds, Hs, Ws = x_cf.shape
    P = w.shape[0]
    Do, Ho, Wo = Ds - 2, Hs - 2, Ws - 2
    M = N * Do * Ho * Wo                 # number of valid conv outputs (BN count)
    Mfull = N * Ds * Hs * Ws             # input-strided column count
    Cp = ((Cin + 7) // 8) * 8            # channel (sublane) padding

    # -- tile sizing: big tiles amortize the ~0.35us per-step overhead, but
    #    keep >= ~4 tiles so v7x's two TensorCores both get work on the
    #    single "parallel" grid axis.
    m_tile = ((m_tile + 511) // 512) * 512
    m_tile = max(512, min(m_tile, max(512, (Mfull // (4 * 512)) * 512)))
    halo = 2 * Hs * Ws + 2 * Ws + 2      # max tap shift in the strided layout
    halo_r = ((halo + 511) // 512) * 512
    m_tile = max(m_tile, halo_r)
    ht = halo_r
    while m_tile % ht:                   # smallest 512-multiple >= halo dividing m_tile
        ht += 512

    Mpad = ((Mfull + m_tile - 1) // m_tile) * m_tile
    nm = Mpad // m_tile
    hmult = m_tile // ht

    # -- activation: flattened, bf16, channel- and lane-padded (one small copy
    #    of the *uninflated* activation; the 27x im2col is gone).
    x_flat = x_cf.reshape(Cin, Mfull).astype(jnp.bfloat16)
    x_pad = jnp.pad(x_flat, ((0, Cp - Cin), (0, Mpad + ht - Mfull)))

    # -- weights grouped by tap: (27, P, Cp); tap order (kd, kh, kw) row-major
    #    matches the static shift table below.
    w_taps = jnp.transpose(w, (2, 3, 4, 0, 1)).reshape(27, P, Cin)
    w_taps = jnp.pad(w_taps, ((0, 0), (0, 0), (0, Cp - Cin))).astype(jnp.bfloat16)
    shifts = tuple(kd * Hs * Ws + kh * Ws + kw
                   for kd in range(3) for kh in range(3) for kw in range(3))

    # -- validity mask (d<Do, h<Ho, w<Wo) over strided columns: BN stats only.
    vmask = ((jnp.arange(Ds) < Do)[:, None, None]
             & (jnp.arange(Hs) < Ho)[None, :, None]
             & (jnp.arange(Ws) < Wo)[None, None, :])
    vmask = jnp.broadcast_to(vmask[None], (N, Ds, Hs, Ws)).reshape(1, Mfull)
    vmask = jnp.pad(vmask.astype(jnp.float32), ((0, 0), (0, Mpad - Mfull)))

    stage_isz = jnp.dtype(stage_dtype).itemsize

    # ---- pass A: tiled in-kernel conv + merged per-tile BN partials ---------
    bytes_a = (w_taps.size * 2 + (Mpad + nm * ht) * Cp * 2 + Mpad * 4
               + P * Mpad * stage_isz + nm * P * 2 * 4)
    conv_out, stats = pl.pallas_call(
        functools.partial(_conv_stats_kernel, shifts=shifts),
        grid=(nm,),
        in_specs=[pl.BlockSpec((27, P, Cp), lambda i: (0, 0, 0)),
                  pl.BlockSpec((Cp, m_tile), lambda i: (0, i)),
                  pl.BlockSpec((Cp, ht), lambda i: (0, (i + 1) * hmult)),
                  pl.BlockSpec((1, m_tile), lambda i: (0, i))],
        out_specs=[pl.BlockSpec((P, m_tile), lambda i: (0, i)),
                   pl.BlockSpec((1, P, 2), lambda i: (i, 0, 0))],
        out_shape=[jax.ShapeDtypeStruct((P, Mpad), stage_dtype),
                   jax.ShapeDtypeStruct((nm, P, 2), jnp.float32)],
        compiler_params=_compiler_params(),
        cost_estimate=pl.CostEstimate(flops=2 * P * Cp * 27 * Mpad,
                                      transcendentals=0, bytes_accessed=bytes_a),
    )(w_taps, x_pad, x_pad, vmask)

    # ---- global BN stats (tiny per-channel math), folded into scale/shift ---
    # TODO(synk): E[x^2]-mean^2 can cancel for large-mean data; use a
    # mean-centered second pass if this is reused beyond this regime.
    mean = jnp.sum(stats[:, :, 0], axis=0) / M
    ex2 = jnp.sum(stats[:, :, 1], axis=0) / M
    var = ex2 - mean * mean                          # biased, PyTorch train-mode
    scale_v = gamma.astype(jnp.float32) * jax.lax.rsqrt(var + EPS)
    shift_v = beta.astype(jnp.float32) - mean * scale_v
    scale = scale_v.reshape(P, 1)
    shift = shift_v.reshape(P, 1)

    # ---- pass B: folded BN (+ residual) + ReLU, single full-tile store ------
    has_res = res is not None
    inputs = [conv_out, scale, shift]
    in_specs = [pl.BlockSpec((P, m_tile), lambda i: (0, i)),
                pl.BlockSpec((P, 1), lambda i: (0, 0)),
                pl.BlockSpec((P, 1), lambda i: (0, 0))]
    res_bytes = 0
    if has_res:
        rc = res.shape[0]
        # Channel-pad the residual to P rows (review: avoids masked sub-sublane
        # row-sliced stores in the kernel); kept f32 so the "+x" stays exact.
        res_p = jnp.pad(res.reshape(rc, Mfull).astype(jnp.float32),
                        ((0, P - rc), (0, Mpad - Mfull)))
        inputs.append(res_p)
        in_specs.append(pl.BlockSpec((P, m_tile), lambda i: (0, i)))
        res_bytes = P * Mpad * 4

    out_isz = jnp.dtype(out_dtype).itemsize
    bytes_b = P * Mpad * stage_isz + res_bytes + P * Mpad * out_isz
    y = pl.pallas_call(
        functools.partial(_bn_res_relu_kernel, has_res=has_res),
        grid=(nm,),
        in_specs=in_specs,
        out_specs=pl.BlockSpec((P, m_tile), lambda i: (0, i)),
        out_shape=jax.ShapeDtypeStruct((P, Mpad), out_dtype),
        compiler_params=_compiler_params(),
        cost_estimate=pl.CostEstimate(flops=4 * P * Mpad, transcendentals=0,
                                      bytes_accessed=bytes_b),
    )(*inputs)

    # Strided layout -> compact (P, N, Do, Ho, Wo).  Garbage columns (invalid
    # d/h/w and lane padding) never escape: masked out of the stats above and
    # sliced away here.
    return y[:, :Mfull].reshape(P, N, Ds, Hs, Ws)[:, :, :Do, :Ho, :Wo]


# ----------------------------------------------------------------------------
# Full ResBlock forward: conv1->bn1->relu, conv2->bn2, +cropped residual, relu.
# Activations stay channels-first between the two convs; the only NCDHW
# conversion is at the block boundary.
# ----------------------------------------------------------------------------
def resblock_forward(x, w1, g1, b1, w2, g2, b2, inplanes, planes, m_tile=M_TILE):
    assert x.shape[1] == inplanes and w1.shape[0] == planes and w2.shape[0] == planes
    x_cf = jnp.transpose(x, (1, 0, 2, 3, 4))                    # (Cin, N, D, H, W)

    # conv1 -> bn1 -> relu   (intermediate kept bf16: it feeds the bf16 MXU)
    y1 = conv3d_bn_relu(x_cf, w1, g1, b1, out_dtype=jnp.bfloat16, m_tile=m_tile)

    # conv2 -> bn2 -> (+ cropped residual into the first `inplanes` channels)
    # -> relu.  In conv2's output strided layout the cropped residual is just
    # x_cf[:, :, 2:, 2:, 2:] (valid columns line up; invalid ones are dropped).
    res = x_cf[:, :, 2:, 2:, 2:]
    y2 = conv3d_bn_relu(y1, w2, g2, b2, res=res, out_dtype=jnp.float32,
                        m_tile=m_tile)                           # (planes, N, D-4, ...)

    return jnp.transpose(y2, (1, 0, 2, 3, 4))                    # NCDHW
# TODO(synk): BatchNorm running_mean/running_var momentum update (training
# bookkeeping) is not part of the returned activation and is not implemented.


# ----------------------------------------------------------------------------
# Pure-JAX reference.  match_bf16=True applies the same bf16 rounding to the
# MXU operands that the kernel uses (accumulation stays f32 in both), giving
# a tight apples-to-apples check.
# ----------------------------------------------------------------------------
def ref_forward(x, w1, g1, b1, w2, g2, b2, inplanes, match_bf16=False):
    dn = ('NCDHW', 'OIDHW', 'NCDHW')
    hp = jax.lax.Precision.HIGHEST

    def cast(a):
        return a.astype(jnp.bfloat16).astype(jnp.float32) if match_bf16 else a

    def bn(z, g, b):
        mu = jnp.mean(z, axis=(0, 2, 3, 4), keepdims=True)
        var = jnp.var(z, axis=(0, 2, 3, 4), keepdims=True)
        return (g.reshape(1, -1, 1, 1, 1) * (z - mu) * jax.lax.rsqrt(var + EPS)
                + b.reshape(1, -1, 1, 1, 1))

    y = jax.lax.conv_general_dilated(cast(x), cast(w1), (1, 1, 1), 'VALID',
                                     dimension_numbers=dn, precision=hp)
    y = jnp.maximum(bn(y, g1, b1), 0.0)
    y = jax.lax.conv_general_dilated(cast(y), cast(w2), (1, 1, 1), 'VALID',
                                     dimension_numbers=dn, precision=hp)
    y = bn(y, g2, b2)
    y = y.at[:, :inplanes].add(x[:, :, 2:-2, 2:-2, 2:-2])
    return jnp.maximum(y, 0.0)


if __name__ == "__main__":
    inplanes, planes = 4, 8
    N, D = 2, 16

    key = jax.random.PRNGKey(0)
    kx, kw1, kw2, kg1, kb1, kg2, kb2 = jax.random.split(key, 7)

    x = jax.random.normal(kx, (N, inplanes, D, D, D), dtype=jnp.float32)
    # conv weights (O, I, 3, 3, 3), kaiming-like scaling, bias=False
    w1 = jax.random.normal(kw1, (planes, inplanes, 3, 3, 3), jnp.float32) * (
        2.0 / (inplanes * 27)) ** 0.5
    w2 = jax.random.normal(kw2, (planes, planes, 3, 3, 3), jnp.float32) * (
        2.0 / (planes * 27)) ** 0.5
    # BatchNorm affine params (deterministic, non-trivial)
    g1 = 1.0 + 0.1 * jax.random.normal(kg1, (planes,), jnp.float32)
    b1 = 0.1 * jax.random.normal(kb1, (planes,), jnp.float32)
    g2 = 1.0 + 0.1 * jax.random.normal(kg2, (planes,), jnp.float32)
    b2 = 0.1 * jax.random.normal(kb2, (planes,), jnp.float32)

    fwd = jax.jit(functools.partial(resblock_forward,
                                    inplanes=inplanes, planes=planes))
    out = jax.block_until_ready(fwd(x, w1, g1, b1, w2, g2, b2))
    assert out.shape == (N, planes, D - 4, D - 4, D - 4), out.shape

    # Tight check vs a reference with the same bf16 MXU-operand rounding.
    ref_m = jax.block_until_ready(
        ref_forward(x, w1, g1, b1, w2, g2, b2, inplanes, match_bf16=True))
    err_m = float(jnp.max(jnp.abs(out - ref_m)))
    assert jnp.allclose(out, ref_m, atol=2e-3, rtol=2e-3), err_m

    # Loose sanity check vs the pure-f32 reference (bounds the bf16 cost).
    ref_f = jax.block_until_ready(
        ref_forward(x, w1, g1, b1, w2, g2, b2, inplanes, match_bf16=False))
    err_f = float(jnp.max(jnp.abs(out - ref_f)))
    assert jnp.allclose(out, ref_f, atol=1e-1, rtol=1e-1), err_f

    print("KERNEL_OK")
</pallas_src>

<mosaic_0001>
module attributes {stable_mosaic.version = 11 : i64} {
  func.func @_conv_stats_kernel(%arg0: i32, %arg1: memref<27x8x8xbf16, #tpu.memory_space<vmem>>, %arg2: memref<8x2048xbf16, #tpu.memory_space<vmem>>, %arg3: memref<8x1024xbf16, #tpu.memory_space<vmem>>, %arg4: memref<1x2048xf32, #tpu.memory_space<vmem>>, %arg5: memref<8x2048xf32, #tpu.memory_space<vmem>>, %arg6: memref<1x8x2xf32, #tpu.memory_space<vmem>>) attributes {dimension_semantics = [#tpu.dimension_semantics<parallel>], iteration_bounds = array<i64: 4>, scalar_prefetch = 0 : i64, scratch_operands = 0 : i64, tpu.core_type = #tpu.core_type<tc>, window_params = [{pipeline_mode = #tpu.pipeline_mode<synchronous>, transform_indices = @transform_0, window_bounds = array<i64: 27, 8, 8>}, {transform_indices = @transform_1, window_bounds = array<i64: 8, 2048>}, {transform_indices = @transform_2, window_bounds = array<i64: 8, 1024>}, {transform_indices = @transform_3, window_bounds = array<i64: 1, 2048>}, {transform_indices = @transform_4, window_bounds = array<i64: 8, 2048>}, {transform_indices = @transform_5, window_bounds = array<i64: 1, 8, 2>}]} {
    %c0 = arith.constant 0 : index
    %c0_0 = arith.constant 0 : index
    %0 = vector.load %arg2[%c0, %c0_0] : memref<8x2048xbf16, #tpu.memory_space<vmem>>, vector<8x2048xbf16>
    %c0_1 = arith.constant 0 : index
    %c0_2 = arith.constant 0 : index
    %1 = vector.load %arg3[%c0_1, %c0_2] : memref<8x1024xbf16, #tpu.memory_space<vmem>>, vector<8x1024xbf16>
    %2 = tpu.concatenate %0, %1 in 1 : vector<8x2048xbf16>, vector<8x1024xbf16> -> vector<8x3072xbf16>
    %c0_3 = arith.constant 0 : index
    %c0_4 = arith.constant 0 : index
    %c0_5 = arith.constant 0 : index
    %3 = vector.load %arg1[%c0_3, %c0_4, %c0_5] : memref<27x8x8xbf16, #tpu.memory_space<vmem>>, vector<1x8x8xbf16>
    %4 = vector.shape_cast %3 : vector<1x8x8xbf16> to vector<8x8xbf16>
    %5 = vector.extract_strided_slice %2 {offsets = [0, 0], sizes = [8, 2048], strides = [1, 1]} : vector<8x3072xbf16> to vector<8x2048xbf16>
    %cst = arith.constant dense<0.000000e+00> : vector<8x2048xf32>
    %6 = tpu.matmul %4, %5, %cst {dimension_numbers = #tpu.dot_dimension_numbers<[1], [0], [0], [1], [0, 0, 1, 1], [], []>} : vector<8x8xbf16>, vector<8x2048xbf16>, vector<8x2048xf32> -> vector<8x2048xf32>
    %c1 = arith.constant 1 : index
    %c0_6 = arith.constant 0 : index
    %c0_7 = arith.constant 0 : index
    %7 = vector.load %arg1[%c1, %c0_6, %c0_7] : memref<27x8x8xbf16, #tpu.memory_space<vmem>>, vector<1x8x8xbf16>
    %8 = vector.shape_cast %7 : vector<1x8x8xbf16> to vector<8x8xbf16>
    %9 = vector.extract_strided_slice %2 {offsets = [0, 1], sizes = [8, 2048], strides = [1, 1]} : vector<8x3072xbf16> to vector<8x2048xbf16>
    %cst_8 = arith.constant dense<0.000000e+00> : vector<8x2048xf32>
    %10 = tpu.matmul %8, %9, %cst_8 {dimension_numbers = #tpu.dot_dimension_numbers<[1], [0], [0], [1], [0, 0, 1, 1], [], []>} : vector<8x8xbf16>, vector<8x2048xbf16>, vector<8x2048xf32> -> vector<8x2048xf32>
    %11 = arith.addf %6, %10 : vector<8x2048xf32>
    %c2 = arith.constant 2 : index
    %c0_9 = arith.constant 0 : index
    %c0_10 = arith.constant 0 : index
    %12 = vector.load %arg1[%c2, %c0_9, %c0_10] : memref<27x8x8xbf16, #tpu.memory_space<vmem>>, vector<1x8x8xbf16>
    %13 = vector.shape_cast %12 : vector<1x8x8xbf16> to vector<8x8xbf16>
    %14 = vector.extract_strided_slice %2 {offsets = [0, 2], sizes = [8, 2048], strides = [1, 1]} : vector<8x3072xbf16> to vector<8x2048xbf16>
    %cst_11 = arith.constant dense<0.000000e+00> : vector<8x2048xf32>
    %15 = tpu.matmul %13, %14, %cst_11 {dimension_numbers = #tpu.dot_dimension_numbers<[1], [0], [0], [1], [0, 0, 1, 1], [], []>} : vector<8x8xbf16>, vector<8x2048xbf16>, vector<8x2048xf32> -> vector<8x2048xf32>
    %16 = arith.addf %11, %15 : vector<8x2048xf32>
    %c3 = arith.constant 3 : index
    %c0_12 = arith.constant 0 : index
    %c0_13 = arith.constant 0 : index
    %17 = vector.load %arg1[%c3, %c0_12, %c0_13] : memref<27x8x8xbf16, #tpu.memory_space<vmem>>, vector<1x8x8xbf16>
    %18 = vector.shape_cast %17 : vector<1x8x8xbf16> to vector<8x8xbf16>
    %19 = vector.extract_strided_slice %2 {offsets = [0, 16], sizes = [8, 2048], strides = [1, 1]} : vector<8x3072xbf16> to vector<8x2048xbf16>
    %cst_14 = arith.constant dense<0.000000e+00> : vector<8x2048xf32>
    %20 = tpu.matmul %18, %19, %cst_14 {dimension_numbers = #tpu.dot_dimension_numbers<[1], [0], [0], [1], [0, 0, 1, 1], [], []>} : vector<8x8xbf16>, vector<8x2048xbf16>, vector<8x2048xf32> -> vector<8x2048xf32>
    %21 = arith.addf %16, %20 : vector<8x2048xf32>
    %c4 = arith.constant 4 : index
    %c0_15 = arith.constant 0 : index
    %c0_16 = arith.constant 0 : index
    %22 = vector.load %arg1[%c4, %c0_15, %c0_16] : memref<27x8x8xbf16, #tpu.memory_space<vmem>>, vector<1x8x8xbf16>
    %23 = vector.shape_cast %22 : vector<1x8x8xbf16> to vector<8x8xbf16>
    %24 = vector.extract_strided_slice %2 {offsets = [0, 17], sizes = [8, 2048], strides = [1, 1]} : vector<8x3072xbf16> to vector<8x2048xbf16>
    %cst_17 = arith.constant dense<0.000000e+00> : vector<8x2048xf32>
    %25 = tpu.matmul %23, %24, %cst_17 {dimension_numbers = #tpu.dot_dimension_numbers<[1], [0], [0], [1], [0, 0, 1, 1], [], []>} : vector<8x8xbf16>, vector<8x2048xbf16>, vector<8x2048xf32> -> vector<8x2048xf32>
    %26 = arith.addf %21, %25 : vector<8x2048xf32>
    %c5 = arith.constant 5 : index
    %c0_18 = arith.constant 0 : index
    %c0_19 = arith.constant 0 : index
    %27 = vector.load %arg1[%c5, %c0_18, %c0_19] : memref<27x8x8xbf16, #tpu.memory_space<vmem>>, vector<1x8x8xbf16>
    %28 = vector.shape_cast %27 : vector<1x8x8xbf16> to vector<8x8xbf16>
    %29 = vector.extract_strided_slice %2 {offsets = [0, 18], sizes = [8, 2048], strides = [1, 1]} : vector<8x3072xbf16> to vector<8x2048xbf16>
    %cst_20 = arith.constant dense<0.000000e+00> : vector<8x2048xf32>
    %30 = tpu.matmul %28, %29, %cst_20 {dimension_numbers = #tpu.dot_dimension_numbers<[1], [0], [0], [1], [0, 0, 1, 1], [], []>} : vector<8x8xbf16>, vector<8x2048xbf16>, vector<8x2048xf32> -> vector<8x2048xf32>
    %31 = arith.addf %26, %30 : vector<8x2048xf32>
    %c6 = arith.constant 6 : index
    %c0_21 = arith.constant 0 : index
    %c0_22 = arith.constant 0 : index
    %32 = vector.load %arg1[%c6, %c0_21, %c0_22] : memref<27x8x8xbf16, #tpu.memory_space<vmem>>, vector<1x8x8xbf16>
    %33 = vector.shape_cast %32 : vector<1x8x8xbf16> to vector<8x8xbf16>
    %34 = vector.extract_strided_slice %2 {offsets = [0, 32], sizes = [8, 2048], strides = [1, 1]} : vector<8x3072xbf16> to vector<8x2048xbf16>
    %cst_23 = arith.constant dense<0.000000e+00> : vector<8x2048xf32>
    %35 = tpu.matmul %33, %34, %cst_23 {dimension_numbers = #tpu.dot_dimension_numbers<[1], [0], [0], [1], [0, 0, 1, 1], [], []>} : vector<8x8xbf16>, vector<8x2048xbf16>, vector<8x2048xf32> -> vector<8x2048xf32>
    %36 = arith.addf %31, %35 : vector<8x2048xf32>
    %c7 = arith.constant 7 : index
    %c0_24 = arith.constant 0 : index
    %c0_25 = arith.constant 0 : index
    %37 = vector.load %arg1[%c7, %c0_24, %c0_25] : memref<27x8x8xbf16, #tpu.memory_space<vmem>>, vector<1x8x8xbf16>
    %38 = vector.shape_cast %37 : vector<1x8x8xbf16> to vector<8x8xbf16>
    %39 = vector.extract_strided_slice %2 {offsets = [0, 33], sizes = [8, 2048], strides = [1, 1]} : vector<8x3072xbf16> to vector<8x2048xbf16>
    %cst_26 = arith.constant dense<0.000000e+00> : vector<8x2048xf32>
    %40 = tpu.matmul %38, %39, %cst_26 {dimension_numbers = #tpu.dot_dimension_numbers<[1], [0], [0], [1], [0, 0, 1, 1], [], []>} : vector<8x8xbf16>, vector<8x2048xbf16>, vector<8x2048xf32> -> vector<8x2048xf32>
    %41 = arith.addf %36, %40 : vector<8x2048xf32>
    %c8 = arith.constant 8 : index
    %c0_27 = arith.constant 0 : index
    %c0_28 = arith.constant 0 : index
    %42 = vector.load %arg1[%c8, %c0_27, %c0_28] : memref<27x8x8xbf16, #tpu.memory_space<vmem>>, vector<1x8x8xbf16>
    %43 = vector.shape_cast %42 : vector<1x8x8xbf16> to vector<8x8xbf16>
    %44 = vector.extract_strided_slice %2 {offsets = [0, 34], sizes = [8, 2048], strides = [1, 1]} : vector<8x3072xbf16> to vector<8x2048xbf16>
    %cst_29 = arith.constant dense<0.000000e+00> : vector<8x2048xf32>
    %45 = tpu.matmul %43, %44, %cst_29 {dimension_numbers = #tpu.dot_dimension_numbers<[1], [0], [0], [1], [0, 0, 1, 1], [], []>} : vector<8x8xbf16>, vector<8x2048xbf16>, vector<8x2048xf32> -> vector<8x2048xf32>
    %46 = arith.addf %41, %45 : vector<8x2048xf32>
    %c9 = arith.constant 9 : index
    %c0_30 = arith.constant 0 : index
    %c0_31 = arith.constant 0 : index
    %47 = vector.load %arg1[%c9, %c0_30, %c0_31] : memref<27x8x8xbf16, #tpu.memory_space<vmem>>, vector<1x8x8xbf16>
    %48 = vector.shape_cast %47 : vector<1x8x8xbf16> to vector<8x8xbf16>
    %49 = vector.extract_strided_slice %2 {offsets = [0, 256], sizes = [8, 2048], strides = [1, 1]} : vector<8x3072xbf16> to vector<8x2048xbf16>
    %cst_32 = arith.constant dense<0.000000e+00> : vector<8x2048xf32>
    %50 = tpu.matmul %48, %49, %cst_32 {dimension_numbers = #tpu.dot_dimension_numbers<[1], [0], [0], [1], [0, 0, 1, 1], [], []>} : vector<8x8xbf16>, vector<8x2048xbf16>, vector<8x2048xf32> -> vector<8x2048xf32>
    %51 = arith.addf %46, %50 : vector<8x2048xf32>
    %c10 = arith.constant 10 : index
    %c0_33 = arith.constant 0 : index
    %c0_34 = arith.constant 0 : index
    %52 = vector.load %arg1[%c10, %c0_33, %c0_34] : memref<27x8x8xbf16, #tpu.memory_space<vmem>>, vector<1x8x8xbf16>
    %53 = vector.shape_cast %52 : vector<1x8x8xbf16> to vector<8x8xbf16>
    %54 = vector.extract_strided_slice %2 {offsets = [0, 257], sizes = [8, 2048], strides = [1, 1]} : vector<8x3072xbf16> to vector<8x2048xbf16>
    %cst_35 = arith.constant dense<0.000000e+00> : vector<8x2048xf32>
    %55 = tpu.matmul %53, %54, %cst_35 {dimension_numbers = #tpu.dot_dimension_numbers<[1], [0], [0], [1], [0, 0, 1, 1], [], []>} : vector<8x8xbf16>, vector<8x2048xbf16>, vector<8x2048xf32> -> vector<8x2048xf32>
    %56 = arith.addf %51, %55 : vector<8x2048xf32>
    %c11 = arith.constant 11 : index
    %c0_36 = arith.constant 0 : index
    %c0_37 = arith.constant 0 : index
    %57 = vector.load %arg1[%c11, %c0_36, %c0_37] : memref<27x8x8xbf16, #tpu.memory_space<vmem>>, vector<1x8x8xbf16>
    %58 = vector.shape_cast %57 : vector<1x8x8xbf16> to vector<8x8xbf16>
    %59 = vector.extract_strided_slice %2 {offsets = [0, 258], sizes = [8, 2048], strides = [1, 1]} : vector<8x3072xbf16> to vector<8x2048xbf16>
    %cst_38 = arith.constant dense<0.000000e+00> : vector<8x2048xf32>
    %60 = tpu.matmul %58, %59, %cst_38 {dimension_numbers = #tpu.dot_dimension_numbers<[1], [0], [0], [1], [0, 0, 1, 1], [], []>} : vector<8x8xbf16>, vector<8x2048xbf16>, vector<8x2048xf32> -> vector<8x2048xf32>
    %61 = arith.addf %56, %60 : vector<8x2048xf32>
    %c12 = arith.constant 12 : index
    %c0_39 = arith.constant 0 : index
    %c0_40 = arith.constant 0 : index
    %62 = vector.load %arg1[%c12, %c0_39, %c0_40] : memref<27x8x8xbf16, #tpu.memory_space<vmem>>, vector<1x8x8xbf16>
    %63 = vector.shape_cast %62 : vector<1x8x8xbf16> to vector<8x8xbf16>
    %64 = vector.extract_strided_slice %2 {offsets = [0, 272], sizes = [8, 2048], strides = [1, 1]} : vector<8x3072xbf16> to vector<8x2048xbf16>
    %cst_41 = arith.constant dense<0.000000e+00> : vector<8x2048xf32>
    %65 = tpu.matmul %63, %64, %cst_41 {dimension_numbers = #tpu.dot_dimension_numbers<[1], [0], [0], [1], [0, 0, 1, 1], [], []>} : vector<8x8xbf16>, vector<8x2048xbf16>, vector<8x2048xf32> -> vector<8x2048xf32>
    %66 = arith.addf %61, %65 : vector<8x2048xf32>
    %c13 = arith.constant 13 : index
    %c0_42 = arith.constant 0 : index
    %c0_43 = arith.constant 0 : index
    %67 = vector.load %arg1[%c13, %c0_42, %c0_43] : memref<27x8x8xbf16, #tpu.memory_space<vmem>>, vector<1x8x8xbf16>
    %68 = vector.shape_cast %67 : vector<1x8x8xbf16> to vector<8x8xbf16>
    %69 = vector.extract_strided_slice %2 {offsets = [0, 273], sizes = [8, 2048], strides = [1, 1]} : vector<8x3072xbf16> to vector<8x2048xbf16>
    %cst_44 = arith.constant dense<0.000000e+00> : vector<8x2048xf32>
    %70 = tpu.matmul %68, %69, %cst_44 {dimension_numbers = #tpu.dot_dimension_numbers<[1], [0], [0], [1], [0, 0, 1, 1], [], []>} : vector<8x8xbf16>, vector<8x2048xbf16>, vector<8x2048xf32> -> vector<8x2048xf32>
    %71 = arith.addf %66, %70 : vector<8x2048xf32>
    %c14 = arith.constant 14 : index
    %c0_45 = arith.constant 0 : index
    %c0_46 = arith.constant 0 : index
    %72 = vector.load %arg1[%c14, %c0_45, %c0_46] : memref<27x8x8xbf16, #tpu.memory_space<vmem>>, vector<1x8x8xbf16>
    %73 = vector.shape_cast %72 : vector<1x8x8xbf16> to vector<8x8xbf16>
    %74 = vector.extract_strided_slice %2 {offsets = [0, 274], sizes = [8, 2048], strides = [1, 1]} : vector<8x3072xbf16> to vector<8x2048xbf16>
    %cst_47 = arith.constant dense<0.000000e+00> : vector<8x2048xf32>
    %75 = tpu.matmul %73, %74, %cst_47 {dimension_numbers = #tpu.dot_dimension_numbers<[1], [0], [0], [1], [0, 0, 1, 1], [], []>} : vector<8x8xbf16>, vector<8x2048xbf16>, vector<8x2048xf32> -> vector<8x2048xf32>
    %76 = arith.addf %71, %75 : vector<8x2048xf32>
    %c15 = arith.constant 15 : index
    %c0_48 = arith.constant 0 : index
    %c0_49 = arith.constant 0 : index
    %77 = vector.load %arg1[%c15, %c0_48, %c0_49] : memref<27x8x8xbf16, #tpu.memory_space<vmem>>, vector<1x8x8xbf16>
    %78 = vector.shape_cast %77 : vector<1x8x8xbf16> to vector<8x8xbf16>
    %79 = vector.extract_strided_slice %2 {offsets = [0, 288], sizes = [8, 2048], strides = [1, 1]} : vector<8x3072xbf16> to vector<8x2048xbf16>
    %cst_50 = arith.constant dense<0.000000e+00> : vector<8x2048xf32>
    %80 = tpu.matmul %78, %79, %cst_50 {dimension_numbers = #tpu.dot_dimension_numbers<[1], [0], [0], [1], [0, 0, 1, 1], [], []>} : vector<8x8xbf16>, vector<8x2048xbf16>, vector<8x2048xf32> -> vector<8x2048xf32>
    %81 = arith.addf %76, %80 : vector<8x2048xf32>
    %c16 = arith.constant 16 : index
    %c0_51 = arith.constant 0 : index
    %c0_52 = arith.constant 0 : index
    %82 = vector.load %arg1[%c16, %c0_51, %c0_52] : memref<27x8x8xbf16, #tpu.memory_space<vmem>>, vector<1x8x8xbf16>
    %83 = vector.shape_cast %82 : vector<1x8x8xbf16> to vector<8x8xbf16>
    %84 = vector.extract_strided_slice %2 {offsets = [0, 289], sizes = [8, 2048], strides = [1, 1]} : vector<8x3072xbf16> to vector<8x2048xbf16>
    %cst_53 = arith.constant dense<0.000000e+00> : vector<8x2048xf32>
    %85 = tpu.matmul %83, %84, %cst_53 {dimension_numbers = #tpu.dot_dimension_numbers<[1], [0], [0], [1], [0, 0, 1, 1], [], []>} : vector<8x8xbf16>, vector<8x2048xbf16>, vector<8x2048xf32> -> vector<8x2048xf32>
    %86 = arith.addf %81, %85 : vector<8x2048xf32>
    %c17 = arith.constant 17 : index
    %c0_54 = arith.constant 0 : index
    %c0_55 = arith.constant 0 : index
    %87 = vector.load %arg1[%c17, %c0_54, %c0_55] : memref<27x8x8xbf16, #tpu.memory_space<vmem>>, vector<1x8x8xbf16>
    %88 = vector.shape_cast %87 : vector<1x8x8xbf16> to vector<8x8xbf16>
    %89 = vector.extract_strided_slice %2 {offsets = [0, 290], sizes = [8, 2048], strides = [1, 1]} : vector<8x3072xbf16> to vector<8x2048xbf16>
    %cst_56 = arith.constant dense<0.000000e+00> : vector<8x2048xf32>
    %90 = tpu.matmul %88, %89, %cst_56 {dimension_numbers = #tpu.dot_dimension_numbers<[1], [0], [0], [1], [0, 0, 1, 1], [], []>} : vector<8x8xbf16>, vector<8x2048xbf16>, vector<8x2048xf32> -> vector<8x2048xf32>
    %91 = arith.addf %86, %90 : vector<8x2048xf32>
    %c18 = arith.constant 18 : index
    %c0_57 = arith.constant 0 : index
    %c0_58 = arith.constant 0 : index
    %92 = vector.load %arg1[%c18, %c0_57, %c0_58] : memref<27x8x8xbf16, #tpu.memory_space<vmem>>, vector<1x8x8xbf16>
    %93 = vector.shape_cast %92 : vector<1x8x8xbf16> to vector<8x8xbf16>
    %94 = vector.extract_strided_slice %2 {offsets = [0, 512], sizes = [8, 2048], strides = [1, 1]} : vector<8x3072xbf16> to vector<8x2048xbf16>
    %cst_59 = arith.constant dense<0.000000e+00> : vector<8x2048xf32>
    %95 = tpu.matmul %93, %94, %cst_59 {dimension_numbers = #tpu.dot_dimension_numbers<[1], [0], [0], [1], [0, 0, 1, 1], [], []>} : vector<8x8xbf16>, vector<8x2048xbf16>, vector<8x2048xf32> -> vector<8x2048xf32>
    %96 = arith.addf %91, %95 : vector<8x2048xf32>
    %c19 = arith.constant 19 : index
    %c0_60 = arith.constant 0 : index
    %c0_61 = arith.constant 0 : index
    %97 = vector.load %arg1[%c19, %c0_60, %c0_61] : memref<27x8x8xbf16, #tpu.memory_space<vmem>>, vector<1x8x8xbf16>
    %98 = vector.shape_cast %97 : vector<1x8x8xbf16> to vector<8x8xbf16>
    %99 = vector.extract_strided_slice %2 {offsets = [0, 513], sizes = [8, 2048], strides = [1, 1]} : vector<8x3072xbf16> to vector<8x2048xbf16>
    %cst_62 = arith.constant dense<0.000000e+00> : vector<8x2048xf32>
    %100 = tpu.matmul %98, %99, %cst_62 {dimension_numbers = #tpu.dot_dimension_numbers<[1], [0], [0], [1], [0, 0, 1, 1], [], []>} : vector<8x8xbf16>, vector<8x2048xbf16>, vector<8x2048xf32> -> vector<8x2048xf32>
    %101 = arith.addf %96, %100 : vector<8x2048xf32>
    %c20 = arith.constant 20 : index
    %c0_63 = arith.constant 0 : index
    %c0_64 = arith.constant 0 : index
    %102 = vector.load %arg1[%c20, %c0_63, %c0_64] : memref<27x8x8xbf16, #tpu.memory_space<vmem>>, vector<1x8x8xbf16>
    %103 = vector.shape_cast %102 : vector<1x8x8xbf16> to vector<8x8xbf16>
    %104 = vector.extract_strided_slice %2 {offsets = [0, 514], sizes = [8, 2048], strides = [1, 1]} : vector<8x3072xbf16> to vector<8x2048xbf16>
    %cst_65 = arith.constant dense<0.000000e+00> : vector<8x2048xf32>
    %105 = tpu.matmul %103, %104, %cst_65 {dimension_numbers = #tpu.dot_dimension_numbers<[1], [0], [0], [1], [0, 0, 1, 1], [], []>} : vector<8x8xbf16>, vector<8x2048xbf16>, vector<8x2048xf32> -> vector<8x2048xf32>
    %106 = arith.addf %101, %105 : vector<8x2048xf32>
    %c21 = arith.constant 21 : index
    %c0_66 = arith.constant 0 : index
    %c0_67 = arith.constant 0 : index
    %107 = vector.load %arg1[%c21, %c0_66, %c0_67] : memref<27x8x8xbf16, #tpu.memory_space<vmem>>, vector<1x8x8xbf16>
    %108 = vector.shape_cast %107 : vector<1x8x8xbf16> to vector<8x8xbf16>
    %109 = vector.extract_strided_slice %2 {offsets = [0, 528], sizes = [8, 2048], strides = [1, 1]} : vector<8x3072xbf16> to vector<8x2048xbf16>
    %cst_68 = arith.constant dense<0.000000e+00> : vector<8x2048xf32>
    %110 = tpu.matmul %108, %109, %cst_68 {dimension_numbers = #tpu.dot_dimension_numbers<[1], [0], [0], [1], [0, 0, 1, 1], [], []>} : vector<8x8xbf16>, vector<8x2048xbf16>, vector<8x2048xf32> -> vector<8x2048xf32>
    %111 = arith.addf %106, %110 : vector<8x2048xf32>
    %c22 = arith.constant 22 : index
    %c0_69 = arith.constant 0 : index
    %c0_70 = arith.constant 0 : index
    %112 = vector.load %arg1[%c22, %c0_69, %c0_70] : memref<27x8x8xbf16, #tpu.memory_space<vmem>>, vector<1x8x8xbf16>
    %113 = vector.shape_cast %112 : vector<1x8x8xbf16> to vector<8x8xbf16>
    %114 = vector.extract_strided_slice %2 {offsets = [0, 529], sizes = [8, 2048], strides = [1, 1]} : vector<8x3072xbf16> to vector<8x2048xbf16>
    %cst_71 = arith.constant dense<0.000000e+00> : vector<8x2048xf32>
    %115 = tpu.matmul %113, %114, %cst_71 {dimension_numbers = #tpu.dot_dimension_numbers<[1], [0], [0], [1], [0, 0, 1, 1], [], []>} : vector<8x8xbf16>, vector<8x2048xbf16>, vector<8x2048xf32> -> vector<8x2048xf32>
    %116 = arith.addf %111, %115 : vector<8x2048xf32>
    %c23 = arith.constant 23 : index
    %c0_72 = arith.constant 0 : index
    %c0_73 = arith.constant 0 : index
    %117 = vector.load %arg1[%c23, %c0_72, %c0_73] : memref<27x8x8xbf16, #tpu.memory_space<vmem>>, vector<1x8x8xbf16>
    %118 = vector.shape_cast %117 : vector<1x8x8xbf16> to vector<8x8xbf16>
    %119 = vector.extract_strided_slice %2 {offsets = [0, 530], sizes = [8, 2048], strides = [1, 1]} : vector<8x3072xbf16> to vector<8x2048xbf16>
    %cst_74 = arith.constant dense<0.000000e+00> : vector<8x2048xf32>
    %120 = tpu.matmul %118, %119, %cst_74 {dimension_numbers = #tpu.dot_dimension_numbers<[1], [0], [0], [1], [0, 0, 1, 1], [], []>} : vector<8x8xbf16>, vector<8x2048xbf16>, vector<8x2048xf32> -> vector<8x2048xf32>
    %121 = arith.addf %116, %120 : vector<8x2048xf32>
    %c24 = arith.constant 24 : index
    %c0_75 = arith.constant 0 : index
    %c0_76 = arith.constant 0 : index
    %122 = vector.load %arg1[%c24, %c0_75, %c0_76] : memref<27x8x8xbf16, #tpu.memory_space<vmem>>, vector<1x8x8xbf16>
    %123 = vector.shape_cast %122 : vector<1x8x8xbf16> to vector<8x8xbf16>
    %124 = vector.extract_strided_slice %2 {offsets = [0, 544], sizes = [8, 2048], strides = [1, 1]} : vector<8x3072xbf16> to vector<8x2048xbf16>
    %cst_77 = arith.constant dense<0.000000e+00> : vector<8x2048xf32>
    %125 = tpu.matmul %123, %124, %cst_77 {dimension_numbers = #tpu.dot_dimension_numbers<[1], [0], [0], [1], [0, 0, 1, 1], [], []>} : vector<8x8xbf16>, vector<8x2048xbf16>, vector<8x2048xf32> -> vector<8x2048xf32>
    %126 = arith.addf %121, %125 : vector<8x2048xf32>
    %c25 = arith.constant 25 : index
    %c0_78 = arith.constant 0 : index
    %c0_79 = arith.constant 0 : index
    %127 = vector.load %arg1[%c25, %c0_78, %c0_79] : memref<27x8x8xbf16, #tpu.memory_space<vmem>>, vector<1x8x8xbf16>
    %128 = vector.shape_cast %127 : vector<1x8x8xbf16> to vector<8x8xbf16>
    %129 = vector.extract_strided_slice %2 {offsets = [0, 545], sizes = [8, 2048], strides = [1, 1]} : vector<8x3072xbf16> to vector<8x2048xbf16>
    %cst_80 = arith.constant dense<0.000000e+00> : vector<8x2048xf32>
    %130 = tpu.matmul %128, %129, %cst_80 {dimension_numbers = #tpu.dot_dimension_numbers<[1], [0], [0], [1], [0, 0, 1, 1], [], []>} : vector<8x8xbf16>, vector<8x2048xbf16>, vector<8x2048xf32> -> vector<8x2048xf32>
    %131 = arith.addf %126, %130 : vector<8x2048xf32>
    %c26 = arith.constant 26 : index
    %c0_81 = arith.constant 0 : index
    %c0_82 = arith.constant 0 : index
    %132 = vector.load %arg1[%c26, %c0_81, %c0_82] : memref<27x8x8xbf16, #tpu.memory_space<vmem>>, vector<1x8x8xbf16>
    %133 = vector.shape_cast %132 : vector<1x8x8xbf16> to vector<8x8xbf16>
    %134 = vector.extract_strided_slice %2 {offsets = [0, 546], sizes = [8, 2048], strides = [1, 1]} : vector<8x3072xbf16> to vector<8x2048xbf16>
    %cst_83 = arith.constant dense<0.000000e+00> : vector<8x2048xf32>
    %135 = tpu.matmul %133, %134, %cst_83 {dimension_numbers = #tpu.dot_dimension_numbers<[1], [0], [0], [1], [0, 0, 1, 1], [], []>} : vector<8x8xbf16>, vector<8x2048xbf16>, vector<8x2048xf32> -> vector<8x2048xf32>
    %136 = arith.addf %131, %135 : vector<8x2048xf32>
    %c0_84 = arith.constant 0 : index
    %c0_85 = arith.constant 0 : index
    %137 = vector.load %arg5[%c0_84, %c0_85] : memref<8x2048xf32, #tpu.memory_space<vmem>>, vector<8x2048xf32>
    tpu.vector_store %arg5[%c0_84, %c0_85], %136 {strides = array<i32>} : memref<8x2048xf32, #tpu.memory_space<vmem>>, vector<8x2048xf32>,
    %c0_86 = arith.constant 0 : index
    %c0_87 = arith.constant 0 : index
    %138 = vector.load %arg4[%c0_86, %c0_87] : memref<1x2048xf32, #tpu.memory_space<vmem>>, vector<1x2048xf32>
    %139 = vector.broadcast %138 : vector<1x2048xf32> to vector<8x2048xf32>
    %140 = arith.mulf %136, %139 : vector<8x2048xf32>
    %cst_88 = arith.constant dense<0.000000e+00> : vector<8xf32>
    %141 = vector.multi_reduction <add>, %140, %cst_88 [1] : vector<8x2048xf32> to vector<8xf32>
    %142 = vector.shape_cast %141 : vector<8xf32> to vector<8x1xf32>
    %143 = arith.mulf %140, %136 : vector<8x2048xf32>
    %cst_89 = arith.constant dense<0.000000e+00> : vector<8xf32>
    %144 = vector.multi_reduction <add>, %143, %cst_89 [1] : vector<8x2048xf32> to vector<8xf32>
    %145 = vector.shape_cast %144 : vector<8xf32> to vector<8x1xf32>
    %146 = tpu.concatenate %142, %145 in 1 : vector<8x1xf32>, vector<8x1xf32> -> vector<8x2xf32>
    %c0_90 = arith.constant 0 : index
    %c0_91 = arith.constant 0 : index
    %c0_92 = arith.constant 0 : index
    %147 = vector.load %arg6[%c0_90, %c0_91, %c0_92] : memref<1x8x2xf32, #tpu.memory_space<vmem>>, vector<1x8x2xf32>
    %148 = vector.shape_cast %147 : vector<1x8x2xf32> to vector<8x2xf32>
    %149 = vector.shape_cast %146 : vector<8x2xf32> to vector<1x8x2xf32>
    tpu.vector_store %arg6[%c0_90, %c0_91, %c0_92], %149 {strides = array<i32>} : memref<1x8x2xf32, #tpu.memory_space<vmem>>, vector<1x8x2xf32>,
    return
  }
  func.func @transform_0(%arg0: i32) -> (i32, i32, i32) {
    %c0_i32 = arith.constant 0 : i32
    %c0_i32_0 = arith.constant 0 : i32
    %c0_i32_1 = arith.constant 0 : i32
    %c0_i32_2 = arith.constant 0 : i32
    return %c0_i32, %c0_i32_0, %c0_i32_1 : i32, i32, i32
  }
  func.func @transform_1(%arg0: i32) -> (i32, i32) {
    %c0_i32 = arith.constant 0 : i32
    %c0_i32_0 = arith.constant 0 : i32
    return %c0_i32, %arg0 : i32, i32
  }
  func.func @transform_2(%arg0: i32) -> (i32, i32) {
    %c1_i32 = arith.constant 1 : i32
    %0 = arith.addi %arg0, %c1_i32 : i32
    %c2_i32 = arith.constant 2 : i32
    %1 = arith.muli %0, %c2_i32 : i32
    %c0_i32 = arith.constant 0 : i32
    %c0_i32_0 = arith.constant 0 : i32
    return %c0_i32, %1 : i32, i32
  }
  func.func @transform_3(%arg0: i32) -> (i32, i32) {
    %c0_i32 = arith.constant 0 : i32
    %c0_i32_0 = arith.constant 0 : i32
    return %c0_i32, %arg0 : i32, i32
  }
  func.func @transform_4(%arg0: i32) -> (i32, i32) {
    %c0_i32 = arith.constant 0 : i32
    %c0_i32_0 = arith.constant 0 : i32
    return %c0_i32, %arg0 : i32, i32
  }
  func.func @transform_5(%arg0: i32) -> (i32, i32, i32) {
    %c0_i32 = arith.constant 0 : i32
    %c0_i32_0 = arith.constant 0 : i32
    %c0_i32_1 = arith.constant 0 : i32
    return %arg0, %c0_i32, %c0_i32_0 : i32, i32, i32
  }
}

module attributes {stable_mosaic.version = 11 : i64} {
  func.func @_bn_res_relu_kernel(%arg0: i32, %arg1: memref<8x2048xf32, #tpu.memory_space<vmem>>, %arg2: memref<8x1xf32, #tpu.memory_space<vmem>>, %arg3: memref<8x1xf32, #tpu.memory_space<vmem>>, %arg4: memref<8x2048xbf16, #tpu.memory_space<vmem>>) attributes {dimension_semantics = [#tpu.dimension_semantics<parallel>], iteration_bounds = array<i64: 4>, scalar_prefetch = 0 : i64, scratch_operands = 0 : i64, tpu.core_type = #tpu.core_type<tc>, window_params = [{transform_indices = @transform_0, window_bounds = array<i64: 8, 2048>}, {pipeline_mode = #tpu.pipeline_mode<synchronous>, transform_indices = @transform_1, window_bounds = array<i64: 8, 1>}, {pipeline_mode = #tpu.pipeline_mode<synchronous>, transform_indices = @transform_2, window_bounds = array<i64: 8, 1>}, {transform_indices = @transform_3, window_bounds = array<i64: 8, 2048>}]} {
    %c0 = arith.constant 0 : index
    %c0_0 = arith.constant 0 : index
    %0 = vector.load %arg1[%c0, %c0_0] : memref<8x2048xf32, #tpu.memory_space<vmem>>, vector<8x2048xf32>
    %c0_1 = arith.constant 0 : index
    %c0_2 = arith.constant 0 : index
    %1 = vector.load %arg2[%c0_1, %c0_2] : memref<8x1xf32, #tpu.memory_space<vmem>>, vector<8x1xf32>
    %2 = vector.broadcast %1 : vector<8x1xf32> to vector<8x2048xf32>
    %3 = arith.mulf %0, %2 : vector<8x2048xf32>
    %c0_3 = arith.constant 0 : index
    %c0_4 = arith.constant 0 : index
    %4 = vector.load %arg3[%c0_3, %c0_4] : memref<8x1xf32, #tpu.memory_space<vmem>>, vector<8x1xf32>
    %5 = vector.broadcast %4 : vector<8x1xf32> to vector<8x2048xf32>
    %6 = arith.addf %3, %5 : vector<8x2048xf32>
    %cst = arith.constant 0.000000e+00 : f32
    %7 = vector.broadcast %cst : f32 to vector<8x2048xf32>
    %8 = arith.maximumf %6, %7 : vector<8x2048xf32>
    %9 = arith.truncf %8 : vector<8x2048xf32> to vector<8x2048xbf16>
    %c0_5 = arith.constant 0 : index
    %c0_6 = arith.constant 0 : index
    %10 = vector.load %arg4[%c0_5, %c0_6] : memref<8x2048xbf16, #tpu.memory_space<vmem>>, vector<8x2048xbf16>
    tpu.vector_store %arg4[%c0_5, %c0_6], %9 {strides = array<i32>} : memref<8x2048xbf16, #tpu.memory_space<vmem>>, vector<8x2048xbf16>,
    return
  }
  func.func @transform_0(%arg0: i32) -> (i32, i32) {
    %c0_i32 = arith.constant 0 : i32
    %c0_i32_0 = arith.constant 0 : i32
    return %c0_i32, %arg0 : i32, i32
  }
  func.func @transform_1(%arg0: i32) -> (i32, i32) {
    %c0_i32 = arith.constant 0 : i32
    %c0_i32_0 = arith.constant 0 : i32
    %c0_i32_1 = arith.constant 0 : i32
    return %c0_i32, %c0_i32_0 : i32, i32
  }
  func.func @transform_2(%arg0: i32) -> (i32, i32) {
    %c0_i32 = arith.constant 0 : i32
    %c0_i32_0 = arith.constant 0 : i32
    %c0_i32_1 = arith.constant 0 : i32
    return %c0_i32, %c0_i32_0 : i32, i32
  }
  func.func @transform_3(%arg0: i32) -> (i32, i32) {
    %c0_i32 = arith.constant 0 : i32
    %c0_i32_0 = arith.constant 0 : i32
    return %c0_i32, %arg0 : i32, i32
  }
}

module attributes {stable_mosaic.version = 11 : i64} {
  func.func @_conv_stats_kernel(%arg0: i32, %arg1: memref<27x8x8xbf16, #tpu.memory_space<vmem>>, %arg2: memref<8x1024xbf16, #tpu.memory_space<vmem>>, %arg3: memref<8x512xbf16, #tpu.memory_space<vmem>>, %arg4: memref<1x1024xf32, #tpu.memory_space<vmem>>, %arg5: memref<8x1024xf32, #tpu.memory_space<vmem>>, %arg6: memref<1x8x2xf32, #tpu.memory_space<vmem>>) attributes {dimension_semantics = [#tpu.dimension_semantics<parallel>], iteration_bounds = array<i64: 6>, scalar_prefetch = 0 : i64, scratch_operands = 0 : i64, tpu.core_type = #tpu.core_type<tc>, window_params = [{pipeline_mode = #tpu.pipeline_mode<synchronous>, transform_indices = @transform_0, window_bounds = array<i64: 27, 8, 8>}, {transform_indices = @transform_1, window_bounds = array<i64: 8, 1024>}, {transform_indices = @transform_2, window_bounds = array<i64: 8, 512>}, {transform_indices = @transform_3, window_bounds = array<i64: 1, 1024>}, {transform_indices = @transform_4, window_bounds = array<i64: 8, 1024>}, {transform_indices = @transform_5, window_bounds = array<i64: 1, 8, 2>}]} {
    %c0 = arith.constant 0 : index
    %c0_0 = arith.constant 0 : index
    %0 = vector.load %arg2[%c0, %c0_0] : memref<8x1024xbf16, #tpu.memory_space<vmem>>, vector<8x1024xbf16>
    %c0_1 = arith.constant 0 : index
    %c0_2 = arith.constant 0 : index
    %1 = vector.load %arg3[%c0_1, %c0_2] : memref<8x512xbf16, #tpu.memory_space<vmem>>, vector<8x512xbf16>
    %2 = tpu.concatenate %0, %1 in 1 : vector<8x1024xbf16>, vector<8x512xbf16> -> vector<8x1536xbf16>
    %c0_3 = arith.constant 0 : index
    %c0_4 = arith.constant 0 : index
    %c0_5 = arith.constant 0 : index
    %3 = vector.load %arg1[%c0_3, %c0_4, %c0_5] : memref<27x8x8xbf16, #tpu.memory_space<vmem>>, vector<1x8x8xbf16>
    %4 = vector.shape_cast %3 : vector<1x8x8xbf16> to vector<8x8xbf16>
    %5 = vector.extract_strided_slice %2 {offsets = [0, 0], sizes = [8, 1024], strides = [1, 1]} : vector<8x1536xbf16> to vector<8x1024xbf16>
    %cst = arith.constant dense<0.000000e+00> : vector<8x1024xf32>
    %6 = tpu.matmul %4, %5, %cst {dimension_numbers = #tpu.dot_dimension_numbers<[1], [0], [0], [1], [0, 0, 1, 1], [], []>} : vector<8x8xbf16>, vector<8x1024xbf16>, vector<8x1024xf32> -> vector<8x1024xf32>
    %c1 = arith.constant 1 : index
    %c0_6 = arith.constant 0 : index
    %c0_7 = arith.constant 0 : index
    %7 = vector.load %arg1[%c1, %c0_6, %c0_7] : memref<27x8x8xbf16, #tpu.memory_space<vmem>>, vector<1x8x8xbf16>
    %8 = vector.shape_cast %7 : vector<1x8x8xbf16> to vector<8x8xbf16>
    %9 = vector.extract_strided_slice %2 {offsets = [0, 1], sizes = [8, 1024], strides = [1, 1]} : vector<8x1536xbf16> to vector<8x1024xbf16>
    %cst_8 = arith.constant dense<0.000000e+00> : vector<8x1024xf32>
    %10 = tpu.matmul %8, %9, %cst_8 {dimension_numbers = #tpu.dot_dimension_numbers<[1], [0], [0], [1], [0, 0, 1, 1], [], []>} : vector<8x8xbf16>, vector<8x1024xbf16>, vector<8x1024xf32> -> vector<8x1024xf32>
    %11 = arith.addf %6, %10 : vector<8x1024xf32>
    %c2 = arith.constant 2 : index
    %c0_9 = arith.constant 0 : index
    %c0_10 = arith.constant 0 : index
    %12 = vector.load %arg1[%c2, %c0_9, %c0_10] : memref<27x8x8xbf16, #tpu.memory_space<vmem>>, vector<1x8x8xbf16>
    %13 = vector.shape_cast %12 : vector<1x8x8xbf16> to vector<8x8xbf16>
    %14 = vector.extract_strided_slice %2 {offsets = [0, 2], sizes = [8, 1024], strides = [1, 1]} : vector<8x1536xbf16> to vector<8x1024xbf16>
    %cst_11 = arith.constant dense<0.000000e+00> : vector<8x1024xf32>
    %15 = tpu.matmul %13, %14, %cst_11 {dimension_numbers = #tpu.dot_dimension_numbers<[1], [0], [0], [1], [0, 0, 1, 1], [], []>} : vector<8x8xbf16>, vector<8x1024xbf16>, vector<8x1024xf32> -> vector<8x1024xf32>
    %16 = arith.addf %11, %15 : vector<8x1024xf32>
    %c3 = arith.constant 3 : index
    %c0_12 = arith.constant 0 : index
    %c0_13 = arith.constant 0 : index
    %17 = vector.load %arg1[%c3, %c0_12, %c0_13] : memref<27x8x8xbf16, #tpu.memory_space<vmem>>, vector<1x8x8xbf16>
    %18 = vector.shape_cast %17 : vector<1x8x8xbf16> to vector<8x8xbf16>
    %19 = vector.extract_strided_slice %2 {offsets = [0, 14], sizes = [8, 1024], strides = [1, 1]} : vector<8x1536xbf16> to vector<8x1024xbf16>
    %cst_14 = arith.constant dense<0.000000e+00> : vector<8x1024xf32>
    %20 = tpu.matmul %18, %19, %cst_14 {dimension_numbers = #tpu.dot_dimension_numbers<[1], [0], [0], [1], [0, 0, 1, 1], [], []>} : vector<8x8xbf16>, vector<8x1024xbf16>, vector<8x1024xf32> -> vector<8x1024xf32>
    %21 = arith.addf %16, %20 : vector<8x1024xf32>
    %c4 = arith.constant 4 : index
    %c0_15 = arith.constant 0 : index
    %c0_16 = arith.constant 0 : index
    %22 = vector.load %arg1[%c4, %c0_15, %c0_16] : memref<27x8x8xbf16, #tpu.memory_space<vmem>>, vector<1x8x8xbf16>
    %23 = vector.shape_cast %22 : vector<1x8x8xbf16> to vector<8x8xbf16>
    %24 = vector.extract_strided_slice %2 {offsets = [0, 15], sizes = [8, 1024], strides = [1, 1]} : vector<8x1536xbf16> to vector<8x1024xbf16>
    %cst_17 = arith.constant dense<0.000000e+00> : vector<8x1024xf32>
    %25 = tpu.matmul %23, %24, %cst_17 {dimension_numbers = #tpu.dot_dimension_numbers<[1], [0], [0], [1], [0, 0, 1, 1], [], []>} : vector<8x8xbf16>, vector<8x1024xbf16>, vector<8x1024xf32> -> vector<8x1024xf32>
    %26 = arith.addf %21, %25 : vector<8x1024xf32>
    %c5 = arith.constant 5 : index
    %c0_18 = arith.constant 0 : index
    %c0_19 = arith.constant 0 : index
    %27 = vector.load %arg1[%c5, %c0_18, %c0_19] : memref<27x8x8xbf16, #tpu.memory_space<vmem>>, vector<1x8x8xbf16>
    %28 = vector.shape_cast %27 : vector<1x8x8xbf16> to vector<8x8xbf16>
    %29 = vector.extract_strided_slice %2 {offsets = [0, 16], sizes = [8, 1024], strides = [1, 1]} : vector<8x1536xbf16> to vector<8x1024xbf16>
    %cst_20 = arith.constant dense<0.000000e+00> : vector<8x1024xf32>
    %30 = tpu.matmul %28, %29, %cst_20 {dimension_numbers = #tpu.dot_dimension_numbers<[1], [0], [0], [1], [0, 0, 1, 1], [], []>} : vector<8x8xbf16>, vector<8x1024xbf16>, vector<8x1024xf32> -> vector<8x1024xf32>
    %31 = arith.addf %26, %30 : vector<8x1024xf32>
    %c6 = arith.constant 6 : index
    %c0_21 = arith.constant 0 : index
    %c0_22 = arith.constant 0 : index
    %32 = vector.load %arg1[%c6, %c0_21, %c0_22] : memref<27x8x8xbf16, #tpu.memory_space<vmem>>, vector<1x8x8xbf16>
    %33 = vector.shape_cast %32 : vector<1x8x8xbf16> to vector<8x8xbf16>
    %34 = vector.extract_strided_slice %2 {offsets = [0, 28], sizes = [8, 1024], strides = [1, 1]} : vector<8x1536xbf16> to vector<8x1024xbf16>
    %cst_23 = arith.constant dense<0.000000e+00> : vector<8x1024xf32>
    %35 = tpu.matmul %33, %34, %cst_23 {dimension_numbers = #tpu.dot_dimension_numbers<[1], [0], [0], [1], [0, 0, 1, 1], [], []>} : vector<8x8xbf16>, vector<8x1024xbf16>, vector<8x1024xf32> -> vector<8x1024xf32>
    %36 = arith.addf %31, %35 : vector<8x1024xf32>
    %c7 = arith.constant 7 : index
    %c0_24 = arith.constant 0 : index
    %c0_25 = arith.constant 0 : index
    %37 = vector.load %arg1[%c7, %c0_24, %c0_25] : memref<27x8x8xbf16, #tpu.memory_space<vmem>>, vector<1x8x8xbf16>
    %38 = vector.shape_cast %37 : vector<1x8x8xbf16> to vector<8x8xbf16>
    %39 = vector.extract_strided_slice %2 {offsets = [0, 29], sizes = [8, 1024], strides = [1, 1]} : vector<8x1536xbf16> to vector<8x1024xbf16>
    %cst_26 = arith.constant dense<0.000000e+00> : vector<8x1024xf32>
    %40 = tpu.matmul %38, %39, %cst_26 {dimension_numbers = #tpu.dot_dimension_numbers<[1], [0], [0], [1], [0, 0, 1, 1], [], []>} : vector<8x8xbf16>, vector<8x1024xbf16>, vector<8x1024xf32> -> vector<8x1024xf32>
    %41 = arith.addf %36, %40 : vector<8x1024xf32>
    %c8 = arith.constant 8 : index
    %c0_27 = arith.constant 0 : index
    %c0_28 = arith.constant 0 : index
    %42 = vector.load %arg1[%c8, %c0_27, %c0_28] : memref<27x8x8xbf16, #tpu.memory_space<vmem>>, vector<1x8x8xbf16>
    %43 = vector.shape_cast %42 : vector<1x8x8xbf16> to vector<8x8xbf16>
    %44 = vector.extract_strided_slice %2 {offsets = [0, 30], sizes = [8, 1024], strides = [1, 1]} : vector<8x1536xbf16> to vector<8x1024xbf16>
    %cst_29 = arith.constant dense<0.000000e+00> : vector<8x1024xf32>
    %45 = tpu.matmul %43, %44, %cst_29 {dimension_numbers = #tpu.dot_dimension_numbers<[1], [0], [0], [1], [0, 0, 1, 1], [], []>} : vector<8x8xbf16>, vector<8x1024xbf16>, vector<8x1024xf32> -> vector<8x1024xf32>
    %46 = arith.addf %41, %45 : vector<8x1024xf32>
    %c9 = arith.constant 9 : index
    %c0_30 = arith.constant 0 : index
    %c0_31 = arith.constant 0 : index
    %47 = vector.load %arg1[%c9, %c0_30, %c0_31] : memref<27x8x8xbf16, #tpu.memory_space<vmem>>, vector<1x8x8xbf16>
    %48 = vector.shape_cast %47 : vector<1x8x8xbf16> to vector<8x8xbf16>
    %49 = vector.extract_strided_slice %2 {offsets = [0, 196], sizes = [8, 1024], strides = [1, 1]} : vector<8x1536xbf16> to vector<8x1024xbf16>
    %cst_32 = arith.constant dense<0.000000e+00> : vector<8x1024xf32>
    %50 = tpu.matmul %48, %49, %cst_32 {dimension_numbers = #tpu.dot_dimension_numbers<[1], [0], [0], [1], [0, 0, 1, 1], [], []>} : vector<8x8xbf16>, vector<8x1024xbf16>, vector<8x1024xf32> -> vector<8x1024xf32>
    %51 = arith.addf %46, %50 : vector<8x1024xf32>
    %c10 = arith.constant 10 : index
    %c0_33 = arith.constant 0 : index
    %c0_34 = arith.constant 0 : index
    %52 = vector.load %arg1[%c10, %c0_33, %c0_34] : memref<27x8x8xbf16, #tpu.memory_space<vmem>>, vector<1x8x8xbf16>
    %53 = vector.shape_cast %52 : vector<1x8x8xbf16> to vector<8x8xbf16>
    %54 = vector.extract_strided_slice %2 {offsets = [0, 197], sizes = [8, 1024], strides = [1, 1]} : vector<8x1536xbf16> to vector<8x1024xbf16>
    %cst_35 = arith.constant dense<0.000000e+00> : vector<8x1024xf32>
    %55 = tpu.matmul %53, %54, %cst_35 {dimension_numbers = #tpu.dot_dimension_numbers<[1], [0], [0], [1], [0, 0, 1, 1], [], []>} : vector<8x8xbf16>, vector<8x1024xbf16>, vector<8x1024xf32> -> vector<8x1024xf32>
    %56 = arith.addf %51, %55 : vector<8x1024xf32>
    %c11 = arith.constant 11 : index
    %c0_36 = arith.constant 0 : index
    %c0_37 = arith.constant 0 : index
    %57 = vector.load %arg1[%c11, %c0_36, %c0_37] : memref<27x8x8xbf16, #tpu.memory_space<vmem>>, vector<1x8x8xbf16>
    %58 = vector.shape_cast %57 : vector<1x8x8xbf16> to vector<8x8xbf16>
    %59 = vector.extract_strided_slice %2 {offsets = [0, 198], sizes = [8, 1024], strides = [1, 1]} : vector<8x1536xbf16> to vector<8x1024xbf16>
    %cst_38 = arith.constant dense<0.000000e+00> : vector<8x1024xf32>
    %60 = tpu.matmul %58, %59, %cst_38 {dimension_numbers = #tpu.dot_dimension_numbers<[1], [0], [0], [1], [0, 0, 1, 1], [], []>} : vector<8x8xbf16>, vector<8x1024xbf16>, vector<8x1024xf32> -> vector<8x1024xf32>
    %61 = arith.addf %56, %60 : vector<8x1024xf32>
    %c12 = arith.constant 12 : index
    %c0_39 = arith.constant 0 : index
    %c0_40 = arith.constant 0 : index
    %62 = vector.load %arg1[%c12, %c0_39, %c0_40] : memref<27x8x8xbf16, #tpu.memory_space<vmem>>, vector<1x8x8xbf16>
    %63 = vector.shape_cast %62 : vector<1x8x8xbf16> to vector<8x8xbf16>
    %64 = vector.extract_strided_slice %2 {offsets = [0, 210], sizes = [8, 1024], strides = [1, 1]} : vector<8x1536xbf16> to vector<8x1024xbf16>
    %cst_41 = arith.constant dense<0.000000e+00> : vector<8x1024xf32>
    %65 = tpu.matmul %63, %64, %cst_41 {dimension_numbers = #tpu.dot_dimension_numbers<[1], [0], [0], [1], [0, 0, 1, 1], [], []>} : vector<8x8xbf16>, vector<8x1024xbf16>, vector<8x1024xf32> -> vector<8x1024xf32>
    %66 = arith.addf %61, %65 : vector<8x1024xf32>
    %c13 = arith.constant 13 : index
    %c0_42 = arith.constant 0 : index
    %c0_43 = arith.constant 0 : index
    %67 = vector.load %arg1[%c13, %c0_42, %c0_43] : memref<27x8x8xbf16, #tpu.memory_space<vmem>>, vector<1x8x8xbf16>
    %68 = vector.shape_cast %67 : vector<1x8x8xbf16> to vector<8x8xbf16>
    %69 = vector.extract_strided_slice %2 {offsets = [0, 211], sizes = [8, 1024], strides = [1, 1]} : vector<8x1536xbf16> to vector<8x1024xbf16>
    %cst_44 = arith.constant dense<0.000000e+00> : vector<8x1024xf32>
    %70 = tpu.matmul %68, %69, %cst_44 {dimension_numbers = #tpu.dot_dimension_numbers<[1], [0], [0], [1], [0, 0, 1, 1], [], []>} : vector<8x8xbf16>, vector<8x1024xbf16>, vector<8x1024xf32> -> vector<8x1024xf32>
    %71 = arith.addf %66, %70 : vector<8x1024xf32>
    %c14 = arith.constant 14 : index
    %c0_45 = arith.constant 0 : index
    %c0_46 = arith.constant 0 : index
    %72 = vector.load %arg1[%c14, %c0_45, %c0_46] : memref<27x8x8xbf16, #tpu.memory_space<vmem>>, vector<1x8x8xbf16>
    %73 = vector.shape_cast %72 : vector<1x8x8xbf16> to vector<8x8xbf16>
    %74 = vector.extract_strided_slice %2 {offsets = [0, 212], sizes = [8, 1024], strides = [1, 1]} : vector<8x1536xbf16> to vector<8x1024xbf16>
    %cst_47 = arith.constant dense<0.000000e+00> : vector<8x1024xf32>
    %75 = tpu.matmul %73, %74, %cst_47 {dimension_numbers = #tpu.dot_dimension_numbers<[1], [0], [0], [1], [0, 0, 1, 1], [], []>} : vector<8x8xbf16>, vector<8x1024xbf16>, vector<8x1024xf32> -> vector<8x1024xf32>
    %76 = arith.addf %71, %75 : vector<8x1024xf32>
    %c15 = arith.constant 15 : index
    %c0_48 = arith.constant 0 : index
    %c0_49 = arith.constant 0 : index
    %77 = vector.load %arg1[%c15, %c0_48, %c0_49] : memref<27x8x8xbf16, #tpu.memory_space<vmem>>, vector<1x8x8xbf16>
    %78 = vector.shape_cast %77 : vector<1x8x8xbf16> to vector<8x8xbf16>
    %79 = vector.extract_strided_slice %2 {offsets = [0, 224], sizes = [8, 1024], strides = [1, 1]} : vector<8x1536xbf16> to vector<8x1024xbf16>
    %cst_50 = arith.constant dense<0.000000e+00> : vector<8x1024xf32>
    %80 = tpu.matmul %78, %79, %cst_50 {dimension_numbers = #tpu.dot_dimension_numbers<[1], [0], [0], [1], [0, 0, 1, 1], [], []>} : vector<8x8xbf16>, vector<8x1024xbf16>, vector<8x1024xf32> -> vector<8x1024xf32>
    %81 = arith.addf %76, %80 : vector<8x1024xf32>
    %c16 = arith.constant 16 : index
    %c0_51 = arith.constant 0 : index
    %c0_52 = arith.constant 0 : index
    %82 = vector.load %arg1[%c16, %c0_51, %c0_52] : memref<27x8x8xbf16, #tpu.memory_space<vmem>>, vector<1x8x8xbf16>
    %83 = vector.shape_cast %82 : vector<1x8x8xbf16> to vector<8x8xbf16>
    %84 = vector.extract_strided_slice %2 {offsets = [0, 225], sizes = [8, 1024], strides = [1, 1]} : vector<8x1536xbf16> to vector<8x1024xbf16>
    %cst_53 = arith.constant dense<0.000000e+00> : vector<8x1024xf32>
    %85 = tpu.matmul %83, %84, %cst_53 {dimension_numbers = #tpu.dot_dimension_numbers<[1], [0], [0], [1], [0, 0, 1, 1], [], []>} : vector<8x8xbf16>, vector<8x1024xbf16>, vector<8x1024xf32> -> vector<8x1024xf32>
    %86 = arith.addf %81, %85 : vector<8x1024xf32>
    %c17 = arith.constant 17 : index
    %c0_54 = arith.constant 0 : index
    %c0_55 = arith.constant 0 : index
    %87 = vector.load %arg1[%c17, %c0_54, %c0_55] : memref<27x8x8xbf16, #tpu.memory_space<vmem>>, vector<1x8x8xbf16>
    %88 = vector.shape_cast %87 : vector<1x8x8xbf16> to vector<8x8xbf16>
    %89 = vector.extract_strided_slice %2 {offsets = [0, 226], sizes = [8, 1024], strides = [1, 1]} : vector<8x1536xbf16> to vector<8x1024xbf16>
    %cst_56 = arith.constant dense<0.000000e+00> : vector<8x1024xf32>
    %90 = tpu.matmul %88, %89, %cst_56 {dimension_numbers = #tpu.dot_dimension_numbers<[1], [0], [0], [1], [0, 0, 1, 1], [], []>} : vector<8x8xbf16>, vector<8x1024xbf16>, vector<8x1024xf32> -> vector<8x1024xf32>
    %91 = arith.addf %86, %90 : vector<8x1024xf32>
    %c18 = arith.constant 18 : index
    %c0_57 = arith.constant 0 : index
    %c0_58 = arith.constant 0 : index
    %92 = vector.load %arg1[%c18, %c0_57, %c0_58] : memref<27x8x8xbf16, #tpu.memory_space<vmem>>, vector<1x8x8xbf16>
    %93 = vector.shape_cast %92 : vector<1x8x8xbf16> to vector<8x8xbf16>
    %94 = vector.extract_strided_slice %2 {offsets = [0, 392], sizes = [8, 1024], strides = [1, 1]} : vector<8x1536xbf16> to vector<8x1024xbf16>
    %cst_59 = arith.constant dense<0.000000e+00> : vector<8x1024xf32>
    %95 = tpu.matmul %93, %94, %cst_59 {dimension_numbers = #tpu.dot_dimension_numbers<[1], [0], [0], [1], [0, 0, 1, 1], [], []>} : vector<8x8xbf16>, vector<8x1024xbf16>, vector<8x1024xf32> -> vector<8x1024xf32>
    %96 = arith.addf %91, %95 : vector<8x1024xf32>
    %c19 = arith.constant 19 : index
    %c0_60 = arith.constant 0 : index
    %c0_61 = arith.constant 0 : index
    %97 = vector.load %arg1[%c19, %c0_60, %c0_61] : memref<27x8x8xbf16, #tpu.memory_space<vmem>>, vector<1x8x8xbf16>
    %98 = vector.shape_cast %97 : vector<1x8x8xbf16> to vector<8x8xbf16>
    %99 = vector.extract_strided_slice %2 {offsets = [0, 393], sizes = [8, 1024], strides = [1, 1]} : vector<8x1536xbf16> to vector<8x1024xbf16>
    %cst_62 = arith.constant dense<0.000000e+00> : vector<8x1024xf32>
    %100 = tpu.matmul %98, %99, %cst_62 {dimension_numbers = #tpu.dot_dimension_numbers<[1], [0], [0], [1], [0, 0, 1, 1], [], []>} : vector<8x8xbf16>, vector<8x1024xbf16>, vector<8x1024xf32> -> vector<8x1024xf32>
    %101 = arith.addf %96, %100 : vector<8x1024xf32>
    %c20 = arith.constant 20 : index
    %c0_63 = arith.constant 0 : index
    %c0_64 = arith.constant 0 : index
    %102 = vector.load %arg1[%c20, %c0_63, %c0_64] : memref<27x8x8xbf16, #tpu.memory_space<vmem>>, vector<1x8x8xbf16>
    %103 = vector.shape_cast %102 : vector<1x8x8xbf16> to vector<8x8xbf16>
    %104 = vector.extract_strided_slice %2 {offsets = [0, 394], sizes = [8, 1024], strides = [1, 1]} : vector<8x1536xbf16> to vector<8x1024xbf16>
    %cst_65 = arith.constant dense<0.000000e+00> : vector<8x1024xf32>
    %105 = tpu.matmul %103, %104, %cst_65 {dimension_numbers = #tpu.dot_dimension_numbers<[1], [0], [0], [1], [0, 0, 1, 1], [], []>} : vector<8x8xbf16>, vector<8x1024xbf16>, vector<8x1024xf32> -> vector<8x1024xf32>
    %106 = arith.addf %101, %105 : vector<8x1024xf32>
    %c21 = arith.constant 21 : index
    %c0_66 = arith.constant 0 : index
    %c0_67 = arith.constant 0 : index
    %107 = vector.load %arg1[%c21, %c0_66, %c0_67] : memref<27x8x8xbf16, #tpu.memory_space<vmem>>, vector<1x8x8xbf16>
    %108 = vector.shape_cast %107 : vector<1x8x8xbf16> to vector<8x8xbf16>
    %109 = vector.extract_strided_slice %2 {offsets = [0, 406], sizes = [8, 1024], strides = [1, 1]} : vector<8x1536xbf16> to vector<8x1024xbf16>
    %cst_68 = arith.constant dense<0.000000e+00> : vector<8x1024xf32>
    %110 = tpu.matmul %108, %109, %cst_68 {dimension_numbers = #tpu.dot_dimension_numbers<[1], [0], [0], [1], [0, 0, 1, 1], [], []>} : vector<8x8xbf16>, vector<8x1024xbf16>, vector<8x1024xf32> -> vector<8x1024xf32>
    %111 = arith.addf %106, %110 : vector<8x1024xf32>
    %c22 = arith.constant 22 : index
    %c0_69 = arith.constant 0 : index
    %c0_70 = arith.constant 0 : index
    %112 = vector.load %arg1[%c22, %c0_69, %c0_70] : memref<27x8x8xbf16, #tpu.memory_space<vmem>>, vector<1x8x8xbf16>
    %113 = vector.shape_cast %112 : vector<1x8x8xbf16> to vector<8x8xbf16>
    %114 = vector.extract_strided_slice %2 {offsets = [0, 407], sizes = [8, 1024], strides = [1, 1]} : vector<8x1536xbf16> to vector<8x1024xbf16>
    %cst_71 = arith.constant dense<0.000000e+00> : vector<8x1024xf32>
    %115 = tpu.matmul %113, %114, %cst_71 {dimension_numbers = #tpu.dot_dimension_numbers<[1], [0], [0], [1], [0, 0, 1, 1], [], []>} : vector<8x8xbf16>, vector<8x1024xbf16>, vector<8x1024xf32> -> vector<8x1024xf32>
    %116 = arith.addf %111, %115 : vector<8x1024xf32>
    %c23 = arith.constant 23 : index
    %c0_72 = arith.constant 0 : index
    %c0_73 = arith.constant 0 : index
    %117 = vector.load %arg1[%c23, %c0_72, %c0_73] : memref<27x8x8xbf16, #tpu.memory_space<vmem>>, vector<1x8x8xbf16>
    %118 = vector.shape_cast %117 : vector<1x8x8xbf16> to vector<8x8xbf16>
    %119 = vector.extract_strided_slice %2 {offsets = [0, 408], sizes = [8, 1024], strides = [1, 1]} : vector<8x1536xbf16> to vector<8x1024xbf16>
    %cst_74 = arith.constant dense<0.000000e+00> : vector<8x1024xf32>
    %120 = tpu.matmul %118, %119, %cst_74 {dimension_numbers = #tpu.dot_dimension_numbers<[1], [0], [0], [1], [0, 0, 1, 1], [], []>} : vector<8x8xbf16>, vector<8x1024xbf16>, vector<8x1024xf32> -> vector<8x1024xf32>
    %121 = arith.addf %116, %120 : vector<8x1024xf32>
    %c24 = arith.constant 24 : index
    %c0_75 = arith.constant 0 : index
    %c0_76 = arith.constant 0 : index
    %122 = vector.load %arg1[%c24, %c0_75, %c0_76] : memref<27x8x8xbf16, #tpu.memory_space<vmem>>, vector<1x8x8xbf16>
    %123 = vector.shape_cast %122 : vector<1x8x8xbf16> to vector<8x8xbf16>
    %124 = vector.extract_strided_slice %2 {offsets = [0, 420], sizes = [8, 1024], strides = [1, 1]} : vector<8x1536xbf16> to vector<8x1024xbf16>
    %cst_77 = arith.constant dense<0.000000e+00> : vector<8x1024xf32>
    %125 = tpu.matmul %123, %124, %cst_77 {dimension_numbers = #tpu.dot_dimension_numbers<[1], [0], [0], [1], [0, 0, 1, 1], [], []>} : vector<8x8xbf16>, vector<8x1024xbf16>, vector<8x1024xf32> -> vector<8x1024xf32>
    %126 = arith.addf %121, %125 : vector<8x1024xf32>
    %c25 = arith.constant 25 : index
    %c0_78 = arith.constant 0 : index
    %c0_79 = arith.constant 0 : index
    %127 = vector.load %arg1[%c25, %c0_78, %c0_79] : memref<27x8x8xbf16, #tpu.memory_space<vmem>>, vector<1x8x8xbf16>
    %128 = vector.shape_cast %127 : vector<1x8x8xbf16> to vector<8x8xbf16>
    %129 = vector.extract_strided_slice %2 {offsets = [0, 421], sizes = [8, 1024], strides = [1, 1]} : vector<8x1536xbf16> to vector<8x1024xbf16>
    %cst_80 = arith.constant dense<0.000000e+00> : vector<8x1024xf32>
    %130 = tpu.matmul %128, %129, %cst_80 {dimension_numbers = #tpu.dot_dimension_numbers<[1], [0], [0], [1], [0, 0, 1, 1], [], []>} : vector<8x8xbf16>, vector<8x1024xbf16>, vector<8x1024xf32> -> vector<8x1024xf32>
    %131 = arith.addf %126, %130 : vector<8x1024xf32>
    %c26 = arith.constant 26 : index
    %c0_81 = arith.constant 0 : index
    %c0_82 = arith.constant 0 : index
    %132 = vector.load %arg1[%c26, %c0_81, %c0_82] : memref<27x8x8xbf16, #tpu.memory_space<vmem>>, vector<1x8x8xbf16>
    %133 = vector.shape_cast %132 : vector<1x8x8xbf16> to vector<8x8xbf16>
    %134 = vector.extract_strided_slice %2 {offsets = [0, 422], sizes = [8, 1024], strides = [1, 1]} : vector<8x1536xbf16> to vector<8x1024xbf16>
    %cst_83 = arith.constant dense<0.000000e+00> : vector<8x1024xf32>
    %135 = tpu.matmul %133, %134, %cst_83 {dimension_numbers = #tpu.dot_dimension_numbers<[1], [0], [0], [1], [0, 0, 1, 1], [], []>} : vector<8x8xbf16>, vector<8x1024xbf16>, vector<8x1024xf32> -> vector<8x1024xf32>
    %136 = arith.addf %131, %135 : vector<8x1024xf32>
    %c0_84 = arith.constant 0 : index
    %c0_85 = arith.constant 0 : index
    %137 = vector.load %arg5[%c0_84, %c0_85] : memref<8x1024xf32, #tpu.memory_space<vmem>>, vector<8x1024xf32>
    tpu.vector_store %arg5[%c0_84, %c0_85], %136 {strides = array<i32>} : memref<8x1024xf32, #tpu.memory_space<vmem>>, vector<8x1024xf32>,
    %c0_86 = arith.constant 0 : index
    %c0_87 = arith.constant 0 : index
    %138 = vector.load %arg4[%c0_86, %c0_87] : memref<1x1024xf32, #tpu.memory_space<vmem>>, vector<1x1024xf32>
    %139 = vector.broadcast %138 : vector<1x1024xf32> to vector<8x1024xf32>
    %140 = arith.mulf %136, %139 : vector<8x1024xf32>
    %cst_88 = arith.constant dense<0.000000e+00> : vector<8xf32>
    %141 = vector.multi_reduction <add>, %140, %cst_88 [1] : vector<8x1024xf32> to vector<8xf32>
    %142 = vector.shape_cast %141 : vector<8xf32> to vector<8x1xf32>
    %143 = arith.mulf %140, %136 : vector<8x1024xf32>
    %cst_89 = arith.constant dense<0.000000e+00> : vector<8xf32>
    %144 = vector.multi_reduction <add>, %143, %cst_89 [1] : vector<8x1024xf32> to vector<8xf32>
    %145 = vector.shape_cast %144 : vector<8xf32> to vector<8x1xf32>
    %146 = tpu.concatenate %142, %145 in 1 : vector<8x1xf32>, vector<8x1xf32> -> vector<8x2xf32>
    %c0_90 = arith.constant 0 : index
    %c0_91 = arith.constant 0 : index
    %c0_92 = arith.constant 0 : index
    %147 = vector.load %arg6[%c0_90, %c0_91, %c0_92] : memref<1x8x2xf32, #tpu.memory_space<vmem>>, vector<1x8x2xf32>
    %148 = vector.shape_cast %147 : vector<1x8x2xf32> to vector<8x2xf32>
    %149 = vector.shape_cast %146 : vector<8x2xf32> to vector<1x8x2xf32>
    tpu.vector_store %arg6[%c0_90, %c0_91, %c0_92], %149 {strides = array<i32>} : memref<1x8x2xf32, #tpu.memory_space<vmem>>, vector<1x8x2xf32>,
    return
  }
  func.func @transform_0(%arg0: i32) -> (i32, i32, i32) {
    %c0_i32 = arith.constant 0 : i32
    %c0_i32_0 = arith.constant 0 : i32
    %c0_i32_1 = arith.constant 0 : i32
    %c0_i32_2 = arith.constant 0 : i32
    return %c0_i32, %c0_i32_0, %c0_i32_1 : i32, i32, i32
  }
  func.func @transform_1(%arg0: i32) -> (i32, i32) {
    %c0_i32 = arith.constant 0 : i32
    %c0_i32_0 = arith.constant 0 : i32
    return %c0_i32, %arg0 : i32, i32
  }
  func.func @transform_2(%arg0: i32) -> (i32, i32) {
    %c1_i32 = arith.constant 1 : i32
    %0 = arith.addi %arg0, %c1_i32 : i32
    %c2_i32 = arith.constant 2 : i32
    %1 = arith.muli %0, %c2_i32 : i32
    %c0_i32 = arith.constant 0 : i32
    %c0_i32_0 = arith.constant 0 : i32
    return %c0_i32, %1 : i32, i32
  }
  func.func @transform_3(%arg0: i32) -> (i32, i32) {
    %c0_i32 = arith.constant 0 : i32
    %c0_i32_0 = arith.constant 0 : i32
    return %c0_i32, %arg0 : i32, i32
  }
  func.func @transform_4(%arg0: i32) -> (i32, i32) {
    %c0_i32 = arith.constant 0 : i32
    %c0_i32_0 = arith.constant 0 : i32
    return %c0_i32, %arg0 : i32, i32
  }
  func.func @transform_5(%arg0: i32) -> (i32, i32, i32) {
    %c0_i32 = arith.constant 0 : i32
    %c0_i32_0 = arith.constant 0 : i32
    %c0_i32_1 = arith.constant 0 : i32
    return %arg0, %c0_i32, %c0_i32_0 : i32, i32, i32
  }
}

module attributes {stable_mosaic.version = 11 : i64} {
  func.func @_bn_res_relu_kernel(%arg0: i32, %arg1: memref<8x1024xf32, #tpu.memory_space<vmem>>, %arg2: memref<8x1xf32, #tpu.memory_space<vmem>>, %arg3: memref<8x1xf32, #tpu.memory_space<vmem>>, %arg4: memref<8x1024xf32, #tpu.memory_space<vmem>>, %arg5: memref<8x1024xf32, #tpu.memory_space<vmem>>) attributes {dimension_semantics = [#tpu.dimension_semantics<parallel>], iteration_bounds = array<i64: 6>, scalar_prefetch = 0 : i64, scratch_operands = 0 : i64, tpu.core_type = #tpu.core_type<tc>, window_params = [{transform_indices = @transform_0, window_bounds = array<i64: 8, 1024>}, {pipeline_mode = #tpu.pipeline_mode<synchronous>, transform_indices = @transform_1, window_bounds = array<i64: 8, 1>}, {pipeline_mode = #tpu.pipeline_mode<synchronous>, transform_indices = @transform_2, window_bounds = array<i64: 8, 1>}, {transform_indices = @transform_3, window_bounds = array<i64: 8, 1024>}, {transform_indices = @transform_4, window_bounds = array<i64: 8, 1024>}]} {
    %c0 = arith.constant 0 : index
    %c0_0 = arith.constant 0 : index
    %0 = vector.load %arg1[%c0, %c0_0] : memref<8x1024xf32, #tpu.memory_space<vmem>>, vector<8x1024xf32>
    %c0_1 = arith.constant 0 : index
    %c0_2 = arith.constant 0 : index
    %1 = vector.load %arg2[%c0_1, %c0_2] : memref<8x1xf32, #tpu.memory_space<vmem>>, vector<8x1xf32>
    %2 = vector.broadcast %1 : vector<8x1xf32> to vector<8x1024xf32>
    %3 = arith.mulf %0, %2 : vector<8x1024xf32>
    %c0_3 = arith.constant 0 : index
    %c0_4 = arith.constant 0 : index
    %4 = vector.load %arg3[%c0_3, %c0_4] : memref<8x1xf32, #tpu.memory_space<vmem>>, vector<8x1xf32>
    %5 = vector.broadcast %4 : vector<8x1xf32> to vector<8x1024xf32>
    %6 = arith.addf %3, %5 : vector<8x1024xf32>
    %c0_5 = arith.constant 0 : index
    %c0_6 = arith.constant 0 : index
    %7 = vector.load %arg4[%c0_5, %c0_6] : memref<8x1024xf32, #tpu.memory_space<vmem>>, vector<8x1024xf32>
    %8 = arith.addf %6, %7 : vector<8x1024xf32>
    %cst = arith.constant 0.000000e+00 : f32
    %9 = vector.broadcast %cst : f32 to vector<8x1024xf32>
    %10 = arith.maximumf %8, %9 : vector<8x1024xf32>
    %c0_7 = arith.constant 0 : index
    %c0_8 = arith.constant 0 : index
    %11 = vector.load %arg5[%c0_7, %c0_8] : memref<8x1024xf32, #tpu.memory_space<vmem>>, vector<8x1024xf32>
    tpu.vector_store %arg5[%c0_7, %c0_8], %10 {strides = array<i32>} : memref<8x1024xf32, #tpu.memory_space<vmem>>, vector<8x1024xf32>,
    return
  }
  func.func @transform_0(%arg0: i32) -> (i32, i32) {
    %c0_i32 = arith.constant 0 : i32
    %c0_i32_0 = arith.constant 0 : i32
    return %c0_i32, %arg0 : i32, i32
  }
  func.func @transform_1(%arg0: i32) -> (i32, i32) {
    %c0_i32 = arith.constant 0 : i32
    %c0_i32_0 = arith.constant 0 : i32
    %c0_i32_1 = arith.constant 0 : i32
    return %c0_i32, %c0_i32_0 : i32, i32
  }
  func.func @transform_2(%arg0: i32) -> (i32, i32) {
    %c0_i32 = arith.constant 0 : i32
    %c0_i32_0 = arith.constant 0 : i32
    %c0_i32_1 = arith.constant 0 : i32
    return %c0_i32, %c0_i32_0 : i32, i32
  }
  func.func @transform_3(%arg0: i32) -> (i32, i32) {
    %c0_i32 = arith.constant 0 : i32
    %c0_i32_0 = arith.constant 0 : i32
    return %c0_i32, %arg0 : i32, i32
  }
  func.func @transform_4(%arg0: i32) -> (i32, i32) {
    %c0_i32 = arith.constant 0 : i32
    %c0_i32_0 = arith.constant 0 : i32
    return %c0_i32, %arg0 : i32, i32
  }
}

</mosaic_0001>

<bundles_post_ra>
// kernel: resblock_forward.5
= control target key start
LH: loop header
LB: loop body
LE: loop exit
PB: predicated region body
PF: predicated region fallthrough
CT: control target
= control target key end

     0   :  { %s444_s12 = smov 0   ;;  %s471_s0 = inlined_call_operand.vmem [shape: f32[8,8192], index: 0, kind: input, shape index: {}]   ;;  %s472_s1 = inlined_call_operand.vmem [shape: f32[8,1], index: 1, kind: input, shape index: {}]   ;;  %s473_s2 = inlined_call_operand.vmem [shape: f32[8,1], index: 2, kind: input, shape index: {}]   ;;  %s474_s3 = inlined_call_operand.vmem [shape: bf16[8,8192], index: 3, kind: output, shape index: {}]  }
   0x1 LB: > { %s378_s13 = sadd.s32 4294967295, %s421_s12   ;;  %p382_p0 = scmp.ge.s32.totalorder %s421_s12, 1  ;;  %s421_s12 = sphi %s444_s12, %s13_s12  }
   0x2   : > { %p138_p1 = scmp.lt.s32.totalorder %s421_s12, 5 }
   0x4   : > { %p139_p2 = pnand %p382_p0, %p138_p1 }
   0x5   : > { %v190_v0 = vld [vmem:[%s472_s1] sm:$0xff] (!%p139_p2)  ;;  %v423_v1 = vmov (!%p139_p2), 0   ;;  %s383_s18 = sshll.u32 (!%p139_p2), %s378_s13, 4 }
   0x6   : > { %142 = sbr.rel (%p139_p2) target bundleno = 153 (0x99), region = 32  ;;  %414 = vset.pattern.permute.xlu0 (!%p139_p2), %v423_v1  ;;  %v212_v2 = vld [vmem:[%s473_s2] sm:$0xff] (!%p139_p2)  ;;  %p163_p3 = scmp.lt.s32.totalorder (!%p139_p2), %s383_s18, 63 }
   0x7   : > { %193 = vperm.xlu0 (!%p139_p2), %414, %v190_v0  }
   0xb   : > { %215 = vperm.xlu0 (!%p139_p2), %414, %v212_v2  }
   0xd   : > { %s476_s18 = smov (!%p163_p3, %s383_s18), 63 }
   0xe   : > { %s384_s19 = sshll.u32 %s476_s18, 3  ;;  %s386_s23 = sshll.u32 %s476_s18, 2 }
   0xf   : > { %s166_s22 = scalar_lea.vmem %s471_s0, %s384_s19  ;;  %s172_s26 = scalar_lea.vmem %s474_s3, %s386_s23 }
  0x10   : > { %v174_v3 = vld [vmem:[%s166_s22] sm:$0xff]  ;;  %v175_v4 = vld [vmem:[%s166_s22 + $0x8] sm:$0xff]  ;;  %v176_v5 = vld [vmem:[%s166_s22 + $0x10] sm:$0xff] }
  0x11   : > { %v177_v6 = vld [vmem:[%s166_s22 + $0x18] sm:$0xff]  ;;  %v178_v7 = vld [vmem:[%s166_s22 + $0x20] sm:$0xff]  ;;  %v179_v8 = vld [vmem:[%s166_s22 + $0x28] sm:$0xff] }
  0x12   : > { %v180_v9 = vld [vmem:[%s166_s22 + $0x30] sm:$0xff]  ;;  %v181_v10 = vld [vmem:[%s166_s22 + $0x38] sm:$0xff]  ;;  %v182_v11 = vld [vmem:[%s166_s22 + $0x40] sm:$0xff] }
  0x13   : > { %v183_v12 = vld [vmem:[%s166_s22 + $0x48] sm:$0xff]  ;;  %v184_v14 = vld [vmem:[%s166_s22 + $0x50] sm:$0xff]  ;;  %v185_v15 = vld [vmem:[%s166_s22 + $0x58] sm:$0xff] }
  0x14   : > { %v186_v16 = vld [vmem:[%s166_s22 + $0x60] sm:$0xff]  ;;  %v187_v17 = vld [vmem:[%s166_s22 + $0x68] sm:$0xff]  ;;  %v188_v18 = vld [vmem:[%s166_s22 + $0x70] sm:$0xff] }
  0x15   : > { %v189_v19 = vld [vmem:[%s166_s22 + $0x78] sm:$0xff] }
  0x86   : > { %v194_v13 = vpop.permute.xlu0 %193 }
  0x87   : > { %v196_v20 = vmul.f32 %v194_v13, %v174_v3  ;;  %v197_v21 = vmul.f32 %v194_v13, %v175_v4  ;;  %v198_v22 = vmul.f32 %v194_v13, %v176_v5  ;;  %v199_v23 = vmul.f32 %v194_v13, %v177_v6 }
  0x88   : > { %v200_v24 = vmul.f32 %v194_v13, %v178_v7  ;;  %v201_v25 = vmul.f32 %v194_v13, %v179_v8  ;;  %v202_v26 = vmul.f32 %v194_v13, %v180_v9  ;;  %v203_v27 = vmul.f32 %v194_v13, %v181_v10 }
  0x89   : > { %v204_v28 = vmul.f32 %v194_v13, %v182_v11  ;;  %v205_v29 = vmul.f32 %v194_v13, %v183_v12  ;;  %v206_v30 = vmul.f32 %v194_v13, %v184_v14  ;;  %v207_v31 = vmul.f32 %v194_v13, %v185_v15 }
  0x8a   : > { %v216_v32 = vpop.permute.xlu0 %215  ;;  %v208_v33 = vmul.f32 %v194_v13, %v186_v16  ;;  %v209_v34 = vmul.f32 %v194_v13, %v187_v17  ;;  %v210_v35 = vmul.f32 %v194_v13, %v188_v18  ;;  %v211_v36 = vmul.f32 %v194_v13, %v189_v19 }
  0x8b   : > { %v218_v37 = vadd.f32 %v216_v32, %v196_v20  ;;  %v219_v38 = vadd.f32 %v216_v32, %v197_v21  ;;  %v220_v39 = vadd.f32 %v216_v32, %v198_v22  ;;  %v221_v40 = vadd.f32 %v216_v32, %v199_v23 }
  0x8c   : > { %v222_v41 = vadd.f32 %v216_v32, %v200_v24  ;;  %v223_v42 = vadd.f32 %v216_v32, %v201_v25  ;;  %v224_v43 = vadd.f32 %v216_v32, %v202_v26  ;;  %v225_v44 = vadd.f32 %v216_v32, %v203_v27 }
  0x8d   : > { %v226_v45 = vadd.f32 %v216_v32, %v204_v28  ;;  %v227_v46 = vadd.f32 %v216_v32, %v205_v29  ;;  %v228_v47 = vadd.f32 %v216_v32, %v206_v30  ;;  %v229_v48 = vadd.f32 %v216_v32, %v207_v31 }
  0x8e   : > { %v230_v49 = vadd.f32 %v216_v32, %v208_v33  ;;  %v231_v50 = vadd.f32 %v216_v32, %v209_v34  ;;  %v232_v51 = vadd.f32 %v216_v32, %v210_v35  ;;  %v233_v52 = vadd.f32 %v216_v32, %v211_v36 }
  0x8f   : > { %v234_v53 = vmax.f32 %v218_v37, 0.0  ;;  %v235_v54 = vmax.f32 %v219_v38, 0.0  ;;  %v236_v55 = vmax.f32 %v220_v39, 0.0  ;;  %v237_v56 = vmax.f32 %v221_v40, 0.0 }
  0x90   : > { %v238_v57 = vmax.f32 %v222_v41, 0.0  ;;  %v239_v58 = vmax.f32 %v223_v42, 0.0  ;;  %v240_v59 = vmax.f32 %v224_v43, 0.0  ;;  %v241_v60 = vmax.f32 %v225_v44, 0.0 }
  0x91   : > { %v242_v61 = vmax.f32 %v226_v45, 0.0  ;;  %v243_v62 = vmax.f32 %v227_v46, 0.0  ;;  %v244_v63 = vmax.f32 %v228_v47, 0.0  ;;  %v245_v0 = vmax.f32 %v229_v48, 0.0 }
  0x92   : > { %v246_v1 = vmax.f32 %v230_v49, 0.0  ;;  %v247_v2 = vmax.f32 %v231_v50, 0.0  ;;  %v248_v3 = vmax.f32 %v232_v51, 0.0  ;;  %v249_v4 = vmax.f32 %v233_v52, 0.0 }
  0x93   : > { %v397_v5 = vpack.c.bf16 %v235_v54, %v234_v53  ;;  %v398_v6 = vpack.c.bf16 %v237_v56, %v236_v55  ;;  %v399_v7 = vpack.c.bf16 %v239_v58, %v238_v57  ;;  %v400_v8 = vpack.c.bf16 %v241_v60, %v240_v59 }
  0x94   : > { %v401_v9 = vpack.c.bf16 %v243_v62, %v242_v61  ;;  %v402_v10 = vpack.c.bf16 %v245_v0, %v244_v63  ;;  %v403_v11 = vpack.c.bf16 %v247_v2, %v246_v1  ;;  %v404_v12 = vpack.c.bf16 %v249_v4, %v248_v3 }
  0x95   : > { %314 = vst [vmem:[%s172_s26] sm:$0xff] %v397_v5  ;;  %315 = vst [vmem:[%s172_s26 + $0x8] sm:$0xff] %v398_v6 }
  0x96   : > { %316 = vst [vmem:[%s172_s26 + $0x10] sm:$0xff] %v399_v7  ;;  %317 = vst [vmem:[%s172_s26 + $0x18] sm:$0xff] %v400_v8 }
  0x97   : > { %318 = vst [vmem:[%s172_s26 + $0x20] sm:$0xff] %v401_v9  ;;  %319 = vst [vmem:[%s172_s26 + $0x28] sm:$0xff] %v402_v10 }
  0x98   : > { %320 = vst [vmem:[%s172_s26 + $0x30] sm:$0xff] %v403_v11  ;;  %321 = vst [vmem:[%s172_s26 + $0x38] sm:$0xff] %v404_v12 }
  0x99 PF: > { %s13_s12 = sadd.s32 1, %s421_s12  }
  0x9a   : > { %p10_p4 = scmp.ge.s32.totalorder %s13_s12, 6  }
  0x9c   :  { %12 = sbr.rel (!%p10_p4) target bundleno = 1 (0x1), region = 62 }

// kernel: resblock_forward.4
= control target key start
LH: loop header
LB: loop body
LE: loop exit
PB: predicated region body
PF: predicated region fallthrough
CT: control target
= control target key end

     0   :  { %s12516_s18 = smov 0   ;;  %s15042_s0 = inlined_call_operand.vmem [shape: bf16[27,8,8], index: 0, kind: input, shape index: {}]   ;;  %s15043_s1 = inlined_call_operand.vmem [shape: bf16[8,9216], index: 1, kind: input, shape index: {}, may-alias: {1,2}]   ;;  %s15044_s2 = inlined_call_operand.vmem [shape: bf16[8,9216], index: 2, kind: input, shape index: {}, may-alias: {1,2}]   ;;  %s15045_s3 = inlined_call_operand.vmem [shape: f32[1,8192], index: 3, kind: input, shape index: {}]   ;;  %s15046_s4 = inlined_call_operand.vmem [shape: f32[8,8192], index: 4, kind: output, shape index: {0}]   ;;  %s15047_s5 = inlined_call_operand.vmem [shape: f32[4,8,2], index: 5, kind: output, shape index: {1}]  }
   0x1 LB: > { %s12522_s19 = sadd.s32 4294967295, %s12475_s18   ;;  %p11099_p0 = scmp.ge.s32.totalorder %s12475_s18, 1  ;;  %s12475_s18 = sphi %s12516_s18, %s16_s18  }
   0x2   : > { %p228_p1 = scmp.lt.s32.totalorder %s12475_s18, 5 }
   0x4   : > { %p229_p2 = pnand %p11099_p0, %p228_p1 }
   0x6   : > { %232 = sbr.rel (%p229_p2) target bundleno = 1372 (0x55c), region = 36 }
   0xd   : > { %s12527_s20 = sshll.u32 %s12522_s19, 4  ;;  %v15048_v0 = vmov 0   ;;  %s12478_s6 = smov 127   ;;  %vm416_vm0 = vcmask 1039360   ;;  %vm437_vm1 = vcmask 1043456   ;;  %vm433_vm2 = vcmask 64512  }
   0xe   : > { %p280_p3 = scmp.lt.s32.totalorder %s12527_s20, 71  ;;  %s11598_s21 = sadd.s32 16, %s12527_s20  ;;  %518 = vmatprep.mubr.bf16.mxu0 %v15048_v0  ;;  %559 = vmatprep.mubr.bf16.mxu1 %v15048_v0  ;;  %v12720_v34 = vld [vmem:[%s15042_s0 + $0x4] sm:$0xf]  ;;  %vm1229_vm3 = vcmask 1031168   ;;  %vm1677_vm4 = vcmask 916480  }
   0xf   : > { %p292_p4 = scmp.lt.s32.totalorder %s11598_s21, 71  ;;  %s12479_s7 = smov 126   ;;  %vm2125_vm5 = vcmask 908288   ;;  %vm2573_vm6 = vcmask 900096   ;;  %vm3021_vm7 = vcmask 785408   ;;  %vm3469_vm8 = vcmask 777216  }
  0x10   : > { %s281_s22 = scalar_select %p280_p3, %s12527_s20, 71  ;;  %vm3917_vm9 = vcmask 769024   ;;  %vm10981_vm10 = vcmask 7168   ;;  %vm10983_vm11 = vcmask 15360  }
  0x11   : > { %s15482_s21 = smov (!%p292_p4, %s11598_s21), 71  ;;  %s12480_s8 = smov 112  }
  0x12   : > { %s11101_s23 = sshll.u32 %s281_s22, 2  ;;  %s11104_s27 = sshll.u32 %s15482_s21, 2 }
  0x13   : > { %s12537_s26 = scalar_lea.vmem %s15043_s1, %s11101_s23  ;;  %s12548_s30 = scalar_lea.vmem %s15044_s2, %s11104_s27 }
  0x14   : > { %v316_v1 = vld [vmem:[%s12537_s26 + $0x8] sm:$0xff]  ;;  %v315_v2 = vld [vmem:[%s12537_s26] sm:$0xff]  ;;  %v317_v7 = vld [vmem:[%s12537_s26 + $0x10] sm:$0xff]  ;;  %s12481_s9 = smov 111   ;;  %s12482_s12 = smov 110  }
  0x15   : > { %v12541_v3 = vcombine.low %v316_v1, %v316_v1  ;;  %v12543_v4 = vcombine.low %v315_v2, %v315_v2  ;;  %v12550_v5 = vcombine.high %v316_v1, %v316_v1  ;;  %v12556_v6 = vcombine.high %v315_v2, %v315_v2  ;;  %v318_v10 = vld [vmem:[%s12537_s26 + $0x18] sm:$0xff]  ;;  %v319_v13 = vld [vmem:[%s12537_s26 + $0x20] sm:$0xff]  ;;  %v320_v16 = vld [vmem:[%s12537_s26 + $0x28] sm:$0xff]  ;;  %s12483_s15 = smov 96   ;;  %s12484_s21 = smov 95  }
  0x16   : > { %v12563_v8 = vcombine.high %v317_v7, %v317_v7  ;;  %v12565_v9 = vcombine.low %v317_v7, %v317_v7  ;;  %v12572_v11 = vcombine.high %v318_v10, %v318_v10  ;;  %v12574_v12 = vcombine.low %v318_v10, %v318_v10  ;;  %v321_v19 = vld [vmem:[%s12537_s26 + $0x30] sm:$0xff]  ;;  %v322_v22 = vld [vmem:[%s12537_s26 + $0x38] sm:$0xff]  ;;  %v12613_v25 = vld [vmem:[%s12548_s30] sm:$0xff]  ;;  %s12485_s24 = smov 94   ;;  %p300_p5 = scmp.lt.s32.totalorder %s12527_s20, 63 }
  0x17   : > { %386 = vrot.lane.b32.xlu1 %v12541_v3, %s12478_s6  ;;  %382 = vrot.lane.b32.xlu0 %v12543_v4, %s12478_s6  ;;  %v12581_v14 = vcombine.high %v319_v13, %v319_v13  ;;  %v12583_v15 = vcombine.low %v319_v13, %v319_v13  ;;  %v12590_v17 = vcombine.high %v320_v16, %v320_v16  ;;  %v818_v10 = vsel %vm437_vm1, %v12543_v4, 0  ;;  %p310_p6 = scmp.lt.s32.totalorder %s12522_s19, 3 }
  0x18   : > { %v12592_v18 = vcombine.low %v320_v16, %v320_v16  ;;  %v12599_v20 = vcombine.high %v321_v19, %v321_v19  ;;  %v12601_v21 = vcombine.low %v321_v19, %v321_v19  ;;  %v12608_v23 = vcombine.high %v322_v22, %v322_v22  ;;  %s15484_s20 = smov (!%p300_p5, %s12527_s20), 63 }
  0x19   : > { %v12610_v24 = vcombine.low %v322_v22, %v322_v22  ;;  %v12621_v26 = vcombine.low %v12613_v25, %v12613_v25  ;;  %s11107_s10 = sshll.u32 %s15484_s20, 3  ;;  %s15486_s19 = smov (!%p310_p6, %s12522_s19), 3 }
  0x1a   : > { %s14975_s14 = scalar_lea.vmem %s15046_s4, %s11107_s10 }
  0x1b   : > { %388 = vrot.lane.b32.xlu1 %v12550_v5, %s12478_s6  ;;  %384 = vrot.lane.b32.xlu0 %v12556_v6, %s12478_s6 }
  0x1f   : > { %392 = vrot.lane.b32.xlu1 %v12563_v8, %s12478_s6  ;;  %390 = vrot.lane.b32.xlu0 %v12565_v9, %s12478_s6 }
  0x23   : > { %396 = vrot.lane.b32.xlu1 %v12572_v11, %s12478_s6  ;;  %394 = vrot.lane.b32.xlu0 %v12574_v12, %s12478_s6 }
  0x27   : > { %400 = vrot.lane.b32.xlu1 %v12581_v14, %s12478_s6  ;;  %398 = vrot.lane.b32.xlu0 %v12583_v15, %s12478_s6 }
  0x2b   : > { %404 = vrot.lane.b32.xlu1 %v12590_v17, %s12478_s6  ;;  %402 = vrot.lane.b32.xlu0 %v12592_v18, %s12478_s6 }
  0x2f   : > { %408 = vrot.lane.b32.xlu1 %v12599_v20, %s12478_s6  ;;  %406 = vrot.lane.b32.xlu0 %v12601_v21, %s12478_s6 }
  0x33   : > { %412 = vrot.lane.b32.xlu1 %v12608_v23, %s12478_s6  ;;  %410 = vrot.lane.b32.xlu0 %v12610_v24, %s12478_s6 }
  0x37   : > { %414 = vrot.lane.b32.xlu0 %v12621_v26, %s12478_s6  ;;  %1195 = vrot.lane.b32.xlu1 %v12543_v4, %s12479_s7 }
  0x3b   : > { %1197 = vrot.lane.b32.xlu0 %v12556_v6, %s12479_s7  ;;  %1199 = vrot.lane.b32.xlu1 %v12541_v3, %s12479_s7 }
  0x3f   : > { %1201 = vrot.lane.b32.xlu0 %v12550_v5, %s12479_s7  ;;  %1203 = vrot.lane.b32.xlu1 %v12565_v9, %s12479_s7 }
  0x43   : > { %1205 = vrot.lane.b32.xlu0 %v12563_v8, %s12479_s7  ;;  %1207 = vrot.lane.b32.xlu1 %v12574_v12, %s12479_s7 }
  0x47   : > { %1209 = vrot.lane.b32.xlu0 %v12572_v11, %s12479_s7  ;;  %1211 = vrot.lane.b32.xlu1 %v12583_v15, %s12479_s7 }
  0x4b   : > { %1213 = vrot.lane.b32.xlu0 %v12581_v14, %s12479_s7  ;;  %1215 = vrot.lane.b32.xlu1 %v12592_v18, %s12479_s7 }
  0x4f   : > { %1217 = vrot.lane.b32.xlu0 %v12590_v17, %s12479_s7  ;;  %1219 = vrot.lane.b32.xlu1 %v12601_v21, %s12479_s7 }
  0x53   : > { %1221 = vrot.lane.b32.xlu0 %v12599_v20, %s12479_s7  ;;  %1223 = vrot.lane.b32.xlu1 %v12610_v24, %s12479_s7 }
  0x57   : > { %1225 = vrot.lane.b32.xlu0 %v12608_v23, %s12479_s7  ;;  %1227 = vrot.lane.b32.xlu1 %v12621_v26, %s12479_s7 }
  0x5b   : > { %1643 = vrot.lane.b32.xlu0 %v12543_v4, %s12480_s8  ;;  %1645 = vrot.lane.b32.xlu1 %v12556_v6, %s12480_s8 }
  0x5f   : > { %1647 = vrot.lane.b32.xlu0 %v12541_v3, %s12480_s8  ;;  %1649 = vrot.lane.b32.xlu1 %v12550_v5, %s12480_s8 }
  0x63   : > { %1651 = vrot.lane.b32.xlu0 %v12565_v9, %s12480_s8  ;;  %1653 = vrot.lane.b32.xlu1 %v12563_v8, %s12480_s8 }
  0x67   : > { %1655 = vrot.lane.b32.xlu0 %v12574_v12, %s12480_s8  ;;  %1657 = vrot.lane.b32.xlu1 %v12572_v11, %s12480_s8 }
  0x6b   : > { %1659 = vrot.lane.b32.xlu0 %v12583_v15, %s12480_s8  ;;  %1661 = vrot.lane.b32.xlu1 %v12581_v14, %s12480_s8 }
  0x6f   : > { %1663 = vrot.lane.b32.xlu0 %v12592_v18, %s12480_s8  ;;  %1665 = vrot.lane.b32.xlu1 %v12590_v17, %s12480_s8 }
  0x73   : > { %1667 = vrot.lane.b32.xlu0 %v12601_v21, %s12480_s8  ;;  %1669 = vrot.lane.b32.xlu1 %v12599_v20, %s12480_s8 }
  0x77   : > { %1671 = vrot.lane.b32.xlu0 %v12610_v24, %s12480_s8  ;;  %1673 = vrot.lane.b32.xlu1 %v12608_v23, %s12480_s8 }
  0x7b   : > { %1675 = vrot.lane.b32.xlu0 %v12621_v26, %s12480_s8  ;;  %2091 = vrot.lane.b32.xlu1 %v12543_v4, %s12481_s9 }
  0x7f   : > { %2093 = vrot.lane.b32.xlu0 %v12556_v6, %s12481_s9  ;;  %2095 = vrot.lane.b32.xlu1 %v12541_v3, %s12481_s9 }
  0x83   : > { %2097 = vrot.lane.b32.xlu0 %v12550_v5, %s12481_s9  ;;  %2099 = vrot.lane.b32.xlu1 %v12565_v9, %s12481_s9 }
  0x87   : > { %2101 = vrot.lane.b32.xlu0 %v12563_v8, %s12481_s9  ;;  %2103 = vrot.lane.b32.xlu1 %v12574_v12, %s12481_s9 }
  0x89   : > { %v387_v27 = vpop.permute.xlu1 %386  ;;  %v383_v28 = vpop.permute.xlu0 %382 }
  0x8b   : > { %2105 = vrot.lane.b32.xlu0 %v12572_v11, %s12481_s9  ;;  %2107 = vrot.lane.b32.xlu1 %v12583_v15, %s12481_s9 }
  0x8d   : > { %v389_v29 = vpop.permute.xlu1 %388  ;;  %v385_v30 = vpop.permute.xlu0 %384 }
  0x8e   : > { %v418_v31 = vsel %vm416_vm0, %v385_v30, %v387_v27  ;;  %v417_v32 = vsel %vm416_vm0, %v383_v28, %v385_v30  ;;  %v419_v37 = vsel %vm416_vm0, %v387_v27, %v389_v29  ;;  %v12858_v28 = vsel %vm437_vm1, %v12541_v3, 0 }
  0x8f   : > { %2109 = vrot.lane.b32.xlu0 %v12581_v14, %s12481_s9  ;;  %11131 = vmatprep.subr.msk.bf16.mxu0 %vm437_vm1, %v418_v31  ;;  %v439_v33 = vsel %vm437_vm1, %v417_v32, 0  ;;  %v12736_v40 = vsel %vm437_vm1, %v419_v37, 0  ;;  %v12879_v31 = vsel %vm437_vm1, %v12565_v9, 0  ;;  %v12913_v37 = vsel %vm437_vm1, %v12583_v15, 0 }
  0x90   : > { %487 = vmatpush1.bf16.msra.mxu0 %v439_v33  ;;  %2111 = vrot.lane.b32.xlu1 %v12592_v18, %s12481_s9 }
  0x91   : > { %v393_v35 = vpop.permute.xlu1 %392  ;;  %v391_v36 = vpop.permute.xlu0 %390 }
  0x92   : > { %v12726_v38 = vsel %vm416_vm0, %v389_v29, %v391_v36  ;;  %v421_v39 = vsel %vm416_vm0, %v391_v36, %v393_v35  ;;  %v12871_v29 = vld [vmem:[%s15042_s0] sm:$0xf] }
  0x93   : > { %2113 = vrot.lane.b32.xlu0 %v12590_v17, %s12481_s9  ;;  %11132 = vmatmul.mubr.msk.bf16.vlgmr.msra.gmra.mrb[0].mxu0 %vm433_vm2, %v12720_v34  ;;  %v12750_v44 = vsel %vm437_vm1, %v421_v39, 0 }
  0x94   : > { %11133 = vmatprep.subr.msk.bf16.mxu1 %vm437_vm1, %v12726_v38  ;;  %600 = vmatprep.mubr.bf16.mxu0 %v15048_v0 }
  0x95   : > { %528 = vmatpush1.bf16.msra.mxu1 %v12736_v40  ;;  %v397_v41 = vpop.permute.xlu1 %396  ;;  %v395_v42 = vpop.permute.xlu0 %394  ;;  %2115 = vrot.lane.b32.xlu1 %v12601_v21, %s12481_s9 }
  0x96   : > { %v12743_v43 = vsel %vm416_vm0, %v393_v35, %v395_v42  ;;  %v423_v45 = vsel %vm416_vm0, %v395_v42, %v397_v41  ;;  %v12901_v35 = vsel %vm437_vm1, %v12574_v12, 0 }
  0x97   : > { %2117 = vrot.lane.b32.xlu0 %v12599_v20, %s12481_s9  ;;  %11135 = vmatprep.subr.msk.bf16.mxu0 %vm437_vm1, %v12743_v43  ;;  %v12770_v50 = vsel %vm437_vm1, %v423_v45, 0  ;;  %v12935_v45 = vsel %vm437_vm1, %v12592_v18, 0 }
  0x98   : > { %11134 = vmatmul.mubr.msk.bf16.vlgmr.msra.gmra.mrb[0].mxu1 %vm433_vm2, %v12720_v34  ;;  %569 = vmatpush1.bf16.msra.mxu0 %v12750_v44 }
  0x99   : > { %v401_v46 = vpop.permute.xlu1 %400  ;;  %v399_v47 = vpop.permute.xlu0 %398  ;;  %641 = vmatprep.mubr.bf16.mxu1 %v15048_v0  ;;  %2119 = vrot.lane.b32.xlu1 %v12610_v24, %s12481_s9 }
  0x9a   : > { %v12760_v48 = vsel %vm416_vm0, %v397_v41, %v399_v47  ;;  %v425_v49 = vsel %vm416_vm0, %v399_v47, %v401_v46  ;;  %v12948_v47 = vsel %vm437_vm1, %v12601_v21, 0 }
  0x9b   : > { %2121 = vrot.lane.b32.xlu0 %v12608_v23, %s12481_s9  ;;  %11136 = vmatmul.mubr.msk.bf16.vlgmr.msra.gmra.mrb[4].mxu0 %vm433_vm2, %v12720_v34  ;;  %v12784_v54 = vsel %vm437_vm1, %v425_v49, 0 }
  0x9c   : > { %11137 = vmatprep.subr.msk.bf16.mxu1 %vm437_vm1, %v12760_v48  ;;  %682 = vmatprep.mubr.bf16.mxu0 %v15048_v0 }
  0x9d   : > { %610 = vmatpush1.bf16.msra.mxu1 %v12770_v50  ;;  %v405_v51 = vpop.permute.xlu1 %404  ;;  %v403_v52 = vpop.permute.xlu0 %402  ;;  %2123 = vrot.lane.b32.xlu1 %v12621_v26, %s12481_s9 }
  0x9e   : > { %v12777_v53 = vsel %vm416_vm0, %v401_v46, %v403_v52  ;;  %v427_v55 = vsel %vm416_vm0, %v403_v52, %v405_v51 }
  0x9f   : > { %2539 = vrot.lane.b32.xlu0 %v12543_v4, %s12482_s12  ;;  %11139 = vmatprep.subr.msk.bf16.mxu0 %vm437_vm1, %v12777_v53  ;;  %v12804_v60 = vsel %vm437_vm1, %v427_v55, 0 }
  0xa0   : > { %11138 = vmatmul.mubr.msk.bf16.vlgmr.msra.gmra.mrb[4].mxu1 %vm433_vm2, %v12720_v34  ;;  %651 = vmatpush1.bf16.msra.mxu0 %v12784_v54 }
  0xa1   : > { %v409_v56 = vpop.permute.xlu1 %408  ;;  %v407_v57 = vpop.permute.xlu0 %406  ;;  %723 = vmatprep.mubr.bf16.mxu1 %v15048_v0  ;;  %2541 = vrot.lane.b32.xlu1 %v12556_v6, %s12482_s12 }
  0xa2   : > { %v12794_v58 = vsel %vm416_vm0, %v405_v51, %v407_v57  ;;  %v429_v59 = vsel %vm416_vm0, %v407_v57, %v409_v56 }
  0xa3   : > { %2543 = vrot.lane.b32.xlu0 %v12541_v3, %s12482_s12  ;;  %11140 = vmatmul.mubr.msk.bf16.vlgmr.msra.gmra.mrb[8].mxu0 %vm433_vm2, %v12720_v34  ;;  %v12818_v1 = vsel %vm437_vm1, %v429_v59, 0 }
  0xa4   : > { %11141 = vmatprep.subr.msk.bf16.mxu1 %vm437_vm1, %v12794_v58  ;;  %764 = vmatprep.mubr.bf16.mxu0 %v15048_v0 }
  0xa5   : > { %692 = vmatpush1.bf16.msra.mxu1 %v12804_v60  ;;  %v413_v61 = vpop.permute.xlu1 %412  ;;  %v411_v62 = vpop.permute.xlu0 %410  ;;  %2545 = vrot.lane.b32.xlu1 %v12550_v5, %s12482_s12 }
  0xa6   : > { %v12811_v63 = vsel %vm416_vm0, %v409_v56, %v411_v62  ;;  %v431_v2 = vsel %vm416_vm0, %v411_v62, %v413_v61  ;;  %v12973_v56 = vsel %vm437_vm1, %v12610_v24, 0 }
  0xa7   : > { %2547 = vrot.lane.b32.xlu0 %v12565_v9, %s12482_s12  ;;  %11143 = vmatprep.subr.msk.bf16.mxu0 %vm437_vm1, %v12811_v63  ;;  %v12846_v19 = vsel %vm437_vm1, %v431_v2, 0 }
  0xa8   : > { %11142 = vmatmul.mubr.msk.bf16.vlgmr.msra.gmra.mrb[8].mxu1 %vm433_vm2, %v12720_v34  ;;  %733 = vmatpush1.bf16.msra.mxu0 %v12818_v1 }
  0xa9   : > { %v12824_v7 = vpop.permute.xlu0 %414  ;;  %805 = vmatprep.mubr.bf16.mxu1 %v15048_v0  ;;  %11147 = vmatprep.subr.msk.bf16.mxu0 %vm437_vm1, %v12556_v6  ;;  %v12831_v13 = vpop.permute.xlu1 %1195 }
  0xaa   : > { %v12835_v16 = vsel %vm416_vm0, %v413_v61, %v12824_v7  ;;  %2549 = vrot.lane.b32.xlu1 %v12563_v8, %s12482_s12 }
  0xab   : > { %2551 = vrot.lane.b32.xlu0 %v12574_v12, %s12482_s12  ;;  %11144 = vmatmul.mubr.msk.bf16.vlgmr.msra.gmra.mrb[12].mxu0 %vm433_vm2, %v12720_v34 }
  0xac   : > { %11145 = vmatprep.subr.msk.bf16.mxu1 %vm437_vm1, %v12835_v16  ;;  %866 = vmatpush1.bf16.msra.mxu0 %v818_v10 }
  0xad   : > { %774 = vmatpush1.bf16.msra.mxu1 %v12846_v19  ;;  %v12849_v22 = vpop.permute.xlu0 %1197  ;;  %897 = vmatprep.mubr.bf16.mxu0 %v15048_v0  ;;  %v12852_v27 = vpop.permute.xlu1 %1199 }
  0xae   : > { %11149 = vmatprep.subr.msk.bf16.mxu1 %vm437_vm1, %v12550_v5  ;;  %11151 = vmatprep.subr.msk.bf16.mxu0 %vm437_vm1, %v12563_v8  ;;  %v1231_v51 = vsel %vm1229_vm3, %v12849_v22, %v12852_v27  ;;  %v1230_v59 = vsel %vm1229_vm3, %v12831_v13, %v12849_v22 }
  0xaf   : > { %2555 = vrot.lane.b32.xlu0 %v12583_v15, %s12482_s12  ;;  %2553 = vrot.lane.b32.xlu1 %v12572_v11, %s12482_s12  ;;  %v1250_v10 = vsel %vm437_vm1, %v1230_v59, 0 }
  0xb0   : > { %11146 = vmatmul.mubr.msk.bf16.vlgmr.msra.gmra.mrb[12].mxu1 %vm433_vm2, %v12720_v34 }
  0xb1   : > { %v12873_v30 = vpop.permute.xlu0 %1201  ;;  %907 = vmatpush1.bf16.msra.mxu1 %v12858_v28  ;;  %938 = vmatprep.mubr.bf16.mxu1 %v15048_v0  ;;  %v12881_v32 = vpop.permute.xlu1 %1203 }
  0xb2   : > { %11153 = vmatprep.subr.msk.bf16.mxu1 %vm437_vm1, %v12572_v11  ;;  %v12982_v57 = vsel %vm1229_vm3, %v12873_v30, %v12881_v32  ;;  %v1232_v13 = vsel %vm1229_vm3, %v12852_v27, %v12873_v30 }
  0xb3   : > { %2559 = vrot.lane.b32.xlu0 %v12592_v18, %s12482_s12  ;;  %11148 = vmatmul.mubr.msk.bf16.vlgmr.msra.gmra.mrb[0].mxu0 %vm433_vm2, %v12871_v29  ;;  %15218 = vst [vmem:[#allocation2_spill] sm:$0xff] %v12982_v57  ;;  %v13034_v30 = vsel %vm437_vm1, %v1232_v13, 0 }
  0xb4   : > { %948 = vmatpush1.bf16.msra.mxu0 %v12879_v31  ;;  %979 = vmatprep.mubr.bf16.mxu0 %v15048_v0 }
  0xb5   : > { %v12891_v33 = vpop.permute.xlu0 %1205  ;;  %11155 = vmatprep.subr.msk.bf16.mxu0 %vm437_vm1, %v12581_v14  ;;  %2557 = vrot.lane.b32.xlu1 %v12581_v14, %s12482_s12  ;;  %v12897_v34 = vpop.permute.xlu1 %1207 }
  0xb6   : > { %v13000_v2 = vsel %vm1229_vm3, %v12891_v33, %v12897_v34  ;;  %v1234_v27 = vsel %vm1229_vm3, %v12881_v32, %v12891_v33 }
  0xb7   : > { %2563 = vrot.lane.b32.xlu0 %v12601_v21, %s12482_s12  ;;  %15220 = vst [vmem:[#allocation4_spill] sm:$0xff] %v13000_v2  ;;  %v13061_v32 = vsel %vm437_vm1, %v1234_v27, 0 }
  0xb8   : > { %11150 = vmatmul.mubr.msk.bf16.vlgmr.msra.gmra.mrb[0].mxu1 %vm433_vm2, %v12871_v29  ;;  %15224 = vst [vmem:[#allocation7_spill] sm:$0xff] %v13061_v32 }
  0xb9   : > { %v12907_v36 = vpop.permute.xlu0 %1209  ;;  %989 = vmatpush1.bf16.msra.mxu1 %v12901_v35  ;;  %1020 = vmatprep.mubr.bf16.mxu1 %v15048_v0  ;;  %v12915_v39 = vpop.permute.xlu1 %1211 }
  0xba   : > { %11157 = vmatprep.subr.msk.bf16.mxu1 %vm437_vm1, %v12590_v17  ;;  %2561 = vrot.lane.b32.xlu1 %v12590_v17, %s12482_s12  ;;  %v13026_v59 = vsel %vm1229_vm3, %v12907_v36, %v12915_v39  ;;  %v1236_v33 = vsel %vm1229_vm3, %v12897_v34, %v12907_v36 }
  0xbb   : > { %2567 = vrot.lane.b32.xlu0 %v12610_v24, %s12482_s12  ;;  %11152 = vmatmul.mubr.msk.bf16.vlgmr.msra.gmra.mrb[4].mxu0 %vm433_vm2, %v12871_v29  ;;  %15221 = vst [vmem:[#allocation5_spill] sm:$0xff] %v13026_v59  ;;  %v13089_v36 = vsel %vm437_vm1, %v1236_v33, 0 }
  0xbc   : > { %1030 = vmatpush1.bf16.msra.mxu0 %v12913_v37  ;;  %1061 = vmatprep.mubr.bf16.mxu0 %v15048_v0  ;;  %15226 = vst [vmem:[#allocation9_spill] sm:$0xff] %v13089_v36 }
  0xbd   : > { %v12927_v41 = vpop.permute.xlu0 %1213  ;;  %11159 = vmatprep.subr.msk.bf16.mxu0 %vm437_vm1, %v12599_v20  ;;  %v12931_v42 = vpop.permute.xlu1 %1215 }
  0xbe   : > { %2565 = vrot.lane.b32.xlu1 %v12599_v20, %s12482_s12  ;;  %v1238_v34 = vsel %vm1229_vm3, %v12915_v39, %v12927_v41 }
  0xbf   : > { %2571 = vrot.lane.b32.xlu0 %v12621_v26, %s12482_s12 }
  0xc0   : > { %11154 = vmatmul.mubr.msk.bf16.vlgmr.msra.gmra.mrb[4].mxu1 %vm433_vm2, %v12871_v29 }
  0xc1   : > { %v12943_v46 = vpop.permute.xlu0 %1217  ;;  %1071 = vmatpush1.bf16.msra.mxu1 %v12935_v45  ;;  %1102 = vmatprep.mubr.bf16.mxu1 %v15048_v0  ;;  %v12951_v49 = vpop.permute.xlu1 %1219 }
  0xc2   : > { %11161 = vmatprep.subr.msk.bf16.mxu1 %vm437_vm1, %v12608_v23  ;;  %2569 = vrot.lane.b32.xlu1 %v12608_v23, %s12482_s12  ;;  %v13081_v27 = vsel %vm1229_vm3, %v12943_v46, %v12951_v49  ;;  %v1240_v33 = vsel %vm1229_vm3, %v12931_v42, %v12943_v46 }
  0xc3   : > { %2989 = vrot.lane.b32.xlu0 %v12556_v6, %s12483_s15  ;;  %11156 = vmatmul.mubr.msk.bf16.vlgmr.msra.gmra.mrb[8].mxu0 %vm433_vm2, %v12871_v29  ;;  %15225 = vst [vmem:[#allocation8_spill] sm:$0xff] %v13081_v27  ;;  %v13139_v46 = vsel %vm437_vm1, %v1240_v33, 0 }
  0xc4   : > { %1112 = vmatpush1.bf16.msra.mxu0 %v12948_v47  ;;  %1143 = vmatprep.mubr.bf16.mxu0 %v15048_v0  ;;  %15230 = vst [vmem:[#allocation13_spill] sm:$0xff] %v13139_v46 }
  0xc5   : > { %11164 = vmatprep.subr.msk.bf16.mxu0 %vm437_vm1, %v1231_v51  ;;  %v12967_v52 = vpop.permute.xlu0 %1221  ;;  %v12969_v55 = vpop.permute.xlu1 %1223 }
  0xc6   : > { %2987 = vrot.lane.b32.xlu1 %v12543_v4, %s12483_s15  ;;  %v13102_v39 = vsel %vm1229_vm3, %v12967_v52, %v12969_v55 }
  0xc7   : > { %2993 = vrot.lane.b32.xlu0 %v12550_v5, %s12483_s15  ;;  %15227 = vst [vmem:[#allocation10_spill] sm:$0xff] %v13102_v39 }
  0xc8   : > { %11158 = vmatmul.mubr.msk.bf16.vlgmr.msra.gmra.mrb[8].mxu1 %vm433_vm2, %v12871_v29 }
  0xc9   : > { %1153 = vmatpush1.bf16.msra.mxu1 %v12973_v56  ;;  %v12990_v61 = vpop.permute.xlu0 %1225  ;;  %1184 = vmatprep.mubr.bf16.mxu1 %v15048_v0  ;;  %v12993_v62 = vpop.permute.xlu1 %1227 }
  0xca   : > { %15219 = vst [vmem:[#allocation3_spill] sm:$0xff] %v12993_v62  ;;  %11166 = vmatprep.subr.msk.bf16.mxu1 %vm437_vm1, %v12982_v57  ;;  %2991 = vrot.lane.b32.xlu1 %v12541_v3, %s12483_s15  ;;  %v1244_v33 = vsel %vm1229_vm3, %v12969_v55, %v12990_v61 }
  0xcb   : > { %2997 = vrot.lane.b32.xlu0 %v12563_v8, %s12483_s15  ;;  %11160 = vmatmul.mubr.msk.bf16.vlgmr.msra.gmra.mrb[12].mxu0 %vm433_vm2, %v12871_v29 }
  0xcc   : > { %1298 = vmatpush1.bf16.msra.mxu0 %v1250_v10  ;;  %1329 = vmatprep.mubr.bf16.mxu0 %v15048_v0  ;;  %v13039_v10 = vld [vmem:[%s15042_s0 + $0x8] sm:$0xf] }
  0xcd   : > { %11168 = vmatprep.subr.msk.bf16.mxu0 %vm437_vm1, %v13000_v2  ;;  %v13015_v22 = vpop.permute.xlu0 %1643  ;;  %v13017_v51 = vpop.permute.xlu1 %1645  ;;  %v15222_v2 = vmov 0  }
  0xce   : > { %2995 = vrot.lane.b32.xlu1 %v12565_v9, %s12483_s15  ;;  %v1678_v55 = vsel %vm1677_vm4, %v13015_v22, %v13017_v51 }
  0xcf   : > { %3001 = vrot.lane.b32.xlu0 %v12572_v11, %s12483_s15 }
  0xd0   : > { %11162 = vmatmul.mubr.msk.bf16.vlgmr.msra.gmra.mrb[12].mxu1 %vm433_vm2, %v12871_v29  ;;  %v13052_v29 = vsel %vm1229_vm3, %v12927_v41, %v12931_v42  ;;  %v13111_v41 = vsel %vm437_vm1, %v1238_v34, 0  ;;  %v13131_v34 = vsel %vm1229_vm3, %v12990_v61, %v12993_v62  ;;  %v1242_v42 = vsel %vm1229_vm3, %v12951_v49, %v12967_v52 }
  0xd1   : > { %1339 = vmatpush1.bf16.msra.mxu1 %v13034_v30  ;;  %v13042_v0 = vpop.permute.xlu0 %1647  ;;  %1370 = vmatprep.mubr.bf16.mxu1 %v15222_v2  ;;  %v13045_v57 = vpop.permute.xlu1 %1649  ;;  %15223 = vst [vmem:[#allocation6_spill] sm:$0xff] %v13052_v29  ;;  %15228 = vst [vmem:[#allocation11_spill] sm:$0xff] %v13111_v41  ;;  %v13159_v52 = vsel %vm437_vm1, %v1242_v42, 0  ;;  %v13186_v61 = vsel %vm437_vm1, %v1244_v33, 0 }
  0xd2   : > { %11170 = vmatprep.subr.msk.bf16.mxu1 %vm437_vm1, %v13026_v59  ;;  %2999 = vrot.lane.b32.xlu1 %v12574_v12, %s12483_s15  ;;  %15229 = vst [vmem:[#allocation12_spill] sm:$0xff] %v13131_v34  ;;  %v1679_v49 = vsel %vm1677_vm4, %v13017_v51, %v13042_v0  ;;  %15231 = vst [vmem:[#allocation14_spill] sm:$0xff] %v13159_v52  ;;  %v1698_v51 = vsel %vm437_vm1, %v1678_v55, 0  ;;  %v1680_v33 = vsel %vm1677_vm4, %v13042_v0, %v13045_v57 }
  0xd3   : > { %3005 = vrot.lane.b32.xlu0 %v12581_v14, %s12483_s15  ;;  %11165 = vmatmul.mubr.msk.bf16.vlgmr.msra.gmra.mrb[0].mxu0 %vm433_vm2, %v13039_v10  ;;  %15233 = vst [vmem:[#allocation16_spill] sm:$0xff] %v13186_v61 }
  0xd4   : > { %1380 = vmatpush1.bf16.msra.mxu0 %v13061_v32  ;;  %1411 = vmatprep.mubr.bf16.mxu0 %v15222_v2 }
  0xd5   : > { %11172 = vmatprep.subr.msk.bf16.mxu0 %vm437_vm1, %v13052_v29  ;;  %v13070_v13 = vpop.permute.xlu0 %1651  ;;  %v13072_v59 = vpop.permute.xlu1 %1653 }
  0xd6   : > { %3003 = vrot.lane.b32.xlu1 %v12583_v15, %s12483_s15  ;;  %v13178_v42 = vsel %vm1677_vm4, %v13045_v57, %v13070_v13  ;;  %v1682_v0 = vsel %vm1677_vm4, %v13070_v13, %v13072_v59  ;;  %v13233_v57 = vsel %vm437_vm1, %v1680_v33, 0 }
  0xd7   : > { %3009 = vrot.lane.b32.xlu0 %v12590_v17, %s12483_s15  ;;  %15232 = vst [vmem:[#allocation15_spill] sm:$0xff] %v13178_v42 }
  0xd8   : > { %11167 = vmatmul.mubr.msk.bf16.vlgmr.msra.gmra.mrb[0].mxu1 %vm433_vm2, %v13039_v10 }
  0xd9   : > { %1421 = vmatpush1.bf16.msra.mxu1 %v13089_v36  ;;  %v13092_v29 = vpop.permute.xlu0 %1655  ;;  %1452 = vmatprep.mubr.bf16.mxu1 %v15222_v2  ;;  %v13095_v32 = vpop.permute.xlu1 %1657 }
  0xda   : > { %11174 = vmatprep.subr.msk.bf16.mxu1 %vm437_vm1, %v13081_v27  ;;  %3007 = vrot.lane.b32.xlu1 %v12592_v18, %s12483_s15  ;;  %v13199_v22 = vsel %vm1677_vm4, %v13072_v59, %v13092_v29  ;;  %v1684_v13 = vsel %vm1677_vm4, %v13092_v29, %v13095_v32 }
  0xdb   : > { %3013 = vrot.lane.b32.xlu0 %v12599_v20, %s12483_s15  ;;  %11169 = vmatmul.mubr.msk.bf16.vlgmr.msra.gmra.mrb[4].mxu0 %vm433_vm2, %v13039_v10  ;;  %15234 = vst [vmem:[#allocation17_spill] sm:$0xff] %v13199_v22 }
  0xdc   : > { %1462 = vmatpush1.bf16.msra.mxu0 %v13111_v41  ;;  %1493 = vmatprep.mubr.bf16.mxu0 %v15222_v2 }
  0xdd   : > { %11176 = vmatprep.subr.msk.bf16.mxu0 %vm437_vm1, %v13102_v39  ;;  %v13120_v27 = vpop.permute.xlu0 %1659  ;;  %v13122_v36 = vpop.permute.xlu1 %1661 }
  0xde   : > { %3011 = vrot.lane.b32.xlu1 %v12601_v21, %s12483_s15  ;;  %v13225_v55 = vsel %vm1677_vm4, %v13095_v32, %v13120_v27  ;;  %v1686_v29 = vsel %vm1677_vm4, %v13120_v27, %v13122_v36  ;;  %v13288_v32 = vsel %vm437_vm1, %v1684_v13, 0 }
  0xdf   : > { %3017 = vrot.lane.b32.xlu0 %v12608_v23, %s12483_s15  ;;  %15236 = vst [vmem:[#allocation19_spill] sm:$0xff] %v13225_v55  ;;  %15240 = vst [vmem:[#allocation23_spill] sm:$0xff] %v13288_v32 }
  0xe0   : > { %11171 = vmatmul.mubr.msk.bf16.vlgmr.msra.gmra.mrb[4].mxu1 %vm433_vm2, %v13039_v10 }
  0xe1   : > { %1503 = vmatpush1.bf16.msra.mxu1 %v13139_v46  ;;  %v13142_v39 = vpop.permute.xlu0 %1663  ;;  %1534 = vmatprep.mubr.bf16.mxu1 %v15222_v2  ;;  %v13145_v41 = vpop.permute.xlu1 %1665 }
  0xe2   : > { %11178 = vmatprep.subr.msk.bf16.mxu1 %vm437_vm1, %v13131_v34  ;;  %3015 = vrot.lane.b32.xlu1 %v12610_v24, %s12483_s15  ;;  %v13251_v59 = vsel %vm1677_vm4, %v13122_v36, %v13142_v39  ;;  %v13310_v36 = vsel %vm437_vm1, %v1686_v29, 0  ;;  %v1688_v13 = vsel %vm1677_vm4, %v13142_v39, %v13145_v41 }
  0xe3   : > { %3435 = vrot.lane.b32.xlu0 %v12543_v4, %s12484_s21  ;;  %11173 = vmatmul.mubr.msk.bf16.vlgmr.msra.gmra.mrb[8].mxu0 %vm433_vm2, %v13039_v10  ;;  %15237 = vst [vmem:[#allocation20_spill] sm:$0xff] %v13251_v59  ;;  %15242 = vst [vmem:[#allocation25_spill] sm:$0xff] %v13310_v36 }
  0xe4   : > { %1544 = vmatpush1.bf16.msra.mxu0 %v13159_v52  ;;  %1575 = vmatprep.mubr.bf16.mxu0 %v15222_v2 }
  0xe5   : > { %11181 = vmatprep.subr.msk.bf16.mxu0 %vm437_vm1, %v1679_v49  ;;  %v13167_v62 = vpop.permute.xlu0 %1667  ;;  %v13169_v34 = vpop.permute.xlu1 %1669 }
  0xe6   : > { %3019 = vrot.lane.b32.xlu1 %v12621_v26, %s12483_s15  ;;  %v1690_v39 = vsel %vm1677_vm4, %v13167_v62, %v13169_v34 }
  0xe7   : > { %3439 = vrot.lane.b32.xlu0 %v12541_v3, %s12484_s21 }
  0xe8   : > { %11175 = vmatmul.mubr.msk.bf16.vlgmr.msra.gmra.mrb[8].mxu1 %vm433_vm2, %v13039_v10 }
  0xe9   : > { %1585 = vmatpush1.bf16.msra.mxu1 %v13186_v61  ;;  %v13189_v49 = vpop.permute.xlu0 %1671  ;;  %1616 = vmatprep.mubr.bf16.mxu1 %v15222_v2  ;;  %v13192_v52 = vpop.permute.xlu1 %1673 }
  0xea   : > { %11183 = vmatprep.subr.msk.bf16.mxu1 %vm437_vm1, %v13178_v42  ;;  %3437 = vrot.lane.b32.xlu1 %v12556_v6, %s12484_s21  ;;  %v13301_v27 = vsel %vm1677_vm4, %v13169_v34, %v13189_v49 }
  0xeb   : > { %3443 = vrot.lane.b32.xlu0 %v12565_v9, %s12484_s21  ;;  %11177 = vmatmul.mubr.msk.bf16.vlgmr.msra.gmra.mrb[12].mxu0 %vm433_vm2, %v13039_v10  ;;  %15241 = vst [vmem:[#allocation24_spill] sm:$0xff] %v13301_v27 }
  0xec   : > { %1746 = vmatpush1.bf16.msra.mxu0 %v1698_v51  ;;  %1777 = vmatprep.mubr.bf16.mxu0 %v15222_v2  ;;  %v13238_v51 = vld [vmem:[%s15042_s0 + $0xc] sm:$0xf] }
  0xed   : > { %11185 = vmatprep.subr.msk.bf16.mxu0 %vm437_vm1, %v13199_v22  ;;  %v13214_v42 = vpop.permute.xlu0 %1675  ;;  %v13216_v61 = vpop.permute.xlu1 %2091 }
  0xee   : > { %15235 = vst [vmem:[#allocation18_spill] sm:$0xff] %v13214_v42  ;;  %3441 = vrot.lane.b32.xlu1 %v12550_v5, %s12484_s21  ;;  %v13330_v29 = vsel %vm1677_vm4, %v13192_v52, %v13214_v42  ;;  %v1692_v42 = vsel %vm1677_vm4, %v13189_v49, %v13192_v52 }
  0xef   : > { %3447 = vrot.lane.b32.xlu0 %v12574_v12, %s12484_s21  ;;  %15243 = vst [vmem:[#allocation26_spill] sm:$0xff] %v13330_v29  ;;  %v13385_v49 = vsel %vm437_vm1, %v1692_v42, 0 }
  0xf0   : > { %11179 = vmatmul.mubr.msk.bf16.vlgmr.msra.gmra.mrb[12].mxu1 %vm433_vm2, %v13039_v10  ;;  %v13260_v10 = vsel %vm437_vm1, %v1682_v0, 0  ;;  %v13280_v0 = vsel %vm1677_vm4, %v13145_v41, %v13167_v62  ;;  %v13338_v41 = vsel %vm437_vm1, %v1688_v13, 0  ;;  %v13358_v13 = vsel %vm437_vm1, %v1690_v39, 0 }
  0xf1   : > { %1787 = vmatpush1.bf16.msra.mxu1 %v13233_v57  ;;  %v13241_v22 = vpop.permute.xlu0 %2093  ;;  %1818 = vmatprep.mubr.bf16.mxu1 %v15222_v2  ;;  %v13244_v46 = vpop.permute.xlu1 %2095  ;;  %15238 = vst [vmem:[#allocation21_spill] sm:$0xff] %v13260_v10  ;;  %15239 = vst [vmem:[#allocation22_spill] sm:$0xff] %v13280_v0 }
  0xf2   : > { %11187 = vmatprep.subr.msk.bf16.mxu1 %vm437_vm1, %v13225_v55  ;;  %3445 = vrot.lane.b32.xlu1 %v12563_v8, %s12484_s21  ;;  %15244 = vst [vmem:[#allocation27_spill] sm:$0xff] %v13338_v41  ;;  %v2127_v62 = vsel %vm2125_vm5, %v13241_v22, %v13244_v46  ;;  %15245 = vst [vmem:[#allocation28_spill] sm:$0xff] %v13358_v13  ;;  %v2126_v52 = vsel %vm2125_vm5, %v13216_v61, %v13241_v22 }
  0xf3   : > { %3451 = vrot.lane.b32.xlu0 %v12583_v15, %s12484_s21  ;;  %11182 = vmatmul.mubr.msk.bf16.vlgmr.msra.gmra.mrb[0].mxu0 %vm433_vm2, %v13238_v51  ;;  %v2146_v42 = vsel %vm437_vm1, %v2126_v52, 0 }
  0xf4   : > { %1828 = vmatpush1.bf16.msra.mxu0 %v13260_v10  ;;  %1859 = vmatprep.mubr.bf16.mxu0 %v15222_v2 }
  0xf5   : > { %11189 = vmatprep.subr.msk.bf16.mxu0 %vm437_vm1, %v13251_v59  ;;  %v13269_v33 = vpop.permute.xlu0 %2097  ;;  %v13271_v55 = vpop.permute.xlu1 %2099 }
  0xf6   : > { %3449 = vrot.lane.b32.xlu1 %v12572_v11, %s12484_s21  ;;  %v13375_v39 = vsel %vm2125_vm5, %v13269_v33, %v13271_v55  ;;  %v2128_v22 = vsel %vm2125_vm5, %v13244_v46, %v13269_v33 }
  0xf7   : > { %3455 = vrot.lane.b32.xlu0 %v12592_v18, %s12484_s21  ;;  %15246 = vst [vmem:[#allocation29_spill] sm:$0xff] %v13375_v39  ;;  %v13432_v33 = vsel %vm437_vm1, %v2128_v22, 0 }
  0xf8   : > { %11184 = vmatmul.mubr.msk.bf16.vlgmr.msra.gmra.mrb[0].mxu1 %vm433_vm2, %v13238_v51 }
  0xf9   : > { %1869 = vmatpush1.bf16.msra.mxu1 %v13288_v32  ;;  %v13291_v59 = vpop.permute.xlu0 %2101  ;;  %1900 = vmatprep.mubr.bf16.mxu1 %v15222_v2  ;;  %v13294_v10 = vpop.permute.xlu1 %2103 }
  0xfa   : > { %11191 = vmatprep.subr.msk.bf16.mxu1 %vm437_vm1, %v13280_v0  ;;  %3453 = vrot.lane.b32.xlu1 %v12581_v14, %s12484_s21  ;;  %v2130_v46 = vsel %vm2125_vm5, %v13271_v55, %v13291_v59 }
  0xfb   : > { %3459 = vrot.lane.b32.xlu0 %v12601_v21, %s12484_s21  ;;  %11186 = vmatmul.mubr.msk.bf16.vlgmr.msra.gmra.mrb[4].mxu0 %vm433_vm2, %v13238_v51 }
  0xfc   : > { %1910 = vmatpush1.bf16.msra.mxu0 %v13310_v36  ;;  %1941 = vmatprep.mubr.bf16.mxu0 %v15222_v2 }
  0xfd   : > { %11193 = vmatprep.subr.msk.bf16.mxu0 %vm437_vm1, %v13301_v27  ;;  %v13319_v0 = vpop.permute.xlu0 %2105  ;;  %v13321_v32 = vpop.permute.xlu1 %2107 }
  0xfe   : > { %3457 = vrot.lane.b32.xlu1 %v12590_v17, %s12484_s21  ;;  %v2132_v22 = vsel %vm2125_vm5, %v13294_v10, %v13319_v0 }
  0xff   : > { %3463 = vrot.lane.b32.xlu0 %v12610_v24, %s12484_s21 }
 0x100   : > { %11188 = vmatmul.mubr.msk.bf16.vlgmr.msra.gmra.mrb[4].mxu1 %vm433_vm2, %v13238_v51 }
 0x101   : > { %1951 = vmatpush1.bf16.msra.mxu1 %v13338_v41  ;;  %v13341_v27 = vpop.permute.xlu0 %2109  ;;  %1982 = vmatprep.mubr.bf16.mxu1 %v15222_v2 }
 0x102   : > { %11195 = vmatprep.subr.msk.bf16.mxu1 %vm437_vm1, %v13330_v29  ;;  %3461 = vrot.lane.b32.xlu1 %v12599_v20, %s12484_s21  ;;  %v13351_v34 = vpop.permute.xlu1 %2111 }
 0x103   : > { %3467 = vrot.lane.b32.xlu0 %v12621_v26, %s12484_s21  ;;  %11190 = vmatmul.mubr.msk.bf16.vlgmr.msra.gmra.mrb[8].mxu0 %vm433_vm2, %v13238_v51  ;;  %v13448_v55 = vsel %vm2125_vm5, %v13341_v27, %v13351_v34 }
 0x104   : > { %1992 = vmatpush1.bf16.msra.mxu0 %v13358_v13  ;;  %2023 = vmatprep.mubr.bf16.mxu0 %v15222_v2  ;;  %15249 = vst [vmem:[#allocation32_spill] sm:$0xff] %v13448_v55 }
 0x105   : > { %v13365_v29 = vpop.permute.xlu0 %2113  ;;  %11198 = vmatprep.subr.msk.bf16.mxu0 %vm437_vm1, %v2127_v62  ;;  %v13396_v62 = vsel %vm2125_vm5, %v13291_v59, %v13294_v10  ;;  %v2134_v10 = vsel %vm2125_vm5, %v13321_v32, %v13341_v27 }
 0x106   : > { %3465 = vrot.lane.b32.xlu1 %v12608_v23, %s12484_s21 }
 0x107   : > { %3885 = vrot.lane.b32.xlu0 %v12556_v6, %s12485_s24  ;;  %v13377_v13 = vpop.permute.xlu1 %2115 }
 0x108   : > { %11192 = vmatmul.mubr.msk.bf16.vlgmr.msra.gmra.mrb[8].mxu1 %vm433_vm2, %v13238_v51 }
 0x109   : > { %2033 = vmatpush1.bf16.msra.mxu1 %v13385_v49  ;;  %v13388_v6 = vpop.permute.xlu0 %2117  ;;  %2064 = vmatprep.mubr.bf16.mxu1 %v15222_v2 }
 0x10a   : > { %11200 = vmatprep.subr.msk.bf16.mxu1 %vm437_vm1, %v13375_v39  ;;  %3883 = vrot.lane.b32.xlu1 %v12543_v4, %s12485_s24  ;;  %v13422_v4 = vsel %vm2125_vm5, %v13319_v0, %v13321_v32  ;;  %v13485_v0 = vsel %vm437_vm1, %v2132_v22, 0  ;;  %v13505_v32 = vsel %vm437_vm1, %v2134_v10, 0  ;;  %v2136_v22 = vsel %vm2125_vm5, %v13351_v34, %v13365_v29 }
 0x10b   : > { %3889 = vrot.lane.b32.xlu0 %v12550_v5, %s12485_s24  ;;  %11194 = vmatmul.mubr.msk.bf16.vlgmr.msra.gmra.mrb[12].mxu0 %vm433_vm2, %v13238_v51  ;;  %v13405_v61 = vpop.permute.xlu1 %2119  ;;  %15247 = vst [vmem:[#allocation30_spill] sm:$0xff] %v13422_v4  ;;  %15251 = vst [vmem:[#allocation34_spill] sm:$0xff] %v13485_v0  ;;  %v13531_v34 = vsel %vm437_vm1, %v2136_v22, 0 }
 0x10c   : > { %2194 = vmatpush1.bf16.msra.mxu0 %v2146_v42  ;;  %2225 = vmatprep.mubr.bf16.mxu0 %v15222_v2  ;;  %15253 = vst [vmem:[#allocation36_spill] sm:$0xff] %v13505_v32  ;;  %15255 = vst [vmem:[#allocation38_spill] sm:$0xff] %v13531_v34 }
 0x10d   : > { %v13411_v39 = vpop.permute.xlu0 %2121  ;;  %11202 = vmatprep.subr.msk.bf16.mxu0 %vm437_vm1, %v13396_v62 }
 0x10e   : > { %3887 = vrot.lane.b32.xlu1 %v12541_v3, %s12485_s24  ;;  %v13437_v3 = vld [vmem:[%s15042_s0 + $0x10] sm:$0xf] }
 0x10f   : > { %3893 = vrot.lane.b32.xlu0 %v12563_v8, %s12485_s24  ;;  %v13424_v52 = vpop.permute.xlu1 %2123 }
 0x110   : > { %15248 = vst [vmem:[#allocation31_spill] sm:$0xff] %v13424_v52  ;;  %11196 = vmatmul.mubr.msk.bf16.vlgmr.msra.gmra.mrb[12].mxu1 %vm433_vm2, %v13238_v51  ;;  %v13457_v51 = vsel %vm437_vm1, %v2130_v46, 0 }
 0x111   : > { %2235 = vmatpush1.bf16.msra.mxu1 %v13432_v33  ;;  %v13440_v42 = vpop.permute.xlu0 %2539  ;;  %2266 = vmatprep.mubr.bf16.mxu1 %v15222_v2 }
 0x112   : > { %11204 = vmatprep.subr.msk.bf16.mxu1 %vm437_vm1, %v13422_v4  ;;  %3891 = vrot.lane.b32.xlu1 %v12565_v9, %s12485_s24  ;;  %v13475_v9 = vsel %vm2125_vm5, %v13365_v29, %v13377_v13  ;;  %v2138_v29 = vsel %vm2125_vm5, %v13377_v13, %v13388_v6 }
 0x113   : > { %3897 = vrot.lane.b32.xlu0 %v12572_v11, %s12485_s24  ;;  %11199 = vmatmul.mubr.msk.bf16.vlgmr.msra.gmra.mrb[0].mxu0 %vm433_vm2, %v13437_v3  ;;  %v2542_v59 = vpop.permute.xlu1 %2541  ;;  %15250 = vst [vmem:[#allocation33_spill] sm:$0xff] %v13475_v9  ;;  %v13552_v22 = vsel %vm437_vm1, %v2138_v29, 0 }
 0x114   : > { %2276 = vmatpush1.bf16.msra.mxu0 %v13457_v51  ;;  %2307 = vmatprep.mubr.bf16.mxu0 %v15222_v2  ;;  %15256 = vst [vmem:[#allocation39_spill] sm:$0xff] %v13552_v22 }
 0x115   : > { %v13464_v4 = vpop.permute.xlu0 %2543  ;;  %11206 = vmatprep.subr.msk.bf16.mxu0 %vm437_vm1, %v13448_v55  ;;  %v13496_v55 = vsel %vm2125_vm5, %v13388_v6, %v13405_v61  ;;  %v13545_v6 = vcombine.high %v12613_v25, %v12613_v25 }
 0x116   : > { %3895 = vrot.lane.b32.xlu1 %v12574_v12, %s12485_s24  ;;  %15252 = vst [vmem:[#allocation35_spill] sm:$0xff] %v13496_v55  ;;  %v2575_v13 = vsel %vm2573_vm6, %v2542_v59, %v13464_v4 }
 0x117   : > { %3901 = vrot.lane.b32.xlu0 %v12581_v14, %s12485_s24  ;;  %v13477_v46 = vpop.permute.xlu1 %2545 }
 0x118   : > { %11201 = vmatmul.mubr.msk.bf16.vlgmr.msra.gmra.mrb[0].mxu1 %vm433_vm2, %v13437_v3 }
 0x119   : > { %2317 = vmatpush1.bf16.msra.mxu1 %v13485_v0  ;;  %v13488_v12 = vpop.permute.xlu0 %2547  ;;  %2348 = vmatprep.mubr.bf16.mxu1 %v15222_v2 }
 0x11a   : > { %11208 = vmatprep.subr.msk.bf16.mxu1 %vm437_vm1, %v13475_v9  ;;  %3899 = vrot.lane.b32.xlu1 %v12583_v15, %s12485_s24  ;;  %v13523_v15 = vsel %vm2125_vm5, %v13411_v39, %v13424_v52  ;;  %v13569_v25 = vsel %vm2573_vm6, %v13477_v46, %v13488_v12 }
 0x11b   : > { %3905 = vrot.lane.b32.xlu0 %v12590_v17, %s12485_s24  ;;  %11203 = vmatmul.mubr.msk.bf16.vlgmr.msra.gmra.mrb[4].mxu0 %vm433_vm2, %v13437_v3  ;;  %15254 = vst [vmem:[#allocation37_spill] sm:$0xff] %v13523_v15  ;;  %15257 = vst [vmem:[#allocation40_spill] sm:$0xff] %v13569_v25 }
 0x11c   : > { %2358 = vmatpush1.bf16.msra.mxu0 %v13505_v32  ;;  %2389 = vmatprep.mubr.bf16.mxu0 %v15222_v2  ;;  %v2550_v27 = vpop.permute.xlu1 %2549 }
 0x11d   : > { %v13512_v9 = vpop.permute.xlu0 %2551  ;;  %11210 = vmatprep.subr.msk.bf16.mxu0 %vm437_vm1, %v13496_v55 }
 0x11e   : > { %3903 = vrot.lane.b32.xlu1 %v12592_v18, %s12485_s24 }
 0x11f   : > { %3909 = vrot.lane.b32.xlu0 %v12599_v20, %s12485_s24 }
 0x120   : > { %11205 = vmatmul.mubr.msk.bf16.vlgmr.msra.gmra.mrb[4].mxu1 %vm433_vm2, %v13437_v3 }
 0x121   : > { %2399 = vmatpush1.bf16.msra.mxu1 %v13531_v34  ;;  %v13534_v18 = vpop.permute.xlu0 %2555  ;;  %2430 = vmatprep.mubr.bf16.mxu1 %v15222_v2  ;;  %v2554_v10 = vpop.permute.xlu1 %2553 }
 0x122   : > { %11212 = vmatprep.subr.msk.bf16.mxu1 %vm437_vm1, %v13523_v15  ;;  %3907 = vrot.lane.b32.xlu1 %v12601_v21, %s12485_s24  ;;  %v2140_v21 = vsel %vm2125_vm5, %v13405_v61, %v13411_v39  ;;  %v2574_v39 = vsel %vm2573_vm6, %v13440_v42, %v2542_v59  ;;  %v13614_v15 = vsel %vm2573_vm6, %v2554_v10, %v13534_v18 }
 0x123   : > { %3913 = vrot.lane.b32.xlu0 %v12608_v23, %s12485_s24  ;;  %11207 = vmatmul.mubr.msk.bf16.vlgmr.msra.gmra.mrb[8].mxu0 %vm433_vm2, %v13437_v3  ;;  %v13579_v61 = vsel %vm437_vm1, %v2140_v21, 0  ;;  %v2594_v59 = vsel %vm437_vm1, %v2574_v39, 0  ;;  %15261 = vst [vmem:[#allocation44_spill] sm:$0xff] %v13614_v15  ;;  %v2578_v39 = vsel %vm2573_vm6, %v13488_v12, %v2550_v27 }
 0x124   : > { %2440 = vmatpush1.bf16.msra.mxu0 %v13552_v22  ;;  %2471 = vmatprep.mubr.bf16.mxu0 %v15222_v2  ;;  %v13572_v22 = vld [vmem:[%s12548_s30 + $0x8] sm:$0xff]  ;;  %15258 = vst [vmem:[#allocation41_spill] sm:$0xff] %v13579_v61 }
 0x125   : > { %v13559_v52 = vpop.permute.xlu0 %2559  ;;  %11215 = vmatprep.subr.msk.bf16.mxu0 %vm437_vm1, %v2575_v13  ;;  %v13587_v13 = vsel %vm2573_vm6, %v2550_v27, %v13512_v9  ;;  %v13595_v42 = vcombine.low %v13572_v22, %v13572_v22 }
 0x126   : > { %3911 = vrot.lane.b32.xlu1 %v12610_v24, %s12485_s24  ;;  %15259 = vst [vmem:[#allocation42_spill] sm:$0xff] %v13587_v13 }
 0x127   : > { %4686 = vrot.lane.b32.xlu0 %v13545_v6, %s12478_s6  ;;  %v2558_v29 = vpop.permute.xlu1 %2557  ;;  %15260 = vst [vmem:[#allocation43_spill] sm:$0xff] %v13595_v42 }
 0x128   : > { %11209 = vmatmul.mubr.msk.bf16.vlgmr.msra.gmra.mrb[8].mxu1 %vm433_vm2, %v13437_v3  ;;  %v13636_v12 = vsel %vm2573_vm6, %v2558_v29, %v13559_v52 }
 0x129   : > { %2481 = vmatpush1.bf16.msra.mxu1 %v13579_v61  ;;  %v13582_v24 = vpop.permute.xlu0 %2563  ;;  %2512 = vmatprep.mubr.bf16.mxu1 %v15222_v2  ;;  %15264 = vst [vmem:[#allocation47_spill] sm:$0xff] %v13636_v12 }
 0x12a   : > { %11217 = vmatprep.subr.msk.bf16.mxu1 %vm437_vm1, %v13569_v25  ;;  %3915 = vrot.lane.b32.xlu1 %v12621_v26, %s12485_s24  ;;  %v2576_v25 = vsel %vm2573_vm6, %v13464_v4, %v13477_v46  ;;  %v13628_v46 = vld [vmem:[%s15042_s0 + $0x14] sm:$0xf] }
 0x12b   : > { %5047 = vrot.lane.b32.xlu0 %v13545_v6, %s12479_s7  ;;  %11211 = vmatmul.mubr.msk.bf16.vlgmr.msra.gmra.mrb[12].mxu0 %vm433_vm2, %v13437_v3  ;;  %v13623_v4 = vsel %vm437_vm1, %v2576_v25, 0  ;;  %v2580_v25 = vsel %vm2573_vm6, %v13512_v9, %v2554_v10  ;;  %v2582_v9 = vsel %vm2573_vm6, %v13534_v18, %v2558_v29 }
 0x12c   : > { %2642 = vmatpush1.bf16.msra.mxu0 %v2594_v59  ;;  %2673 = vmatprep.mubr.bf16.mxu0 %v15222_v2  ;;  %v2562_v21 = vpop.permute.xlu1 %2561  ;;  %15262 = vst [vmem:[#allocation45_spill] sm:$0xff] %v13623_v4  ;;  %v13681_v18 = vsel %vm437_vm1, %v2582_v9, 0 }
 0x12d   : > { %v13606_v61 = vpop.permute.xlu0 %2567  ;;  %11219 = vmatprep.subr.msk.bf16.mxu0 %vm437_vm1, %v13587_v13  ;;  %15269 = vst [vmem:[#allocation52_spill] sm:$0xff] %v13681_v18 }
 0x12e   : > { %4688 = vrot.lane.b32.xlu1 %v13595_v42, %s12478_s6 }
 0x12f   : > { %5408 = vrot.lane.b32.xlu0 %v13545_v6, %s12480_s8 }
 0x130   : > { %11213 = vmatmul.mubr.msk.bf16.vlgmr.msra.gmra.mrb[12].mxu1 %vm433_vm2, %v13437_v3  ;;  %v2566_v59 = vpop.permute.xlu1 %2565  ;;  %v13643_v3 = vsel %vm437_vm1, %v2578_v39, 0  ;;  %v13659_v39 = vsel %vm2573_vm6, %v2562_v21, %v13582_v24 }
 0x131   : > { %2683 = vmatpush1.bf16.msra.mxu1 %v13623_v4  ;;  %v13631_v13 = vpop.permute.xlu0 %2571  ;;  %2714 = vmatprep.mubr.bf16.mxu1 %v15222_v2  ;;  %15265 = vst [vmem:[#allocation48_spill] sm:$0xff] %v13643_v3  ;;  %15266 = vst [vmem:[#allocation49_spill] sm:$0xff] %v13659_v39  ;;  %v13674_v4 = vsel %vm2573_vm6, %v2566_v59, %v13606_v61 }
 0x132   : > { %15263 = vst [vmem:[#allocation46_spill] sm:$0xff] %v13631_v13  ;;  %11221 = vmatprep.subr.msk.bf16.mxu1 %vm437_vm1, %v13614_v15  ;;  %5049 = vrot.lane.b32.xlu1 %v13595_v42, %s12479_s7  ;;  %15268 = vst [vmem:[#allocation51_spill] sm:$0xff] %v13674_v4 }
 0x133   : > { %5769 = vrot.lane.b32.xlu0 %v13545_v6, %s12481_s9  ;;  %11216 = vmatmul.mubr.msk.bf16.vlgmr.msra.gmra.mrb[0].mxu0 %vm433_vm2, %v13628_v46 }
 0x134   : > { %2724 = vmatpush1.bf16.msra.mxu0 %v13643_v3  ;;  %2755 = vmatprep.mubr.bf16.mxu0 %v15222_v2  ;;  %v2570_v27 = vpop.permute.xlu1 %2569  ;;  %v13664_v3 = vsel %vm437_vm1, %v2580_v25, 0  ;;  %v2584_v25 = vsel %vm2573_vm6, %v13559_v52, %v2562_v21  ;;  %v2586_v52 = vsel %vm2573_vm6, %v13582_v24, %v2566_v59  ;;  %v13724_v59 = vcombine.high %v13572_v22, %v13572_v22 }
 0x135   : > { %v2990_v15 = vpop.permute.xlu0 %2989  ;;  %11223 = vmatprep.subr.msk.bf16.mxu0 %vm437_vm1, %v13636_v12  ;;  %15267 = vst [vmem:[#allocation50_spill] sm:$0xff] %v13664_v3  ;;  %v13697_v9 = vsel %vm2573_vm6, %v2570_v27, %v13631_v13  ;;  %v13716_v24 = vsel %vm437_vm1, %v2586_v52, 0 }
 0x136   : > { %5410 = vrot.lane.b32.xlu1 %v13595_v42, %s12480_s8  ;;  %15270 = vst [vmem:[#allocation53_spill] sm:$0xff] %v13697_v9  ;;  %15272 = vst [vmem:[#allocation55_spill] sm:$0xff] %v13716_v24 }
 0x137   : > { %6130 = vrot.lane.b32.xlu0 %v13545_v6, %s12482_s12  ;;  %15273 = vst [vmem:[#allocation56_spill] sm:$0xff] %v13724_v59 }
 0x138   : > { %11218 = vmatmul.mubr.msk.bf16.vlgmr.msra.gmra.mrb[0].mxu1 %vm433_vm2, %v13628_v46  ;;  %v2988_v10 = vpop.permute.xlu1 %2987 }
 0x139   : > { %2765 = vmatpush1.bf16.msra.mxu1 %v13664_v3  ;;  %v2994_v12 = vpop.permute.xlu0 %2993  ;;  %2796 = vmatprep.mubr.bf16.mxu1 %v15222_v2 }
 0x13a   : > { %11225 = vmatprep.subr.msk.bf16.mxu1 %vm437_vm1, %v13659_v39  ;;  %5771 = vrot.lane.b32.xlu1 %v13595_v42, %s12481_s9 }
 0x13b   : > { %6491 = vrot.lane.b32.xlu0 %v13545_v6, %s12483_s15  ;;  %11220 = vmatmul.mubr.msk.bf16.vlgmr.msra.gmra.mrb[4].mxu0 %vm433_vm2, %v13628_v46 }
 0x13c   : > { %2806 = vmatpush1.bf16.msra.mxu0 %v13681_v18  ;;  %2837 = vmatprep.mubr.bf16.mxu0 %v15222_v2  ;;  %v2992_v29 = vpop.permute.xlu1 %2991  ;;  %v13702_v18 = vsel %vm437_vm1, %v2584_v25, 0 }
 0x13d   : > { %v2998_v39 = vpop.permute.xlu0 %2997  ;;  %11227 = vmatprep.subr.msk.bf16.mxu0 %vm437_vm1, %v13674_v4  ;;  %15271 = vst [vmem:[#allocation54_spill] sm:$0xff] %v13702_v18  ;;  %v3023_v13 = vsel %vm3021_vm7, %v2990_v15, %v2992_v29 }
 0x13e   : > { %6132 = vrot.lane.b32.xlu1 %v13595_v42, %s12482_s12 }
 0x13f   : > { %6852 = vrot.lane.b32.xlu0 %v13545_v6, %s12484_s21 }
 0x140   : > { %11222 = vmatmul.mubr.msk.bf16.vlgmr.msra.gmra.mrb[4].mxu1 %vm433_vm2, %v13628_v46  ;;  %v2996_v21 = vpop.permute.xlu1 %2995 }
 0x141   : > { %2847 = vmatpush1.bf16.msra.mxu1 %v13702_v18  ;;  %v3002_v4 = vpop.permute.xlu0 %3001  ;;  %2878 = vmatprep.mubr.bf16.mxu1 %v15222_v2  ;;  %v13734_v18 = vsel %vm3021_vm7, %v2994_v12, %v2996_v21 }
 0x142   : > { %11229 = vmatprep.subr.msk.bf16.mxu1 %vm437_vm1, %v13697_v9  ;;  %6493 = vrot.lane.b32.xlu1 %v13595_v42, %s12483_s15  ;;  %v2588_v9 = vsel %vm2573_vm6, %v13606_v61, %v2570_v27  ;;  %15274 = vst [vmem:[#allocation57_spill] sm:$0xff] %v13734_v18 }
 0x143   : > { %7213 = vrot.lane.b32.xlu0 %v13545_v6, %s12485_s24  ;;  %11224 = vmatmul.mubr.msk.bf16.vlgmr.msra.gmra.mrb[8].mxu0 %vm433_vm2, %v13628_v46  ;;  %v13739_v22 = vsel %vm437_vm1, %v2588_v9, 0  ;;  %v3024_v9 = vsel %vm3021_vm7, %v2992_v29, %v2994_v12  ;;  %v13776_v12 = vld [vmem:[%s15042_s0 + $0x18] sm:$0xf] }
 0x144   : > { %2888 = vmatpush1.bf16.msra.mxu0 %v13716_v24  ;;  %2919 = vmatprep.mubr.bf16.mxu0 %v15222_v2  ;;  %v3000_v25 = vpop.permute.xlu1 %2999  ;;  %15275 = vst [vmem:[#allocation58_spill] sm:$0xff] %v13739_v22  ;;  %v3022_v24 = vsel %vm3021_vm7, %v2988_v10, %v2990_v15 }
 0x145   : > { %v3006_v52 = vpop.permute.xlu0 %3005  ;;  %11232 = vmatprep.subr.msk.bf16.mxu0 %vm437_vm1, %v3023_v13  ;;  %v13747_v27 = vsel %vm3021_vm7, %v2998_v39, %v3000_v25  ;;  %v3042_v15 = vsel %vm437_vm1, %v3022_v24, 0  ;;  %v13768_v24 = vsel %vm437_vm1, %v3024_v9, 0 }
 0x146   : > { %6854 = vrot.lane.b32.xlu1 %v13595_v42, %s12484_s21  ;;  %15276 = vst [vmem:[#allocation59_spill] sm:$0xff] %v13747_v27  ;;  %15278 = vst [vmem:[#allocation61_spill] sm:$0xff] %v13768_v24 }
 0x147   : > { %7929 = vrot.lane.b32.xlu0 %v13724_v59, %s12478_s6 }
 0x148   : > { %11226 = vmatmul.mubr.msk.bf16.vlgmr.msra.gmra.mrb[8].mxu1 %vm433_vm2, %v13628_v46  ;;  %v3004_v61 = vpop.permute.xlu1 %3003 }
 0x149   : > { %2929 = vmatpush1.bf16.msra.mxu1 %v13739_v22  ;;  %v3010_v13 = vpop.permute.xlu0 %3009  ;;  %2960 = vmatprep.mubr.bf16.mxu1 %v15222_v2 }
 0x14a   : > { %11234 = vmatprep.subr.msk.bf16.mxu1 %vm437_vm1, %v13734_v18  ;;  %7215 = vrot.lane.b32.xlu1 %v13595_v42, %s12485_s24  ;;  %v13763_v42 = vsel %vm3021_vm7, %v3002_v4, %v3004_v61 }
 0x14b   : > { %11228 = vmatmul.mubr.msk.bf16.vlgmr.msra.gmra.mrb[12].mxu0 %vm433_vm2, %v13628_v46  ;;  %8290 = vrot.lane.b32.xlu0 %v13724_v59, %s12479_s7  ;;  %15277 = vst [vmem:[#allocation60_spill] sm:$0xff] %v13763_v42 }
 0x14c   : > { %3090 = vmatpush1.bf16.msra.mxu0 %v3042_v15  ;;  %3121 = vmatprep.mubr.bf16.mxu0 %v15222_v2  ;;  %v3008_v10 = vpop.permute.xlu1 %3007  ;;  %v3026_v15 = vsel %vm3021_vm7, %v2996_v21, %v2998_v39  ;;  %v3028_v21 = vsel %vm3021_vm7, %v3000_v25, %v3002_v4 }
 0x14d   : > { %v3014_v22 = vpop.permute.xlu0 %3013  ;;  %11236 = vmatprep.subr.msk.bf16.mxu0 %vm437_vm1, %v13747_v27  ;;  %v13781_v18 = vsel %vm3021_vm7, %v3006_v52, %v3008_v10  ;;  %v13786_v39 = vsel %vm437_vm1, %v3026_v15, 0 }
 0x14e   : > { %15279 = vst [vmem:[#allocation62_spill] sm:$0xff] %v13781_v18  ;;  %15280 = vst [vmem:[#allocation63_spill] sm:$0xff] %v13786_v39 }
 0x14f   : > { %8651 = vrot.lane.b32.xlu0 %v13724_v59, %s12480_s8 }
 0x150   : > { %11230 = vmatmul.mubr.msk.bf16.vlgmr.msra.gmra.mrb[12].mxu1 %vm433_vm2, %v13628_v46  ;;  %v3012_v29 = vpop.permute.xlu1 %3011 }
 0x151   : > { %3131 = vmatpush1.bf16.msra.mxu1 %v13768_v24  ;;  %v3018_v27 = vpop.permute.xlu0 %3017  ;;  %3162 = vmatprep.mubr.bf16.mxu1 %v15222_v2  ;;  %v13798_v15 = vsel %vm3021_vm7, %v3010_v13, %v3012_v29 }
 0x152   : > { %11238 = vmatprep.subr.msk.bf16.mxu1 %vm437_vm1, %v13763_v42  ;;  %15281 = vst [vmem:[#allocation64_spill] sm:$0xff] %v13798_v15  ;;  %v13803_v42 = vsel %vm437_vm1, %v3028_v21, 0 }
 0x153   : > { %11233 = vmatmul.mubr.msk.bf16.vlgmr.msra.gmra.mrb[0].mxu0 %vm433_vm2, %v13776_v12  ;;  %9012 = vrot.lane.b32.xlu0 %v13724_v59, %s12481_s9  ;;  %15282 = vst [vmem:[#allocation65_spill] sm:$0xff] %v13803_v42 }
 0x154   : > { %3172 = vmatpush1.bf16.msra.mxu0 %v13786_v39  ;;  %3203 = vmatprep.mubr.bf16.mxu0 %v15222_v2  ;;  %v3016_v46 = vpop.permute.xlu1 %3015  ;;  %v3030_v39 = vsel %vm3021_vm7, %v3004_v61, %v3006_v52  ;;  %v3032_v61 = vsel %vm3021_vm7, %v3008_v10, %v3010_v13 }
 0x155   : > { %v3436_v9 = vpop.permute.xlu0 %3435  ;;  %11240 = vmatprep.subr.msk.bf16.mxu0 %vm437_vm1, %v13781_v18  ;;  %v13813_v25 = vsel %vm3021_vm7, %v3014_v22, %v3016_v46  ;;  %v13818_v21 = vsel %vm437_vm1, %v3030_v39, 0 }
 0x156   : > { %15284 = vst [vmem:[#allocation67_spill] sm:$0xff] %v13813_v25  ;;  %15285 = vst [vmem:[#allocation68_spill] sm:$0xff] %v13818_v21 }
 0x157   : > { %9373 = vrot.lane.b32.xlu0 %v13724_v59, %s12482_s12 }
 0x158   : > { %11235 = vmatmul.mubr.msk.bf16.vlgmr.msra.gmra.mrb[0].mxu1 %vm433_vm2, %v13776_v12  ;;  %v13808_v24 = vpop.permute.xlu1 %3019 }
 0x159   : > { %15283 = vst [vmem:[#allocation66_spill] sm:$0xff] %v13808_v24  ;;  %3213 = vmatpush1.bf16.msra.mxu1 %v13803_v42  ;;  %v3440_v4 = vpop.permute.xlu0 %3439  ;;  %3244 = vmatprep.mubr.bf16.mxu1 %v15222_v2  ;;  %v13831_v39 = vsel %vm3021_vm7, %v3018_v27, %v13808_v24 }
 0x15a   : > { %11242 = vmatprep.subr.msk.bf16.mxu1 %vm437_vm1, %v13798_v15  ;;  %15286 = vst [vmem:[#allocation69_spill] sm:$0xff] %v13831_v39  ;;  %v13836_v15 = vsel %vm437_vm1, %v3032_v61, 0 }
 0x15b   : > { %11237 = vmatmul.mubr.msk.bf16.vlgmr.msra.gmra.mrb[4].mxu0 %vm433_vm2, %v13776_v12  ;;  %9734 = vrot.lane.b32.xlu0 %v13724_v59, %s12483_s15  ;;  %15287 = vst [vmem:[#allocation70_spill] sm:$0xff] %v13836_v15 }
 0x15c   : > { %3254 = vmatpush1.bf16.msra.mxu0 %v13818_v21  ;;  %3285 = vmatprep.mubr.bf16.mxu0 %v15222_v2  ;;  %v3438_v52 = vpop.permute.xlu1 %3437  ;;  %v3034_v21 = vsel %vm3021_vm7, %v3012_v29, %v3014_v22  ;;  %v3036_v29 = vsel %vm3021_vm7, %v3016_v46, %v3018_v27 }
 0x15d   : > { %v3444_v42 = vpop.permute.xlu0 %3443  ;;  %11244 = vmatprep.subr.msk.bf16.mxu0 %vm437_vm1, %v13813_v25  ;;  %v3471_v24 = vsel %vm3469_vm8, %v3438_v52, %v3440_v4  ;;  %v13847_v25 = vsel %vm437_vm1, %v3034_v21, 0 }
 0x15e   : > { %15288 = vst [vmem:[#allocation71_spill] sm:$0xff] %v13847_v25 }
 0x15f   : > { %10095 = vrot.lane.b32.xlu0 %v13724_v59, %s12484_s21 }
 0x160   : > { %11239 = vmatmul.mubr.msk.bf16.vlgmr.msra.gmra.mrb[4].mxu1 %vm433_vm2, %v13776_v12  ;;  %v3442_v13 = vpop.permute.xlu1 %3441 }
 0x161   : > { %3295 = vmatpush1.bf16.msra.mxu1 %v13836_v15  ;;  %v3448_v10 = vpop.permute.xlu0 %3447  ;;  %3326 = vmatprep.mubr.bf16.mxu1 %v15222_v2  ;;  %v13859_v21 = vsel %vm3469_vm8, %v3442_v13, %v3444_v42  ;;  %v13862_v15 = vsel %vm437_vm1, %v3036_v29, 0  ;;  %v3472_v46 = vsel %vm3469_vm8, %v3440_v4, %v3442_v13  ;;  %v13892_v4 = vld [vmem:[%s15042_s0 + $0x1c] sm:$0xf] }
 0x162   : > { %11246 = vmatprep.subr.msk.bf16.mxu1 %vm437_vm1, %v13831_v39  ;;  %v3470_v39 = vsel %vm3469_vm8, %v3436_v9, %v3438_v52  ;;  %15289 = vst [vmem:[#allocation72_spill] sm:$0xff] %v13859_v21  ;;  %15290 = vst [vmem:[#allocation73_spill] sm:$0xff] %v13862_v15 }
 0x163   : > { %11241 = vmatmul.mubr.msk.bf16.vlgmr.msra.gmra.mrb[8].mxu0 %vm433_vm2, %v13776_v12  ;;  %10456 = vrot.lane.b32.xlu0 %v13724_v59, %s12485_s24 }
 0x164   : > { %3336 = vmatpush1.bf16.msra.mxu0 %v13847_v25  ;;  %3367 = vmatprep.mubr.bf16.mxu0 %v15222_v2  ;;  %v3446_v22 = vpop.permute.xlu1 %3445  ;;  %v3490_v25 = vsel %vm437_vm1, %v3470_v39, 0  ;;  %v13881_v39 = vsel %vm437_vm1, %v3472_v46, 0 }
 0x165   : > { %v3452_v61 = vpop.permute.xlu0 %3451  ;;  %11249 = vmatprep.subr.msk.bf16.mxu0 %vm437_vm1, %v3471_v24  ;;  %v13870_v24 = vsel %vm3469_vm8, %v3446_v22, %v3448_v10  ;;  %15292 = vst [vmem:[#allocation75_spill] sm:$0xff] %v13881_v39  ;;  %v3474_v29 = vsel %vm3469_vm8, %v3444_v42, %v3446_v22 }
 0x166   : > { %15291 = vst [vmem:[#allocation74_spill] sm:$0xff] %v13870_v24  ;;  %v13895_v13 = vsel %vm437_vm1, %v3474_v29, 0 }
 0x167   : > { %15294 = vst [vmem:[#allocation77_spill] sm:$0xff] %v13895_v13 }
 0x168   : > { %11243 = vmatmul.mubr.msk.bf16.vlgmr.msra.gmra.mrb[8].mxu1 %vm433_vm2, %v13776_v12  ;;  %v3450_v59 = vpop.permute.xlu1 %3449 }
 0x169   : > { %3377 = vmatpush1.bf16.msra.mxu1 %v13862_v15  ;;  %v3456_v27 = vpop.permute.xlu0 %3455  ;;  %3408 = vmatprep.mubr.bf16.mxu1 %v15222_v2 }
 0x16a   : > { %11251 = vmatprep.subr.msk.bf16.mxu1 %vm437_vm1, %v13859_v21  ;;  %v13885_v21 = vsel %vm3469_vm8, %v3450_v59, %v3452_v61 }
 0x16b   : > { %11245 = vmatmul.mubr.msk.bf16.vlgmr.msra.gmra.mrb[12].mxu0 %vm433_vm2, %v13776_v12  ;;  %15293 = vst [vmem:[#allocation76_spill] sm:$0xff] %v13885_v21 }
 0x16c   : > { %3538 = vmatpush1.bf16.msra.mxu0 %v3490_v25  ;;  %3569 = vmatprep.mubr.bf16.mxu0 %v15222_v2  ;;  %v3454_v9 = vpop.permute.xlu1 %3453 }
 0x16d   : > { %v3460_v52 = vpop.permute.xlu0 %3459  ;;  %11253 = vmatprep.subr.msk.bf16.mxu0 %vm437_vm1, %v13870_v24  ;;  %v13900_v42 = vsel %vm3469_vm8, %v3454_v9, %v3456_v27 }
 0x16e   : > { %15295 = vst [vmem:[#allocation78_spill] sm:$0xff] %v13900_v42 }
 0x170   : > { %11247 = vmatmul.mubr.msk.bf16.vlgmr.msra.gmra.mrb[12].mxu1 %vm433_vm2, %v13776_v12  ;;  %v3458_v25 = vpop.permute.xlu1 %3457  ;;  %v3476_v12 = vsel %vm3469_vm8, %v3448_v10, %v3450_v59 }
 0x171   : > { %3579 = vmatpush1.bf16.msra.mxu1 %v13881_v39  ;;  %v3464_v46 = vpop.permute.xlu0 %3463  ;;  %3610 = vmatprep.mubr.bf16.mxu1 %v15222_v2  ;;  %v13914_v39 = vsel %vm437_vm1, %v3476_v12, 0  ;;  %v13918_v59 = vsel %vm3469_vm8, %v3458_v25, %v3460_v52 }
 0x172   : > { %11255 = vmatprep.subr.msk.bf16.mxu1 %vm437_vm1, %v13885_v21  ;;  %15297 = vst [vmem:[#allocation80_spill] sm:$0xff] %v13914_v39  ;;  %v3478_v21 = vsel %vm3469_vm8, %v3452_v61, %v3454_v9  ;;  %15298 = vst [vmem:[#allocation81_spill] sm:$0xff] %v13918_v59  ;;  %v3480_v61 = vsel %vm3469_vm8, %v3456_v27, %v3458_v25 }
 0x173   : > { %11250 = vmatmul.mubr.msk.bf16.vlgmr.msra.gmra.mrb[0].mxu0 %vm433_vm2, %v13892_v4 }
 0x174   : > { %3620 = vmatpush1.bf16.msra.mxu0 %v13895_v13  ;;  %3651 = vmatprep.mubr.bf16.mxu0 %v15222_v2  ;;  %v3462_v22 = vpop.permute.xlu1 %3461  ;;  %v13923_v13 = vsel %vm437_vm1, %v3478_v21, 0 }
 0x175   : > { %v13909_v29 = vpop.permute.xlu0 %3467  ;;  %11257 = vmatprep.subr.msk.bf16.mxu0 %vm437_vm1, %v13900_v42  ;;  %15299 = vst [vmem:[#allocation82_spill] sm:$0xff] %v13923_v13  ;;  %v13928_v12 = vsel %vm3469_vm8, %v3462_v22, %v3464_v46  ;;  %v3482_v42 = vsel %vm3469_vm8, %v3460_v52, %v3462_v22 }
 0x176   : > { %15296 = vst [vmem:[#allocation79_spill] sm:$0xff] %v13909_v29  ;;  %15300 = vst [vmem:[#allocation83_spill] sm:$0xff] %v13928_v12 }
 0x178   : > { %11252 = vmatmul.mubr.msk.bf16.vlgmr.msra.gmra.mrb[0].mxu1 %vm433_vm2, %v13892_v4  ;;  %v3466_v10 = vpop.permute.xlu1 %3465 }
 0x179   : > { %3661 = vmatpush1.bf16.msra.mxu1 %v13914_v39  ;;  %v3886_v24 = vpop.permute.xlu0 %3885  ;;  %3692 = vmatprep.mubr.bf16.mxu1 %v15222_v2  ;;  %v13940_v39 = vsel %vm437_vm1, %v3480_v61, 0  ;;  %v13945_v27 = vsel %vm3469_vm8, %v3466_v10, %v13909_v29  ;;  %v3484_v22 = vsel %vm3469_vm8, %v3464_v46, %v3466_v10 }
 0x17a   : > { %11259 = vmatprep.subr.msk.bf16.mxu1 %vm437_vm1, %v13918_v59  ;;  %15301 = vst [vmem:[#allocation84_spill] sm:$0xff] %v13940_v39  ;;  %15302 = vst [vmem:[#allocation85_spill] sm:$0xff] %v13945_v27  ;;  %v13964_v61 = vsel %vm437_vm1, %v3484_v22, 0 }
 0x17b   : > { %11254 = vmatmul.mubr.msk.bf16.vlgmr.msra.gmra.mrb[4].mxu0 %vm433_vm2, %v13892_v4  ;;  %15303 = vst [vmem:[#allocation86_spill] sm:$0xff] %v13964_v61 }
 0x17c   : > { %3702 = vmatpush1.bf16.msra.mxu0 %v13923_v13  ;;  %3733 = vmatprep.mubr.bf16.mxu0 %v15222_v2  ;;  %v3884_v21 = vpop.permute.xlu1 %3883  ;;  %v13950_v13 = vsel %vm437_vm1, %v3482_v42, 0 }
 0x17d   : > { %v3890_v9 = vpop.permute.xlu0 %3889  ;;  %11261 = vmatprep.subr.msk.bf16.mxu0 %vm437_vm1, %v13928_v12  ;;  %v3918_v29 = vsel %vm3917_vm9, %v3884_v21, %v3886_v24 }
 0x17e   : > { %v3938_v10 = vsel %vm437_vm1, %v3918_v29, 0 }
 0x180   : > { %11256 = vmatmul.mubr.msk.bf16.vlgmr.msra.gmra.mrb[4].mxu1 %vm433_vm2, %v13892_v4  ;;  %v3888_v25 = vpop.permute.xlu1 %3887 }
 0x181   : > { %3743 = vmatpush1.bf16.msra.mxu1 %v13940_v39  ;;  %v3894_v12 = vpop.permute.xlu0 %3893  ;;  %3774 = vmatprep.mubr.bf16.mxu1 %v15222_v2  ;;  %v3919_v52 = vsel %vm3917_vm9, %v3886_v24, %v3888_v25  ;;  %v3920_v24 = vsel %vm3917_vm9, %v3888_v25, %v3890_v9 }
 0x182   : > { %11263 = vmatprep.subr.msk.bf16.mxu1 %vm437_vm1, %v13945_v27  ;;  %v13987_v22 = vsel %vm437_vm1, %v3920_v24, 0 }
 0x183   : > { %11258 = vmatmul.mubr.msk.bf16.vlgmr.msra.gmra.mrb[8].mxu0 %vm433_vm2, %v13892_v4  ;;  %15306 = vst [vmem:[#allocation89_spill] sm:$0xff] %v13987_v22 }
 0x184   : > { %3784 = vmatpush1.bf16.msra.mxu0 %v13950_v13  ;;  %3815 = vmatprep.mubr.bf16.mxu0 %v15222_v2  ;;  %v3892_v42 = vpop.permute.xlu1 %3891 }
 0x185   : > { %11266 = vmatprep.subr.msk.bf16.mxu0 %vm437_vm1, %v3919_v52  ;;  %v3898_v27 = vpop.permute.xlu0 %3897  ;;  %v13968_v39 = vsel %vm3917_vm9, %v3890_v9, %v3892_v42  ;;  %v11265_v9 = vld [vmem:[%s15042_s0 + $0x20] sm:$0xf] }
 0x186   : > { %15304 = vst [vmem:[#allocation87_spill] sm:$0xff] %v13968_v39 }
 0x188   : > { %11260 = vmatmul.mubr.msk.bf16.vlgmr.msra.gmra.mrb[8].mxu1 %vm433_vm2, %v13892_v4  ;;  %v3896_v46 = vpop.permute.xlu1 %3895 }
 0x189   : > { %3825 = vmatpush1.bf16.msra.mxu1 %v13964_v61  ;;  %3856 = vmatprep.mubr.bf16.mxu1 %v15222_v2  ;;  %v13978_v52 = vsel %vm3917_vm9, %v3894_v12, %v3896_v46  ;;  %v3902_v21 = vpop.permute.xlu0 %3901 }
 0x18a   : > { %11268 = vmatprep.subr.msk.bf16.mxu1 %vm437_vm1, %v13968_v39  ;;  %15305 = vst [vmem:[#allocation88_spill] sm:$0xff] %v13978_v52  ;;  %v3922_v39 = vsel %vm3917_vm9, %v3892_v42, %v3894_v12 }
 0x18b   : > { %11262 = vmatmul.mubr.msk.bf16.vlgmr.msra.gmra.mrb[12].mxu0 %vm433_vm2, %v13892_v4 }
 0x18c   : > { %3986 = vmatpush1.bf16.msra.mxu0 %v3938_v10  ;;  %4017 = vmatprep.mubr.bf16.mxu0 %v15222_v2  ;;  %v3900_v29 = vpop.permute.xlu1 %3899  ;;  %v13999_v10 = vsel %vm437_vm1, %v3922_v39, 0 }
 0x18d   : > { %11270 = vmatprep.subr.msk.bf16.mxu0 %vm437_vm1, %v13978_v52  ;;  %v13991_v61 = vsel %vm3917_vm9, %v3898_v27, %v3900_v29  ;;  %v3906_v24 = vpop.permute.xlu0 %3905 }
 0x18e   : > { %15307 = vst [vmem:[#allocation90_spill] sm:$0xff] %v13991_v61 }
 0x190   : > { %11264 = vmatmul.mubr.msk.bf16.vlgmr.msra.gmra.mrb[12].mxu1 %vm433_vm2, %v13892_v4  ;;  %v3904_v25 = vpop.permute.xlu1 %3903  ;;  %v3924_v4 = vsel %vm3917_vm9, %v3896_v46, %v3898_v27 }
 0x191   : > { %4027 = vmatpush1.bf16.msra.mxu1 %v13987_v22  ;;  %4058 = vmatprep.mubr.bf16.mxu1 %v15222_v2  ;;  %v14006_v12 = vsel %vm3917_vm9, %v3902_v21, %v3904_v25  ;;  %v14015_v42 = vsel %vm437_vm1, %v3924_v4, 0  ;;  %v3910_v52 = vpop.permute.xlu0 %3909 }
 0x192   : > { %11272 = vmatprep.subr.msk.bf16.mxu1 %vm437_vm1, %v13991_v61  ;;  %15308 = vst [vmem:[#allocation91_spill] sm:$0xff] %v14015_v42  ;;  %v3926_v61 = vsel %vm3917_vm9, %v3900_v29, %v3902_v21  ;;  %v3928_v21 = vsel %vm3917_vm9, %v3904_v25, %v3906_v24 }
 0x193   : > { %11267 = vmatmul.mubr.msk.bf16.vlgmr.msra.gmra.mrb[0].mxu0 %vm433_vm2, %v11265_v9  ;;  %v14023_v46 = vsel %vm437_vm1, %v3926_v61, 0 }
 0x194   : > { %4068 = vmatpush1.bf16.msra.mxu0 %v13999_v10  ;;  %4099 = vmatprep.mubr.bf16.mxu0 %v15222_v2  ;;  %v3908_v39 = vpop.permute.xlu1 %3907  ;;  %15310 = vst [vmem:[#allocation93_spill] sm:$0xff] %v14023_v46 }
 0x195   : > { %11274 = vmatprep.subr.msk.bf16.mxu0 %vm437_vm1, %v14006_v12  ;;  %v14019_v22 = vsel %vm3917_vm9, %v3906_v24, %v3908_v39  ;;  %v3914_v29 = vpop.permute.xlu0 %3913 }
 0x196   : > { %15309 = vst [vmem:[#allocation92_spill] sm:$0xff] %v14019_v22 }
 0x198   : > { %11269 = vmatmul.mubr.msk.bf16.vlgmr.msra.gmra.mrb[0].mxu1 %vm433_vm2, %v11265_v9  ;;  %v3912_v27 = vpop.permute.xlu1 %3911 }
 0x199   : > { %4109 = vmatpush1.bf16.msra.mxu1 %v14015_v42  ;;  %4140 = vmatprep.mubr.bf16.mxu1 %v15222_v2  ;;  %v14030_v4 = vsel %vm3917_vm9, %v3910_v52, %v3912_v27  ;;  %v14041_v42 = vsel %vm437_vm1, %v3928_v21, 0  ;;  %v3932_v21 = vsel %vm3917_vm9, %v3912_v27, %v3914_v29 }
 0x19a   : > { %11276 = vmatprep.subr.msk.bf16.mxu1 %vm437_vm1, %v14019_v22  ;;  %v3930_v22 = vsel %vm3917_vm9, %v3908_v39, %v3910_v52  ;;  %v14063_v52 = vsel %vm437_vm1, %v3932_v21, 0  ;;  %v15312_v39 = vld [vmem:[#allocation2_spill] sm:$0xff]  ;;  %v11316_v21 = vld [vmem:[%s15042_s0 + $0x2c] sm:$0xf] }
 0x19b   : > { %11271 = vmatmul.mubr.msk.bf16.vlgmr.msra.gmra.mrb[4].mxu0 %vm433_vm2, %v11265_v9  ;;  %v14050_v24 = vsel %vm437_vm1, %v3930_v22, 0 }
 0x19c   : > { %4150 = vmatpush1.bf16.msra.mxu0 %v14023_v46  ;;  %4181 = vmatprep.mubr.bf16.mxu0 %v15222_v2  ;;  %v14036_v61 = vpop.permute.xlu1 %3915 }
 0x19d   : > { %11278 = vmatprep.subr.msk.bf16.mxu0 %vm437_vm1, %v14030_v4  ;;  %v14046_v25 = vsel %vm3917_vm9, %v3914_v29, %v14036_v61  ;;  %v15313_v29 = vld [vmem:[#allocation4_spill] sm:$0xff] }
 0x19e   : > { %15311 = vst [vmem:[#allocation94_spill] sm:$0xff] %v14046_v25 }
 0x1a0   : > { %11273 = vmatmul.mubr.msk.bf16.vlgmr.msra.gmra.mrb[4].mxu1 %vm433_vm2, %v11265_v9 }
 0x1a1   : > { %4191 = vmatpush1.bf16.msra.mxu1 %v14041_v42  ;;  %4222 = vmatprep.mubr.bf16.mxu1 %v15222_v2 }
 0x1a2   : > { %11280 = vmatprep.subr.msk.bf16.mxu1 %vm437_vm1, %v14046_v25 }
 0x1a3   : > { %11275 = vmatmul.mubr.msk.bf16.vlgmr.msra.gmra.mrb[8].mxu0 %vm433_vm2, %v11265_v9 }
 0x1a4   : > { %4232 = vmatpush1.bf16.msra.mxu0 %v14050_v24  ;;  %4263 = vmatprep.mubr.bf16.mxu0 %v15222_v2 }
 0x1a5   : > { %11283 = vmatprep.subr.msk.bf16.mxu0 %vm437_vm1, %v12550_v5  ;;  %v11282_v5 = vld [vmem:[%s15042_s0 + $0x24] sm:$0xf] }
 0x1a8   : > { %11277 = vmatmul.mubr.msk.bf16.vlgmr.msra.gmra.mrb[8].mxu1 %vm433_vm2, %v11265_v9 }
 0x1a9   : > { %4273 = vmatpush1.bf16.msra.mxu1 %v14063_v52  ;;  %4304 = vmatprep.mubr.bf16.mxu1 %v15222_v2 }
 0x1aa   : > { %11285 = vmatprep.subr.msk.bf16.mxu1 %vm437_vm1, %v12563_v8 }
 0x1ab   : > { %11279 = vmatmul.mubr.msk.bf16.vlgmr.msra.gmra.mrb[12].mxu0 %vm433_vm2, %v11265_v9 }
 0x1ac   : > { %4341 = vmatpush1.bf16.msra.mxu0 %v12858_v28  ;;  %4372 = vmatprep.mubr.bf16.mxu0 %v15222_v2  ;;  %v14110_v28 = vsel %vm437_vm1, %v12621_v26, 0  ;;  %v11299_v26 = vld [vmem:[%s15042_s0 + $0x28] sm:$0xf] }
 0x1ad   : > { %11287 = vmatprep.subr.msk.bf16.mxu0 %vm437_vm1, %v12572_v11 }
 0x1b0   : > { %11281 = vmatmul.mubr.msk.bf16.vlgmr.msra.gmra.mrb[12].mxu1 %vm433_vm2, %v11265_v9 }
 0x1b1   : > { %4382 = vmatpush1.bf16.msra.mxu1 %v12879_v31  ;;  %4413 = vmatprep.mubr.bf16.mxu1 %v15222_v2 }
 0x1b2   : > { %11289 = vmatprep.subr.msk.bf16.mxu1 %vm437_vm1, %v12581_v14 }
 0x1b3   : > { %11284 = vmatmul.mubr.msk.bf16.vlgmr.msra.gmra.mrb[0].mxu0 %vm433_vm2, %v11282_v5 }
 0x1b4   : > { %4423 = vmatpush1.bf16.msra.mxu0 %v12901_v35  ;;  %4454 = vmatprep.mubr.bf16.mxu0 %v15222_v2 }
 0x1b5   : > { %11291 = vmatprep.subr.msk.bf16.mxu0 %vm437_vm1, %v12590_v17 }
 0x1b8   : > { %11286 = vmatmul.mubr.msk.bf16.vlgmr.msra.gmra.mrb[0].mxu1 %vm433_vm2, %v11282_v5 }
 0x1b9   : > { %4464 = vmatpush1.bf16.msra.mxu1 %v12913_v37  ;;  %4495 = vmatprep.mubr.bf16.mxu1 %v15222_v2 }
 0x1ba   : > { %11293 = vmatprep.subr.msk.bf16.mxu1 %vm437_vm1, %v12599_v20 }
 0x1bb   : > { %11288 = vmatmul.mubr.msk.bf16.vlgmr.msra.gmra.mrb[4].mxu0 %vm433_vm2, %v11282_v5 }
 0x1bc   : > { %4505 = vmatpush1.bf16.msra.mxu0 %v12935_v45  ;;  %4536 = vmatprep.mubr.bf16.mxu0 %v15222_v2 }
 0x1bd   : > { %11295 = vmatprep.subr.msk.bf16.mxu0 %vm437_vm1, %v12608_v23 }
 0x1c0   : > { %11290 = vmatmul.mubr.msk.bf16.vlgmr.msra.gmra.mrb[4].mxu1 %vm433_vm2, %v11282_v5 }
 0x1c1   : > { %4546 = vmatpush1.bf16.msra.mxu1 %v12948_v47  ;;  %4577 = vmatprep.mubr.bf16.mxu1 %v15222_v2 }
 0x1c2   : > { %11297 = vmatprep.subr.msk.bf16.mxu1 %vm437_vm1, %v13545_v6 }
 0x1c3   : > { %11292 = vmatmul.mubr.msk.bf16.vlgmr.msra.gmra.mrb[8].mxu0 %vm433_vm2, %v11282_v5 }
 0x1c4   : > { %4587 = vmatpush1.bf16.msra.mxu0 %v12973_v56  ;;  %4618 = vmatprep.mubr.bf16.mxu0 %v15222_v2 }
 0x1c5   : > { %11300 = vmatprep.subr.msk.bf16.mxu0 %vm437_vm1, %v12726_v38  ;;  %v14143_v38 = vpop.permute.xlu1 %4688 }
 0x1c8   : > { %11294 = vmatmul.mubr.msk.bf16.vlgmr.msra.gmra.mrb[8].mxu1 %vm433_vm2, %v11282_v5 }
 0x1c9   : > { %4628 = vmatpush1.bf16.msra.mxu1 %v14110_v28  ;;  %4659 = vmatprep.mubr.bf16.mxu1 %v15222_v2 }
 0x1ca   : > { %11302 = vmatprep.subr.msk.bf16.mxu1 %vm437_vm1, %v12743_v43 }
 0x1cb   : > { %11296 = vmatmul.mubr.msk.bf16.vlgmr.msra.gmra.mrb[12].mxu0 %vm433_vm2, %v11282_v5 }
 0x1cc   : > { %4702 = vmatpush1.bf16.msra.mxu0 %v12736_v40  ;;  %4733 = vmatprep.mubr.bf16.mxu0 %v15222_v2  ;;  %v4687_v40 = vpop.permute.xlu0 %4686 }
 0x1cd   : > { %11304 = vmatprep.subr.msk.bf16.mxu0 %vm437_vm1, %v12760_v48  ;;  %v14149_v22 = vsel %vm416_vm0, %v4687_v40, %v14143_v38  ;;  %v4690_v9 = vsel %vm416_vm0, %v12824_v7, %v4687_v40  ;;  %v15314_v7 = vld [vmem:[#allocation5_spill] sm:$0xff]  ;;  %v15316_v40 = vld [vmem:[#allocation6_spill] sm:$0xff] }
 0x1ce   : > { %v14164_v27 = vsel %vm437_vm1, %v4690_v9, 0  ;;  %v15318_v9 = vld [vmem:[#allocation8_spill] sm:$0xff] }
 0x1d0   : > { %11298 = vmatmul.mubr.msk.bf16.vlgmr.msra.gmra.mrb[12].mxu1 %vm433_vm2, %v11282_v5  ;;  %v15315_v5 = vld [vmem:[#allocation7_spill] sm:$0xff] }
 0x1d1   : > { %4743 = vmatpush1.bf16.msra.mxu1 %v12750_v44  ;;  %4774 = vmatprep.mubr.bf16.mxu1 %v15222_v2 }
 0x1d2   : > { %11306 = vmatprep.subr.msk.bf16.mxu1 %vm437_vm1, %v12777_v53 }
 0x1d3   : > { %11301 = vmatmul.mubr.msk.bf16.vlgmr.msra.gmra.mrb[0].mxu0 %vm433_vm2, %v11299_v26 }
 0x1d4   : > { %4784 = vmatpush1.bf16.msra.mxu0 %v12770_v50  ;;  %4815 = vmatprep.mubr.bf16.mxu0 %v15222_v2 }
 0x1d5   : > { %11308 = vmatprep.subr.msk.bf16.mxu0 %vm437_vm1, %v12794_v58 }
 0x1d8   : > { %11303 = vmatmul.mubr.msk.bf16.vlgmr.msra.gmra.mrb[0].mxu1 %vm433_vm2, %v11299_v26 }
 0x1d9   : > { %4825 = vmatpush1.bf16.msra.mxu1 %v12784_v54  ;;  %4856 = vmatprep.mubr.bf16.mxu1 %v15222_v2 }
 0x1da   : > { %11310 = vmatprep.subr.msk.bf16.mxu1 %vm437_vm1, %v12811_v63 }
 0x1db   : > { %11305 = vmatmul.mubr.msk.bf16.vlgmr.msra.gmra.mrb[4].mxu0 %vm433_vm2, %v11299_v26 }
 0x1dc   : > { %4866 = vmatpush1.bf16.msra.mxu0 %v12804_v60  ;;  %4897 = vmatprep.mubr.bf16.mxu0 %v15222_v2 }
 0x1dd   : > { %11312 = vmatprep.subr.msk.bf16.mxu0 %vm437_vm1, %v12835_v16 }
 0x1e0   : > { %11307 = vmatmul.mubr.msk.bf16.vlgmr.msra.gmra.mrb[4].mxu1 %vm433_vm2, %v11299_v26 }
 0x1e1   : > { %4907 = vmatpush1.bf16.msra.mxu1 %v12818_v1  ;;  %4938 = vmatprep.mubr.bf16.mxu1 %v15222_v2 }
 0x1e2   : > { %11314 = vmatprep.subr.msk.bf16.mxu1 %vm437_vm1, %v14149_v22 }
 0x1e3   : > { %11309 = vmatmul.mubr.msk.bf16.vlgmr.msra.gmra.mrb[8].mxu0 %vm433_vm2, %v11299_v26 }
 0x1e4   : > { %4948 = vmatpush1.bf16.msra.mxu0 %v12846_v19  ;;  %4979 = vmatprep.mubr.bf16.mxu0 %v15222_v2 }
 0x1e5   : > { %11317 = vmatprep.subr.msk.bf16.mxu0 %vm437_vm1, %v15312_v39  ;;  %v15320_v39 = vld [vmem:[#allocation10_spill] sm:$0xff] }
 0x1e8   : > { %11311 = vmatmul.mubr.msk.bf16.vlgmr.msra.gmra.mrb[8].mxu1 %vm433_vm2, %v11299_v26 }
 0x1e9   : > { %4989 = vmatpush1.bf16.msra.mxu1 %v14164_v27  ;;  %5020 = vmatprep.mubr.bf16.mxu1 %v15222_v2 }
 0x1ea   : > { %11319 = vmatprep.subr.msk.bf16.mxu1 %vm437_vm1, %v15313_v29 }
 0x1eb   : > { %11313 = vmatmul.mubr.msk.bf16.vlgmr.msra.gmra.mrb[12].mxu0 %vm433_vm2, %v11299_v26 }
 0x1ec   : > { %5063 = vmatpush1.bf16.msra.mxu0 %v13034_v30  ;;  %5094 = vmatprep.mubr.bf16.mxu0 %v15222_v2  ;;  %v15317_v30 = vld [vmem:[#allocation9_spill] sm:$0xff] }
 0x1ed   : > { %11321 = vmatprep.subr.msk.bf16.mxu0 %vm437_vm1, %v15314_v7  ;;  %v15325_v7 = vld [vmem:[#allocation14_spill] sm:$0xff] }
 0x1f0   : > { %11315 = vmatmul.mubr.msk.bf16.vlgmr.msra.gmra.mrb[12].mxu1 %vm433_vm2, %v11299_v26  ;;  %v15319_v26 = vld [vmem:[#allocation11_spill] sm:$0xff] }
 0x1f1   : > { %5104 = vmatpush1.bf16.msra.mxu1 %v15315_v5  ;;  %5135 = vmatprep.mubr.bf16.mxu1 %v15222_v2  ;;  %v15323_v5 = vld [vmem:[#allocation12_spill] sm:$0xff] }
 0x1f2   : > { %11323 = vmatprep.subr.msk.bf16.mxu1 %vm437_vm1, %v15316_v40  ;;  %v15321_v40 = vld [vmem:[#allocation13_spill] sm:$0xff] }
 0x1f3   : > { %11318 = vmatmul.mubr.msk.bf16.vlgmr.msra.gmra.mrb[0].mxu0 %vm433_vm2, %v11316_v21 }
 0x1f4   : > { %5145 = vmatpush1.bf16.msra.mxu0 %v15317_v30  ;;  %5176 = vmatprep.mubr.bf16.mxu0 %v15222_v2  ;;  %v14197_v30 = vpop.permute.xlu1 %5049 }
 0x1f5   : > { %11325 = vmatprep.subr.msk.bf16.mxu0 %vm437_vm1, %v15318_v9  ;;  %15322 = vst [vmem:[#allocation2_spill] sm:$0xff] %v14197_v30  ;;  %v5048_v9 = vpop.permute.xlu0 %5047 }
 0x1f8   : > { %11320 = vmatmul.mubr.msk.bf16.vlgmr.msra.gmra.mrb[0].mxu1 %vm433_vm2, %v11316_v21 }
 0x1f9   : > { %5186 = vmatpush1.bf16.msra.mxu1 %v15319_v26  ;;  %5217 = vmatprep.mubr.bf16.mxu1 %v15222_v2  ;;  %v14203_v26 = vsel %vm1229_vm3, %v5048_v9, %v14197_v30  ;;  %v15328_v30 = vld [vmem:[#allocation15_spill] sm:$0xff] }
 0x1fa   : > { %11327 = vmatprep.subr.msk.bf16.mxu1 %vm437_vm1, %v15320_v39  ;;  %15324 = vst [vmem:[#allocation4_spill] sm:$0xff] %v14203_v26 }
 0x1fb   : > { %11322 = vmatmul.mubr.msk.bf16.vlgmr.msra.gmra.mrb[4].mxu0 %vm433_vm2, %v11316_v21 }
 0x1fc   : > { %5227 = vmatpush1.bf16.msra.mxu0 %v15321_v40  ;;  %5258 = vmatprep.mubr.bf16.mxu0 %v15222_v2  ;;  %v15326_v40 = vld [vmem:[#allocation16_spill] sm:$0xff] }
 0x1fd   : > { %11329 = vmatprep.subr.msk.bf16.mxu0 %vm437_vm1, %v15323_v5  ;;  %v15327_v5 = vld [vmem:[#allocation3_spill] sm:$0xff] }
 0x1fe   : > { %v5051_v39 = vsel %vm1229_vm3, %v15327_v5, %v5048_v9  ;;  %v15330_v5 = vld [vmem:[#allocation19_spill] sm:$0xff]  ;;  %v15331_v9 = vld [vmem:[#allocation21_spill] sm:$0xff] }
 0x200   : > { %11324 = vmatmul.mubr.msk.bf16.vlgmr.msra.gmra.mrb[4].mxu1 %vm433_vm2, %v11316_v21 }
 0x201   : > { %5268 = vmatpush1.bf16.msra.mxu1 %v15325_v7  ;;  %5299 = vmatprep.mubr.bf16.mxu1 %v15222_v2  ;;  %v14218_v7 = vsel %vm437_vm1, %v5051_v39, 0  ;;  %v15332_v39 = vld [vmem:[#allocation20_spill] sm:$0xff] }
 0x202   : > { %11331 = vmatprep.subr.msk.bf16.mxu1 %vm437_vm1, %v14203_v26  ;;  %v15329_v26 = vld [vmem:[#allocation17_spill] sm:$0xff] }
 0x203   : > { %11326 = vmatmul.mubr.msk.bf16.vlgmr.msra.gmra.mrb[8].mxu0 %vm433_vm2, %v11316_v21 }
 0x204   : > { %5309 = vmatpush1.bf16.msra.mxu0 %v15326_v40  ;;  %5340 = vmatprep.mubr.bf16.mxu0 %v15222_v2 }
 0x205   : > { %11334 = vmatprep.subr.msk.bf16.mxu0 %vm437_vm1, %v15328_v30  ;;  %v11333_v30 = vld [vmem:[%s15042_s0 + $0x30] sm:$0xf] }
 0x208   : > { %11328 = vmatmul.mubr.msk.bf16.vlgmr.msra.gmra.mrb[8].mxu1 %vm433_vm2, %v11316_v21 }
 0x209   : > { %5350 = vmatpush1.bf16.msra.mxu1 %v14218_v7  ;;  %5381 = vmatprep.mubr.bf16.mxu1 %v15222_v2 }
 0x20a   : > { %11336 = vmatprep.subr.msk.bf16.mxu1 %vm437_vm1, %v15329_v26  ;;  %v12468_v26 = vld [vmem:[%s12548_s30 + $0x10] ss:$0 sps:$4 sm:$0xff]  }
 0x20b   : > { %11330 = vmatmul.mubr.msk.bf16.vlgmr.msra.gmra.mrb[12].mxu0 %vm433_vm2, %v11316_v21  ;;  %7931 = vrot.lane.b32.xlu1 %v12468_v26, %s12478_s6 }
 0x20c   : > { %5424 = vmatpush1.bf16.msra.mxu0 %v13233_v57  ;;  %5455 = vmatprep.mubr.bf16.mxu0 %v15222_v2  ;;  %v15333_v57 = vld [vmem:[#allocation23_spill] sm:$0xff] }
 0x20d   : > { %11338 = vmatprep.subr.msk.bf16.mxu0 %vm437_vm1, %v15330_v5  ;;  %v15334_v5 = vld [vmem:[#allocation22_spill] sm:$0xff] }
 0x20f   : > { %8292 = vrot.lane.b32.xlu1 %v12468_v26, %s12479_s7 }
 0x210   : > { %11332 = vmatmul.mubr.msk.bf16.vlgmr.msra.gmra.mrb[12].mxu1 %vm433_vm2, %v11316_v21  ;;  %v15335_v21 = vld [vmem:[#allocation24_spill] sm:$0xff] }
 0x211   : > { %5465 = vmatpush1.bf16.msra.mxu1 %v15331_v9  ;;  %5496 = vmatprep.mubr.bf16.mxu1 %v15222_v2 }
 0x212   : > { %11340 = vmatprep.subr.msk.bf16.mxu1 %vm437_vm1, %v15332_v39  ;;  %v5409_v39 = vpop.permute.xlu0 %5408 }
 0x213   : > { %11335 = vmatmul.mubr.msk.bf16.vlgmr.msra.gmra.mrb[0].mxu0 %vm433_vm2, %v11333_v30  ;;  %8653 = vrot.lane.b32.xlu1 %v12468_v26, %s12480_s8 }
 0x214   : > { %5506 = vmatpush1.bf16.msra.mxu0 %v15333_v57  ;;  %5537 = vmatprep.mubr.bf16.mxu0 %v15222_v2  ;;  %v15337_v57 = vld [vmem:[#allocation26_spill] sm:$0xff] }
 0x215   : > { %11342 = vmatprep.subr.msk.bf16.mxu0 %vm437_vm1, %v15334_v5  ;;  %v14254_v5 = vpop.permute.xlu1 %5410 }
 0x216   : > { %15336 = vst [vmem:[#allocation16_spill] sm:$0xff] %v14254_v5 }
 0x217   : > { %9014 = vrot.lane.b32.xlu1 %v12468_v26, %s12481_s9 }
 0x218   : > { %11337 = vmatmul.mubr.msk.bf16.vlgmr.msra.gmra.mrb[0].mxu1 %vm433_vm2, %v11333_v30 }
 0x219   : > { %5547 = vmatpush1.bf16.msra.mxu1 %v13310_v36  ;;  %5578 = vmatprep.mubr.bf16.mxu1 %v15222_v2  ;;  %v14261_v36 = vsel %vm1677_vm4, %v5409_v39, %v14254_v5 }
 0x21a   : > { %11344 = vmatprep.subr.msk.bf16.mxu1 %vm437_vm1, %v15335_v21  ;;  %v15338_v21 = vld [vmem:[#allocation28_spill] sm:$0xff] }
 0x21b   : > { %11339 = vmatmul.mubr.msk.bf16.vlgmr.msra.gmra.mrb[4].mxu0 %vm433_vm2, %v11333_v30  ;;  %9375 = vrot.lane.b32.xlu1 %v12468_v26, %s12482_s12 }
 0x21c   : > { %5588 = vmatpush1.bf16.msra.mxu0 %v13338_v41  ;;  %5619 = vmatprep.mubr.bf16.mxu0 %v15222_v2  ;;  %v15340_v41 = vld [vmem:[#allocation29_spill] sm:$0xff] }
 0x21d   : > { %11346 = vmatprep.subr.msk.bf16.mxu0 %vm437_vm1, %v15337_v57  ;;  %v15339_v57 = vld [vmem:[#allocation18_spill] sm:$0xff] }
 0x21e   : > { %v5412_v5 = vsel %vm1677_vm4, %v15339_v57, %v5409_v39  ;;  %v15342_v39 = vld [vmem:[#allocation32_spill] sm:$0xff]  ;;  %v5770_v57 = vpop.permute.xlu0 %5769 }
 0x21f   : > { %9736 = vrot.lane.b32.xlu1 %v12468_v26, %s12483_s15 }
 0x220   : > { %11341 = vmatmul.mubr.msk.bf16.vlgmr.msra.gmra.mrb[4].mxu1 %vm433_vm2, %v11333_v30 }
 0x221   : > { %5629 = vmatpush1.bf16.msra.mxu1 %v15338_v21  ;;  %5660 = vmatprep.mubr.bf16.mxu1 %v15222_v2  ;;  %v14278_v21 = vsel %vm437_vm1, %v5412_v5, 0  ;;  %v11350_v5 = vld [vmem:[%s15042_s0 + $0x34] sm:$0xf] }
 0x222   : > { %11348 = vmatprep.subr.msk.bf16.mxu1 %vm437_vm1, %v14261_v36 }
 0x223   : > { %11343 = vmatmul.mubr.msk.bf16.vlgmr.msra.gmra.mrb[8].mxu0 %vm433_vm2, %v11333_v30  ;;  %10097 = vrot.lane.b32.xlu1 %v12468_v26, %s12484_s21 }
 0x224   : > { %5670 = vmatpush1.bf16.msra.mxu0 %v13385_v49  ;;  %5701 = vmatprep.mubr.bf16.mxu0 %v15222_v2 }
 0x225   : > { %11351 = vmatprep.subr.msk.bf16.mxu0 %vm437_vm1, %v15340_v41  ;;  %v15341_v41 = vld [vmem:[#allocation30_spill] sm:$0xff] }
 0x227   : > { %10458 = vrot.lane.b32.xlu1 %v12468_v26, %s12485_s24  ;;  %v14314_v26 = vpop.permute.xlu1 %5771  ;;  %s14967_s24 = scalar_lea.vmem %s15045_s3, %s15484_s20  ;;  %s11108_s20 = sshll.u32 %s15486_s19, 3 }
 0x228   : > { %11345 = vmatmul.mubr.msk.bf16.vlgmr.msra.gmra.mrb[8].mxu1 %vm433_vm2, %v11333_v30  ;;  %15344 = vst [vmem:[#allocation3_spill] sm:$0xff] %v14314_v26  ;;  %s313_s22 = scalar_lea.vmem %s15047_s5, %s11108_s20 }
 0x229   : > { %5711 = vmatpush1.bf16.msra.mxu1 %v14278_v21  ;;  %5742 = vmatprep.mubr.bf16.mxu1 %v15222_v2 }
 0x22a   : > { %11353 = vmatprep.subr.msk.bf16.mxu1 %vm437_vm1, %v13396_v62 }
 0x22b   : > { %11347 = vmatmul.mubr.msk.bf16.vlgmr.msra.gmra.mrb[12].mxu0 %vm433_vm2, %v11333_v30 }
 0x22c   : > { %5785 = vmatpush1.bf16.msra.mxu0 %v13432_v33  ;;  %5816 = vmatprep.mubr.bf16.mxu0 %v15222_v2  ;;  %v15343_v33 = vld [vmem:[#allocation33_spill] sm:$0xff] }
 0x22d   : > { %11355 = vmatprep.subr.msk.bf16.mxu0 %vm437_vm1, %v15341_v41 }
 0x230   : > { %11349 = vmatmul.mubr.msk.bf16.vlgmr.msra.gmra.mrb[12].mxu1 %vm433_vm2, %v11333_v30  ;;  %v15345_v30 = vld [vmem:[#allocation37_spill] sm:$0xff] }
 0x231   : > { %5826 = vmatpush1.bf16.msra.mxu1 %v13457_v51  ;;  %5857 = vmatprep.mubr.bf16.mxu1 %v15222_v2 }
 0x232   : > { %11357 = vmatprep.subr.msk.bf16.mxu1 %vm437_vm1, %v15342_v39 }
 0x233   : > { %11352 = vmatmul.mubr.msk.bf16.vlgmr.msra.gmra.mrb[0].mxu0 %vm433_vm2, %v11350_v5 }
 0x234   : > { %5867 = vmatpush1.bf16.msra.mxu0 %v13485_v0  ;;  %5898 = vmatprep.mubr.bf16.mxu0 %v15222_v2 }
 0x235   : > { %11359 = vmatprep.subr.msk.bf16.mxu0 %vm437_vm1, %v15343_v33  ;;  %v15347_v33 = vld [vmem:[#allocation39_spill] sm:$0xff] }
 0x238   : > { %11354 = vmatmul.mubr.msk.bf16.vlgmr.msra.gmra.mrb[0].mxu1 %vm433_vm2, %v11350_v5 }
 0x239   : > { %5908 = vmatpush1.bf16.msra.mxu1 %v13505_v32  ;;  %5939 = vmatprep.mubr.bf16.mxu1 %v15222_v2  ;;  %v14320_v32 = vsel %vm2125_vm5, %v5770_v57, %v14314_v26  ;;  %v15350_v26 = vld [vmem:[#allocation40_spill] sm:$0xff] }
 0x23a   : > { %11361 = vmatprep.subr.msk.bf16.mxu1 %vm437_vm1, %v13496_v55  ;;  %15346 = vst [vmem:[#allocation15_spill] sm:$0xff] %v14320_v32 }
 0x23b   : > { %11356 = vmatmul.mubr.msk.bf16.vlgmr.msra.gmra.mrb[4].mxu0 %vm433_vm2, %v11350_v5 }
 0x23c   : > { %5949 = vmatpush1.bf16.msra.mxu0 %v13531_v34  ;;  %5980 = vmatprep.mubr.bf16.mxu0 %v15222_v2  ;;  %v15348_v34 = vld [vmem:[#allocation41_spill] sm:$0xff] }
 0x23d   : > { %11363 = vmatprep.subr.msk.bf16.mxu0 %vm437_vm1, %v15345_v30  ;;  %v15349_v30 = vld [vmem:[#allocation31_spill] sm:$0xff] }
 0x23e   : > { %v5773_v55 = vsel %vm2125_vm5, %v15349_v30, %v5770_v57  ;;  %v15354_v30 = vld [vmem:[#allocation44_spill] sm:$0xff]  ;;  %v15356_v57 = vld [vmem:[#allocation47_spill] sm:$0xff] }
 0x23f   : > { %v14335_v0 = vsel %vm437_vm1, %v5773_v55, 0  ;;  %v11367_v55 = vld [vmem:[%s15042_s0 + $0x38] sm:$0xf] }
 0x240   : > { %11358 = vmatmul.mubr.msk.bf16.vlgmr.msra.gmra.mrb[4].mxu1 %vm433_vm2, %v11350_v5  ;;  %15351 = vst [vmem:[#allocation21_spill] sm:$0xff] %v14335_v0 }
 0x241   : > { %5990 = vmatpush1.bf16.msra.mxu1 %v15347_v33  ;;  %6021 = vmatprep.mubr.bf16.mxu1 %v15222_v2 }
 0x242   : > { %11365 = vmatprep.subr.msk.bf16.mxu1 %vm437_vm1, %v14320_v32  ;;  %v15352_v32 = vld [vmem:[#allocation42_spill] sm:$0xff] }
 0x243   : > { %11360 = vmatmul.mubr.msk.bf16.vlgmr.msra.gmra.mrb[8].mxu0 %vm433_vm2, %v11350_v5 }
 0x244   : > { %6031 = vmatpush1.bf16.msra.mxu0 %v15348_v34  ;;  %6062 = vmatprep.mubr.bf16.mxu0 %v15222_v2  ;;  %v15353_v34 = vld [vmem:[#allocation45_spill] sm:$0xff] }
 0x245   : > { %11368 = vmatprep.subr.msk.bf16.mxu0 %vm437_vm1, %v15350_v26  ;;  %v15355_v26 = vld [vmem:[#allocation48_spill] sm:$0xff] }
 0x248   : > { %11362 = vmatmul.mubr.msk.bf16.vlgmr.msra.gmra.mrb[8].mxu1 %vm433_vm2, %v11350_v5 }
 0x249   : > { %6072 = vmatpush1.bf16.msra.mxu1 %v14335_v0  ;;  %6103 = vmatprep.mubr.bf16.mxu1 %v15222_v2 }
 0x24a   : > { %11370 = vmatprep.subr.msk.bf16.mxu1 %vm437_vm1, %v15352_v32  ;;  %v15364_v32 = vld [vmem:[#allocation55_spill] sm:$0xff] }
 0x24b   : > { %11364 = vmatmul.mubr.msk.bf16.vlgmr.msra.gmra.mrb[12].mxu0 %vm433_vm2, %v11350_v5 }
 0x24c   : > { %6146 = vmatpush1.bf16.msra.mxu0 %v15353_v34  ;;  %6177 = vmatprep.mubr.bf16.mxu0 %v15222_v2  ;;  %v15357_v34 = vld [vmem:[#allocation49_spill] sm:$0xff] }
 0x24d   : > { %11372 = vmatprep.subr.msk.bf16.mxu0 %vm437_vm1, %v15354_v30  ;;  %v15362_v30 = vld [vmem:[#allocation53_spill] sm:$0xff] }
 0x250   : > { %11366 = vmatmul.mubr.msk.bf16.vlgmr.msra.gmra.mrb[12].mxu1 %vm433_vm2, %v11350_v5  ;;  %v15358_v5 = vld [vmem:[#allocation52_spill] sm:$0xff] }
 0x251   : > { %6187 = vmatpush1.bf16.msra.mxu1 %v15355_v26  ;;  %6218 = vmatprep.mubr.bf16.mxu1 %v15222_v2  ;;  %v15359_v26 = vld [vmem:[#allocation51_spill] sm:$0xff] }
 0x252   : > { %11374 = vmatprep.subr.msk.bf16.mxu1 %vm437_vm1, %v15356_v57  ;;  %v15360_v57 = vld [vmem:[#allocation54_spill] sm:$0xff] }
 0x253   : > { %11369 = vmatmul.mubr.msk.bf16.vlgmr.msra.gmra.mrb[0].mxu0 %vm433_vm2, %v11367_v55 }
 0x254   : > { %6228 = vmatpush1.bf16.msra.mxu0 %v13664_v3  ;;  %6259 = vmatprep.mubr.bf16.mxu0 %v15222_v2  ;;  %v14368_v3 = vpop.permute.xlu1 %6132 }
 0x255   : > { %11376 = vmatprep.subr.msk.bf16.mxu0 %vm437_vm1, %v15357_v34  ;;  %15361 = vst [vmem:[#allocation18_spill] sm:$0xff] %v14368_v3  ;;  %v6131_v34 = vpop.permute.xlu0 %6130 }
 0x258   : > { %11371 = vmatmul.mubr.msk.bf16.vlgmr.msra.gmra.mrb[0].mxu1 %vm433_vm2, %v11367_v55 }
 0x259   : > { %6269 = vmatpush1.bf16.msra.mxu1 %v15358_v5  ;;  %6300 = vmatprep.mubr.bf16.mxu1 %v15222_v2  ;;  %v14374_v5 = vsel %vm2573_vm6, %v6131_v34, %v14368_v3  ;;  %v15367_v3 = vld [vmem:[#allocation57_spill] sm:$0xff] }
 0x25a   : > { %11378 = vmatprep.subr.msk.bf16.mxu1 %vm437_vm1, %v15359_v26  ;;  %15363 = vst [vmem:[#allocation29_spill] sm:$0xff] %v14374_v5 }
 0x25b   : > { %11373 = vmatmul.mubr.msk.bf16.vlgmr.msra.gmra.mrb[4].mxu0 %vm433_vm2, %v11367_v55 }
 0x25c   : > { %6310 = vmatpush1.bf16.msra.mxu0 %v15360_v57  ;;  %6341 = vmatprep.mubr.bf16.mxu0 %v15222_v2  ;;  %v15365_v57 = vld [vmem:[#allocation58_spill] sm:$0xff] }
 0x25d   : > { %11380 = vmatprep.subr.msk.bf16.mxu0 %vm437_vm1, %v15362_v30  ;;  %v15366_v30 = vld [vmem:[#allocation46_spill] sm:$0xff] }
 0x25e   : > { %v6134_v26 = vsel %vm2573_vm6, %v15366_v30, %v6131_v34  ;;  %v15370_v30 = vld [vmem:[#allocation60_spill] sm:$0xff] }
 0x25f   : > { %v14389_v0 = vsel %vm437_vm1, %v6134_v26, 0  ;;  %v15371_v26 = vld [vmem:[#allocation63_spill] sm:$0xff]  ;;  %v15373_v34 = vld [vmem:[#allocation64_spill] sm:$0xff] }
 0x260   : > { %11375 = vmatmul.mubr.msk.bf16.vlgmr.msra.gmra.mrb[4].mxu1 %vm433_vm2, %v11367_v55 }
 0x261   : > { %6351 = vmatpush1.bf16.msra.mxu1 %v15364_v32  ;;  %6382 = vmatprep.mubr.bf16.mxu1 %v15222_v2 }
 0x262   : > { %11382 = vmatprep.subr.msk.bf16.mxu1 %vm437_vm1, %v14374_v5  ;;  %v15368_v5 = vld [vmem:[#allocation59_spill] sm:$0xff] }
 0x263   : > { %11377 = vmatmul.mubr.msk.bf16.vlgmr.msra.gmra.mrb[8].mxu0 %vm433_vm2, %v11367_v55 }
 0x264   : > { %6392 = vmatpush1.bf16.msra.mxu0 %v15365_v57  ;;  %6423 = vmatprep.mubr.bf16.mxu0 %v15222_v2  ;;  %v15369_v57 = vld [vmem:[#allocation61_spill] sm:$0xff] }
 0x265   : > { %11385 = vmatprep.subr.msk.bf16.mxu0 %vm437_vm1, %v15367_v3  ;;  %v11384_v3 = vld [vmem:[%s15042_s0 + $0x3c] sm:$0xf] }
 0x268   : > { %11379 = vmatmul.mubr.msk.bf16.vlgmr.msra.gmra.mrb[8].mxu1 %vm433_vm2, %v11367_v55 }
 0x269   : > { %6433 = vmatpush1.bf16.msra.mxu1 %v14389_v0  ;;  %6464 = vmatprep.mubr.bf16.mxu1 %v15222_v2 }
 0x26a   : > { %11387 = vmatprep.subr.msk.bf16.mxu1 %vm437_vm1, %v15368_v5  ;;  %v15380_v5 = vld [vmem:[#allocation71_spill] sm:$0xff] }
 0x26b   : > { %11381 = vmatmul.mubr.msk.bf16.vlgmr.msra.gmra.mrb[12].mxu0 %vm433_vm2, %v11367_v55 }
 0x26c   : > { %6507 = vmatpush1.bf16.msra.mxu0 %v15369_v57  ;;  %6538 = vmatprep.mubr.bf16.mxu0 %v15222_v2  ;;  %v15372_v57 = vld [vmem:[#allocation65_spill] sm:$0xff] }
 0x26d   : > { %11389 = vmatprep.subr.msk.bf16.mxu0 %vm437_vm1, %v15370_v30  ;;  %v15378_v30 = vld [vmem:[#allocation69_spill] sm:$0xff] }
 0x270   : > { %11383 = vmatmul.mubr.msk.bf16.vlgmr.msra.gmra.mrb[12].mxu1 %vm433_vm2, %v11367_v55  ;;  %v15374_v55 = vld [vmem:[#allocation68_spill] sm:$0xff] }
 0x271   : > { %6548 = vmatpush1.bf16.msra.mxu1 %v15371_v26  ;;  %6579 = vmatprep.mubr.bf16.mxu1 %v15222_v2  ;;  %v15375_v26 = vld [vmem:[#allocation67_spill] sm:$0xff] }
 0x272   : > { %11391 = vmatprep.subr.msk.bf16.mxu1 %vm437_vm1, %v13781_v18  ;;  %v15376_v18 = vld [vmem:[#allocation70_spill] sm:$0xff] }
 0x273   : > { %11386 = vmatmul.mubr.msk.bf16.vlgmr.msra.gmra.mrb[0].mxu0 %vm433_vm2, %v11384_v3 }
 0x274   : > { %6589 = vmatpush1.bf16.msra.mxu0 %v15372_v57  ;;  %6620 = vmatprep.mubr.bf16.mxu0 %v15222_v2  ;;  %v14422_v57 = vpop.permute.xlu1 %6493 }
 0x275   : > { %11393 = vmatprep.subr.msk.bf16.mxu0 %vm437_vm1, %v15373_v34  ;;  %15377 = vst [vmem:[#allocation30_spill] sm:$0xff] %v14422_v57  ;;  %v6492_v34 = vpop.permute.xlu0 %6491 }
 0x278   : > { %11388 = vmatmul.mubr.msk.bf16.vlgmr.msra.gmra.mrb[0].mxu1 %vm433_vm2, %v11384_v3 }
 0x279   : > { %6630 = vmatpush1.bf16.msra.mxu1 %v15374_v55  ;;  %6661 = vmatprep.mubr.bf16.mxu1 %v15222_v2  ;;  %v14428_v55 = vsel %vm3021_vm7, %v6492_v34, %v14422_v57  ;;  %v15382_v57 = vld [vmem:[#allocation72_spill] sm:$0xff] }
 0x27a   : > { %11395 = vmatprep.subr.msk.bf16.mxu1 %vm437_vm1, %v15375_v26  ;;  %15379 = vst [vmem:[#allocation32_spill] sm:$0xff] %v14428_v55 }
 0x27b   : > { %11390 = vmatmul.mubr.msk.bf16.vlgmr.msra.gmra.mrb[4].mxu0 %vm433_vm2, %v11384_v3 }
 0x27c   : > { %6671 = vmatpush1.bf16.msra.mxu0 %v15376_v18  ;;  %6702 = vmatprep.mubr.bf16.mxu0 %v15222_v2 }
 0x27d   : > { %11397 = vmatprep.subr.msk.bf16.mxu0 %vm437_vm1, %v15378_v30  ;;  %v15381_v30 = vld [vmem:[#allocation66_spill] sm:$0xff] }
 0x27e   : > { %v6495_v18 = vsel %vm3021_vm7, %v15381_v30, %v6492_v34  ;;  %v15385_v30 = vld [vmem:[#allocation76_spill] sm:$0xff]  ;;  %v15387_v34 = vld [vmem:[#allocation78_spill] sm:$0xff] }
 0x27f   : > { %v14443_v26 = vsel %vm437_vm1, %v6495_v18, 0  ;;  %v11401_v18 = vld [vmem:[%s15042_s0 + $0x40] sm:$0xf] }
 0x280   : > { %11392 = vmatmul.mubr.msk.bf16.vlgmr.msra.gmra.mrb[4].mxu1 %vm433_vm2, %v11384_v3 }
 0x281   : > { %6712 = vmatpush1.bf16.msra.mxu1 %v15380_v5  ;;  %6743 = vmatprep.mubr.bf16.mxu1 %v15222_v2 }
 0x282   : > { %11399 = vmatprep.subr.msk.bf16.mxu1 %vm437_vm1, %v14428_v55  ;;  %v15383_v55 = vld [vmem:[#allocation74_spill] sm:$0xff] }
 0x283   : > { %11394 = vmatmul.mubr.msk.bf16.vlgmr.msra.gmra.mrb[8].mxu0 %vm433_vm2, %v11384_v3 }
 0x284   : > { %6753 = vmatpush1.bf16.msra.mxu0 %v13862_v15  ;;  %6784 = vmatprep.mubr.bf16.mxu0 %v15222_v2  ;;  %v15384_v15 = vld [vmem:[#allocation75_spill] sm:$0xff] }
 0x285   : > { %11402 = vmatprep.subr.msk.bf16.mxu0 %vm437_vm1, %v15382_v57  ;;  %v15386_v57 = vld [vmem:[#allocation77_spill] sm:$0xff] }
 0x288   : > { %11396 = vmatmul.mubr.msk.bf16.vlgmr.msra.gmra.mrb[8].mxu1 %vm433_vm2, %v11384_v3 }
 0x289   : > { %6794 = vmatpush1.bf16.msra.mxu1 %v14443_v26  ;;  %6825 = vmatprep.mubr.bf16.mxu1 %v15222_v2 }
 0x28a   : > { %11404 = vmatprep.subr.msk.bf16.mxu1 %vm437_vm1, %v15383_v55 }
 0x28b   : > { %11398 = vmatmul.mubr.msk.bf16.vlgmr.msra.gmra.mrb[12].mxu0 %vm433_vm2, %v11384_v3 }
 0x28c   : > { %6868 = vmatpush1.bf16.msra.mxu0 %v15384_v15  ;;  %6899 = vmatprep.mubr.bf16.mxu0 %v15222_v2  ;;  %v15388_v15 = vld [vmem:[#allocation80_spill] sm:$0xff] }
 0x28d   : > { %11406 = vmatprep.subr.msk.bf16.mxu0 %vm437_vm1, %v15385_v30  ;;  %v15393_v30 = vld [vmem:[#allocation85_spill] sm:$0xff] }
 0x290   : > { %11400 = vmatmul.mubr.msk.bf16.vlgmr.msra.gmra.mrb[12].mxu1 %vm433_vm2, %v11384_v3  ;;  %v15389_v3 = vld [vmem:[#allocation82_spill] sm:$0xff] }
 0x291   : > { %6909 = vmatpush1.bf16.msra.mxu1 %v15386_v57  ;;  %6940 = vmatprep.mubr.bf16.mxu1 %v15222_v2  ;;  %v15390_v57 = vld [vmem:[#allocation83_spill] sm:$0xff] }
 0x292   : > { %11408 = vmatprep.subr.msk.bf16.mxu1 %vm437_vm1, %v15387_v34  ;;  %v15391_v34 = vld [vmem:[#allocation84_spill] sm:$0xff] }
 0x293   : > { %11403 = vmatmul.mubr.msk.bf16.vlgmr.msra.gmra.mrb[0].mxu0 %vm433_vm2, %v11401_v18 }
 0x294   : > { %6950 = vmatpush1.bf16.msra.mxu0 %v15388_v15  ;;  %6981 = vmatprep.mubr.bf16.mxu0 %v15222_v2  ;;  %v14476_v15 = vpop.permute.xlu1 %6854 }
 0x295   : > { %11410 = vmatprep.subr.msk.bf16.mxu0 %vm437_vm1, %v13918_v59  ;;  %15392 = vst [vmem:[#allocation39_spill] sm:$0xff] %v14476_v15  ;;  %v6853_v59 = vpop.permute.xlu0 %6852 }
 0x298   : > { %11405 = vmatmul.mubr.msk.bf16.vlgmr.msra.gmra.mrb[0].mxu1 %vm433_vm2, %v11401_v18 }
 0x299   : > { %6991 = vmatpush1.bf16.msra.mxu1 %v15389_v3  ;;  %7022 = vmatprep.mubr.bf16.mxu1 %v15222_v2  ;;  %v14482_v3 = vsel %vm3469_vm8, %v6853_v59, %v14476_v15  ;;  %v15397_v15 = vld [vmem:[#allocation87_spill] sm:$0xff] }
 0x29a   : > { %11412 = vmatprep.subr.msk.bf16.mxu1 %vm437_vm1, %v15390_v57  ;;  %15394 = vst [vmem:[#allocation31_spill] sm:$0xff] %v14482_v3 }
 0x29b   : > { %11407 = vmatmul.mubr.msk.bf16.vlgmr.msra.gmra.mrb[4].mxu0 %vm433_vm2, %v11401_v18 }
 0x29c   : > { %7032 = vmatpush1.bf16.msra.mxu0 %v15391_v34  ;;  %7063 = vmatprep.mubr.bf16.mxu0 %v15222_v2  ;;  %v15395_v34 = vld [vmem:[#allocation86_spill] sm:$0xff] }
 0x29d   : > { %11414 = vmatprep.subr.msk.bf16.mxu0 %vm437_vm1, %v15393_v30  ;;  %v15396_v30 = vld [vmem:[#allocation79_spill] sm:$0xff] }
 0x29e   : > { %v6856_v57 = vsel %vm3469_vm8, %v15396_v30, %v6853_v59  ;;  %v15400_v59 = vld [vmem:[#allocation90_spill] sm:$0xff] }
 0x29f   : > { %v14497_v55 = vsel %vm437_vm1, %v6856_v57, 0  ;;  %v11418_v30 = vld [vmem:[%s15042_s0 + $0x44] sm:$0xf]  ;;  %v15401_v57 = vld [vmem:[#allocation91_spill] sm:$0xff] }
 0x2a0   : > { %11409 = vmatmul.mubr.msk.bf16.vlgmr.msra.gmra.mrb[4].mxu1 %vm433_vm2, %v11401_v18 }
 0x2a1   : > { %7073 = vmatpush1.bf16.msra.mxu1 %v13950_v13  ;;  %7104 = vmatprep.mubr.bf16.mxu1 %v15222_v2 }
 0x2a2   : > { %11416 = vmatprep.subr.msk.bf16.mxu1 %vm437_vm1, %v14482_v3  ;;  %v15398_v3 = vld [vmem:[#allocation88_spill] sm:$0xff] }
 0x2a3   : > { %11411 = vmatmul.mubr.msk.bf16.vlgmr.msra.gmra.mrb[8].mxu0 %vm433_vm2, %v11401_v18 }
 0x2a4   : > { %7114 = vmatpush1.bf16.msra.mxu0 %v15395_v34  ;;  %7145 = vmatprep.mubr.bf16.mxu0 %v15222_v2  ;;  %v15399_v34 = vld [vmem:[#allocation89_spill] sm:$0xff] }
 0x2a5   : > { %11419 = vmatprep.subr.msk.bf16.mxu0 %vm437_vm1, %v15397_v15  ;;  %v7214_v15 = vpop.permute.xlu0 %7213 }
 0x2a8   : > { %11413 = vmatmul.mubr.msk.bf16.vlgmr.msra.gmra.mrb[8].mxu1 %vm433_vm2, %v11401_v18 }
 0x2a9   : > { %7155 = vmatpush1.bf16.msra.mxu1 %v14497_v55  ;;  %7186 = vmatprep.mubr.bf16.mxu1 %v15222_v2 }
 0x2aa   : > { %11421 = vmatprep.subr.msk.bf16.mxu1 %vm437_vm1, %v15398_v3 }
 0x2ab   : > { %11415 = vmatmul.mubr.msk.bf16.vlgmr.msra.gmra.mrb[12].mxu0 %vm433_vm2, %v11401_v18 }
 0x2ac   : > { %7229 = vmatpush1.bf16.msra.mxu0 %v15399_v34  ;;  %7260 = vmatprep.mubr.bf16.mxu0 %v15222_v2  ;;  %v15402_v34 = vld [vmem:[#allocation92_spill] sm:$0xff] }
 0x2ad   : > { %11423 = vmatprep.subr.msk.bf16.mxu0 %vm437_vm1, %v15400_v59 }
 0x2b0   : > { %11417 = vmatmul.mubr.msk.bf16.vlgmr.msra.gmra.mrb[12].mxu1 %vm433_vm2, %v11401_v18  ;;  %v14530_v18 = vpop.permute.xlu1 %7215 }
 0x2b1   : > { %7270 = vmatpush1.bf16.msra.mxu1 %v13999_v10  ;;  %7301 = vmatprep.mubr.bf16.mxu1 %v15222_v2  ;;  %15403 = vst [vmem:[#allocation40_spill] sm:$0xff] %v14530_v18 }
 0x2b2   : > { %11425 = vmatprep.subr.msk.bf16.mxu1 %vm437_vm1, %v14006_v12 }
 0x2b3   : > { %11420 = vmatmul.mubr.msk.bf16.vlgmr.msra.gmra.mrb[0].mxu0 %vm433_vm2, %v11418_v30 }
 0x2b4   : > { %7311 = vmatpush1.bf16.msra.mxu0 %v15401_v57  ;;  %7342 = vmatprep.mubr.bf16.mxu0 %v15222_v2 }
 0x2b5   : > { %11427 = vmatprep.subr.msk.bf16.mxu0 %vm437_vm1, %v15402_v34 }
 0x2b8   : > { %11422 = vmatmul.mubr.msk.bf16.vlgmr.msra.gmra.mrb[0].mxu1 %vm433_vm2, %v11418_v30 }
 0x2b9   : > { %7352 = vmatpush1.bf16.msra.mxu1 %v14023_v46  ;;  %7383 = vmatprep.mubr.bf16.mxu1 %v15222_v2  ;;  %v14536_v46 = vsel %vm3917_vm9, %v7214_v15, %v14530_v18 }
 0x2ba   : > { %11429 = vmatprep.subr.msk.bf16.mxu1 %vm437_vm1, %v14030_v4 }
 0x2bb   : > { %11424 = vmatmul.mubr.msk.bf16.vlgmr.msra.gmra.mrb[4].mxu0 %vm433_vm2, %v11418_v30 }
 0x2bc   : > { %7393 = vmatpush1.bf16.msra.mxu0 %v14041_v42  ;;  %7424 = vmatprep.mubr.bf16.mxu0 %v15222_v2 }
 0x2bd   : > { %11431 = vmatprep.subr.msk.bf16.mxu0 %vm437_vm1, %v14046_v25  ;;  %v7217_v25 = vsel %vm3917_vm9, %v14036_v61, %v7214_v15  ;;  %v15417_v61 = vld [vmem:[#allocation2_spill] sm:$0xff]  ;;  %v15425_v15 = vld [vmem:[#allocation27_spill] sm:$0xff] }
 0x2be   : > { %v14551_v18 = vsel %vm437_vm1, %v7217_v25, 0 }
 0x2c0   : > { %11426 = vmatmul.mubr.msk.bf16.vlgmr.msra.gmra.mrb[4].mxu1 %vm433_vm2, %v11418_v30 }
 0x2c1   : > { %7434 = vmatpush1.bf16.msra.mxu1 %v14050_v24  ;;  %7465 = vmatprep.mubr.bf16.mxu1 %v15222_v2 }
 0x2c2   : > { %11433 = vmatprep.subr.msk.bf16.mxu1 %vm437_vm1, %v14536_v46 }
 0x2c3   : > { %11428 = vmatmul.mubr.msk.bf16.vlgmr.msra.gmra.mrb[8].mxu0 %vm433_vm2, %v11418_v30 }
 0x2c4   : > { %7475 = vmatpush1.bf16.msra.mxu0 %v14063_v52  ;;  %7506 = vmatprep.mubr.bf16.mxu0 %v15222_v2 }
 0x2c5   : > { %11436 = vmatprep.subr.msk.bf16.mxu0 %vm437_vm1, %v12563_v8  ;;  %v11435_v8 = vld [vmem:[%s15042_s0 + $0x48] sm:$0xf] }
 0x2c8   : > { %11430 = vmatmul.mubr.msk.bf16.vlgmr.msra.gmra.mrb[8].mxu1 %vm433_vm2, %v11418_v30 }
 0x2c9   : > { %7516 = vmatpush1.bf16.msra.mxu1 %v14551_v18  ;;  %7547 = vmatprep.mubr.bf16.mxu1 %v15222_v2 }
 0x2ca   : > { %11438 = vmatprep.subr.msk.bf16.mxu1 %vm437_vm1, %v12572_v11  ;;  %v15404_v11 = vld [vmem:[#allocation56_spill] sm:$0xff] }
 0x2cb   : > { %11432 = vmatmul.mubr.msk.bf16.vlgmr.msra.gmra.mrb[12].mxu0 %vm433_vm2, %v11418_v30 }
 0x2cc   : > { %7584 = vmatpush1.bf16.msra.mxu0 %v12879_v31  ;;  %7615 = vmatprep.mubr.bf16.mxu0 %v15222_v2  ;;  %v15413_v31 = vld [vmem:[#allocation13_spill] sm:$0xff] }
 0x2cd   : > { %11440 = vmatprep.subr.msk.bf16.mxu0 %vm437_vm1, %v12581_v14  ;;  %v15405_v14 = vld [vmem:[#allocation43_spill] sm:$0xff] }
 0x2d0   : > { %11434 = vmatmul.mubr.msk.bf16.vlgmr.msra.gmra.mrb[12].mxu1 %vm433_vm2, %v11418_v30  ;;  %v15424_v30 = vld [vmem:[#allocation24_spill] sm:$0xff] }
 0x2d1   : > { %7625 = vmatpush1.bf16.msra.mxu1 %v12901_v35  ;;  %7656 = vmatprep.mubr.bf16.mxu1 %v15222_v2  ;;  %v15414_v35 = vld [vmem:[#allocation12_spill] sm:$0xff] }
 0x2d2   : > { %11442 = vmatprep.subr.msk.bf16.mxu1 %vm437_vm1, %v12590_v17  ;;  %v7578_v17 = vsel %vm437_vm1, %v15405_v14, 0 }
 0x2d3   : > { %11437 = vmatmul.mubr.msk.bf16.vlgmr.msra.gmra.mrb[0].mxu0 %vm433_vm2, %v11435_v8 }
 0x2d4   : > { %7666 = vmatpush1.bf16.msra.mxu0 %v12913_v37  ;;  %7697 = vmatprep.mubr.bf16.mxu0 %v15222_v2  ;;  %v15415_v37 = vld [vmem:[#allocation14_spill] sm:$0xff] }
 0x2d5   : > { %11444 = vmatprep.subr.msk.bf16.mxu0 %vm437_vm1, %v12599_v20  ;;  %v11452_v20 = vld [vmem:[%s15042_s0 + $0x4c] sm:$0xf] }
 0x2d8   : > { %11439 = vmatmul.mubr.msk.bf16.vlgmr.msra.gmra.mrb[0].mxu1 %vm433_vm2, %v11435_v8 }
 0x2d9   : > { %7707 = vmatpush1.bf16.msra.mxu1 %v12935_v45  ;;  %7738 = vmatprep.mubr.bf16.mxu1 %v15222_v2 }
 0x2da   : > { %11446 = vmatprep.subr.msk.bf16.mxu1 %vm437_vm1, %v12608_v23  ;;  %v7932_v23 = vpop.permute.xlu1 %7931 }
 0x2db   : > { %11441 = vmatmul.mubr.msk.bf16.vlgmr.msra.gmra.mrb[4].mxu0 %vm433_vm2, %v11435_v8 }
 0x2dc   : > { %7748 = vmatpush1.bf16.msra.mxu0 %v12948_v47  ;;  %7779 = vmatprep.mubr.bf16.mxu0 %v15222_v2  ;;  %v15416_v47 = vld [vmem:[#allocation4_spill] sm:$0xff] }
 0x2dd   : > { %11448 = vmatprep.subr.msk.bf16.mxu0 %vm437_vm1, %v13545_v6 }
 0x2de   : > { %v8293_v45 = vpop.permute.xlu1 %8292 }
 0x2e0   : > { %11443 = vmatmul.mubr.msk.bf16.vlgmr.msra.gmra.mrb[4].mxu1 %vm433_vm2, %v11435_v8 }
 0x2e1   : > { %7789 = vmatpush1.bf16.msra.mxu1 %v12973_v56  ;;  %7820 = vmatprep.mubr.bf16.mxu1 %v15222_v2 }
 0x2e2   : > { %11450 = vmatprep.subr.msk.bf16.mxu1 %vm437_vm1, %v15404_v11  ;;  %v15427_v11 = vld [vmem:[#allocation28_spill] sm:$0xff]  ;;  %v8654_v14 = vpop.permute.xlu1 %8653 }
 0x2e3   : > { %11445 = vmatmul.mubr.msk.bf16.vlgmr.msra.gmra.mrb[8].mxu0 %vm433_vm2, %v11435_v8 }
 0x2e4   : > { %7830 = vmatpush1.bf16.msra.mxu0 %v14110_v28  ;;  %7861 = vmatprep.mubr.bf16.mxu0 %v15222_v2  ;;  %v15418_v28 = vld [vmem:[#allocation17_spill] sm:$0xff] }
 0x2e5   : > { %11453 = vmatprep.subr.msk.bf16.mxu0 %vm437_vm1, %v12743_v43  ;;  %v7930_v43 = vpop.permute.xlu0 %7929 }
 0x2e8   : > { %11447 = vmatmul.mubr.msk.bf16.vlgmr.msra.gmra.mrb[8].mxu1 %vm433_vm2, %v11435_v8 }
 0x2e9   : > { %7871 = vmatpush1.bf16.msra.mxu1 %v7578_v17  ;;  %7902 = vmatprep.mubr.bf16.mxu1 %v15222_v2  ;;  %v8291_v56 = vpop.permute.xlu0 %8290 }
 0x2ea   : > { %11455 = vmatprep.subr.msk.bf16.mxu1 %vm437_vm1, %v12760_v48  ;;  %v7933_v48 = vsel %vm416_vm0, %v14143_v38, %v7930_v43  ;;  %v8295_v6 = vsel %vm1229_vm3, %v8291_v56, %v8293_v45  ;;  %v8294_v25 = vsel %vm1229_vm3, %v15417_v61, %v8291_v56  ;;  %v15443_v45 = vld [vmem:[#allocation50_spill] sm:$0xff]  ;;  %v15445_v56 = vld [vmem:[#allocation52_spill] sm:$0xff] }
 0x2eb   : > { %11449 = vmatmul.mubr.msk.bf16.vlgmr.msra.gmra.mrb[12].mxu0 %vm433_vm2, %v11435_v8  ;;  %v8300_v38 = vsel %vm437_vm1, %v8294_v25, 0  ;;  %v15447_v61 = vld [vmem:[#allocation54_spill] sm:$0xff]  ;;  %v15448_v25 = vld [vmem:[#allocation53_spill] sm:$0xff] }
 0x2ec   : > { %7945 = vmatpush1.bf16.msra.mxu0 %v12750_v44  ;;  %7976 = vmatprep.mubr.bf16.mxu0 %v15222_v2  ;;  %v7934_v44 = vsel %vm416_vm0, %v7930_v43, %v7932_v23  ;;  %v15428_v23 = vld [vmem:[#allocation16_spill] sm:$0xff] }
 0x2ed   : > { %11457 = vmatprep.subr.msk.bf16.mxu0 %vm437_vm1, %v12777_v53  ;;  %v15406_v53 = vld [vmem:[#allocation5_spill] sm:$0xff]  ;;  %v8652_v17 = vpop.permute.xlu0 %8651 }
 0x2f0   : > { %11451 = vmatmul.mubr.msk.bf16.vlgmr.msra.gmra.mrb[12].mxu1 %vm433_vm2, %v11435_v8  ;;  %v15426_v8 = vld [vmem:[#allocation26_spill] sm:$0xff] }
 0x2f1   : > { %7986 = vmatpush1.bf16.msra.mxu1 %v12770_v50  ;;  %8017 = vmatprep.mubr.bf16.mxu1 %v15222_v2  ;;  %v7939_v50 = vsel %vm437_vm1, %v7933_v48, 0  ;;  %v9015_v48 = vpop.permute.xlu1 %9014 }
 0x2f2   : > { %11459 = vmatprep.subr.msk.bf16.mxu1 %vm437_vm1, %v12794_v58  ;;  %v15408_v58 = vld [vmem:[#allocation6_spill] sm:$0xff] }
 0x2f3   : > { %11454 = vmatmul.mubr.msk.bf16.vlgmr.msra.gmra.mrb[0].mxu0 %vm433_vm2, %v11452_v20 }
 0x2f4   : > { %8027 = vmatpush1.bf16.msra.mxu0 %v12784_v54  ;;  %8058 = vmatprep.mubr.bf16.mxu0 %v15222_v2  ;;  %v15407_v54 = vld [vmem:[#allocation7_spill] sm:$0xff] }
 0x2f5   : > { %11461 = vmatprep.subr.msk.bf16.mxu0 %vm437_vm1, %v12811_v63  ;;  %v15409_v63 = vld [vmem:[#allocation9_spill] sm:$0xff] }
 0x2f8   : > { %11456 = vmatmul.mubr.msk.bf16.vlgmr.msra.gmra.mrb[0].mxu1 %vm433_vm2, %v11452_v20 }
 0x2f9   : > { %8068 = vmatpush1.bf16.msra.mxu1 %v12804_v60  ;;  %8099 = vmatprep.mubr.bf16.mxu1 %v15222_v2  ;;  %v11469_v60 = vld [vmem:[%s15042_s0 + $0x50] sm:$0xf] }
 0x2fa   : > { %11463 = vmatprep.subr.msk.bf16.mxu1 %vm437_vm1, %v12835_v16  ;;  %v15411_v16 = vld [vmem:[#allocation11_spill] sm:$0xff] }
 0x2fb   : > { %11458 = vmatmul.mubr.msk.bf16.vlgmr.msra.gmra.mrb[4].mxu0 %vm433_vm2, %v11452_v20 }
 0x2fc   : > { %8109 = vmatpush1.bf16.msra.mxu0 %v12818_v1  ;;  %8140 = vmatprep.mubr.bf16.mxu0 %v15222_v2  ;;  %v15410_v1 = vld [vmem:[#allocation8_spill] sm:$0xff] }
 0x2fd   : > { %11465 = vmatprep.subr.msk.bf16.mxu0 %vm437_vm1, %v14149_v22  ;;  %v15419_v22 = vld [vmem:[#allocation19_spill] sm:$0xff] }
 0x300   : > { %11460 = vmatmul.mubr.msk.bf16.vlgmr.msra.gmra.mrb[4].mxu1 %vm433_vm2, %v11452_v20 }
 0x301   : > { %8150 = vmatpush1.bf16.msra.mxu1 %v12846_v19  ;;  %8181 = vmatprep.mubr.bf16.mxu1 %v15222_v2  ;;  %v15412_v19 = vld [vmem:[#allocation10_spill] sm:$0xff] }
 0x302   : > { %11467 = vmatprep.subr.msk.bf16.mxu1 %vm437_vm1, %v7934_v44  ;;  %v15434_v44 = vld [vmem:[#allocation37_spill] sm:$0xff] }
 0x303   : > { %11462 = vmatmul.mubr.msk.bf16.vlgmr.msra.gmra.mrb[8].mxu0 %vm433_vm2, %v11452_v20 }
 0x304   : > { %8191 = vmatpush1.bf16.msra.mxu0 %v14164_v27  ;;  %8222 = vmatprep.mubr.bf16.mxu0 %v15222_v2  ;;  %v15420_v27 = vld [vmem:[#allocation20_spill] sm:$0xff] }
 0x305   : > { %11470 = vmatprep.subr.msk.bf16.mxu0 %vm437_vm1, %v15313_v29  ;;  %v11486_v29 = vld [vmem:[%s15042_s0 + $0x54] sm:$0xf] }
 0x308   : > { %11464 = vmatmul.mubr.msk.bf16.vlgmr.msra.gmra.mrb[8].mxu1 %vm433_vm2, %v11452_v20 }
 0x309   : > { %8232 = vmatpush1.bf16.msra.mxu1 %v7939_v50  ;;  %8263 = vmatprep.mubr.bf16.mxu1 %v15222_v2  ;;  %v15435_v50 = vld [vmem:[#allocation15_spill] sm:$0xff] }
 0x30a   : > { %11472 = vmatprep.subr.msk.bf16.mxu1 %vm437_vm1, %v15406_v53  ;;  %v9013_v53 = vpop.permute.xlu0 %9012 }
 0x30b   : > { %11466 = vmatmul.mubr.msk.bf16.vlgmr.msra.gmra.mrb[12].mxu0 %vm433_vm2, %v11452_v20 }
 0x30c   : > { %8306 = vmatpush1.bf16.msra.mxu0 %v15407_v54  ;;  %8337 = vmatprep.mubr.bf16.mxu0 %v15222_v2  ;;  %v9017_v54 = vsel %vm2125_vm5, %v9013_v53, %v9015_v48  ;;  %v15466_v48 = vld [vmem:[#allocation76_spill] sm:$0xff] }
 0x30d   : > { %11474 = vmatprep.subr.msk.bf16.mxu0 %vm437_vm1, %v15408_v58  ;;  %v15436_v58 = vld [vmem:[#allocation41_spill] sm:$0xff] }
 0x310   : > { %11468 = vmatmul.mubr.msk.bf16.vlgmr.msra.gmra.mrb[12].mxu1 %vm433_vm2, %v11452_v20  ;;  %v8656_v20 = vsel %vm1677_vm4, %v8652_v17, %v8654_v14  ;;  %v15457_v14 = vld [vmem:[#allocation64_spill] sm:$0xff] }
 0x311   : > { %8347 = vmatpush1.bf16.msra.mxu1 %v15409_v63  ;;  %8378 = vmatprep.mubr.bf16.mxu1 %v15222_v2 }
 0x312   : > { %11476 = vmatprep.subr.msk.bf16.mxu1 %vm437_vm1, %v15410_v1  ;;  %v15439_v1 = vld [vmem:[#allocation42_spill] sm:$0xff] }
 0x313   : > { %11471 = vmatmul.mubr.msk.bf16.vlgmr.msra.gmra.mrb[0].mxu0 %vm433_vm2, %v11469_v60 }
 0x314   : > { %8388 = vmatpush1.bf16.msra.mxu0 %v15411_v16  ;;  %8419 = vmatprep.mubr.bf16.mxu0 %v15222_v2 }
 0x315   : > { %11478 = vmatprep.subr.msk.bf16.mxu0 %vm437_vm1, %v15412_v19  ;;  %v15440_v19 = vld [vmem:[#allocation44_spill] sm:$0xff] }
 0x318   : > { %11473 = vmatmul.mubr.msk.bf16.vlgmr.msra.gmra.mrb[0].mxu1 %vm433_vm2, %v11469_v60 }
 0x319   : > { %8429 = vmatpush1.bf16.msra.mxu1 %v15413_v31  ;;  %8460 = vmatprep.mubr.bf16.mxu1 %v15222_v2  ;;  %v15441_v31 = vld [vmem:[#allocation48_spill] sm:$0xff] }
 0x31a   : > { %11480 = vmatprep.subr.msk.bf16.mxu1 %vm437_vm1, %v15414_v35  ;;  %v15442_v35 = vld [vmem:[#allocation47_spill] sm:$0xff] }
 0x31b   : > { %11475 = vmatmul.mubr.msk.bf16.vlgmr.msra.gmra.mrb[4].mxu0 %vm433_vm2, %v11469_v60 }
 0x31c   : > { %8470 = vmatpush1.bf16.msra.mxu0 %v15415_v37  ;;  %8501 = vmatprep.mubr.bf16.mxu0 %v15222_v2  ;;  %v11520_v37 = vld [vmem:[%s15042_s0 + $0x5c] sm:$0xf] }
 0x31d   : > { %11482 = vmatprep.subr.msk.bf16.mxu0 %vm437_vm1, %v15416_v47  ;;  %v15444_v47 = vld [vmem:[#allocation49_spill] sm:$0xff] }
 0x320   : > { %11477 = vmatmul.mubr.msk.bf16.vlgmr.msra.gmra.mrb[4].mxu1 %vm433_vm2, %v11469_v60 }
 0x321   : > { %8511 = vmatpush1.bf16.msra.mxu1 %v15326_v40  ;;  %8542 = vmatprep.mubr.bf16.mxu1 %v15222_v2  ;;  %v15422_v40 = vld [vmem:[#allocation22_spill] sm:$0xff] }
 0x322   : > { %11484 = vmatprep.subr.msk.bf16.mxu1 %vm437_vm1, %v8295_v6  ;;  %v15446_v6 = vld [vmem:[#allocation51_spill] sm:$0xff] }
 0x323   : > { %11479 = vmatmul.mubr.msk.bf16.vlgmr.msra.gmra.mrb[8].mxu0 %vm433_vm2, %v11469_v60 }
 0x324   : > { %8552 = vmatpush1.bf16.msra.mxu0 %v14218_v7  ;;  %8583 = vmatprep.mubr.bf16.mxu0 %v15222_v2  ;;  %v15421_v7 = vld [vmem:[#allocation23_spill] sm:$0xff] }
 0x325   : > { %11487 = vmatprep.subr.msk.bf16.mxu0 %vm437_vm1, %v15418_v28  ;;  %v9376_v28 = vpop.permute.xlu1 %9375 }
 0x328   : > { %11481 = vmatmul.mubr.msk.bf16.vlgmr.msra.gmra.mrb[8].mxu1 %vm433_vm2, %v11469_v60 }
 0x329   : > { %8593 = vmatpush1.bf16.msra.mxu1 %v8300_v38  ;;  %8624 = vmatprep.mubr.bf16.mxu1 %v15222_v2  ;;  %v15449_v38 = vld [vmem:[#allocation29_spill] sm:$0xff] }
 0x32a   : > { %11489 = vmatprep.subr.msk.bf16.mxu1 %vm437_vm1, %v15419_v22  ;;  %v9374_v22 = vpop.permute.xlu0 %9373 }
 0x32b   : > { %11483 = vmatmul.mubr.msk.bf16.vlgmr.msra.gmra.mrb[12].mxu0 %vm433_vm2, %v11469_v60 }
 0x32c   : > { %8667 = vmatpush1.bf16.msra.mxu0 %v15331_v9  ;;  %8698 = vmatprep.mubr.bf16.mxu0 %v15222_v2  ;;  %v15423_v9 = vld [vmem:[#allocation25_spill] sm:$0xff] }
 0x32d   : > { %11491 = vmatprep.subr.msk.bf16.mxu0 %vm437_vm1, %v15420_v27  ;;  %v9378_v27 = vsel %vm2573_vm6, %v9374_v22, %v9376_v28 }
 0x330   : > { %11485 = vmatmul.mubr.msk.bf16.vlgmr.msra.gmra.mrb[12].mxu1 %vm433_vm2, %v11469_v60  ;;  %v15438_v60 = vld [vmem:[#allocation3_spill] sm:$0xff] }
 0x331   : > { %8708 = vmatpush1.bf16.msra.mxu1 %v15421_v7  ;;  %8739 = vmatprep.mubr.bf16.mxu1 %v15222_v2  ;;  %v9016_v63 = vsel %vm2125_vm5, %v15438_v60, %v9013_v53  ;;  %v11554_v53 = vld [vmem:[%s15042_s0 + $0x64] sm:$0xf]  ;;  %v15472_v60 = vld [vmem:[#allocation83_spill] sm:$0xff] }
 0x332   : > { %11493 = vmatprep.subr.msk.bf16.mxu1 %vm437_vm1, %v15422_v40  ;;  %v9022_v16 = vsel %vm437_vm1, %v9016_v63, 0  ;;  %v15452_v40 = vld [vmem:[#allocation59_spill] sm:$0xff]  ;;  %v15473_v63 = vld [vmem:[#allocation84_spill] sm:$0xff] }
 0x333   : > { %11488 = vmatmul.mubr.msk.bf16.vlgmr.msra.gmra.mrb[0].mxu0 %vm433_vm2, %v11486_v29 }
 0x334   : > { %8749 = vmatpush1.bf16.msra.mxu0 %v15423_v9  ;;  %8780 = vmatprep.mubr.bf16.mxu0 %v15222_v2 }
 0x335   : > { %11495 = vmatprep.subr.msk.bf16.mxu0 %vm437_vm1, %v15424_v30  ;;  %v15453_v30 = vld [vmem:[#allocation60_spill] sm:$0xff] }
 0x338   : > { %11490 = vmatmul.mubr.msk.bf16.vlgmr.msra.gmra.mrb[0].mxu1 %vm433_vm2, %v11486_v29 }
 0x339   : > { %8790 = vmatpush1.bf16.msra.mxu1 %v15425_v15  ;;  %8821 = vmatprep.mubr.bf16.mxu1 %v15222_v2  ;;  %v15455_v15 = vld [vmem:[#allocation62_spill] sm:$0xff] }
 0x33a   : > { %11497 = vmatprep.subr.msk.bf16.mxu1 %vm437_vm1, %v15426_v8  ;;  %v11537_v8 = vld [vmem:[%s15042_s0 + $0x60] sm:$0xf] }
 0x33b   : > { %11492 = vmatmul.mubr.msk.bf16.vlgmr.msra.gmra.mrb[4].mxu0 %vm433_vm2, %v11486_v29 }
 0x33c   : > { %8831 = vmatpush1.bf16.msra.mxu0 %v15427_v11  ;;  %8862 = vmatprep.mubr.bf16.mxu0 %v15222_v2  ;;  %v15456_v11 = vld [vmem:[#allocation65_spill] sm:$0xff] }
 0x33d   : > { %11499 = vmatprep.subr.msk.bf16.mxu0 %vm437_vm1, %v14261_v36  ;;  %v8655_v36 = vsel %vm1677_vm4, %v15428_v23, %v8652_v17  ;;  %v15458_v17 = vld [vmem:[#allocation68_spill] sm:$0xff]  ;;  %v15460_v23 = vld [vmem:[#allocation70_spill] sm:$0xff] }
 0x33e   : > { %v8661_v43 = vsel %vm437_vm1, %v8655_v36, 0  ;;  %v15461_v36 = vld [vmem:[#allocation69_spill] sm:$0xff] }
 0x340   : > { %11494 = vmatmul.mubr.msk.bf16.vlgmr.msra.gmra.mrb[4].mxu1 %vm433_vm2, %v11486_v29 }
 0x341   : > { %8872 = vmatpush1.bf16.msra.mxu1 %v13385_v49  ;;  %8903 = vmatprep.mubr.bf16.mxu1 %v15222_v2  ;;  %v11503_v49 = vld [vmem:[%s15042_s0 + $0x58] sm:$0xf] }
 0x342   : > { %11501 = vmatprep.subr.msk.bf16.mxu1 %vm437_vm1, %v8656_v20  ;;  %v15459_v20 = vld [vmem:[#allocation67_spill] sm:$0xff] }
 0x343   : > { %11496 = vmatmul.mubr.msk.bf16.vlgmr.msra.gmra.mrb[8].mxu0 %vm433_vm2, %v11486_v29 }
 0x344   : > { %8913 = vmatpush1.bf16.msra.mxu0 %v14278_v21  ;;  %8944 = vmatprep.mubr.bf16.mxu0 %v15222_v2  ;;  %v15430_v21 = vld [vmem:[#allocation33_spill] sm:$0xff] }
 0x345   : > { %11504 = vmatprep.subr.msk.bf16.mxu0 %vm437_vm1, %v13396_v62  ;;  %v15429_v62 = vld [vmem:[#allocation34_spill] sm:$0xff] }
 0x348   : > { %11498 = vmatmul.mubr.msk.bf16.vlgmr.msra.gmra.mrb[8].mxu1 %vm433_vm2, %v11486_v29 }
 0x349   : > { %8954 = vmatpush1.bf16.msra.mxu1 %v8661_v43  ;;  %8985 = vmatprep.mubr.bf16.mxu1 %v15222_v2  ;;  %v9737_v43 = vpop.permute.xlu1 %9736 }
 0x34a   : > { %11506 = vmatprep.subr.msk.bf16.mxu1 %vm437_vm1, %v15341_v41  ;;  %v15432_v41 = vld [vmem:[#allocation35_spill] sm:$0xff] }
 0x34b   : > { %11500 = vmatmul.mubr.msk.bf16.vlgmr.msra.gmra.mrb[12].mxu0 %vm433_vm2, %v11486_v29 }
 0x34c   : > { %9028 = vmatpush1.bf16.msra.mxu0 %v13457_v51  ;;  %9059 = vmatprep.mubr.bf16.mxu0 %v15222_v2  ;;  %v15431_v51 = vld [vmem:[#allocation36_spill] sm:$0xff] }
 0x34d   : > { %11508 = vmatprep.subr.msk.bf16.mxu0 %vm437_vm1, %v15342_v39  ;;  %v15433_v39 = vld [vmem:[#allocation38_spill] sm:$0xff] }
 0x350   : > { %11502 = vmatmul.mubr.msk.bf16.vlgmr.msra.gmra.mrb[12].mxu1 %vm433_vm2, %v11486_v29  ;;  %v15450_v29 = vld [vmem:[#allocation58_spill] sm:$0xff] }
 0x351   : > { %9069 = vmatpush1.bf16.msra.mxu1 %v15429_v62  ;;  %9100 = vmatprep.mubr.bf16.mxu1 %v15222_v2  ;;  %v9735_v62 = vpop.permute.xlu0 %9734 }
 0x352   : > { %11510 = vmatprep.subr.msk.bf16.mxu1 %vm437_vm1, %v15430_v21  ;;  %v9739_v21 = vsel %vm3021_vm7, %v9735_v62, %v9737_v43 }
 0x353   : > { %11505 = vmatmul.mubr.msk.bf16.vlgmr.msra.gmra.mrb[0].mxu0 %vm433_vm2, %v11503_v49 }
 0x354   : > { %9110 = vmatpush1.bf16.msra.mxu0 %v15431_v51  ;;  %9141 = vmatprep.mubr.bf16.mxu0 %v15222_v2  ;;  %v15463_v51 = vld [vmem:[#allocation73_spill] sm:$0xff] }
 0x355   : > { %11512 = vmatprep.subr.msk.bf16.mxu0 %vm437_vm1, %v15432_v41 }
 0x358   : > { %11507 = vmatmul.mubr.msk.bf16.vlgmr.msra.gmra.mrb[0].mxu1 %vm433_vm2, %v11503_v49 }
 0x359   : > { %9151 = vmatpush1.bf16.msra.mxu1 %v15433_v39  ;;  %9182 = vmatprep.mubr.bf16.mxu1 %v15222_v2  ;;  %v15465_v39 = vld [vmem:[#allocation74_spill] sm:$0xff] }
 0x35a   : > { %11514 = vmatprep.subr.msk.bf16.mxu1 %vm437_vm1, %v15434_v44 }
 0x35b   : > { %11509 = vmatmul.mubr.msk.bf16.vlgmr.msra.gmra.mrb[4].mxu0 %vm433_vm2, %v11503_v49 }
 0x35c   : > { %9192 = vmatpush1.bf16.msra.mxu0 %v15347_v33  ;;  %9223 = vmatprep.mubr.bf16.mxu0 %v15222_v2  ;;  %v15437_v33 = vld [vmem:[#allocation21_spill] sm:$0xff] }
 0x35d   : > { %11516 = vmatprep.subr.msk.bf16.mxu0 %vm437_vm1, %v15435_v50  ;;  %v15468_v50 = vld [vmem:[#allocation78_spill] sm:$0xff] }
 0x360   : > { %11511 = vmatmul.mubr.msk.bf16.vlgmr.msra.gmra.mrb[4].mxu1 %vm433_vm2, %v11503_v49 }
 0x361   : > { %9233 = vmatpush1.bf16.msra.mxu1 %v15436_v58  ;;  %9264 = vmatprep.mubr.bf16.mxu1 %v15222_v2  ;;  %v15470_v58 = vld [vmem:[#allocation81_spill] sm:$0xff] }
 0x362   : > { %11518 = vmatprep.subr.msk.bf16.mxu1 %vm437_vm1, %v9017_v54  ;;  %v15469_v54 = vld [vmem:[#allocation80_spill] sm:$0xff] }
 0x363   : > { %11513 = vmatmul.mubr.msk.bf16.vlgmr.msra.gmra.mrb[8].mxu0 %vm433_vm2, %v11503_v49 }
 0x364   : > { %9274 = vmatpush1.bf16.msra.mxu0 %v15437_v33  ;;  %9305 = vmatprep.mubr.bf16.mxu0 %v15222_v2  ;;  %v15471_v33 = vld [vmem:[#allocation82_spill] sm:$0xff] }
 0x365   : > { %11521 = vmatprep.subr.msk.bf16.mxu0 %vm437_vm1, %v15439_v1  ;;  %v15474_v1 = vld [vmem:[#allocation85_spill] sm:$0xff] }
 0x368   : > { %11515 = vmatmul.mubr.msk.bf16.vlgmr.msra.gmra.mrb[8].mxu1 %vm433_vm2, %v11503_v49 }
 0x369   : > { %9315 = vmatpush1.bf16.msra.mxu1 %v9022_v16  ;;  %9346 = vmatprep.mubr.bf16.mxu1 %v15222_v2  ;;  %v10098_v16 = vpop.permute.xlu1 %10097 }
 0x36a   : > { %11523 = vmatprep.subr.msk.bf16.mxu1 %vm437_vm1, %v15440_v19  ;;  %v15475_v19 = vld [vmem:[#allocation31_spill] sm:$0xff] }
 0x36b   : > { %11517 = vmatmul.mubr.msk.bf16.vlgmr.msra.gmra.mrb[12].mxu0 %vm433_vm2, %v11503_v49 }
 0x36c   : > { %9389 = vmatpush1.bf16.msra.mxu0 %v15441_v31  ;;  %9420 = vmatprep.mubr.bf16.mxu0 %v15222_v2  ;;  %v10096_v31 = vpop.permute.xlu0 %10095 }
 0x36d   : > { %11525 = vmatprep.subr.msk.bf16.mxu0 %vm437_vm1, %v15442_v35  ;;  %v10100_v35 = vsel %vm3469_vm8, %v10096_v31, %v10098_v16 }
 0x370   : > { %11519 = vmatmul.mubr.msk.bf16.vlgmr.msra.gmra.mrb[12].mxu1 %vm433_vm2, %v11503_v49  ;;  %v15462_v49 = vld [vmem:[#allocation32_spill] sm:$0xff] }
 0x371   : > { %9430 = vmatpush1.bf16.msra.mxu1 %v15443_v45  ;;  %9461 = vmatprep.mubr.bf16.mxu1 %v15222_v2 }
 0x372   : > { %11527 = vmatprep.subr.msk.bf16.mxu1 %vm437_vm1, %v15444_v47 }
 0x373   : > { %11522 = vmatmul.mubr.msk.bf16.vlgmr.msra.gmra.mrb[0].mxu0 %vm433_vm2, %v11520_v37 }
 0x374   : > { %9471 = vmatpush1.bf16.msra.mxu0 %v15445_v56  ;;  %9502 = vmatprep.mubr.bf16.mxu0 %v15222_v2 }
 0x375   : > { %11529 = vmatprep.subr.msk.bf16.mxu0 %vm437_vm1, %v15446_v6 }
 0x378   : > { %11524 = vmatmul.mubr.msk.bf16.vlgmr.msra.gmra.mrb[0].mxu1 %vm433_vm2, %v11520_v37 }
 0x379   : > { %9512 = vmatpush1.bf16.msra.mxu1 %v15447_v61  ;;  %9543 = vmatprep.mubr.bf16.mxu1 %v15222_v2 }
 0x37a   : > { %11531 = vmatprep.subr.msk.bf16.mxu1 %vm437_vm1, %v15448_v25 }
 0x37b   : > { %11526 = vmatmul.mubr.msk.bf16.vlgmr.msra.gmra.mrb[4].mxu0 %vm433_vm2, %v11520_v37 }
 0x37c   : > { %9553 = vmatpush1.bf16.msra.mxu0 %v15364_v32  ;;  %9584 = vmatprep.mubr.bf16.mxu0 %v15222_v2  ;;  %v15451_v32 = vld [vmem:[#allocation18_spill] sm:$0xff] }
 0x37d   : > { %11533 = vmatprep.subr.msk.bf16.mxu0 %vm437_vm1, %v15449_v38  ;;  %v9377_v7 = vsel %vm2573_vm6, %v15451_v32, %v9374_v22 }
 0x37e   : > { %v9383_v9 = vsel %vm437_vm1, %v9377_v7, 0 }
 0x380   : > { %11528 = vmatmul.mubr.msk.bf16.vlgmr.msra.gmra.mrb[4].mxu1 %vm433_vm2, %v11520_v37 }
 0x381   : > { %9594 = vmatpush1.bf16.msra.mxu1 %v15450_v29  ;;  %9625 = vmatprep.mubr.bf16.mxu1 %v15222_v2 }
 0x382   : > { %11535 = vmatprep.subr.msk.bf16.mxu1 %vm437_vm1, %v9378_v27 }
 0x383   : > { %11530 = vmatmul.mubr.msk.bf16.vlgmr.msra.gmra.mrb[8].mxu0 %vm433_vm2, %v11520_v37 }
 0x384   : > { %9635 = vmatpush1.bf16.msra.mxu0 %v14389_v0  ;;  %9666 = vmatprep.mubr.bf16.mxu0 %v15222_v2  ;;  %v15454_v0 = vld [vmem:[#allocation63_spill] sm:$0xff] }
 0x385   : > { %11538 = vmatprep.subr.msk.bf16.mxu0 %vm437_vm1, %v15452_v40 }
 0x388   : > { %11532 = vmatmul.mubr.msk.bf16.vlgmr.msra.gmra.mrb[8].mxu1 %vm433_vm2, %v11520_v37 }
 0x389   : > { %9676 = vmatpush1.bf16.msra.mxu1 %v9383_v9  ;;  %9707 = vmatprep.mubr.bf16.mxu1 %v15222_v2 }
 0x38a   : > { %11540 = vmatprep.subr.msk.bf16.mxu1 %vm437_vm1, %v15453_v30 }
 0x38b   : > { %11534 = vmatmul.mubr.msk.bf16.vlgmr.msra.gmra.mrb[12].mxu0 %vm433_vm2, %v11520_v37 }
 0x38c   : > { %9750 = vmatpush1.bf16.msra.mxu0 %v15454_v0  ;;  %9781 = vmatprep.mubr.bf16.mxu0 %v15222_v2 }
 0x38d   : > { %11542 = vmatprep.subr.msk.bf16.mxu0 %vm437_vm1, %v15455_v15 }
 0x390   : > { %11536 = vmatmul.mubr.msk.bf16.vlgmr.msra.gmra.mrb[12].mxu1 %vm433_vm2, %v11520_v37  ;;  %v15476_v37 = vld [vmem:[#allocation86_spill] sm:$0xff] }
 0x391   : > { %9791 = vmatpush1.bf16.msra.mxu1 %v15456_v11  ;;  %9822 = vmatprep.mubr.bf16.mxu1 %v15222_v2 }
 0x392   : > { %11544 = vmatprep.subr.msk.bf16.mxu1 %vm437_vm1, %v15457_v14 }
 0x393   : > { %11539 = vmatmul.mubr.msk.bf16.vlgmr.msra.gmra.mrb[0].mxu0 %vm433_vm2, %v11537_v8 }
 0x394   : > { %9832 = vmatpush1.bf16.msra.mxu0 %v15458_v17  ;;  %9863 = vmatprep.mubr.bf16.mxu0 %v15222_v2 }
 0x395   : > { %11546 = vmatprep.subr.msk.bf16.mxu0 %vm437_vm1, %v15459_v20 }
 0x398   : > { %11541 = vmatmul.mubr.msk.bf16.vlgmr.msra.gmra.mrb[0].mxu1 %vm433_vm2, %v11537_v8 }
 0x399   : > { %9873 = vmatpush1.bf16.msra.mxu1 %v15460_v23  ;;  %9904 = vmatprep.mubr.bf16.mxu1 %v15222_v2 }
 0x39a   : > { %11548 = vmatprep.subr.msk.bf16.mxu1 %vm437_vm1, %v15461_v36 }
 0x39b   : > { %11543 = vmatmul.mubr.msk.bf16.vlgmr.msra.gmra.mrb[4].mxu0 %vm433_vm2, %v11537_v8 }
 0x39c   : > { %9914 = vmatpush1.bf16.msra.mxu0 %v15380_v5  ;;  %9945 = vmatprep.mubr.bf16.mxu0 %v15222_v2  ;;  %v15464_v5 = vld [vmem:[#allocation30_spill] sm:$0xff] }
 0x39d   : > { %11550 = vmatprep.subr.msk.bf16.mxu0 %vm437_vm1, %v15462_v49  ;;  %v9738_v41 = vsel %vm3021_vm7, %v15464_v5, %v9735_v62 }
 0x39e   : > { %v9744_v44 = vsel %vm437_vm1, %v9738_v41, 0 }
 0x3a0   : > { %11545 = vmatmul.mubr.msk.bf16.vlgmr.msra.gmra.mrb[4].mxu1 %vm433_vm2, %v11537_v8 }
 0x3a1   : > { %9955 = vmatpush1.bf16.msra.mxu1 %v15463_v51  ;;  %9986 = vmatprep.mubr.bf16.mxu1 %v15222_v2 }
 0x3a2   : > { %11552 = vmatprep.subr.msk.bf16.mxu1 %vm437_vm1, %v9739_v21 }
 0x3a3   : > { %11547 = vmatmul.mubr.msk.bf16.vlgmr.msra.gmra.mrb[8].mxu0 %vm433_vm2, %v11537_v8 }
 0x3a4   : > { %9996 = vmatpush1.bf16.msra.mxu0 %v14443_v26  ;;  %10027 = vmatprep.mubr.bf16.mxu0 %v15222_v2  ;;  %v15467_v26 = vld [vmem:[#allocation77_spill] sm:$0xff] }
 0x3a5   : > { %11555 = vmatprep.subr.msk.bf16.mxu0 %vm437_vm1, %v15465_v39 }
 0x3a8   : > { %11549 = vmatmul.mubr.msk.bf16.vlgmr.msra.gmra.mrb[8].mxu1 %vm433_vm2, %v11537_v8 }
 0x3a9   : > { %10037 = vmatpush1.bf16.msra.mxu1 %v9744_v44  ;;  %10068 = vmatprep.mubr.bf16.mxu1 %v15222_v2 }
 0x3aa   : > { %11557 = vmatprep.subr.msk.bf16.mxu1 %vm437_vm1, %v15466_v48 }
 0x3ab   : > { %11551 = vmatmul.mubr.msk.bf16.vlgmr.msra.gmra.mrb[12].mxu0 %vm433_vm2, %v11537_v8 }
 0x3ac   : > { %10111 = vmatpush1.bf16.msra.mxu0 %v15467_v26  ;;  %10142 = vmatprep.mubr.bf16.mxu0 %v15222_v2 }
 0x3ad   : > { %11559 = vmatprep.subr.msk.bf16.mxu0 %vm437_vm1, %v15468_v50 }
 0x3b0   : > { %11553 = vmatmul.mubr.msk.bf16.vlgmr.msra.gmra.mrb[12].mxu1 %vm433_vm2, %v11537_v8 }
 0x3b1   : > { %10152 = vmatpush1.bf16.msra.mxu1 %v15469_v54  ;;  %10183 = vmatprep.mubr.bf16.mxu1 %v15222_v2 }
 0x3b2   : > { %11561 = vmatprep.subr.msk.bf16.mxu1 %vm437_vm1, %v15470_v58 }
 0x3b3   : > { %11556 = vmatmul.mubr.msk.bf16.vlgmr.msra.gmra.mrb[0].mxu0 %vm433_vm2, %v11554_v53 }
 0x3b4   : > { %10193 = vmatpush1.bf16.msra.mxu0 %v15471_v33  ;;  %10224 = vmatprep.mubr.bf16.mxu0 %v15222_v2 }
 0x3b5   : > { %11563 = vmatprep.subr.msk.bf16.mxu0 %vm437_vm1, %v15472_v60  ;;  %v15000_v60 = vld [vmem:[%s14967_s24 + $0x8] sm:$0xff] }
 0x3b8   : > { %11558 = vmatmul.mubr.msk.bf16.vlgmr.msra.gmra.mrb[0].mxu1 %vm433_vm2, %v11554_v53 }
 0x3b9   : > { %10234 = vmatpush1.bf16.msra.mxu1 %v15473_v63  ;;  %10265 = vmatprep.mubr.bf16.mxu1 %v15222_v2 }
 0x3ba   : > { %11565 = vmatprep.subr.msk.bf16.mxu1 %vm437_vm1, %v15474_v1 }
 0x3bb   : > { %11560 = vmatmul.mubr.msk.bf16.vlgmr.msra.gmra.mrb[4].mxu0 %vm433_vm2, %v11554_v53 }
 0x3bc   : > { %10275 = vmatpush1.bf16.msra.mxu0 %v13950_v13  ;;  %10306 = vmatprep.mubr.bf16.mxu0 %v15222_v2  ;;  %v15477_v13 = vld [vmem:[#allocation39_spill] sm:$0xff] }
 0x3bd   : > { %11567 = vmatprep.subr.msk.bf16.mxu0 %vm437_vm1, %v15475_v19  ;;  %v10099_v45 = vsel %vm3469_vm8, %v15477_v13, %v10096_v31 }
 0x3be   : > { %v10105_v47 = vsel %vm437_vm1, %v10099_v45, 0 }
 0x3c0   : > { %11562 = vmatmul.mubr.msk.bf16.vlgmr.msra.gmra.mrb[4].mxu1 %vm433_vm2, %v11554_v53 }
 0x3c1   : > { %10316 = vmatpush1.bf16.msra.mxu1 %v15476_v37  ;;  %10347 = vmatprep.mubr.bf16.mxu1 %v15222_v2 }
 0x3c2   : > { %11569 = vmatprep.subr.msk.bf16.mxu1 %vm437_vm1, %v10100_v35 }
 0x3c3   : > { %11564 = vmatmul.mubr.msk.bf16.vlgmr.msra.gmra.mrb[8].mxu0 %vm433_vm2, %v11554_v53 }
 0x3c4   : > { %10357 = vmatpush1.bf16.msra.mxu0 %v14497_v55  ;;  %10388 = vmatprep.mubr.bf16.mxu0 %v15222_v2  ;;  %v11571_v55 = vld [vmem:[%s15042_s0 + $0x68] sm:$0xf] }
 0x3c5   : > { %11572 = vmatprep.subr.msk.bf16.mxu0 %vm437_vm1, %v15398_v3  ;;  %v10459_v3 = vpop.permute.xlu1 %10458 }
 0x3c8   : > { %11566 = vmatmul.mubr.msk.bf16.vlgmr.msra.gmra.mrb[8].mxu1 %vm433_vm2, %v11554_v53 }
 0x3c9   : > { %10398 = vmatpush1.bf16.msra.mxu1 %v10105_v47  ;;  %10429 = vmatprep.mubr.bf16.mxu1 %v15222_v2 }
 0x3ca   : > { %11574 = vmatprep.subr.msk.bf16.mxu1 %vm437_vm1, %v15400_v59 }
 0x3cb   : > { %11568 = vmatmul.mubr.msk.bf16.vlgmr.msra.gmra.mrb[12].mxu0 %vm433_vm2, %v11554_v53 }
 0x3cc   : > { %10472 = vmatpush1.bf16.msra.mxu0 %v13999_v10  ;;  %10503 = vmatprep.mubr.bf16.mxu0 %v15222_v2  ;;  %v15478_v10 = vld [vmem:[#allocation93_spill] sm:$0xff] }
 0x3cd   : > { %11576 = vmatprep.subr.msk.bf16.mxu0 %vm437_vm1, %v14006_v12  ;;  %v15479_v12 = vld [vmem:[#allocation94_spill] sm:$0xff] }
 0x3d0   : > { %11570 = vmatmul.mubr.msk.bf16.vlgmr.msra.gmra.mrb[12].mxu1 %vm433_vm2, %v11554_v53 }
 0x3d1   : > { %10513 = vmatpush1.bf16.msra.mxu1 %v15401_v57  ;;  %10544 = vmatprep.mubr.bf16.mxu1 %v15222_v2 }
 0x3d2   : > { %11578 = vmatprep.subr.msk.bf16.mxu1 %vm437_vm1, %v15402_v34 }
 0x3d3   : > { %11573 = vmatmul.mubr.msk.bf16.vlgmr.msra.gmra.mrb[0].mxu0 %vm433_vm2, %v11571_v55 }
 0x3d4   : > { %10554 = vmatpush1.bf16.msra.mxu0 %v15478_v10  ;;  %10585 = vmatprep.mubr.bf16.mxu0 %v15222_v2 }
 0x3d5   : > { %11580 = vmatprep.subr.msk.bf16.mxu0 %vm437_vm1, %v14030_v4  ;;  %v10457_v4 = vpop.permute.xlu0 %10456 }
 0x3d6   : > { %v10461_v59 = vsel %vm3917_vm9, %v10457_v4, %v10459_v3 }
 0x3d8   : > { %11575 = vmatmul.mubr.msk.bf16.vlgmr.msra.gmra.mrb[0].mxu1 %vm433_vm2, %v11571_v55 }
 0x3d9   : > { %10595 = vmatpush1.bf16.msra.mxu1 %v14041_v42  ;;  %10626 = vmatprep.mubr.bf16.mxu1 %v15222_v2  ;;  %v15480_v42 = vld [vmem:[#allocation40_spill] sm:$0xff] }
 0x3da   : > { %11582 = vmatprep.subr.msk.bf16.mxu1 %vm437_vm1, %v15479_v12 }
 0x3db   : > { %11577 = vmatmul.mubr.msk.bf16.vlgmr.msra.gmra.mrb[4].mxu0 %vm433_vm2, %v11571_v55 }
 0x3dc   : > { %10636 = vmatpush1.bf16.msra.mxu0 %v14050_v24  ;;  %10667 = vmatprep.mubr.bf16.mxu0 %v15222_v2 }
 0x3dd   : > { %11584 = vmatprep.subr.msk.bf16.mxu0 %vm437_vm1, %v14536_v46  ;;  %v10460_v46 = vsel %vm3917_vm9, %v15480_v42, %v10457_v4 }
 0x3de   : > { %v10466_v24 = vsel %vm437_vm1, %v10460_v46, 0 }
 0x3e0   : > { %11579 = vmatmul.mubr.msk.bf16.vlgmr.msra.gmra.mrb[4].mxu1 %vm433_vm2, %v11571_v55 }
 0x3e1   : > { %10677 = vmatpush1.bf16.msra.mxu1 %v14063_v52  ;;  %10708 = vmatprep.mubr.bf16.mxu1 %v15222_v2  ;;  %v10835_v52 = vlaneseq }
 0x3e2   : > { %11586 = vmatprep.subr.msk.bf16.mxu1 %vm437_vm1, %v10461_v59 }
 0x3e3   : > { %11581 = vmatmul.mubr.msk.bf16.vlgmr.msra.gmra.mrb[8].mxu0 %vm433_vm2, %v11571_v55  ;;  %v14962_v57 = vshrl.u32 %v10835_v52, 7 }
 0x3e4   : > { %10718 = vmatpush1.bf16.msra.mxu0 %v14551_v18  ;;  %10749 = vmatprep.mubr.bf16.mxu0 %v15222_v2  ;;  %v10831_v18 = vld [vmem:[%s14967_s24] sm:$0xff] }
 0x3e5   : > { %v10837_v34 = vsub.s32 0, %v14962_v57  ;;  %v10845_v61 = vsub.s32 2, %v14962_v57  ;;  %v10849_v25 = vsub.s32 3, %v14962_v57  ;;  %v10853_v27 = vsub.s32 4, %v14962_v57 }
 0x3e6   : > { %v10857_v40 = vsub.s32 5, %v14962_v57  ;;  %v10861_v43 = vsub.s32 6, %v14962_v57  ;;  %v10865_v21 = vsub.s32 7, %v14962_v57 }
 0x3e7   : > { %v10838_v56 = vrot.slane %v10831_v18, %v10837_v34  ;;  %v10846_v7 = vrot.slane %v10831_v18, %v10845_v61  ;;  %v10850_v0 = vrot.slane %v10831_v18, %v10849_v25  ;;  %v10854_v14 = vrot.slane %v10831_v18, %v10853_v27 }
 0x3e8   : > { %11583 = vmatmul.mubr.msk.bf16.vlgmr.msra.gmra.mrb[8].mxu1 %vm433_vm2, %v11571_v55  ;;  %v10858_v36 = vrot.slane %v10831_v18, %v10857_v40  ;;  %v10862_v33 = vrot.slane %v10831_v18, %v10861_v43  ;;  %v10866_v16 = vrot.slane %v10831_v18, %v10865_v21  ;;  %v10870_v13 = vrot.slane %v15000_v60, %v10837_v34 }
 0x3e9   : > { %10759 = vmatpush1.bf16.msra.mxu1 %v10466_v24  ;;  %10790 = vmatprep.mubr.bf16.mxu1 %v15222_v2  ;;  %v10841_v2 = vsub.s32 1, %v14962_v57 }
 0x3eb   : > { %11585 = vmatmul.mubr.msk.bf16.vlgmr.msra.gmra.mrb[12].mxu0 %vm433_vm2, %v11571_v55  ;;  %v10842_v6 = vrot.slane %v10831_v18, %v10841_v2  ;;  %v10874_v12 = vrot.slane %v15000_v60, %v10841_v2  ;;  %v10878_v2 = vrot.slane %v15000_v60, %v10845_v61 }
 0x3f0   : > { %11587 = vmatmul.mubr.msk.bf16.vlgmr.msra.gmra.mrb[12].mxu1 %vm433_vm2, %v11571_v55 }
 0x4a6   : > { %v10505_v28 = vpop.f32.mrb[0].mxu0 }
 0x4a7   : > { %10815 = vst [vmem:[%s14975_s14] sm:$0xff] %v10505_v28  ;;  %v10915_v38 = vmul.f32 %v10838_v56, %v10505_v28  ;;  %v10507_v22 = vpop.f32.mrb[1].mxu0 }
 0x4a8   : > { %10816 = vst [vmem:[%s14975_s14 + $0x8] sm:$0xff] %v10507_v22  ;;  %v10916_v29 = vmul.f32 %v10842_v6, %v10507_v22  ;;  %v10509_v32 = vpop.f32.mrb[2].mxu0 }
 0x4a9   : > { %v10948_v9 = vmul.f32 %v10915_v38, %v10505_v28  ;;  %v10510_v30 = vpop.f32.mrb[3].mxu0 }
 0x4aa   : > { %v10931_v15 = vadd.f32 %v10916_v29, %v10915_v38  ;;  %v10949_v8 = vmul.f32 %v10916_v29, %v10507_v22 }
 0x4ab   : > { %v10546_v11 = vpop.f32.mrb[0].mxu1 }
 0x4ac   : > { %v10964_v17 = vadd.f32 %v10949_v8, %v10948_v9  ;;  %10817 = vst [vmem:[%s14975_s14 + $0x10] sm:$0xff] %v10546_v11  ;;  %v10917_v20 = vmul.f32 %v10846_v7, %v10546_v11  ;;  %v10548_v23 = vpop.f32.mrb[1].mxu1  ;;  %v10882_v7 = vrot.slane %v15000_v60, %v10849_v25  ;;  %v10886_v8 = vrot.slane %v15000_v60, %v10853_v27 }
 0x4ad   : > { %10818 = vst [vmem:[%s14975_s14 + $0x18] sm:$0xff] %v10548_v23  ;;  %v10918_v49 = vmul.f32 %v10850_v0, %v10548_v23  ;;  %v10550_v62 = vpop.f32.mrb[2].mxu1 }
 0x4ae   : > { %v10932_v51 = vadd.f32 %v10931_v15, %v10917_v20  ;;  %v10950_v5 = vmul.f32 %v10917_v20, %v10546_v11  ;;  %v10551_v41 = vpop.f32.mrb[3].mxu1  ;;  %v10587_v39 = vpop.f32.mrb[4].mxu0  ;;  %v10890_v20 = vrot.slane %v15000_v60, %v10857_v40  ;;  %v10894_v40 = vrot.slane %v15000_v60, %v10861_v43 }
 0x4af   : > { %v10951_v44 = vmul.f32 %v10918_v49, %v10548_v23  ;;  %10819 = vst [vmem:[%s14975_s14 + $0x20] sm:$0xff] %v10587_v39  ;;  %v10919_v48 = vmul.f32 %v10854_v14, %v10587_v39  ;;  %v10589_v26 = vpop.f32.mrb[5].mxu0 }
 0x4b0   : > { %v10965_v50 = vadd.f32 %v10964_v17, %v10950_v5  ;;  %v10933_v53 = vadd.f32 %v10932_v51, %v10918_v49  ;;  %10820 = vst [vmem:[%s14975_s14 + $0x28] sm:$0xff] %v10589_v26  ;;  %v10920_v54 = vmul.f32 %v10858_v36, %v10589_v26  ;;  %v10591_v58 = vpop.f32.mrb[6].mxu0 }
 0x4b1   : > { %v10952_v63 = vmul.f32 %v10919_v48, %v10587_v39  ;;  %v10592_v1 = vpop.f32.mrb[7].mxu0  ;;  %v10898_v58 = vrot.slane %v15000_v60, %v10865_v21 }
 0x4b2   : > { %v10966_v19 = vadd.f32 %v10965_v50, %v10951_v44  ;;  %v10934_v31 = vadd.f32 %v10933_v53, %v10919_v48  ;;  %v10953_v35 = vmul.f32 %v10920_v54, %v10589_v26 }
 0x4b3   : > { %v10628_v37 = vpop.f32.mrb[4].mxu1 }
 0x4b4   : > { %v10967_v45 = vadd.f32 %v10966_v19, %v10952_v63  ;;  %v10935_v47 = vadd.f32 %v10934_v31, %v10920_v54  ;;  %10821 = vst [vmem:[%s14975_s14 + $0x30] sm:$0xff] %v10628_v37  ;;  %v10921_v55 = vmul.f32 %v10862_v33, %v10628_v37  ;;  %v10630_v10 = vpop.f32.mrb[5].mxu1 }
 0x4b5   : > { %10822 = vst [vmem:[%s14975_s14 + $0x38] sm:$0xff] %v10630_v10  ;;  %v10922_v3 = vmul.f32 %v10866_v16, %v10630_v10  ;;  %v10632_v4 = vpop.f32.mrb[6].mxu1 }
 0x4b6   : > { %v10968_v59 = vadd.f32 %v10967_v45, %v10953_v35  ;;  %v10936_v42 = vadd.f32 %v10935_v47, %v10921_v55  ;;  %v10954_v46 = vmul.f32 %v10921_v55, %v10628_v37  ;;  %v10633_v24 = vpop.f32.mrb[7].mxu1  ;;  %v10669_v52 = vpop.f32.mrb[8].mxu0 }
 0x4b7   : > { %v10955_v18 = vmul.f32 %v10922_v3, %v10630_v10  ;;  %10823 = vst [vmem:[%s14975_s14 + $0x40] sm:$0xff] %v10669_v52  ;;  %v10923_v34 = vmul.f32 %v10870_v13, %v10669_v52  ;;  %v10671_v56 = vpop.f32.mrb[9].mxu0 }
 0x4b8   : > { %v10969_v6 = vadd.f32 %v10968_v59, %v10954_v46  ;;  %v10937_v28 = vadd.f32 %v10936_v42, %v10922_v3  ;;  %10824 = vst [vmem:[%s14975_s14 + $0x48] sm:$0xff] %v10671_v56  ;;  %v10924_v38 = vmul.f32 %v10874_v12, %v10671_v56  ;;  %v10673_v22 = vpop.f32.mrb[10].mxu0 }
 0x4b9   : > { %v10956_v29 = vmul.f32 %v10923_v34, %v10669_v52  ;;  %v10674_v32 = vpop.f32.mrb[11].mxu0 }
 0x4ba   : > { %v10970_v9 = vadd.f32 %v10969_v6, %v10955_v18  ;;  %v10938_v30 = vadd.f32 %v10937_v28, %v10923_v34  ;;  %v10957_v0 = vmul.f32 %v10924_v38, %v10671_v56 }
 0x4bb   : > { %v10710_v15 = vpop.f32.mrb[8].mxu1 }
 0x4bc   : > { %v10971_v11 = vadd.f32 %v10970_v9, %v10956_v29  ;;  %v10939_v14 = vadd.f32 %v10938_v30, %v10924_v38  ;;  %10825 = vst [vmem:[%s14975_s14 + $0x50] sm:$0xff] %v10710_v15  ;;  %v10925_v17 = vmul.f32 %v10878_v2, %v10710_v15  ;;  %v10712_v61 = vpop.f32.mrb[9].mxu1 }
 0x4bd   : > { %10826 = vst [vmem:[%s14975_s14 + $0x58] sm:$0xff] %v10712_v61  ;;  %v10926_v25 = vmul.f32 %v10882_v7, %v10712_v61  ;;  %v10714_v23 = vpop.f32.mrb[10].mxu1 }
 0x4be   : > { %v10972_v36 = vadd.f32 %v10971_v11, %v10957_v0  ;;  %v10940_v49 = vadd.f32 %v10939_v14, %v10925_v17  ;;  %v10958_v62 = vmul.f32 %v10925_v17, %v10710_v15  ;;  %v10715_v51 = vpop.f32.mrb[11].mxu1  ;;  %v10751_v5 = vpop.f32.mrb[12].mxu0 }
 0x4bf   : > { %v10959_v27 = vmul.f32 %v10926_v25, %v10712_v61  ;;  %10827 = vst [vmem:[%s14975_s14 + $0x60] sm:$0xff] %v10751_v5  ;;  %v10927_v41 = vmul.f32 %v10886_v8, %v10751_v5  ;;  %v10753_v39 = vpop.f32.mrb[13].mxu0 }
 0x4c0   : > { %v10973_v44 = vadd.f32 %v10972_v36, %v10958_v62  ;;  %v10941_v48 = vadd.f32 %v10940_v49, %v10926_v25  ;;  %10828 = vst [vmem:[%s14975_s14 + $0x68] sm:$0xff] %v10753_v39  ;;  %v10928_v26 = vmul.f32 %v10890_v20, %v10753_v39  ;;  %v10755_v50 = vpop.f32.mrb[14].mxu0 }
 0x4c1   : > { %v10960_v53 = vmul.f32 %v10927_v41, %v10751_v5  ;;  %v10756_v54 = vpop.f32.mrb[15].mxu0 }
 0x4c2   : > { %v10974_v33 = vadd.f32 %v10973_v44, %v10959_v27  ;;  %v10942_v63 = vadd.f32 %v10941_v48, %v10927_v41  ;;  %v10961_v1 = vmul.f32 %v10928_v26, %v10753_v39 }
 0x4c3   : > { %v10792_v16 = vpop.f32.mrb[12].mxu1 }
 0x4c4   : > { %v10975_v19 = vadd.f32 %v10974_v33, %v10960_v53  ;;  %v10943_v31 = vadd.f32 %v10942_v63, %v10928_v26  ;;  %10829 = vst [vmem:[%s14975_s14 + $0x70] sm:$0xff] %v10792_v16  ;;  %v10929_v35 = vmul.f32 %v10894_v40, %v10792_v16  ;;  %v10794_v37 = vpop.f32.mrb[13].mxu1 }
 0x4c5   : > { %10830 = vst [vmem:[%s14975_s14 + $0x78] sm:$0xff] %v10794_v37  ;;  %v10930_v13 = vmul.f32 %v10898_v58, %v10794_v37  ;;  %v10796_v43 = vpop.f32.mrb[14].mxu1 }
 0x4c6   : > { %v10976_v45 = vadd.f32 %v10975_v19, %v10961_v1  ;;  %v10944_v47 = vadd.f32 %v10943_v31, %v10929_v35  ;;  %v10962_v55 = vmul.f32 %v10929_v35, %v10792_v16  ;;  %v10797_v57 = vpop.f32.mrb[15].mxu1 }
 0x4c7   : > { %v10963_v10 = vmul.f32 %v10930_v13, %v10794_v37 }
 0x4c8   : > { %v10977_v21 = vadd.f32 %v10976_v45, %v10962_v55  ;;  %v10945_v60 = vadd.f32 %v10944_v47, %v10930_v13 }
 0x4ca   : > { %10946 = vadd.xlane.f32.xlu0 %v10945_v60  ;;  %v10978_v12 = vadd.f32 %v10977_v21, %v10963_v10 }
 0x4cc   : > { %10979 = vadd.xlane.f32.xlu1 %v10978_v12 }
 0x557   : > { %v10947_v3 = vpop.xlane.xlu0 %10946 }
 0x559   : > { %v10980_v4 = vpop.xlane.xlu1 %10979 }
 0x55a   : > { %v10982_v59 = vsel %vm10981_vm10, %v10947_v3, %v10980_v4 }
 0x55b   : > { %10984 = vst.msk [vmem:[%s313_s22] sm:$0xff] %vm10983_vm11, %v10982_v59 }
 0x55c PF: > { %s16_s18 = sadd.s32 1, %s12475_s18  }
 0x55d   : > { %p13_p7 = scmp.ge.s32.totalorder %s16_s18, 6  }
 0x55f   :  { %15 = sbr.rel (!%p13_p7) target bundleno = 1 (0x1), region = 110 }

// kernel: resblock_forward.6
= control target key start
LH: loop header
LB: loop body
LE: loop exit
PB: predicated region body
PF: predicated region fallthrough
CT: control target
= control target key end

     0   :  { %s7470_s18 = smov 0   ;;  %s8686_s0 = inlined_call_operand.vmem [shape: bf16[27,8,8], index: 0, kind: input, shape index: {}]   ;;  %s8687_s1 = inlined_call_operand.vmem [shape: bf16[8,6656], index: 1, kind: input, shape index: {}, may-alias: {1,2}]   ;;  %s8688_s2 = inlined_call_operand.vmem [shape: bf16[8,6656], index: 2, kind: input, shape index: {}, may-alias: {1,2}]   ;;  %s8689_s3 = inlined_call_operand.vmem [shape: f32[1,6144], index: 3, kind: input, shape index: {}]   ;;  %s8690_s4 = inlined_call_operand.vmem [shape: f32[8,6144], index: 4, kind: output, shape index: {0}]   ;;  %s8691_s5 = inlined_call_operand.vmem [shape: f32[6,8,2], index: 5, kind: output, shape index: {1}]  }
   0x1 LB: > { %s7476_s19 = sadd.s32 4294967295, %s7411_s18   ;;  %p6667_p0 = scmp.ge.s32.totalorder %s7411_s18, 1  ;;  %s7411_s18 = sphi %s7470_s18, %s16_s18  }
   0x2   : > { %p228_p1 = scmp.lt.s32.totalorder %s7411_s18, 7 }
   0x4   : > { %p229_p2 = pnand %p6667_p0, %p228_p1 }
   0x5   : > { %s7481_s20 = sshll.u32 (!%p229_p2), %s7476_s19, 3  ;;  %v7413_v0 = vmov (!%p229_p2), 0   ;;  %s7414_s27 = smov (!%p229_p2), 127   ;;  %vm372_vm0 = vcmask (!%p229_p2), 1039360   ;;  %vm385_vm1 = vcmask (!%p229_p2), 1043456   ;;  %vm381_vm2 = vcmask (!%p229_p2), 64512  }
   0x6   : > { %232 = sbr.rel (%p229_p2) target bundleno = 968 (0x3c8), region = 36  ;;  %p280_p3 = scmp.lt.s32.totalorder (!%p229_p2), %s7481_s20, 51  ;;  %442 = vmatprep.mubr.bf16.mxu0 (!%p229_p2), %v7413_v0  ;;  %483 = vmatprep.mubr.bf16.mxu1 (!%p229_p2), %v7413_v0  ;;  %v6689_v23 = vld [vmem:[%s8686_s0 + $0x4] sm:$0xf] (!%p229_p2)  ;;  %v351_v43 = vld [vmem:[%s8686_s0] sm:$0xf] (!%p229_p2) }
   0x7   : > { %s6941_s21 = sadd.s32 (!%p229_p2), 8, %s7481_s20  ;;  %s7415_s7 = smov (!%p229_p2), 126   ;;  %vm785_vm3 = vcmask (!%p229_p2), 1031168   ;;  %v6706_v62 = vld [vmem:[%s8686_s0 + $0x8] sm:$0xf] (!%p229_p2)  ;;  %vm1013_vm4 = vcmask (!%p229_p2), 932864  }
   0x8   : > { %p292_p4 = scmp.lt.s32.totalorder (!%p229_p2), %s6941_s21, 51  ;;  %s7416_s8 = smov (!%p229_p2), 114   ;;  %vm1241_vm5 = vcmask (!%p229_p2), 924672   ;;  %vm1469_vm6 = vcmask (!%p229_p2), 916480   ;;  %vm1697_vm7 = vcmask (!%p229_p2), 818176   ;;  %vm1925_vm8 = vcmask (!%p229_p2), 809984  }
   0x9   : > { %s7417_s9 = smov (!%p229_p2), 113   ;;  %s7418_s10 = smov (!%p229_p2), 112   ;;  %vm2153_vm9 = vcmask (!%p229_p2), 801792   ;;  %vm2381_vm10 = vcmask (!%p229_p2), 490496   ;;  %vm2609_vm11 = vcmask (!%p229_p2), 482304   ;;  %vm2837_vm12 = vcmask (!%p229_p2), 474112  }
   0xa   : > { %s7419_s11 = smov (!%p229_p2), 100   ;;  %s7420_s12 = smov (!%p229_p2), 99   ;;  %vm3065_vm13 = vcmask (!%p229_p2), 375808   ;;  %vm3293_vm14 = vcmask (!%p229_p2), 367616   ;;  %vm3521_vm15 = vcmask (!%p229_p2), 359424  }
   0xb   : > { %s7421_s15 = smov (!%p229_p2), 98   ;;  %s7423_s24 = smov (!%p229_p2), 59  }
   0xc   : > { %s7425_s30 = smov (!%p229_p2), 46   ;;  %s7428_s17 = smov (!%p229_p2), 32  }
   0xd   : > { %s281_s22 = scalar_select %p280_p3, %s7481_s20, 51 }
   0xe   : > { %s8693_s21 = smov (!%p292_p4, %s6941_s21), 51  ;;  %s7431_s29 = smov 120  }
   0xf   : > { %s6669_s23 = sshll.u32 %s281_s22, 2  ;;  %s6672_s28 = sshll.u32 %s8693_s21, 2 }
  0x10   : > { %s283_s26 = scalar_lea.vmem %s8687_s1, %s6669_s23  ;;  %s7510_s6 = scalar_lea.vmem %s8688_s2, %s6672_s28 }
  0x11   : > { %v316_v1 = vld [vmem:[%s283_s26 + $0x8] sm:$0xff]  ;;  %v315_v3 = vld [vmem:[%s283_s26] sm:$0xff]  ;;  %v317_v6 = vld [vmem:[%s283_s26 + $0x10] sm:$0xff]  ;;  %s7422_s21 = smov 60   ;;  %s7429_s23 = smov 31  }
  0x12   : > { %v7491_v2 = vcombine.low %v316_v1, %v316_v1  ;;  %v7493_v4 = vcombine.low %v315_v3, %v315_v3  ;;  %v7495_v5 = vcombine.high %v316_v1, %v316_v1  ;;  %v7498_v7 = vcombine.high %v315_v3, %v315_v3  ;;  %v318_v9 = vld [vmem:[%s283_s26 + $0x18] sm:$0xff]  ;;  %v7519_v13 = vld [vmem:[%s7510_s6] sm:$0xff]  ;;  %s7430_s26 = smov 30   ;;  %s7434_s13 = smov 106  }
  0x13   : > { %v7501_v8 = vcombine.high %v317_v6, %v317_v6  ;;  %v7504_v10 = vcombine.low %v317_v6, %v317_v6  ;;  %v7512_v11 = vcombine.high %v318_v9, %v318_v9  ;;  %v7515_v12 = vcombine.low %v318_v9, %v318_v9  ;;  %s7435_s16 = smov 105   ;;  %s7436_s22 = smov 104  }
  0x14   : > { %358 = vrot.lane.b32.xlu1 %v7491_v2, %s7414_s27  ;;  %354 = vrot.lane.b32.xlu0 %v7493_v4, %s7414_s27  ;;  %v7524_v14 = vcombine.low %v7519_v13, %v7519_v13  ;;  %v578_v36 = vsel %vm385_vm1, %v7493_v4, 0  ;;  %v584_v41 = vsel %vm385_vm1, %v7491_v2, 0  ;;  %v7691_v6 = vcombine.high %v7519_v13, %v7519_v13  ;;  %s7437_s25 = smov 92   ;;  %s7438_s28 = smov 91  }
  0x15   : > { %v590_v45 = vsel %vm385_vm1, %v7504_v10, 0  ;;  %v596_v49 = vsel %vm385_vm1, %v7515_v12, 0  ;;  %p300_p5 = scmp.lt.s32.totalorder %s7481_s20, 47  ;;  %p310_p6 = scmp.lt.s32.totalorder %s7476_s19, 5 }
  0x17   : > { %s8695_s20 = smov (!%p300_p5, %s7481_s20), 47  ;;  %s8697_s19 = smov (!%p310_p6, %s7476_s19), 5 }
  0x18   : > { %360 = vrot.lane.b32.xlu1 %v7495_v5, %s7414_s27  ;;  %356 = vrot.lane.b32.xlu0 %v7498_v7, %s7414_s27 }
  0x1c   : > { %364 = vrot.lane.b32.xlu1 %v7501_v8, %s7414_s27  ;;  %362 = vrot.lane.b32.xlu0 %v7504_v10, %s7414_s27 }
  0x20   : > { %368 = vrot.lane.b32.xlu1 %v7512_v11, %s7414_s27  ;;  %366 = vrot.lane.b32.xlu0 %v7515_v12, %s7414_s27 }
  0x24   : > { %767 = vrot.lane.b32.xlu1 %v7493_v4, %s7415_s7  ;;  %370 = vrot.lane.b32.xlu0 %v7524_v14, %s7414_s27  ;;  %s7424_s27 = smov 58  }
  0x28   : > { %771 = vrot.lane.b32.xlu1 %v7491_v2, %s7415_s7  ;;  %769 = vrot.lane.b32.xlu0 %v7498_v7, %s7415_s7 }
  0x2c   : > { %775 = vrot.lane.b32.xlu1 %v7504_v10, %s7415_s7  ;;  %773 = vrot.lane.b32.xlu0 %v7495_v5, %s7415_s7 }
  0x30   : > { %779 = vrot.lane.b32.xlu1 %v7515_v12, %s7415_s7  ;;  %777 = vrot.lane.b32.xlu0 %v7501_v8, %s7415_s7 }
  0x34   : > { %783 = vrot.lane.b32.xlu1 %v7524_v14, %s7415_s7  ;;  %781 = vrot.lane.b32.xlu0 %v7512_v11, %s7415_s7  ;;  %s7432_s7 = smov 119  }
  0x38   : > { %997 = vrot.lane.b32.xlu1 %v7498_v7, %s7416_s8  ;;  %995 = vrot.lane.b32.xlu0 %v7493_v4, %s7416_s8 }
  0x3c   : > { %1001 = vrot.lane.b32.xlu1 %v7495_v5, %s7416_s8  ;;  %999 = vrot.lane.b32.xlu0 %v7491_v2, %s7416_s8 }
  0x40   : > { %1005 = vrot.lane.b32.xlu1 %v7501_v8, %s7416_s8  ;;  %1003 = vrot.lane.b32.xlu0 %v7504_v10, %s7416_s8 }
  0x44   : > { %1009 = vrot.lane.b32.xlu1 %v7512_v11, %s7416_s8  ;;  %1007 = vrot.lane.b32.xlu0 %v7515_v12, %s7416_s8 }
  0x48   : > { %1223 = vrot.lane.b32.xlu1 %v7493_v4, %s7417_s9  ;;  %1011 = vrot.lane.b32.xlu0 %v7524_v14, %s7416_s8 }
  0x4c   : > { %1227 = vrot.lane.b32.xlu1 %v7491_v2, %s7417_s9  ;;  %1225 = vrot.lane.b32.xlu0 %v7498_v7, %s7417_s9 }
  0x50   : > { %1231 = vrot.lane.b32.xlu1 %v7504_v10, %s7417_s9  ;;  %1229 = vrot.lane.b32.xlu0 %v7495_v5, %s7417_s9 }
  0x54   : > { %1235 = vrot.lane.b32.xlu1 %v7515_v12, %s7417_s9  ;;  %1233 = vrot.lane.b32.xlu0 %v7501_v8, %s7417_s9 }
  0x58   : > { %1239 = vrot.lane.b32.xlu1 %v7524_v14, %s7417_s9  ;;  %1237 = vrot.lane.b32.xlu0 %v7512_v11, %s7417_s9  ;;  %s7426_s9 = smov 45  }
  0x5c   : > { %1453 = vrot.lane.b32.xlu1 %v7498_v7, %s7418_s10  ;;  %1451 = vrot.lane.b32.xlu0 %v7493_v4, %s7418_s10 }
  0x60   : > { %1457 = vrot.lane.b32.xlu1 %v7495_v5, %s7418_s10  ;;  %1455 = vrot.lane.b32.xlu0 %v7491_v2, %s7418_s10 }
  0x64   : > { %1461 = vrot.lane.b32.xlu1 %v7501_v8, %s7418_s10  ;;  %1459 = vrot.lane.b32.xlu0 %v7504_v10, %s7418_s10 }
  0x68   : > { %1465 = vrot.lane.b32.xlu1 %v7512_v11, %s7418_s10  ;;  %1463 = vrot.lane.b32.xlu0 %v7515_v12, %s7418_s10 }
  0x6c   : > { %1679 = vrot.lane.b32.xlu1 %v7493_v4, %s7419_s11  ;;  %1467 = vrot.lane.b32.xlu0 %v7524_v14, %s7418_s10  ;;  %s7433_s10 = smov 118  }
  0x70   : > { %1683 = vrot.lane.b32.xlu1 %v7491_v2, %s7419_s11  ;;  %1681 = vrot.lane.b32.xlu0 %v7498_v7, %s7419_s11 }
  0x74   : > { %1687 = vrot.lane.b32.xlu1 %v7504_v10, %s7419_s11  ;;  %1685 = vrot.lane.b32.xlu0 %v7495_v5, %s7419_s11 }
  0x78   : > { %1691 = vrot.lane.b32.xlu1 %v7515_v12, %s7419_s11  ;;  %1689 = vrot.lane.b32.xlu0 %v7501_v8, %s7419_s11 }
  0x7c   : > { %1695 = vrot.lane.b32.xlu1 %v7524_v14, %s7419_s11  ;;  %1693 = vrot.lane.b32.xlu0 %v7512_v11, %s7419_s11 }
  0x80   : > { %1909 = vrot.lane.b32.xlu1 %v7498_v7, %s7420_s12  ;;  %1907 = vrot.lane.b32.xlu0 %v7493_v4, %s7420_s12 }
  0x84   : > { %1913 = vrot.lane.b32.xlu1 %v7495_v5, %s7420_s12  ;;  %1911 = vrot.lane.b32.xlu0 %v7491_v2, %s7420_s12 }
  0x86   : > { %v359_v15 = vpop.permute.xlu1 %358  ;;  %v355_v16 = vpop.permute.xlu0 %354 }
  0x88   : > { %1917 = vrot.lane.b32.xlu1 %v7501_v8, %s7420_s12  ;;  %1915 = vrot.lane.b32.xlu0 %v7504_v10, %s7420_s12 }
  0x8a   : > { %v361_v17 = vpop.permute.xlu1 %360  ;;  %v357_v18 = vpop.permute.xlu0 %356 }
  0x8b   : > { %v374_v19 = vsel %vm372_vm0, %v357_v18, %v359_v15  ;;  %v373_v20 = vsel %vm372_vm0, %v355_v16, %v357_v18  ;;  %v375_v25 = vsel %vm372_vm0, %v359_v15, %v361_v17 }
  0x8c   : > { %1921 = vrot.lane.b32.xlu1 %v7512_v11, %s7420_s12  ;;  %1919 = vrot.lane.b32.xlu0 %v7515_v12, %s7420_s12  ;;  %v387_v21 = vsel %vm385_vm1, %v373_v20, 0  ;;  %v393_v28 = vsel %vm385_vm1, %v375_v25, 0 }
  0x8d   : > { %6690 = vmatprep.subr.msk.bf16.mxu0 %vm385_vm1, %v374_v19 }
  0x8e   : > { %411 = vmatpush1.bf16.msra.mxu0 %v387_v21  ;;  %v365_v22 = vpop.permute.xlu1 %364  ;;  %v363_v24 = vpop.permute.xlu0 %362 }
  0x8f   : > { %v376_v26 = vsel %vm372_vm0, %v361_v17, %v363_v24  ;;  %v377_v27 = vsel %vm372_vm0, %v363_v24, %v365_v22 }
  0x90   : > { %2135 = vrot.lane.b32.xlu1 %v7493_v4, %s7421_s15  ;;  %1923 = vrot.lane.b32.xlu0 %v7524_v14, %s7420_s12  ;;  %v399_v32 = vsel %vm385_vm1, %v377_v27, 0  ;;  %s7427_s12 = smov 44  }
  0x91   : > { %6691 = vmatmul.mubr.msk.bf16.vlgmr.msra.gmra.mrb[0].mxu0 %vm381_vm2, %v6689_v23  ;;  %6692 = vmatprep.subr.msk.bf16.mxu1 %vm385_vm1, %v376_v26 }
  0x92   : > { %v369_v29 = vpop.permute.xlu1 %368  ;;  %524 = vmatprep.mubr.bf16.mxu0 %v7413_v0  ;;  %452 = vmatpush1.bf16.msra.mxu1 %v393_v28  ;;  %v367_v30 = vpop.permute.xlu0 %366 }
  0x93   : > { %v378_v31 = vsel %vm372_vm0, %v365_v22, %v367_v30  ;;  %v379_v34 = vsel %vm372_vm0, %v367_v30, %v369_v29  ;;  %v6715_v30 = vld [vmem:[%s8686_s0 + $0xc] sm:$0xf] }
  0x94   : > { %2139 = vrot.lane.b32.xlu1 %v7491_v2, %s7421_s15  ;;  %2137 = vrot.lane.b32.xlu0 %v7498_v7, %s7421_s15  ;;  %v405_v38 = vsel %vm385_vm1, %v379_v34, 0 }
  0x95   : > { %6694 = vmatprep.subr.msk.bf16.mxu0 %vm385_vm1, %v378_v31  ;;  %6693 = vmatmul.mubr.msk.bf16.vlgmr.msra.gmra.mrb[0].mxu1 %vm381_vm2, %v6689_v23 }
  0x96   : > { %493 = vmatpush1.bf16.msra.mxu0 %v399_v32  ;;  %v768_v33 = vpop.permute.xlu1 %767  ;;  %v371_v35 = vpop.permute.xlu0 %370  ;;  %565 = vmatprep.mubr.bf16.mxu1 %v7413_v0 }
  0x97   : > { %6698 = vmatprep.subr.msk.bf16.mxu0 %vm385_vm1, %v7498_v7  ;;  %v380_v37 = vsel %vm372_vm0, %v369_v29, %v371_v35  ;;  %vm3749_vm0 = vcmask 261120  }
  0x98   : > { %2143 = vrot.lane.b32.xlu1 %v7504_v10, %s7421_s15  ;;  %2141 = vrot.lane.b32.xlu0 %v7495_v5, %s7421_s15 }
  0x99   : > { %6695 = vmatmul.mubr.msk.bf16.vlgmr.msra.gmra.mrb[4].mxu0 %vm381_vm2, %v6689_v23  ;;  %6696 = vmatprep.subr.msk.bf16.mxu1 %vm385_vm1, %v380_v37 }
  0x9a   : > { %v772_v39 = vpop.permute.xlu1 %771  ;;  %602 = vmatpush1.bf16.msra.mxu0 %v578_v36  ;;  %534 = vmatpush1.bf16.msra.mxu1 %v405_v38  ;;  %v770_v40 = vpop.permute.xlu0 %769 }
  0x9b   : > { %633 = vmatprep.mubr.bf16.mxu0 %v7413_v0  ;;  %6700 = vmatprep.subr.msk.bf16.mxu1 %vm385_vm1, %v7495_v5  ;;  %v787_v46 = vsel %vm785_vm3, %v770_v40, %v772_v39  ;;  %v786_v50 = vsel %vm785_vm3, %v768_v33, %v770_v40 }
  0x9c   : > { %2147 = vrot.lane.b32.xlu1 %v7515_v12, %s7421_s15  ;;  %2145 = vrot.lane.b32.xlu0 %v7501_v8, %s7421_s15  ;;  %v798_v54 = vsel %vm385_vm1, %v786_v50, 0 }
  0x9d   : > { %6702 = vmatprep.subr.msk.bf16.mxu0 %vm385_vm1, %v7501_v8  ;;  %6697 = vmatmul.mubr.msk.bf16.vlgmr.msra.gmra.mrb[4].mxu1 %vm381_vm2, %v6689_v23 }
  0x9e   : > { %v776_v42 = vpop.permute.xlu1 %775  ;;  %v774_v44 = vpop.permute.xlu0 %773  ;;  %643 = vmatpush1.bf16.msra.mxu1 %v584_v41  ;;  %674 = vmatprep.mubr.bf16.mxu1 %v7413_v0 }
  0x9f   : > { %6704 = vmatprep.subr.msk.bf16.mxu1 %vm385_vm1, %v7512_v11  ;;  %v789_v52 = vsel %vm785_vm3, %v774_v44, %v776_v42  ;;  %v788_v57 = vsel %vm785_vm3, %v772_v39, %v774_v44 }
  0xa0   : > { %2151 = vrot.lane.b32.xlu1 %v7524_v14, %s7421_s15  ;;  %2149 = vrot.lane.b32.xlu0 %v7512_v11, %s7421_s15  ;;  %v804_v60 = vsel %vm385_vm1, %v788_v57, 0 }
  0xa1   : > { %6699 = vmatmul.mubr.msk.bf16.vlgmr.msra.gmra.mrb[0].mxu0 %vm381_vm2, %v351_v43 }
  0xa2   : > { %684 = vmatpush1.bf16.msra.mxu0 %v590_v45  ;;  %v780_v47 = vpop.permute.xlu1 %779  ;;  %715 = vmatprep.mubr.bf16.mxu0 %v7413_v0  ;;  %v778_v48 = vpop.permute.xlu0 %777 }
  0xa3   : > { %6707 = vmatprep.subr.msk.bf16.mxu0 %vm385_vm1, %v787_v46  ;;  %v791_v55 = vsel %vm785_vm3, %v778_v48, %v780_v47  ;;  %v790_v59 = vsel %vm785_vm3, %v776_v42, %v778_v48 }
  0xa4   : > { %2365 = vrot.lane.b32.xlu1 %v7491_v2, %s7422_s21  ;;  %2363 = vrot.lane.b32.xlu0 %v7498_v7, %s7422_s21  ;;  %v810_v4 = vsel %vm385_vm1, %v790_v59, 0 }
  0xa5   : > { %6701 = vmatmul.mubr.msk.bf16.vlgmr.msra.gmra.mrb[0].mxu1 %vm381_vm2, %v351_v43 }
  0xa6   : > { %v784_v51 = vpop.permute.xlu1 %783  ;;  %725 = vmatpush1.bf16.msra.mxu1 %v596_v49  ;;  %v782_v53 = vpop.permute.xlu0 %781  ;;  %756 = vmatprep.mubr.bf16.mxu1 %v7413_v0 }
  0xa7   : > { %6709 = vmatprep.subr.msk.bf16.mxu1 %vm385_vm1, %v789_v52  ;;  %v793_v63 = vsel %vm785_vm3, %v782_v53, %v784_v51  ;;  %v792_v15 = vsel %vm785_vm3, %v780_v47, %v782_v53  ;;  %v6724_v51 = vld [vmem:[%s8686_s0 + $0x10] sm:$0xf]  ;;  %vm3977_vm3 = vcmask 252928  }
  0xa8   : > { %2369 = vrot.lane.b32.xlu1 %v7504_v10, %s7422_s21  ;;  %2367 = vrot.lane.b32.xlu0 %v7495_v5, %s7422_s21  ;;  %v816_v18 = vsel %vm385_vm1, %v792_v15, 0 }
  0xa9   : > { %6703 = vmatmul.mubr.msk.bf16.vlgmr.msra.gmra.mrb[4].mxu0 %vm381_vm2, %v351_v43 }
  0xaa   : > { %822 = vmatpush1.bf16.msra.mxu0 %v798_v54  ;;  %v998_v56 = vpop.permute.xlu1 %997  ;;  %853 = vmatprep.mubr.bf16.mxu0 %v7413_v0  ;;  %v996_v58 = vpop.permute.xlu0 %995 }
  0xab   : > { %6711 = vmatprep.subr.msk.bf16.mxu0 %vm385_vm1, %v791_v55  ;;  %v1014_v13 = vsel %vm1013_vm4, %v996_v58, %v998_v56 }
  0xac   : > { %2373 = vrot.lane.b32.xlu1 %v7515_v12, %s7422_s21  ;;  %2371 = vrot.lane.b32.xlu0 %v7501_v8, %s7422_s21  ;;  %v1026_v22 = vsel %vm385_vm1, %v1014_v13, 0  ;;  %v6733_v13 = vld [vmem:[%s8686_s0 + $0x14] sm:$0xf] }
  0xad   : > { %6705 = vmatmul.mubr.msk.bf16.vlgmr.msra.gmra.mrb[4].mxu1 %vm381_vm2, %v351_v43 }
  0xae   : > { %v1002_v61 = vpop.permute.xlu1 %1001  ;;  %863 = vmatpush1.bf16.msra.mxu1 %v804_v60  ;;  %v1000_v1 = vpop.permute.xlu0 %999  ;;  %894 = vmatprep.mubr.bf16.mxu1 %v7413_v0 }
  0xaf   : > { %6713 = vmatprep.subr.msk.bf16.mxu1 %vm385_vm1, %v793_v63  ;;  %v1015_v3 = vsel %vm1013_vm4, %v998_v56, %v1000_v1  ;;  %v1016_v24 = vsel %vm1013_vm4, %v1000_v1, %v1002_v61 }
  0xb0   : > { %2377 = vrot.lane.b32.xlu1 %v7524_v14, %s7422_s21  ;;  %2375 = vrot.lane.b32.xlu0 %v7512_v11, %s7422_s21  ;;  %v1032_v28 = vsel %vm385_vm1, %v1016_v24, 0 }
  0xb1   : > { %6708 = vmatmul.mubr.msk.bf16.vlgmr.msra.gmra.mrb[0].mxu0 %vm381_vm2, %v6706_v62 }
  0xb2   : > { %904 = vmatpush1.bf16.msra.mxu0 %v810_v4  ;;  %v1006_v9 = vpop.permute.xlu1 %1005  ;;  %935 = vmatprep.mubr.bf16.mxu0 %v7413_v0  ;;  %v1004_v16 = vpop.permute.xlu0 %1003 }
  0xb3   : > { %6716 = vmatprep.subr.msk.bf16.mxu0 %vm385_vm1, %v1015_v3  ;;  %v1017_v17 = vsel %vm1013_vm4, %v1002_v61, %v1004_v16  ;;  %v1018_v27 = vsel %vm1013_vm4, %v1004_v16, %v1006_v9 }
  0xb4   : > { %2591 = vrot.lane.b32.xlu1 %v7498_v7, %s7423_s24  ;;  %2379 = vrot.lane.b32.xlu0 %v7691_v6, %s7422_s21  ;;  %v1038_v33 = vsel %vm385_vm1, %v1018_v27, 0 }
  0xb5   : > { %6710 = vmatmul.mubr.msk.bf16.vlgmr.msra.gmra.mrb[0].mxu1 %vm381_vm2, %v6706_v62 }
  0xb6   : > { %v1010_v19 = vpop.permute.xlu1 %1009  ;;  %945 = vmatpush1.bf16.msra.mxu1 %v816_v18  ;;  %v1008_v20 = vpop.permute.xlu0 %1007  ;;  %976 = vmatprep.mubr.bf16.mxu1 %v7413_v0 }
  0xb7   : > { %6718 = vmatprep.subr.msk.bf16.mxu1 %vm385_vm1, %v1017_v17  ;;  %v1019_v21 = vsel %vm1013_vm4, %v1006_v9, %v1008_v20  ;;  %v1020_v35 = vsel %vm1013_vm4, %v1008_v20, %v1010_v19 }
  0xb8   : > { %2595 = vrot.lane.b32.xlu1 %v7495_v5, %s7423_s24  ;;  %2593 = vrot.lane.b32.xlu0 %v7491_v2, %s7423_s24  ;;  %v1044_v39 = vsel %vm385_vm1, %v1020_v35, 0 }
  0xb9   : > { %6712 = vmatmul.mubr.msk.bf16.vlgmr.msra.gmra.mrb[4].mxu0 %vm381_vm2, %v6706_v62 }
  0xba   : > { %1050 = vmatpush1.bf16.msra.mxu0 %v1026_v22  ;;  %v1224_v23 = vpop.permute.xlu1 %1223  ;;  %1081 = vmatprep.mubr.bf16.mxu0 %v7413_v0  ;;  %v1012_v25 = vpop.permute.xlu0 %1011 }
  0xbb   : > { %6720 = vmatprep.subr.msk.bf16.mxu0 %vm385_vm1, %v1019_v21  ;;  %v1021_v26 = vsel %vm1013_vm4, %v1010_v19, %v1012_v25  ;;  %vm4205_vm4 = vcmask 244736  }
  0xbc   : > { %2599 = vrot.lane.b32.xlu1 %v7501_v8, %s7423_s24  ;;  %2597 = vrot.lane.b32.xlu0 %v7504_v10, %s7423_s24 }
  0xbd   : > { %6714 = vmatmul.mubr.msk.bf16.vlgmr.msra.gmra.mrb[4].mxu1 %vm381_vm2, %v6706_v62 }
  0xbe   : > { %v1228_v29 = vpop.permute.xlu1 %1227  ;;  %1091 = vmatpush1.bf16.msra.mxu1 %v1032_v28  ;;  %v1226_v31 = vpop.permute.xlu0 %1225  ;;  %1122 = vmatprep.mubr.bf16.mxu1 %v7413_v0 }
  0xbf   : > { %6722 = vmatprep.subr.msk.bf16.mxu1 %vm385_vm1, %v1021_v26  ;;  %v1243_v32 = vsel %vm1241_vm5, %v1226_v31, %v1228_v29  ;;  %v1242_v38 = vsel %vm1241_vm5, %v1224_v23, %v1226_v31 }
  0xc0   : > { %2603 = vrot.lane.b32.xlu1 %v7512_v11, %s7423_s24  ;;  %2601 = vrot.lane.b32.xlu0 %v7515_v12, %s7423_s24  ;;  %v1254_v43 = vsel %vm385_vm1, %v1242_v38, 0  ;;  %v6742_v38 = vld [vmem:[%s8686_s0 + $0x18] sm:$0xf] }
  0xc1   : > { %6717 = vmatmul.mubr.msk.bf16.vlgmr.msra.gmra.mrb[0].mxu0 %vm381_vm2, %v6715_v30 }
  0xc2   : > { %1132 = vmatpush1.bf16.msra.mxu0 %v1038_v33  ;;  %v1232_v34 = vpop.permute.xlu1 %1231  ;;  %1163 = vmatprep.mubr.bf16.mxu0 %v7413_v0  ;;  %v1230_v36 = vpop.permute.xlu0 %1229 }
  0xc3   : > { %6725 = vmatprep.subr.msk.bf16.mxu0 %vm385_vm1, %v1243_v32  ;;  %v1245_v37 = vsel %vm1241_vm5, %v1230_v36, %v1232_v34  ;;  %v1244_v45 = vsel %vm1241_vm5, %v1228_v29, %v1230_v36 }
  0xc4   : > { %2607 = vrot.lane.b32.xlu1 %v7691_v6, %s7423_s24  ;;  %2605 = vrot.lane.b32.xlu0 %v7524_v14, %s7423_s24  ;;  %v1260_v49 = vsel %vm385_vm1, %v1244_v45, 0 }
  0xc5   : > { %6719 = vmatmul.mubr.msk.bf16.vlgmr.msra.gmra.mrb[0].mxu1 %vm381_vm2, %v6715_v30 }
  0xc6   : > { %v1236_v40 = vpop.permute.xlu1 %1235  ;;  %1173 = vmatpush1.bf16.msra.mxu1 %v1044_v39  ;;  %v1234_v41 = vpop.permute.xlu0 %1233  ;;  %1204 = vmatprep.mubr.bf16.mxu1 %v7413_v0 }
  0xc7   : > { %6727 = vmatprep.subr.msk.bf16.mxu1 %vm385_vm1, %v1245_v37  ;;  %v1247_v42 = vsel %vm1241_vm5, %v1234_v41, %v1236_v40  ;;  %v1246_v48 = vsel %vm1241_vm5, %v1232_v34, %v1234_v41 }
  0xc8   : > { %2821 = vrot.lane.b32.xlu1 %v7491_v2, %s7424_s27  ;;  %2819 = vrot.lane.b32.xlu0 %v7498_v7, %s7424_s27  ;;  %v1266_v53 = vsel %vm385_vm1, %v1246_v48, 0 }
  0xc9   : > { %6721 = vmatmul.mubr.msk.bf16.vlgmr.msra.gmra.mrb[4].mxu0 %vm381_vm2, %v6715_v30 }
  0xca   : > { %1278 = vmatpush1.bf16.msra.mxu0 %v1254_v43  ;;  %v1240_v44 = vpop.permute.xlu1 %1239  ;;  %1309 = vmatprep.mubr.bf16.mxu0 %v7413_v0  ;;  %v1238_v46 = vpop.permute.xlu0 %1237 }
  0xcb   : > { %6729 = vmatprep.subr.msk.bf16.mxu0 %vm385_vm1, %v1247_v42  ;;  %v1249_v47 = vsel %vm1241_vm5, %v1238_v46, %v1240_v44  ;;  %v1248_v55 = vsel %vm1241_vm5, %v1236_v40, %v1238_v46  ;;  %vm4433_vm5 = vcmask 982016  }
  0xcc   : > { %2825 = vrot.lane.b32.xlu1 %v7504_v10, %s7424_s27  ;;  %2823 = vrot.lane.b32.xlu0 %v7495_v5, %s7424_s27  ;;  %v1272_v59 = vsel %vm385_vm1, %v1248_v55, 0 }
  0xcd   : > { %6723 = vmatmul.mubr.msk.bf16.vlgmr.msra.gmra.mrb[4].mxu1 %vm381_vm2, %v6715_v30 }
  0xce   : > { %v1454_v50 = vpop.permute.xlu1 %1453  ;;  %1319 = vmatpush1.bf16.msra.mxu1 %v1260_v49  ;;  %v1452_v52 = vpop.permute.xlu0 %1451  ;;  %1350 = vmatprep.mubr.bf16.mxu1 %v7413_v0 }
  0xcf   : > { %6731 = vmatprep.subr.msk.bf16.mxu1 %vm385_vm1, %v1249_v47  ;;  %v1470_v58 = vsel %vm1469_vm6, %v1452_v52, %v1454_v50 }
  0xd0   : > { %2829 = vrot.lane.b32.xlu1 %v7515_v12, %s7424_s27  ;;  %2827 = vrot.lane.b32.xlu0 %v7501_v8, %s7424_s27  ;;  %v1482_v63 = vsel %vm385_vm1, %v1470_v58, 0 }
  0xd1   : > { %6726 = vmatmul.mubr.msk.bf16.vlgmr.msra.gmra.mrb[0].mxu0 %vm381_vm2, %v6724_v51 }
  0xd2   : > { %1360 = vmatpush1.bf16.msra.mxu0 %v1266_v53  ;;  %v1458_v54 = vpop.permute.xlu1 %1457  ;;  %1391 = vmatprep.mubr.bf16.mxu0 %v7413_v0  ;;  %v1456_v56 = vpop.permute.xlu0 %1455 }
  0xd3   : > { %v1471_v57 = vsel %vm1469_vm6, %v1454_v50, %v1456_v56  ;;  %v1472_v3 = vsel %vm1469_vm6, %v1456_v56, %v1458_v54 }
  0xd4   : > { %2833 = vrot.lane.b32.xlu1 %v7524_v14, %s7424_s27  ;;  %2831 = vrot.lane.b32.xlu0 %v7512_v11, %s7424_s27  ;;  %v1488_v16 = vsel %vm385_vm1, %v1472_v3, 0 }
  0xd5   : > { %6734 = vmatprep.subr.msk.bf16.mxu0 %vm385_vm1, %v1471_v57  ;;  %6728 = vmatmul.mubr.msk.bf16.vlgmr.msra.gmra.mrb[0].mxu1 %vm381_vm2, %v6724_v51 }
  0xd6   : > { %v1462_v60 = vpop.permute.xlu1 %1461  ;;  %1401 = vmatpush1.bf16.msra.mxu1 %v1272_v59  ;;  %v1460_v61 = vpop.permute.xlu0 %1459  ;;  %1432 = vmatprep.mubr.bf16.mxu1 %v7413_v0  ;;  %v6751_v59 = vld [vmem:[%s8686_s0 + $0x1c] sm:$0xf] }
  0xd7   : > { %v1473_v62 = vsel %vm1469_vm6, %v1458_v54, %v1460_v61  ;;  %v1474_v15 = vsel %vm1469_vm6, %v1460_v61, %v1462_v60 }
  0xd8   : > { %3047 = vrot.lane.b32.xlu1 %v7498_v7, %s7425_s30  ;;  %2835 = vrot.lane.b32.xlu0 %v7691_v6, %s7424_s27  ;;  %v1494_v20 = vsel %vm385_vm1, %v1474_v15, 0  ;;  %s6675_s27 = sshll.u32 %s8695_s20, 3 }
  0xd9   : > { %6730 = vmatmul.mubr.msk.bf16.vlgmr.msra.gmra.mrb[4].mxu0 %vm381_vm2, %v6724_v51  ;;  %6736 = vmatprep.subr.msk.bf16.mxu1 %vm385_vm1, %v1473_v62 }
  0xda   : > { %1506 = vmatpush1.bf16.msra.mxu0 %v1482_v63  ;;  %v1466_v1 = vpop.permute.xlu1 %1465  ;;  %v1464_v4 = vpop.permute.xlu0 %1463  ;;  %1537 = vmatprep.mubr.bf16.mxu0 %v7413_v0 }
  0xdb   : > { %v1475_v9 = vsel %vm1469_vm6, %v1462_v60, %v1464_v4  ;;  %v1476_v22 = vsel %vm1469_vm6, %v1464_v4, %v1466_v1 }
  0xdc   : > { %3051 = vrot.lane.b32.xlu1 %v7495_v5, %s7425_s30  ;;  %3049 = vrot.lane.b32.xlu0 %v7491_v2, %s7425_s30  ;;  %v1500_v26 = vsel %vm385_vm1, %v1476_v22, 0 }
  0xdd   : > { %6738 = vmatprep.subr.msk.bf16.mxu0 %vm385_vm1, %v1475_v9  ;;  %6732 = vmatmul.mubr.msk.bf16.vlgmr.msra.gmra.mrb[4].mxu1 %vm381_vm2, %v6724_v51 }
  0xde   : > { %v1680_v17 = vpop.permute.xlu1 %1679  ;;  %1547 = vmatpush1.bf16.msra.mxu1 %v1488_v16  ;;  %v1468_v18 = vpop.permute.xlu0 %1467  ;;  %1578 = vmatprep.mubr.bf16.mxu1 %v7413_v0 }
  0xdf   : > { %v1477_v19 = vsel %vm1469_vm6, %v1466_v1, %v1468_v18  ;;  %vm4661_vm6 = vcmask 973824  }
  0xe0   : > { %3055 = vrot.lane.b32.xlu1 %v7501_v8, %s7425_s30  ;;  %3053 = vrot.lane.b32.xlu0 %v7504_v10, %s7425_s30 }
  0xe1   : > { %6735 = vmatmul.mubr.msk.bf16.vlgmr.msra.gmra.mrb[0].mxu0 %vm381_vm2, %v6733_v13  ;;  %6740 = vmatprep.subr.msk.bf16.mxu1 %vm385_vm1, %v1477_v19 }
  0xe2   : > { %1588 = vmatpush1.bf16.msra.mxu0 %v1494_v20  ;;  %v1684_v21 = vpop.permute.xlu1 %1683  ;;  %v1682_v23 = vpop.permute.xlu0 %1681  ;;  %1619 = vmatprep.mubr.bf16.mxu0 %v7413_v0 }
  0xe3   : > { %v1699_v24 = vsel %vm1697_vm7, %v1682_v23, %v1684_v21  ;;  %v1698_v25 = vsel %vm1697_vm7, %v1680_v17, %v1682_v23 }
  0xe4   : > { %3059 = vrot.lane.b32.xlu1 %v7512_v11, %s7425_s30  ;;  %3057 = vrot.lane.b32.xlu0 %v7515_v12, %s7425_s30  ;;  %v1710_v30 = vsel %vm385_vm1, %v1698_v25, 0  ;;  %v6760_v25 = vld [vmem:[%s8686_s0 + $0x20] sm:$0xf] }
  0xe5   : > { %6743 = vmatprep.subr.msk.bf16.mxu0 %vm385_vm1, %v1699_v24  ;;  %6737 = vmatmul.mubr.msk.bf16.vlgmr.msra.gmra.mrb[0].mxu1 %vm381_vm2, %v6733_v13 }
  0xe6   : > { %v1688_v27 = vpop.permute.xlu1 %1687  ;;  %1629 = vmatpush1.bf16.msra.mxu1 %v1500_v26  ;;  %v1686_v28 = vpop.permute.xlu0 %1685  ;;  %1660 = vmatprep.mubr.bf16.mxu1 %v7413_v0 }
  0xe7   : > { %v1701_v29 = vsel %vm1697_vm7, %v1686_v28, %v1688_v27  ;;  %v1700_v32 = vsel %vm1697_vm7, %v1684_v21, %v1686_v28 }
  0xe8   : > { %3063 = vrot.lane.b32.xlu1 %v7691_v6, %s7425_s30  ;;  %3061 = vrot.lane.b32.xlu0 %v7524_v14, %s7425_s30  ;;  %v1716_v36 = vsel %vm385_vm1, %v1700_v32, 0  ;;  %s7439_s30 = smov 90  }
  0xe9   : > { %6739 = vmatmul.mubr.msk.bf16.vlgmr.msra.gmra.mrb[4].mxu0 %vm381_vm2, %v6733_v13  ;;  %6745 = vmatprep.subr.msk.bf16.mxu1 %vm385_vm1, %v1701_v29 }
  0xea   : > { %1734 = vmatpush1.bf16.msra.mxu0 %v1710_v30  ;;  %v1692_v31 = vpop.permute.xlu1 %1691  ;;  %v1690_v33 = vpop.permute.xlu0 %1689  ;;  %1765 = vmatprep.mubr.bf16.mxu0 %v7413_v0 }
  0xeb   : > { %v1703_v34 = vsel %vm1697_vm7, %v1690_v33, %v1692_v31  ;;  %v1702_v35 = vsel %vm1697_vm7, %v1688_v27, %v1690_v33 }
  0xec   : > { %3277 = vrot.lane.b32.xlu1 %v7491_v2, %s7426_s9  ;;  %3275 = vrot.lane.b32.xlu0 %v7498_v7, %s7426_s9  ;;  %v1722_v41 = vsel %vm385_vm1, %v1702_v35, 0 }
  0xed   : > { %6747 = vmatprep.subr.msk.bf16.mxu0 %vm385_vm1, %v1703_v34  ;;  %6741 = vmatmul.mubr.msk.bf16.vlgmr.msra.gmra.mrb[4].mxu1 %vm381_vm2, %v6733_v13 }
  0xee   : > { %v1696_v37 = vpop.permute.xlu1 %1695  ;;  %1775 = vmatpush1.bf16.msra.mxu1 %v1716_v36  ;;  %v1694_v39 = vpop.permute.xlu0 %1693  ;;  %1806 = vmatprep.mubr.bf16.mxu1 %v7413_v0 }
  0xef   : > { %v1705_v40 = vsel %vm1697_vm7, %v1694_v39, %v1696_v37  ;;  %v1704_v43 = vsel %vm1697_vm7, %v1692_v31, %v1694_v39  ;;  %vm4889_vm7 = vcmask 965632  }
  0xf0   : > { %3281 = vrot.lane.b32.xlu1 %v7504_v10, %s7426_s9  ;;  %3279 = vrot.lane.b32.xlu0 %v7495_v5, %s7426_s9  ;;  %v1728_v45 = vsel %vm385_vm1, %v1704_v43, 0 }
  0xf1   : > { %6744 = vmatmul.mubr.msk.bf16.vlgmr.msra.gmra.mrb[0].mxu0 %vm381_vm2, %v6742_v38  ;;  %6749 = vmatprep.subr.msk.bf16.mxu1 %vm385_vm1, %v1705_v40 }
  0xf2   : > { %1816 = vmatpush1.bf16.msra.mxu0 %v1722_v41  ;;  %v1910_v42 = vpop.permute.xlu1 %1909  ;;  %v1908_v44 = vpop.permute.xlu0 %1907  ;;  %1847 = vmatprep.mubr.bf16.mxu0 %v7413_v0 }
  0xf3   : > { %v1926_v47 = vsel %vm1925_vm8, %v1908_v44, %v1910_v42  ;;  %v6769_v44 = vld [vmem:[%s8686_s0 + $0x24] sm:$0xf] }
  0xf4   : > { %3285 = vrot.lane.b32.xlu1 %v7515_v12, %s7426_s9  ;;  %3283 = vrot.lane.b32.xlu0 %v7501_v8, %s7426_s9  ;;  %v1938_v50 = vsel %vm385_vm1, %v1926_v47, 0 }
  0xf5   : > { %6746 = vmatmul.mubr.msk.bf16.vlgmr.msra.gmra.mrb[0].mxu1 %vm381_vm2, %v6742_v38 }
  0xf6   : > { %v1914_v46 = vpop.permute.xlu1 %1913  ;;  %1857 = vmatpush1.bf16.msra.mxu1 %v1728_v45  ;;  %v1912_v48 = vpop.permute.xlu0 %1911  ;;  %1888 = vmatprep.mubr.bf16.mxu1 %v7413_v0 }
  0xf7   : > { %v1927_v49 = vsel %vm1925_vm8, %v1910_v42, %v1912_v48  ;;  %v1928_v52 = vsel %vm1925_vm8, %v1912_v48, %v1914_v46 }
  0xf8   : > { %3289 = vrot.lane.b32.xlu1 %v7524_v14, %s7426_s9  ;;  %3287 = vrot.lane.b32.xlu0 %v7512_v11, %s7426_s9  ;;  %v1944_v55 = vsel %vm385_vm1, %v1928_v52, 0 }
  0xf9   : > { %6752 = vmatprep.subr.msk.bf16.mxu0 %vm385_vm1, %v1927_v49  ;;  %6748 = vmatmul.mubr.msk.bf16.vlgmr.msra.gmra.mrb[4].mxu0 %vm381_vm2, %v6742_v38 }
  0xfa   : > { %v1918_v51 = vpop.permute.xlu1 %1917  ;;  %1962 = vmatpush1.bf16.msra.mxu0 %v1938_v50  ;;  %v1916_v53 = vpop.permute.xlu0 %1915  ;;  %1993 = vmatprep.mubr.bf16.mxu0 %v7413_v0 }
  0xfb   : > { %v1929_v54 = vsel %vm1925_vm8, %v1914_v46, %v1916_v53  ;;  %v1930_v57 = vsel %vm1925_vm8, %v1916_v53, %v1918_v51 }
  0xfc   : > { %3503 = vrot.lane.b32.xlu1 %v7498_v7, %s7427_s12  ;;  %3291 = vrot.lane.b32.xlu0 %v7691_v6, %s7426_s9  ;;  %v1950_v61 = vsel %vm385_vm1, %v1930_v57, 0 }
  0xfd   : > { %6754 = vmatprep.subr.msk.bf16.mxu1 %vm385_vm1, %v1929_v54  ;;  %6750 = vmatmul.mubr.msk.bf16.vlgmr.msra.gmra.mrb[4].mxu1 %vm381_vm2, %v6742_v38 }
  0xfe   : > { %v1922_v56 = vpop.permute.xlu1 %1921  ;;  %2003 = vmatpush1.bf16.msra.mxu1 %v1944_v55  ;;  %v1920_v58 = vpop.permute.xlu0 %1919  ;;  %2034 = vmatprep.mubr.bf16.mxu1 %v7413_v0 }
  0xff   : > { %v1931_v60 = vsel %vm1925_vm8, %v1918_v51, %v1920_v58  ;;  %v1932_v63 = vsel %vm1925_vm8, %v1920_v58, %v1922_v56 }
 0x100   : > { %3507 = vrot.lane.b32.xlu1 %v7495_v5, %s7427_s12  ;;  %3505 = vrot.lane.b32.xlu0 %v7491_v2, %s7427_s12  ;;  %v1956_v4 = vsel %vm385_vm1, %v1932_v63, 0 }
 0x101   : > { %6756 = vmatprep.subr.msk.bf16.mxu0 %vm385_vm1, %v1931_v60  ;;  %6753 = vmatmul.mubr.msk.bf16.vlgmr.msra.gmra.mrb[0].mxu0 %vm381_vm2, %v6751_v59 }
 0x102   : > { %v2136_v62 = vpop.permute.xlu1 %2135  ;;  %2044 = vmatpush1.bf16.msra.mxu0 %v1950_v61  ;;  %v1924_v1 = vpop.permute.xlu0 %1923  ;;  %2075 = vmatprep.mubr.bf16.mxu0 %v7413_v0 }
 0x103   : > { %v1933_v3 = vsel %vm1925_vm8, %v1922_v56, %v1924_v1  ;;  %v6778_v1 = vld [vmem:[%s8686_s0 + $0x28] sm:$0xf]  ;;  %vm5117_vm8 = vcmask 867328  }
 0x104   : > { %3511 = vrot.lane.b32.xlu1 %v7501_v8, %s7427_s12  ;;  %3509 = vrot.lane.b32.xlu0 %v7504_v10, %s7427_s12 }
 0x105   : > { %6758 = vmatprep.subr.msk.bf16.mxu1 %vm385_vm1, %v1933_v3  ;;  %6755 = vmatmul.mubr.msk.bf16.vlgmr.msra.gmra.mrb[0].mxu1 %vm381_vm2, %v6751_v59 }
 0x106   : > { %v2140_v9 = vpop.permute.xlu1 %2139  ;;  %2085 = vmatpush1.bf16.msra.mxu1 %v1956_v4  ;;  %v2138_v15 = vpop.permute.xlu0 %2137  ;;  %2116 = vmatprep.mubr.bf16.mxu1 %v7413_v0 }
 0x107   : > { %v2154_v16 = vsel %vm2153_vm9, %v2136_v62, %v2138_v15  ;;  %v2155_v17 = vsel %vm2153_vm9, %v2138_v15, %v2140_v9 }
 0x108   : > { %3515 = vrot.lane.b32.xlu1 %v7512_v11, %s7427_s12  ;;  %3513 = vrot.lane.b32.xlu0 %v7515_v12, %s7427_s12  ;;  %v2166_v13 = vsel %vm385_vm1, %v2154_v16, 0 }
 0x109   : > { %6761 = vmatprep.subr.msk.bf16.mxu0 %vm385_vm1, %v2155_v17  ;;  %6757 = vmatmul.mubr.msk.bf16.vlgmr.msra.gmra.mrb[4].mxu0 %vm381_vm2, %v6751_v59 }
 0x10a   : > { %v2144_v18 = vpop.permute.xlu1 %2143  ;;  %2190 = vmatpush1.bf16.msra.mxu0 %v2166_v13  ;;  %v2142_v19 = vpop.permute.xlu0 %2141  ;;  %2221 = vmatprep.mubr.bf16.mxu0 %v7413_v0 }
 0x10b   : > { %v2156_v20 = vsel %vm2153_vm9, %v2140_v9, %v2142_v19  ;;  %v2157_v21 = vsel %vm2153_vm9, %v2142_v19, %v2144_v18 }
 0x10c   : > { %3519 = vrot.lane.b32.xlu1 %v7691_v6, %s7427_s12  ;;  %3517 = vrot.lane.b32.xlu0 %v7524_v14, %s7427_s12  ;;  %v2172_v22 = vsel %vm385_vm1, %v2156_v20, 0 }
 0x10d   : > { %6763 = vmatprep.subr.msk.bf16.mxu1 %vm385_vm1, %v2157_v21  ;;  %6759 = vmatmul.mubr.msk.bf16.vlgmr.msra.gmra.mrb[4].mxu1 %vm381_vm2, %v6751_v59 }
 0x10e   : > { %v2148_v23 = vpop.permute.xlu1 %2147  ;;  %2231 = vmatpush1.bf16.msra.mxu1 %v2172_v22  ;;  %v2146_v24 = vpop.permute.xlu0 %2145  ;;  %2262 = vmatprep.mubr.bf16.mxu1 %v7413_v0 }
 0x10f   : > { %v2158_v26 = vsel %vm2153_vm9, %v2144_v18, %v2146_v24  ;;  %v2159_v27 = vsel %vm2153_vm9, %v2146_v24, %v2148_v23 }
 0x110   : > { %3733 = vrot.lane.b32.xlu1 %v7491_v2, %s7428_s17  ;;  %3731 = vrot.lane.b32.xlu0 %v7498_v7, %s7428_s17  ;;  %v2178_v28 = vsel %vm385_vm1, %v2158_v26, 0 }
 0x111   : > { %6765 = vmatprep.subr.msk.bf16.mxu0 %vm385_vm1, %v2159_v27  ;;  %6762 = vmatmul.mubr.msk.bf16.vlgmr.msra.gmra.mrb[0].mxu0 %vm381_vm2, %v6760_v25 }
 0x112   : > { %v2152_v29 = vpop.permute.xlu1 %2151  ;;  %2272 = vmatpush1.bf16.msra.mxu0 %v2178_v28  ;;  %v2150_v30 = vpop.permute.xlu0 %2149  ;;  %2303 = vmatprep.mubr.bf16.mxu0 %v7413_v0 }
 0x113   : > { %v2160_v31 = vsel %vm2153_vm9, %v2148_v23, %v2150_v30  ;;  %v2161_v32 = vsel %vm2153_vm9, %v2150_v30, %v2152_v29  ;;  %vm5345_vm9 = vcmask 859136  }
 0x114   : > { %3737 = vrot.lane.b32.xlu1 %v7504_v10, %s7428_s17  ;;  %3735 = vrot.lane.b32.xlu0 %v7495_v5, %s7428_s17  ;;  %v2184_v33 = vsel %vm385_vm1, %v2160_v31, 0 }
 0x115   : > { %6767 = vmatprep.subr.msk.bf16.mxu1 %vm385_vm1, %v2161_v32  ;;  %6764 = vmatmul.mubr.msk.bf16.vlgmr.msra.gmra.mrb[0].mxu1 %vm381_vm2, %v6760_v25  ;;  %v6787_v32 = vld [vmem:[%s8686_s0 + $0x2c] sm:$0xf] }
 0x116   : > { %v2366_v34 = vpop.permute.xlu1 %2365  ;;  %2313 = vmatpush1.bf16.msra.mxu1 %v2184_v33  ;;  %v2364_v35 = vpop.permute.xlu0 %2363  ;;  %2344 = vmatprep.mubr.bf16.mxu1 %v7413_v0 }
 0x117   : > { %v2382_v36 = vsel %vm2381_vm10, %v2364_v35, %v2366_v34 }
 0x118   : > { %3741 = vrot.lane.b32.xlu1 %v7515_v12, %s7428_s17  ;;  %3739 = vrot.lane.b32.xlu0 %v7501_v8, %s7428_s17  ;;  %v2394_v40 = vsel %vm385_vm1, %v2382_v36, 0 }
 0x119   : > { %6766 = vmatmul.mubr.msk.bf16.vlgmr.msra.gmra.mrb[4].mxu0 %vm381_vm2, %v6760_v25 }
 0x11a   : > { %v2370_v37 = vpop.permute.xlu1 %2369  ;;  %v2368_v38 = vpop.permute.xlu0 %2367  ;;  %2449 = vmatprep.mubr.bf16.mxu0 %v7413_v0 }
 0x11b   : > { %v2383_v39 = vsel %vm2381_vm10, %v2366_v34, %v2368_v38  ;;  %v2384_v41 = vsel %vm2381_vm10, %v2368_v38, %v2370_v37 }
 0x11c   : > { %3745 = vrot.lane.b32.xlu1 %v7524_v14, %s7428_s17  ;;  %3743 = vrot.lane.b32.xlu0 %v7512_v11, %s7428_s17  ;;  %v2400_v46 = vsel %vm385_vm1, %v2384_v41, 0 }
 0x11d   : > { %6770 = vmatprep.subr.msk.bf16.mxu0 %vm385_vm1, %v2383_v39  ;;  %6768 = vmatmul.mubr.msk.bf16.vlgmr.msra.gmra.mrb[4].mxu1 %vm381_vm2, %v6760_v25 }
 0x11e   : > { %2418 = vmatpush1.bf16.msra.mxu0 %v2394_v40  ;;  %v2374_v42 = vpop.permute.xlu1 %2373  ;;  %v2372_v43 = vpop.permute.xlu0 %2371  ;;  %2490 = vmatprep.mubr.bf16.mxu1 %v7413_v0 }
 0x11f   : > { %v2385_v45 = vsel %vm2381_vm10, %v2370_v37, %v2372_v43  ;;  %v2386_v47 = vsel %vm2381_vm10, %v2372_v43, %v2374_v42 }
 0x120   : > { %3959 = vrot.lane.b32.xlu1 %v7498_v7, %s7429_s23  ;;  %3747 = vrot.lane.b32.xlu0 %v7691_v6, %s7428_s17  ;;  %v2406_v51 = vsel %vm385_vm1, %v2386_v47, 0 }
 0x121   : > { %6772 = vmatprep.subr.msk.bf16.mxu1 %vm385_vm1, %v2385_v45  ;;  %6771 = vmatmul.mubr.msk.bf16.vlgmr.msra.gmra.mrb[0].mxu0 %vm381_vm2, %v6769_v44  ;;  %v320_v45 = vld [vmem:[%s7510_s6 + $0x8] sm:$0xff]  ;;  %s8668_s6 = scalar_lea.vmem %s8690_s4, %s6675_s27 }
 0x122   : > { %2459 = vmatpush1.bf16.msra.mxu1 %v2400_v46  ;;  %v2378_v48 = vpop.permute.xlu1 %2377  ;;  %v2376_v49 = vpop.permute.xlu0 %2375  ;;  %2531 = vmatprep.mubr.bf16.mxu0 %v7413_v0 }
 0x123   : > { %v2387_v50 = vsel %vm2381_vm10, %v2374_v42, %v2376_v49  ;;  %v2388_v52 = vsel %vm2381_vm10, %v2376_v49, %v2378_v48 }
 0x124   : > { %3963 = vrot.lane.b32.xlu1 %v7495_v5, %s7429_s23  ;;  %3961 = vrot.lane.b32.xlu0 %v7491_v2, %s7429_s23  ;;  %v2412_v56 = vsel %vm385_vm1, %v2388_v52, 0  ;;  %v8109_v52 = vcombine.low %v320_v45, %v320_v45 }
 0x125   : > { %6774 = vmatprep.subr.msk.bf16.mxu0 %vm385_vm1, %v2387_v50  ;;  %6773 = vmatmul.mubr.msk.bf16.vlgmr.msra.gmra.mrb[0].mxu1 %vm381_vm2, %v6769_v44  ;;  %v8103_v50 = vcombine.high %v320_v45, %v320_v45 }
 0x126   : > { %2500 = vmatpush1.bf16.msra.mxu0 %v2406_v51  ;;  %v2592_v53 = vpop.permute.xlu1 %2591  ;;  %v2380_v54 = vpop.permute.xlu0 %2379  ;;  %2572 = vmatprep.mubr.bf16.mxu1 %v7413_v0 }
 0x127   : > { %v2389_v55 = vsel %vm2381_vm10, %v2378_v48, %v2380_v54  ;;  %vm5573_vm10 = vcmask 850944  }
 0x128   : > { %3967 = vrot.lane.b32.xlu1 %v7501_v8, %s7429_s23  ;;  %3965 = vrot.lane.b32.xlu0 %v7504_v10, %s7429_s23 }
 0x129   : > { %6776 = vmatprep.subr.msk.bf16.mxu1 %vm385_vm1, %v2389_v55  ;;  %6775 = vmatmul.mubr.msk.bf16.vlgmr.msra.gmra.mrb[4].mxu0 %vm381_vm2, %v6769_v44  ;;  %v6796_v55 = vld [vmem:[%s8686_s0 + $0x30] sm:$0xf] }
 0x12a   : > { %2541 = vmatpush1.bf16.msra.mxu1 %v2412_v56  ;;  %v2596_v57 = vpop.permute.xlu1 %2595  ;;  %v2594_v58 = vpop.permute.xlu0 %2593  ;;  %2677 = vmatprep.mubr.bf16.mxu0 %v7413_v0 }
 0x12b   : > { %v2610_v59 = vsel %vm2609_vm11, %v2592_v53, %v2594_v58  ;;  %v2611_v60 = vsel %vm2609_vm11, %v2594_v58, %v2596_v57 }
 0x12c   : > { %3971 = vrot.lane.b32.xlu1 %v7512_v11, %s7429_s23  ;;  %3969 = vrot.lane.b32.xlu0 %v7515_v12, %s7429_s23  ;;  %v2622_v61 = vsel %vm385_vm1, %v2610_v59, 0 }
 0x12d   : > { %6779 = vmatprep.subr.msk.bf16.mxu0 %vm385_vm1, %v2611_v60  ;;  %6777 = vmatmul.mubr.msk.bf16.vlgmr.msra.gmra.mrb[4].mxu1 %vm381_vm2, %v6769_v44 }
 0x12e   : > { %2646 = vmatpush1.bf16.msra.mxu0 %v2622_v61  ;;  %v2600_v62 = vpop.permute.xlu1 %2599  ;;  %v2598_v63 = vpop.permute.xlu0 %2597  ;;  %2718 = vmatprep.mubr.bf16.mxu1 %v7413_v0 }
 0x12f   : > { %v2612_v3 = vsel %vm2609_vm11, %v2596_v57, %v2598_v63  ;;  %v2613_v4 = vsel %vm2609_vm11, %v2598_v63, %v2600_v62 }
 0x130   : > { %3975 = vrot.lane.b32.xlu1 %v7691_v6, %s7429_s23  ;;  %3973 = vrot.lane.b32.xlu0 %v7524_v14, %s7429_s23  ;;  %v2628_v9 = vsel %vm385_vm1, %v2612_v3, 0 }
 0x131   : > { %6781 = vmatprep.subr.msk.bf16.mxu1 %vm385_vm1, %v2613_v4  ;;  %6780 = vmatmul.mubr.msk.bf16.vlgmr.msra.gmra.mrb[0].mxu0 %vm381_vm2, %v6778_v1 }
 0x132   : > { %2687 = vmatpush1.bf16.msra.mxu1 %v2628_v9  ;;  %v2604_v15 = vpop.permute.xlu1 %2603  ;;  %v2602_v16 = vpop.permute.xlu0 %2601  ;;  %2759 = vmatprep.mubr.bf16.mxu0 %v7413_v0 }
 0x133   : > { %v2614_v17 = vsel %vm2609_vm11, %v2600_v62, %v2602_v16  ;;  %v2615_v13 = vsel %vm2609_vm11, %v2602_v16, %v2604_v15 }
 0x134   : > { %4189 = vrot.lane.b32.xlu1 %v7491_v2, %s7430_s26  ;;  %4187 = vrot.lane.b32.xlu0 %v7498_v7, %s7430_s26  ;;  %v2634_v18 = vsel %vm385_vm1, %v2614_v17, 0 }
 0x135   : > { %6783 = vmatprep.subr.msk.bf16.mxu0 %vm385_vm1, %v2615_v13  ;;  %6782 = vmatmul.mubr.msk.bf16.vlgmr.msra.gmra.mrb[0].mxu1 %vm381_vm2, %v6778_v1 }
 0x136   : > { %2728 = vmatpush1.bf16.msra.mxu0 %v2634_v18  ;;  %v2608_v19 = vpop.permute.xlu1 %2607  ;;  %v2606_v20 = vpop.permute.xlu0 %2605  ;;  %2800 = vmatprep.mubr.bf16.mxu1 %v7413_v0 }
 0x137   : > { %v2616_v21 = vsel %vm2609_vm11, %v2604_v15, %v2606_v20  ;;  %v2617_v2 = vsel %vm2609_vm11, %v2606_v20, %v2608_v19  ;;  %vm5801_vm11 = vcmask 752640  }
 0x138   : > { %4193 = vrot.lane.b32.xlu1 %v7504_v10, %s7430_s26  ;;  %4191 = vrot.lane.b32.xlu0 %v7495_v5, %s7430_s26  ;;  %v2640_v7 = vsel %vm385_vm1, %v2616_v21, 0 }
 0x139   : > { %6785 = vmatprep.subr.msk.bf16.mxu1 %vm385_vm1, %v2617_v2  ;;  %6784 = vmatmul.mubr.msk.bf16.vlgmr.msra.gmra.mrb[4].mxu0 %vm381_vm2, %v6778_v1 }
 0x13a   : > { %2769 = vmatpush1.bf16.msra.mxu1 %v2640_v7  ;;  %v2822_v22 = vpop.permute.xlu1 %2821  ;;  %v2820_v23 = vpop.permute.xlu0 %2819  ;;  %2905 = vmatprep.mubr.bf16.mxu0 %v7413_v0 }
 0x13b   : > { %v2838_v24 = vsel %vm2837_vm12, %v2820_v23, %v2822_v22  ;;  %v6805_v23 = vld [vmem:[%s8686_s0 + $0x34] sm:$0xf] }
 0x13c   : > { %4197 = vrot.lane.b32.xlu1 %v7515_v12, %s7430_s26  ;;  %4195 = vrot.lane.b32.xlu0 %v7501_v8, %s7430_s26  ;;  %v2850_v28 = vsel %vm385_vm1, %v2838_v24, 0 }
 0x13d   : > { %6786 = vmatmul.mubr.msk.bf16.vlgmr.msra.gmra.mrb[4].mxu1 %vm381_vm2, %v6778_v1 }
 0x13e   : > { %v2826_v25 = vpop.permute.xlu1 %2825  ;;  %v2824_v26 = vpop.permute.xlu0 %2823  ;;  %2946 = vmatprep.mubr.bf16.mxu1 %v7413_v0 }
 0x13f   : > { %v2839_v27 = vsel %vm2837_vm12, %v2822_v22, %v2824_v26  ;;  %v2840_v29 = vsel %vm2837_vm12, %v2824_v26, %v2826_v25 }
 0x140   : > { %4201 = vrot.lane.b32.xlu1 %v7524_v14, %s7430_s26  ;;  %4199 = vrot.lane.b32.xlu0 %v7512_v11, %s7430_s26  ;;  %v2856_v34 = vsel %vm385_vm1, %v2840_v29, 0 }
 0x141   : > { %6788 = vmatprep.subr.msk.bf16.mxu0 %vm385_vm1, %v2839_v27 }
 0x142   : > { %2874 = vmatpush1.bf16.msra.mxu0 %v2850_v28  ;;  %v2830_v30 = vpop.permute.xlu1 %2829  ;;  %v2828_v31 = vpop.permute.xlu0 %2827 }
 0x143   : > { %v2841_v33 = vsel %vm2837_vm12, %v2826_v25, %v2828_v31  ;;  %v2842_v35 = vsel %vm2837_vm12, %v2828_v31, %v2830_v30 }
 0x144   : > { %4415 = vrot.lane.b32.xlu1 %v7495_v5, %s7431_s29  ;;  %4203 = vrot.lane.b32.xlu0 %v7691_v6, %s7430_s26  ;;  %v2862_v39 = vsel %vm385_vm1, %v2842_v35, 0  ;;  %s302_s26 = scalar_lea.vmem %s8689_s3, %s8695_s20  ;;  %s6676_s20 = sshll.u32 %s8697_s19, 3 }
 0x145   : > { %6790 = vmatprep.subr.msk.bf16.mxu1 %vm385_vm1, %v2841_v33  ;;  %6789 = vmatmul.mubr.msk.bf16.vlgmr.msra.gmra.mrb[0].mxu0 %vm381_vm2, %v6787_v32  ;;  %s313_s8 = scalar_lea.vmem %s8691_s5, %s6676_s20 }
 0x146   : > { %2915 = vmatpush1.bf16.msra.mxu1 %v2856_v34  ;;  %v2834_v36 = vpop.permute.xlu1 %2833  ;;  %v2832_v37 = vpop.permute.xlu0 %2831  ;;  %2987 = vmatprep.mubr.bf16.mxu0 %v7413_v0 }
 0x147   : > { %v2843_v38 = vsel %vm2837_vm12, %v2830_v30, %v2832_v37  ;;  %v2844_v40 = vsel %vm2837_vm12, %v2832_v37, %v2834_v36 }
 0x148   : > { %4419 = vrot.lane.b32.xlu1 %v7501_v8, %s7431_s29  ;;  %4417 = vrot.lane.b32.xlu0 %v7504_v10, %s7431_s29  ;;  %v2868_v44 = vsel %vm385_vm1, %v2844_v40, 0 }
 0x149   : > { %6792 = vmatprep.subr.msk.bf16.mxu0 %vm385_vm1, %v2843_v38  ;;  %6791 = vmatmul.mubr.msk.bf16.vlgmr.msra.gmra.mrb[0].mxu1 %vm381_vm2, %v6787_v32 }
 0x14a   : > { %2956 = vmatpush1.bf16.msra.mxu0 %v2862_v39  ;;  %v3048_v41 = vpop.permute.xlu1 %3047  ;;  %v2836_v42 = vpop.permute.xlu0 %2835  ;;  %3028 = vmatprep.mubr.bf16.mxu1 %v7413_v0 }
 0x14b   : > { %v2845_v43 = vsel %vm2837_vm12, %v2834_v36, %v2836_v42  ;;  %vm6029_vm12 = vcmask 744448  }
 0x14c   : > { %4423 = vrot.lane.b32.xlu1 %v7512_v11, %s7431_s29  ;;  %4421 = vrot.lane.b32.xlu0 %v7515_v12, %s7431_s29 }
 0x14d   : > { %6794 = vmatprep.subr.msk.bf16.mxu1 %vm385_vm1, %v2845_v43  ;;  %6793 = vmatmul.mubr.msk.bf16.vlgmr.msra.gmra.mrb[4].mxu0 %vm381_vm2, %v6787_v32  ;;  %v6814_v43 = vld [vmem:[%s8686_s0 + $0x38] sm:$0xf] }
 0x14e   : > { %2997 = vmatpush1.bf16.msra.mxu1 %v2868_v44  ;;  %v3052_v46 = vpop.permute.xlu1 %3051  ;;  %v3050_v47 = vpop.permute.xlu0 %3049  ;;  %3133 = vmatprep.mubr.bf16.mxu0 %v7413_v0 }
 0x14f   : > { %v3066_v48 = vsel %vm3065_vm13, %v3048_v41, %v3050_v47  ;;  %v3067_v49 = vsel %vm3065_vm13, %v3050_v47, %v3052_v46 }
 0x150   : > { %4427 = vrot.lane.b32.xlu1 %v7691_v6, %s7431_s29  ;;  %4425 = vrot.lane.b32.xlu0 %v7524_v14, %s7431_s29  ;;  %v3078_v51 = vsel %vm385_vm1, %v3066_v48, 0 }
 0x151   : > { %6797 = vmatprep.subr.msk.bf16.mxu0 %vm385_vm1, %v3067_v49  ;;  %6795 = vmatmul.mubr.msk.bf16.vlgmr.msra.gmra.mrb[4].mxu1 %vm381_vm2, %v6787_v32 }
 0x152   : > { %3102 = vmatpush1.bf16.msra.mxu0 %v3078_v51  ;;  %v3056_v53 = vpop.permute.xlu1 %3055  ;;  %v3054_v54 = vpop.permute.xlu0 %3053  ;;  %3174 = vmatprep.mubr.bf16.mxu1 %v7413_v0 }
 0x153   : > { %v3068_v56 = vsel %vm3065_vm13, %v3052_v46, %v3054_v54  ;;  %v3069_v57 = vsel %vm3065_vm13, %v3054_v54, %v3056_v53 }
 0x154   : > { %4431 = vrot.lane.b32.xlu1 %v8103_v50, %s7431_s29  ;;  %4429 = vrot.lane.b32.xlu0 %v8109_v52, %s7431_s29  ;;  %v3084_v58 = vsel %vm385_vm1, %v3068_v56, 0 }
 0x155   : > { %6799 = vmatprep.subr.msk.bf16.mxu1 %vm385_vm1, %v3069_v57  ;;  %6798 = vmatmul.mubr.msk.bf16.vlgmr.msra.gmra.mrb[0].mxu0 %vm381_vm2, %v6796_v55 }
 0x156   : > { %3143 = vmatpush1.bf16.msra.mxu1 %v3084_v58  ;;  %v3060_v59 = vpop.permute.xlu1 %3059  ;;  %v3058_v60 = vpop.permute.xlu0 %3057  ;;  %3215 = vmatprep.mubr.bf16.mxu0 %v7413_v0 }
 0x157   : > { %v3070_v61 = vsel %vm3065_vm13, %v3056_v53, %v3058_v60  ;;  %v3071_v62 = vsel %vm3065_vm13, %v3058_v60, %v3060_v59 }
 0x158   : > { %4645 = vrot.lane.b32.xlu1 %v7504_v10, %s7432_s7  ;;  %4643 = vrot.lane.b32.xlu0 %v7495_v5, %s7432_s7  ;;  %v3090_v63 = vsel %vm385_vm1, %v3070_v61, 0 }
 0x159   : > { %6801 = vmatprep.subr.msk.bf16.mxu0 %vm385_vm1, %v3071_v62  ;;  %6800 = vmatmul.mubr.msk.bf16.vlgmr.msra.gmra.mrb[0].mxu1 %vm381_vm2, %v6796_v55 }
 0x15a   : > { %3184 = vmatpush1.bf16.msra.mxu0 %v3090_v63  ;;  %v3064_v1 = vpop.permute.xlu1 %3063  ;;  %v3062_v3 = vpop.permute.xlu0 %3061  ;;  %3256 = vmatprep.mubr.bf16.mxu1 %v7413_v0 }
 0x15b   : > { %v3072_v4 = vsel %vm3065_vm13, %v3060_v59, %v3062_v3  ;;  %v3073_v9 = vsel %vm3065_vm13, %v3062_v3, %v3064_v1  ;;  %vm6257_vm13 = vcmask 736256  }
 0x15c   : > { %4649 = vrot.lane.b32.xlu1 %v7515_v12, %s7432_s7  ;;  %4647 = vrot.lane.b32.xlu0 %v7501_v8, %s7432_s7  ;;  %v3096_v15 = vsel %vm385_vm1, %v3072_v4, 0 }
 0x15d   : > { %6803 = vmatprep.subr.msk.bf16.mxu1 %vm385_vm1, %v3073_v9  ;;  %6802 = vmatmul.mubr.msk.bf16.vlgmr.msra.gmra.mrb[4].mxu0 %vm381_vm2, %v6796_v55 }
 0x15e   : > { %3225 = vmatpush1.bf16.msra.mxu1 %v3096_v15  ;;  %v3278_v16 = vpop.permute.xlu1 %3277  ;;  %v3276_v17 = vpop.permute.xlu0 %3275  ;;  %3361 = vmatprep.mubr.bf16.mxu0 %v7413_v0 }
 0x15f   : > { %v3294_v13 = vsel %vm3293_vm14, %v3276_v17, %v3278_v16 }
 0x160   : > { %4653 = vrot.lane.b32.xlu1 %v7524_v14, %s7432_s7  ;;  %4651 = vrot.lane.b32.xlu0 %v7512_v11, %s7432_s7  ;;  %v3306_v21 = vsel %vm385_vm1, %v3294_v13, 0 }
 0x161   : > { %6804 = vmatmul.mubr.msk.bf16.vlgmr.msra.gmra.mrb[4].mxu1 %vm381_vm2, %v6796_v55 }
 0x162   : > { %v3282_v18 = vpop.permute.xlu1 %3281  ;;  %v3280_v19 = vpop.permute.xlu0 %3279  ;;  %3402 = vmatprep.mubr.bf16.mxu1 %v7413_v0 }
 0x163   : > { %v3295_v20 = vsel %vm3293_vm14, %v3278_v16, %v3280_v19  ;;  %v3296_v2 = vsel %vm3293_vm14, %v3280_v19, %v3282_v18  ;;  %v6823_v16 = vld [vmem:[%s8686_s0 + $0x3c] sm:$0xf] }
 0x164   : > { %4657 = vrot.lane.b32.xlu1 %v8109_v52, %s7432_s7  ;;  %4655 = vrot.lane.b32.xlu0 %v7691_v6, %s7432_s7  ;;  %v3312_v25 = vsel %vm385_vm1, %v3296_v2, 0 }
 0x165   : > { %6806 = vmatprep.subr.msk.bf16.mxu0 %vm385_vm1, %v3295_v20 }
 0x166   : > { %3330 = vmatpush1.bf16.msra.mxu0 %v3306_v21  ;;  %v3286_v7 = vpop.permute.xlu1 %3285  ;;  %v3284_v22 = vpop.permute.xlu0 %3283 }
 0x167   : > { %v3297_v24 = vsel %vm3293_vm14, %v3282_v18, %v3284_v22  ;;  %v3298_v26 = vsel %vm3293_vm14, %v3284_v22, %v3286_v7 }
 0x168   : > { %4871 = vrot.lane.b32.xlu1 %v7495_v5, %s7433_s10  ;;  %4659 = vrot.lane.b32.xlu0 %v8103_v50, %s7432_s7  ;;  %v3318_v30 = vsel %vm385_vm1, %v3298_v26, 0 }
 0x169   : > { %6808 = vmatprep.subr.msk.bf16.mxu1 %vm385_vm1, %v3297_v24  ;;  %6807 = vmatmul.mubr.msk.bf16.vlgmr.msra.gmra.mrb[0].mxu0 %vm381_vm2, %v6805_v23 }
 0x16a   : > { %3371 = vmatpush1.bf16.msra.mxu1 %v3312_v25  ;;  %v3290_v27 = vpop.permute.xlu1 %3289  ;;  %v3288_v28 = vpop.permute.xlu0 %3287  ;;  %3443 = vmatprep.mubr.bf16.mxu0 %v7413_v0 }
 0x16b   : > { %v3299_v29 = vsel %vm3293_vm14, %v3286_v7, %v3288_v28  ;;  %v3300_v31 = vsel %vm3293_vm14, %v3288_v28, %v3290_v27 }
 0x16c   : > { %4875 = vrot.lane.b32.xlu1 %v7501_v8, %s7433_s10  ;;  %4873 = vrot.lane.b32.xlu0 %v7504_v10, %s7433_s10  ;;  %v3324_v35 = vsel %vm385_vm1, %v3300_v31, 0 }
 0x16d   : > { %6810 = vmatprep.subr.msk.bf16.mxu0 %vm385_vm1, %v3299_v29  ;;  %6809 = vmatmul.mubr.msk.bf16.vlgmr.msra.gmra.mrb[0].mxu1 %vm381_vm2, %v6805_v23 }
 0x16e   : > { %3412 = vmatpush1.bf16.msra.mxu0 %v3318_v30  ;;  %v3504_v32 = vpop.permute.xlu1 %3503  ;;  %v3292_v33 = vpop.permute.xlu0 %3291  ;;  %3484 = vmatprep.mubr.bf16.mxu1 %v7413_v0 }
 0x16f   : > { %v3301_v34 = vsel %vm3293_vm14, %v3290_v27, %v3292_v33  ;;  %v6832_v33 = vld [vmem:[%s8686_s0 + $0x40] sm:$0xf] }
 0x170   : > { %4879 = vrot.lane.b32.xlu1 %v7512_v11, %s7433_s10  ;;  %4877 = vrot.lane.b32.xlu0 %v7515_v12, %s7433_s10 }
 0x171   : > { %6812 = vmatprep.subr.msk.bf16.mxu1 %vm385_vm1, %v3301_v34  ;;  %6811 = vmatmul.mubr.msk.bf16.vlgmr.msra.gmra.mrb[4].mxu0 %vm381_vm2, %v6805_v23 }
 0x172   : > { %3453 = vmatpush1.bf16.msra.mxu1 %v3324_v35  ;;  %v3508_v36 = vpop.permute.xlu1 %3507  ;;  %v3506_v37 = vpop.permute.xlu0 %3505  ;;  %3589 = vmatprep.mubr.bf16.mxu0 %v7413_v0 }
 0x173   : > { %v3522_v38 = vsel %vm3521_vm15, %v3504_v32, %v3506_v37  ;;  %v3523_v39 = vsel %vm3521_vm15, %v3506_v37, %v3508_v36 }
 0x174   : > { %4883 = vrot.lane.b32.xlu1 %v7691_v6, %s7433_s10  ;;  %4881 = vrot.lane.b32.xlu0 %v7524_v14, %s7433_s10  ;;  %v3534_v40 = vsel %vm385_vm1, %v3522_v38, 0 }
 0x175   : > { %6815 = vmatprep.subr.msk.bf16.mxu0 %vm385_vm1, %v3523_v39  ;;  %6813 = vmatmul.mubr.msk.bf16.vlgmr.msra.gmra.mrb[4].mxu1 %vm381_vm2, %v6805_v23 }
 0x176   : > { %3558 = vmatpush1.bf16.msra.mxu0 %v3534_v40  ;;  %v3512_v41 = vpop.permute.xlu1 %3511  ;;  %v3510_v42 = vpop.permute.xlu0 %3509  ;;  %3630 = vmatprep.mubr.bf16.mxu1 %v7413_v0 }
 0x177   : > { %v3524_v44 = vsel %vm3521_vm15, %v3508_v36, %v3510_v42  ;;  %v3525_v45 = vsel %vm3521_vm15, %v3510_v42, %v3512_v41 }
 0x178   : > { %4887 = vrot.lane.b32.xlu1 %v8103_v50, %s7433_s10  ;;  %4885 = vrot.lane.b32.xlu0 %v8109_v52, %s7433_s10  ;;  %v3540_v46 = vsel %vm385_vm1, %v3524_v44, 0 }
 0x179   : > { %6817 = vmatprep.subr.msk.bf16.mxu1 %vm385_vm1, %v3525_v45  ;;  %6816 = vmatmul.mubr.msk.bf16.vlgmr.msra.gmra.mrb[0].mxu0 %vm381_vm2, %v6814_v43 }
 0x17a   : > { %3599 = vmatpush1.bf16.msra.mxu1 %v3540_v46  ;;  %v3516_v47 = vpop.permute.xlu1 %3515  ;;  %v3514_v48 = vpop.permute.xlu0 %3513  ;;  %3671 = vmatprep.mubr.bf16.mxu0 %v7413_v0 }
 0x17b   : > { %v3526_v49 = vsel %vm3521_vm15, %v3512_v41, %v3514_v48  ;;  %v3527_v51 = vsel %vm3521_vm15, %v3514_v48, %v3516_v47 }
 0x17c   : > { %5101 = vrot.lane.b32.xlu1 %v7504_v10, %s7434_s13  ;;  %5099 = vrot.lane.b32.xlu0 %v7495_v5, %s7434_s13  ;;  %v3546_v53 = vsel %vm385_vm1, %v3526_v49, 0 }
 0x17d   : > { %6819 = vmatprep.subr.msk.bf16.mxu0 %vm385_vm1, %v3527_v51  ;;  %6818 = vmatmul.mubr.msk.bf16.vlgmr.msra.gmra.mrb[0].mxu1 %vm381_vm2, %v6814_v43 }
 0x17e   : > { %3640 = vmatpush1.bf16.msra.mxu0 %v3546_v53  ;;  %v3520_v54 = vpop.permute.xlu1 %3519  ;;  %v3518_v55 = vpop.permute.xlu0 %3517  ;;  %3712 = vmatprep.mubr.bf16.mxu1 %v7413_v0 }
 0x17f   : > { %v3528_v56 = vsel %vm3521_vm15, %v3516_v47, %v3518_v55  ;;  %v3529_v57 = vsel %vm3521_vm15, %v3518_v55, %v3520_v54 }
 0x180   : > { %5105 = vrot.lane.b32.xlu1 %v7515_v12, %s7434_s13  ;;  %5103 = vrot.lane.b32.xlu0 %v7501_v8, %s7434_s13  ;;  %v3552_v58 = vsel %vm385_vm1, %v3528_v56, 0 }
 0x181   : > { %6821 = vmatprep.subr.msk.bf16.mxu1 %vm385_vm1, %v3529_v57  ;;  %6820 = vmatmul.mubr.msk.bf16.vlgmr.msra.gmra.mrb[4].mxu0 %vm381_vm2, %v6814_v43 }
 0x182   : > { %3681 = vmatpush1.bf16.msra.mxu1 %v3552_v58  ;;  %v3734_v59 = vpop.permute.xlu1 %3733  ;;  %v3732_v60 = vpop.permute.xlu0 %3731  ;;  %3817 = vmatprep.mubr.bf16.mxu0 %v7413_v0 }
 0x183   : > { %v3750_v61 = vsel %vm3749_vm0, %v3732_v60, %v3734_v59 }
 0x184   : > { %5109 = vrot.lane.b32.xlu1 %v7524_v14, %s7434_s13  ;;  %5107 = vrot.lane.b32.xlu0 %v7512_v11, %s7434_s13  ;;  %v3762_v3 = vsel %vm385_vm1, %v3750_v61, 0 }
 0x185   : > { %6822 = vmatmul.mubr.msk.bf16.vlgmr.msra.gmra.mrb[4].mxu1 %vm381_vm2, %v6814_v43 }
 0x186   : > { %v3738_v62 = vpop.permute.xlu1 %3737  ;;  %v3736_v63 = vpop.permute.xlu0 %3735  ;;  %3858 = vmatprep.mubr.bf16.mxu1 %v7413_v0 }
 0x187   : > { %v3751_v1 = vsel %vm3749_vm0, %v3734_v59, %v3736_v63  ;;  %v3752_v4 = vsel %vm3749_vm0, %v3736_v63, %v3738_v62  ;;  %v6841_v59 = vld [vmem:[%s8686_s0 + $0x44] sm:$0xf] }
 0x188   : > { %5113 = vrot.lane.b32.xlu1 %v8109_v52, %s7434_s13  ;;  %5111 = vrot.lane.b32.xlu0 %v7691_v6, %s7434_s13  ;;  %v3768_v13 = vsel %vm385_vm1, %v3752_v4, 0 }
 0x189   : > { %6824 = vmatprep.subr.msk.bf16.mxu0 %vm385_vm1, %v3751_v1 }
 0x18a   : > { %3786 = vmatpush1.bf16.msra.mxu0 %v3762_v3  ;;  %v3742_v9 = vpop.permute.xlu1 %3741  ;;  %v3740_v15 = vpop.permute.xlu0 %3739 }
 0x18b   : > { %v3753_v17 = vsel %vm3749_vm0, %v3738_v62, %v3740_v15  ;;  %v3754_v18 = vsel %vm3749_vm0, %v3740_v15, %v3742_v9 }
 0x18c   : > { %5327 = vrot.lane.b32.xlu1 %v7495_v5, %s7435_s16  ;;  %5115 = vrot.lane.b32.xlu0 %v8103_v50, %s7434_s13  ;;  %v3774_v2 = vsel %vm385_vm1, %v3754_v18, 0 }
 0x18d   : > { %6826 = vmatprep.subr.msk.bf16.mxu1 %vm385_vm1, %v3753_v17  ;;  %6825 = vmatmul.mubr.msk.bf16.vlgmr.msra.gmra.mrb[0].mxu0 %vm381_vm2, %v6823_v16 }
 0x18e   : > { %3827 = vmatpush1.bf16.msra.mxu1 %v3768_v13  ;;  %v3746_v19 = vpop.permute.xlu1 %3745  ;;  %v3744_v20 = vpop.permute.xlu0 %3743  ;;  %3899 = vmatprep.mubr.bf16.mxu0 %v7413_v0 }
 0x18f   : > { %v3755_v21 = vsel %vm3749_vm0, %v3742_v9, %v3744_v20  ;;  %v3756_v7 = vsel %vm3749_vm0, %v3744_v20, %v3746_v19 }
 0x190   : > { %5331 = vrot.lane.b32.xlu1 %v7501_v8, %s7435_s16  ;;  %5329 = vrot.lane.b32.xlu0 %v7504_v10, %s7435_s16  ;;  %v3780_v25 = vsel %vm385_vm1, %v3756_v7, 0 }
 0x191   : > { %6828 = vmatprep.subr.msk.bf16.mxu0 %vm385_vm1, %v3755_v21  ;;  %6827 = vmatmul.mubr.msk.bf16.vlgmr.msra.gmra.mrb[0].mxu1 %vm381_vm2, %v6823_v16 }
 0x192   : > { %3868 = vmatpush1.bf16.msra.mxu0 %v3774_v2  ;;  %v3960_v22 = vpop.permute.xlu1 %3959  ;;  %v3748_v23 = vpop.permute.xlu0 %3747  ;;  %3940 = vmatprep.mubr.bf16.mxu1 %v7413_v0 }
 0x193   : > { %v3757_v24 = vsel %vm3749_vm0, %v3746_v19, %v3748_v23  ;;  %v6850_v23 = vld [vmem:[%s8686_s0 + $0x48] sm:$0xf] }
 0x194   : > { %5335 = vrot.lane.b32.xlu1 %v7512_v11, %s7435_s16  ;;  %5333 = vrot.lane.b32.xlu0 %v7515_v12, %s7435_s16 }
 0x195   : > { %6830 = vmatprep.subr.msk.bf16.mxu1 %vm385_vm1, %v3757_v24  ;;  %6829 = vmatmul.mubr.msk.bf16.vlgmr.msra.gmra.mrb[4].mxu0 %vm381_vm2, %v6823_v16 }
 0x196   : > { %3909 = vmatpush1.bf16.msra.mxu1 %v3780_v25  ;;  %v3964_v26 = vpop.permute.xlu1 %3963  ;;  %v3962_v27 = vpop.permute.xlu0 %3961  ;;  %4045 = vmatprep.mubr.bf16.mxu0 %v7413_v0 }
 0x197   : > { %v3978_v28 = vsel %vm3977_vm3, %v3960_v22, %v3962_v27  ;;  %v3979_v29 = vsel %vm3977_vm3, %v3962_v27, %v3964_v26 }
 0x198   : > { %5339 = vrot.lane.b32.xlu1 %v7691_v6, %s7435_s16  ;;  %5337 = vrot.lane.b32.xlu0 %v7524_v14, %s7435_s16  ;;  %v3990_v30 = vsel %vm385_vm1, %v3978_v28, 0 }
 0x199   : > { %6833 = vmatprep.subr.msk.bf16.mxu0 %vm385_vm1, %v3979_v29  ;;  %6831 = vmatmul.mubr.msk.bf16.vlgmr.msra.gmra.mrb[4].mxu1 %vm381_vm2, %v6823_v16 }
 0x19a   : > { %4014 = vmatpush1.bf16.msra.mxu0 %v3990_v30  ;;  %v3968_v31 = vpop.permute.xlu1 %3967  ;;  %v3966_v32 = vpop.permute.xlu0 %3965  ;;  %4086 = vmatprep.mubr.bf16.mxu1 %v7413_v0 }
 0x19b   : > { %v3980_v34 = vsel %vm3977_vm3, %v3964_v26, %v3966_v32  ;;  %v3981_v35 = vsel %vm3977_vm3, %v3966_v32, %v3968_v31 }
 0x19c   : > { %5343 = vrot.lane.b32.xlu1 %v8103_v50, %s7435_s16  ;;  %v3996_v36 = vsel %vm385_vm1, %v3980_v34, 0  ;;  %5341 = vrot.lane.b32.xlu0 %v8109_v52, %s7435_s16 }
 0x19d   : > { %6835 = vmatprep.subr.msk.bf16.mxu1 %vm385_vm1, %v3981_v35  ;;  %6834 = vmatmul.mubr.msk.bf16.vlgmr.msra.gmra.mrb[0].mxu0 %vm381_vm2, %v6832_v33 }
 0x19e   : > { %4055 = vmatpush1.bf16.msra.mxu1 %v3996_v36  ;;  %v3972_v37 = vpop.permute.xlu1 %3971  ;;  %v3970_v38 = vpop.permute.xlu0 %3969  ;;  %4127 = vmatprep.mubr.bf16.mxu0 %v7413_v0 }
 0x19f   : > { %v3982_v39 = vsel %vm3977_vm3, %v3968_v31, %v3970_v38  ;;  %v3983_v40 = vsel %vm3977_vm3, %v3970_v38, %v3972_v37 }
 0x1a0   : > { %5557 = vrot.lane.b32.xlu1 %v7504_v10, %s7436_s22  ;;  %v4002_v41 = vsel %vm385_vm1, %v3982_v39, 0  ;;  %5555 = vrot.lane.b32.xlu0 %v7495_v5, %s7436_s22 }
 0x1a1   : > { %6837 = vmatprep.subr.msk.bf16.mxu0 %vm385_vm1, %v3983_v40  ;;  %6836 = vmatmul.mubr.msk.bf16.vlgmr.msra.gmra.mrb[0].mxu1 %vm381_vm2, %v6832_v33 }
 0x1a2   : > { %4096 = vmatpush1.bf16.msra.mxu0 %v4002_v41  ;;  %v3976_v42 = vpop.permute.xlu1 %3975  ;;  %v3974_v43 = vpop.permute.xlu0 %3973  ;;  %4168 = vmatprep.mubr.bf16.mxu1 %v7413_v0 }
 0x1a3   : > { %v3984_v44 = vsel %vm3977_vm3, %v3972_v37, %v3974_v43  ;;  %v3985_v45 = vsel %vm3977_vm3, %v3974_v43, %v3976_v42 }
 0x1a4   : > { %5561 = vrot.lane.b32.xlu1 %v7515_v12, %s7436_s22  ;;  %v4008_v46 = vsel %vm385_vm1, %v3984_v44, 0  ;;  %5559 = vrot.lane.b32.xlu0 %v7501_v8, %s7436_s22 }
 0x1a5   : > { %6839 = vmatprep.subr.msk.bf16.mxu1 %vm385_vm1, %v3985_v45  ;;  %6838 = vmatmul.mubr.msk.bf16.vlgmr.msra.gmra.mrb[4].mxu0 %vm381_vm2, %v6832_v33 }
 0x1a6   : > { %4137 = vmatpush1.bf16.msra.mxu1 %v4008_v46  ;;  %v4190_v47 = vpop.permute.xlu1 %4189  ;;  %v4188_v48 = vpop.permute.xlu0 %4187  ;;  %4273 = vmatprep.mubr.bf16.mxu0 %v7413_v0 }
 0x1a7   : > { %v4206_v49 = vsel %vm4205_vm4, %v4188_v48, %v4190_v47 }
 0x1a8   : > { %5565 = vrot.lane.b32.xlu1 %v7524_v14, %s7436_s22  ;;  %5563 = vrot.lane.b32.xlu0 %v7512_v11, %s7436_s22  ;;  %v4218_v55 = vsel %vm385_vm1, %v4206_v49, 0 }
 0x1a9   : > { %6840 = vmatmul.mubr.msk.bf16.vlgmr.msra.gmra.mrb[4].mxu1 %vm381_vm2, %v6832_v33 }
 0x1aa   : > { %v4194_v51 = vpop.permute.xlu1 %4193  ;;  %v4192_v53 = vpop.permute.xlu0 %4191  ;;  %4314 = vmatprep.mubr.bf16.mxu1 %v7413_v0 }
 0x1ab   : > { %v4207_v54 = vsel %vm4205_vm4, %v4190_v47, %v4192_v53  ;;  %v4208_v56 = vsel %vm4205_vm4, %v4192_v53, %v4194_v51  ;;  %v6859_v47 = vld [vmem:[%s8686_s0 + $0x4c] sm:$0xf] }
 0x1ac   : > { %5569 = vrot.lane.b32.xlu1 %v8109_v52, %s7436_s22  ;;  %5567 = vrot.lane.b32.xlu0 %v7691_v6, %s7436_s22  ;;  %v4224_v61 = vsel %vm385_vm1, %v4208_v56, 0 }
 0x1ad   : > { %6842 = vmatprep.subr.msk.bf16.mxu0 %vm385_vm1, %v4207_v54 }
 0x1ae   : > { %4242 = vmatpush1.bf16.msra.mxu0 %v4218_v55  ;;  %v4198_v57 = vpop.permute.xlu1 %4197  ;;  %v4196_v58 = vpop.permute.xlu0 %4195 }
 0x1af   : > { %v4209_v60 = vsel %vm4205_vm4, %v4194_v51, %v4196_v58  ;;  %v4210_v62 = vsel %vm4205_vm4, %v4196_v58, %v4198_v57 }
 0x1b0   : > { %5783 = vrot.lane.b32.xlu1 %v7495_v5, %s7437_s25  ;;  %5571 = vrot.lane.b32.xlu0 %v8103_v50, %s7436_s22  ;;  %v4230_v4 = vsel %vm385_vm1, %v4210_v62, 0 }
 0x1b1   : > { %6844 = vmatprep.subr.msk.bf16.mxu1 %vm385_vm1, %v4209_v60  ;;  %6843 = vmatmul.mubr.msk.bf16.vlgmr.msra.gmra.mrb[0].mxu0 %vm381_vm2, %v6841_v59 }
 0x1b2   : > { %4283 = vmatpush1.bf16.msra.mxu1 %v4224_v61  ;;  %v4202_v63 = vpop.permute.xlu1 %4201  ;;  %v4200_v1 = vpop.permute.xlu0 %4199  ;;  %4355 = vmatprep.mubr.bf16.mxu0 %v7413_v0 }
 0x1b3   : > { %v4211_v3 = vsel %vm4205_vm4, %v4198_v57, %v4200_v1  ;;  %v4212_v9 = vsel %vm4205_vm4, %v4200_v1, %v4202_v63  ;;  %v6868_v1 = vld [vmem:[%s8686_s0 + $0x50] sm:$0xf] }
 0x1b4   : > { %5787 = vrot.lane.b32.xlu1 %v7501_v8, %s7437_s25  ;;  %5785 = vrot.lane.b32.xlu0 %v7504_v10, %s7437_s25  ;;  %v4236_v13 = vsel %vm385_vm1, %v4212_v9, 0 }
 0x1b5   : > { %6846 = vmatprep.subr.msk.bf16.mxu0 %vm385_vm1, %v4211_v3  ;;  %6845 = vmatmul.mubr.msk.bf16.vlgmr.msra.gmra.mrb[0].mxu1 %vm381_vm2, %v6841_v59 }
 0x1b6   : > { %4324 = vmatpush1.bf16.msra.mxu0 %v4230_v4  ;;  %v4416_v15 = vpop.permute.xlu1 %4415  ;;  %v4204_v16 = vpop.permute.xlu0 %4203  ;;  %4396 = vmatprep.mubr.bf16.mxu1 %v7413_v0 }
 0x1b7   : > { %v4213_v17 = vsel %vm4205_vm4, %v4202_v63, %v4204_v16 }
 0x1b8   : > { %5791 = vrot.lane.b32.xlu1 %v7512_v11, %s7437_s25  ;;  %5789 = vrot.lane.b32.xlu0 %v7515_v12, %s7437_s25 }
 0x1b9   : > { %6848 = vmatprep.subr.msk.bf16.mxu1 %vm385_vm1, %v4213_v17  ;;  %6847 = vmatmul.mubr.msk.bf16.vlgmr.msra.gmra.mrb[4].mxu0 %vm381_vm2, %v6841_v59 }
 0x1ba   : > { %4365 = vmatpush1.bf16.msra.mxu1 %v4236_v13  ;;  %v4420_v18 = vpop.permute.xlu1 %4419  ;;  %v4418_v19 = vpop.permute.xlu0 %4417  ;;  %4501 = vmatprep.mubr.bf16.mxu0 %v7413_v0 }
 0x1bb   : > { %v4434_v20 = vsel %vm4433_vm5, %v4416_v15, %v4418_v19  ;;  %v4435_v21 = vsel %vm4433_vm5, %v4418_v19, %v4420_v18 }
 0x1bc   : > { %5795 = vrot.lane.b32.xlu1 %v7691_v6, %s7437_s25  ;;  %v4446_v2 = vsel %vm385_vm1, %v4434_v20, 0  ;;  %5793 = vrot.lane.b32.xlu0 %v7524_v14, %s7437_s25 }
 0x1bd   : > { %6851 = vmatprep.subr.msk.bf16.mxu0 %vm385_vm1, %v4435_v21  ;;  %6849 = vmatmul.mubr.msk.bf16.vlgmr.msra.gmra.mrb[4].mxu1 %vm381_vm2, %v6841_v59 }
 0x1be   : > { %4470 = vmatpush1.bf16.msra.mxu0 %v4446_v2  ;;  %v4424_v7 = vpop.permute.xlu1 %4423  ;;  %v4422_v22 = vpop.permute.xlu0 %4421  ;;  %4542 = vmatprep.mubr.bf16.mxu1 %v7413_v0 }
 0x1bf   : > { %v4436_v24 = vsel %vm4433_vm5, %v4420_v18, %v4422_v22  ;;  %v4437_v25 = vsel %vm4433_vm5, %v4422_v22, %v4424_v7 }
 0x1c0   : > { %5799 = vrot.lane.b32.xlu1 %v8103_v50, %s7437_s25  ;;  %v4452_v26 = vsel %vm385_vm1, %v4436_v24, 0  ;;  %5797 = vrot.lane.b32.xlu0 %v8109_v52, %s7437_s25 }
 0x1c1   : > { %6853 = vmatprep.subr.msk.bf16.mxu1 %vm385_vm1, %v4437_v25  ;;  %6852 = vmatmul.mubr.msk.bf16.vlgmr.msra.gmra.mrb[0].mxu0 %vm381_vm2, %v6850_v23 }
 0x1c2   : > { %4511 = vmatpush1.bf16.msra.mxu1 %v4452_v26  ;;  %v4428_v27 = vpop.permute.xlu1 %4427  ;;  %v4426_v28 = vpop.permute.xlu0 %4425  ;;  %4583 = vmatprep.mubr.bf16.mxu0 %v7413_v0 }
 0x1c3   : > { %v4438_v29 = vsel %vm4433_vm5, %v4424_v7, %v4426_v28  ;;  %v4439_v30 = vsel %vm4433_vm5, %v4426_v28, %v4428_v27 }
 0x1c4   : > { %6013 = vrot.lane.b32.xlu1 %v7504_v10, %s7438_s28  ;;  %v4458_v31 = vsel %vm385_vm1, %v4438_v29, 0  ;;  %6011 = vrot.lane.b32.xlu0 %v7495_v5, %s7438_s28 }
 0x1c5   : > { %6855 = vmatprep.subr.msk.bf16.mxu0 %vm385_vm1, %v4439_v30  ;;  %6854 = vmatmul.mubr.msk.bf16.vlgmr.msra.gmra.mrb[0].mxu1 %vm381_vm2, %v6850_v23 }
 0x1c6   : > { %4552 = vmatpush1.bf16.msra.mxu0 %v4458_v31  ;;  %v4432_v32 = vpop.permute.xlu1 %4431  ;;  %v4430_v33 = vpop.permute.xlu0 %4429  ;;  %4624 = vmatprep.mubr.bf16.mxu1 %v7413_v0 }
 0x1c7   : > { %v4440_v34 = vsel %vm4433_vm5, %v4428_v27, %v4430_v33  ;;  %v4441_v35 = vsel %vm4433_vm5, %v4430_v33, %v4432_v32  ;;  %v6877_v27 = vld [vmem:[%s8686_s0 + $0x54] sm:$0xf] }
 0x1c8   : > { %6017 = vrot.lane.b32.xlu1 %v7515_v12, %s7438_s28  ;;  %v4464_v36 = vsel %vm385_vm1, %v4440_v34, 0  ;;  %6015 = vrot.lane.b32.xlu0 %v7501_v8, %s7438_s28 }
 0x1c9   : > { %6857 = vmatprep.subr.msk.bf16.mxu1 %vm385_vm1, %v4441_v35  ;;  %6856 = vmatmul.mubr.msk.bf16.vlgmr.msra.gmra.mrb[4].mxu0 %vm381_vm2, %v6850_v23 }
 0x1ca   : > { %4593 = vmatpush1.bf16.msra.mxu1 %v4464_v36  ;;  %v4646_v37 = vpop.permute.xlu1 %4645  ;;  %v4644_v38 = vpop.permute.xlu0 %4643  ;;  %4729 = vmatprep.mubr.bf16.mxu0 %v7413_v0 }
 0x1cb   : > { %v4662_v39 = vsel %vm4661_vm6, %v4644_v38, %v4646_v37 }
 0x1cc   : > { %6021 = vrot.lane.b32.xlu1 %v7524_v14, %s7438_s28  ;;  %6019 = vrot.lane.b32.xlu0 %v7512_v11, %s7438_s28  ;;  %v4674_v43 = vsel %vm385_vm1, %v4662_v39, 0 }
 0x1cd   : > { %6858 = vmatmul.mubr.msk.bf16.vlgmr.msra.gmra.mrb[4].mxu1 %vm381_vm2, %v6850_v23 }
 0x1ce   : > { %v4650_v40 = vpop.permute.xlu1 %4649  ;;  %v4648_v41 = vpop.permute.xlu0 %4647  ;;  %4770 = vmatprep.mubr.bf16.mxu1 %v7413_v0 }
 0x1cf   : > { %v4663_v42 = vsel %vm4661_vm6, %v4646_v37, %v4648_v41  ;;  %v4664_v44 = vsel %vm4661_vm6, %v4648_v41, %v4650_v40 }
 0x1d0   : > { %6025 = vrot.lane.b32.xlu1 %v8109_v52, %s7438_s28  ;;  %6023 = vrot.lane.b32.xlu0 %v7691_v6, %s7438_s28  ;;  %v4680_v49 = vsel %vm385_vm1, %v4664_v44, 0 }
 0x1d1   : > { %6860 = vmatprep.subr.msk.bf16.mxu0 %vm385_vm1, %v4663_v42 }
 0x1d2   : > { %4698 = vmatpush1.bf16.msra.mxu0 %v4674_v43  ;;  %v4654_v45 = vpop.permute.xlu1 %4653  ;;  %v4652_v46 = vpop.permute.xlu0 %4651 }
 0x1d3   : > { %v4665_v48 = vsel %vm4661_vm6, %v4650_v40, %v4652_v46  ;;  %v4666_v51 = vsel %vm4661_vm6, %v4652_v46, %v4654_v45 }
 0x1d4   : > { %6239 = vrot.lane.b32.xlu1 %v7495_v5, %s7439_s30  ;;  %6027 = vrot.lane.b32.xlu0 %v8103_v50, %s7438_s28  ;;  %v4686_v5 = vsel %vm385_vm1, %v4666_v51, 0 }
 0x1d5   : > { %6862 = vmatprep.subr.msk.bf16.mxu1 %vm385_vm1, %v4665_v48  ;;  %6861 = vmatmul.mubr.msk.bf16.vlgmr.msra.gmra.mrb[0].mxu0 %vm381_vm2, %v6859_v47 }
 0x1d6   : > { %4739 = vmatpush1.bf16.msra.mxu1 %v4680_v49  ;;  %v4658_v53 = vpop.permute.xlu1 %4657  ;;  %v4656_v54 = vpop.permute.xlu0 %4655  ;;  %4811 = vmatprep.mubr.bf16.mxu0 %v7413_v0 }
 0x1d7   : > { %v4667_v55 = vsel %vm4661_vm6, %v4654_v45, %v4656_v54  ;;  %v4668_v56 = vsel %vm4661_vm6, %v4656_v54, %v4658_v53 }
 0x1d8   : > { %6243 = vrot.lane.b32.xlu1 %v7501_v8, %s7439_s30  ;;  %6241 = vrot.lane.b32.xlu0 %v7504_v10, %s7439_s30  ;;  %v4692_v8 = vsel %vm385_vm1, %v4668_v56, 0 }
 0x1d9   : > { %6864 = vmatprep.subr.msk.bf16.mxu0 %vm385_vm1, %v4667_v55  ;;  %6863 = vmatmul.mubr.msk.bf16.vlgmr.msra.gmra.mrb[0].mxu1 %vm381_vm2, %v6859_v47 }
 0x1da   : > { %4780 = vmatpush1.bf16.msra.mxu0 %v4686_v5  ;;  %v4872_v57 = vpop.permute.xlu1 %4871  ;;  %v4660_v58 = vpop.permute.xlu0 %4659  ;;  %4852 = vmatprep.mubr.bf16.mxu1 %v7413_v0 }
 0x1db   : > { %v4669_v59 = vsel %vm4661_vm6, %v4658_v53, %v4660_v58 }
 0x1dc   : > { %6247 = vrot.lane.b32.xlu1 %v7512_v11, %s7439_s30  ;;  %6245 = vrot.lane.b32.xlu0 %v7515_v12, %s7439_s30 }
 0x1dd   : > { %6866 = vmatprep.subr.msk.bf16.mxu1 %vm385_vm1, %v4669_v59  ;;  %6865 = vmatmul.mubr.msk.bf16.vlgmr.msra.gmra.mrb[4].mxu0 %vm381_vm2, %v6859_v47 }
 0x1de   : > { %4821 = vmatpush1.bf16.msra.mxu1 %v4692_v8  ;;  %v4876_v10 = vpop.permute.xlu1 %4875  ;;  %v4874_v60 = vpop.permute.xlu0 %4873  ;;  %4957 = vmatprep.mubr.bf16.mxu0 %v7413_v0 }
 0x1df   : > { %v4890_v61 = vsel %vm4889_vm7, %v4872_v57, %v4874_v60  ;;  %v4891_v62 = vsel %vm4889_vm7, %v4874_v60, %v4876_v10 }
 0x1e0   : > { %6251 = vrot.lane.b32.xlu1 %v7691_v6, %s7439_s30  ;;  %v4902_v11 = vsel %vm385_vm1, %v4890_v61, 0  ;;  %6249 = vrot.lane.b32.xlu0 %v7524_v14, %s7439_s30 }
 0x1e1   : > { %6869 = vmatprep.subr.msk.bf16.mxu0 %vm385_vm1, %v4891_v62  ;;  %6867 = vmatmul.mubr.msk.bf16.vlgmr.msra.gmra.mrb[4].mxu1 %vm381_vm2, %v6859_v47  ;;  %v6886_v47 = vld [vmem:[%s8686_s0 + $0x58] sm:$0xf] }
 0x1e2   : > { %4926 = vmatpush1.bf16.msra.mxu0 %v4902_v11  ;;  %v4880_v12 = vpop.permute.xlu1 %4879  ;;  %v4878_v63 = vpop.permute.xlu0 %4877  ;;  %4998 = vmatprep.mubr.bf16.mxu1 %v7413_v0 }
 0x1e3   : > { %v4892_v6 = vsel %vm4889_vm7, %v4876_v10, %v4878_v63  ;;  %v4893_v3 = vsel %vm4889_vm7, %v4878_v63, %v4880_v12 }
 0x1e4   : > { %6255 = vrot.lane.b32.xlu1 %v8103_v50, %s7439_s30  ;;  %v4908_v14 = vsel %vm385_vm1, %v4892_v6, 0  ;;  %6253 = vrot.lane.b32.xlu0 %v8109_v52, %s7439_s30 }
 0x1e5   : > { %6871 = vmatprep.subr.msk.bf16.mxu1 %vm385_vm1, %v4893_v3  ;;  %6870 = vmatmul.mubr.msk.bf16.vlgmr.msra.gmra.mrb[0].mxu0 %vm381_vm2, %v6868_v1 }
 0x1e6   : > { %4967 = vmatpush1.bf16.msra.mxu1 %v4908_v14  ;;  %v4884_v4 = vpop.permute.xlu1 %4883  ;;  %v4882_v9 = vpop.permute.xlu0 %4881  ;;  %5039 = vmatprep.mubr.bf16.mxu0 %v7413_v0 }
 0x1e7   : > { %v4894_v15 = vsel %vm4889_vm7, %v4880_v12, %v4882_v9  ;;  %v4895_v16 = vsel %vm4889_vm7, %v4882_v9, %v4884_v4 }
 0x1e8   : > { %v4914_v50 = vsel %vm385_vm1, %v4894_v15, 0  ;;  %6873 = vmatprep.subr.msk.bf16.mxu0 %vm385_vm1, %v4895_v16 }
 0x1e9   : > { %5008 = vmatpush1.bf16.msra.mxu0 %v4914_v50  ;;  %6872 = vmatmul.mubr.msk.bf16.vlgmr.msra.gmra.mrb[0].mxu1 %vm381_vm2, %v6868_v1 }
 0x1ea   : > { %v4888_v17 = vpop.permute.xlu1 %4887  ;;  %v4886_v52 = vpop.permute.xlu0 %4885  ;;  %5080 = vmatprep.mubr.bf16.mxu1 %v7413_v0 }
 0x1eb   : > { %v4896_v13 = vsel %vm4889_vm7, %v4884_v4, %v4886_v52  ;;  %v4897_v18 = vsel %vm4889_vm7, %v4886_v52, %v4888_v17  ;;  %v6895_v4 = vld [vmem:[%s8686_s0 + $0x5c] sm:$0xf] }
 0x1ec   : > { %v4920_v19 = vsel %vm385_vm1, %v4896_v13, 0  ;;  %6875 = vmatprep.subr.msk.bf16.mxu1 %vm385_vm1, %v4897_v18 }
 0x1ed   : > { %5049 = vmatpush1.bf16.msra.mxu1 %v4920_v19  ;;  %6874 = vmatmul.mubr.msk.bf16.vlgmr.msra.gmra.mrb[4].mxu0 %vm381_vm2, %v6868_v1 }
 0x1ee   : > { %v5102_v20 = vpop.permute.xlu1 %5101  ;;  %v5100_v21 = vpop.permute.xlu0 %5099  ;;  %5185 = vmatprep.mubr.bf16.mxu0 %v7413_v0 }
 0x1ef   : > { %v5118_v2 = vsel %vm5117_vm8, %v5100_v21, %v5102_v20 }
 0x1f0   : > { %v5130_v24 = vsel %vm385_vm1, %v5118_v2, 0 }
 0x1f1   : > { %6876 = vmatmul.mubr.msk.bf16.vlgmr.msra.gmra.mrb[4].mxu1 %vm381_vm2, %v6868_v1 }
 0x1f2   : > { %v5106_v7 = vpop.permute.xlu1 %5105  ;;  %v5104_v22 = vpop.permute.xlu0 %5103  ;;  %5226 = vmatprep.mubr.bf16.mxu1 %v7413_v0 }
 0x1f3   : > { %v5119_v23 = vsel %vm5117_vm8, %v5102_v20, %v5104_v22  ;;  %v5120_v25 = vsel %vm5117_vm8, %v5104_v22, %v5106_v7 }
 0x1f4   : > { %6878 = vmatprep.subr.msk.bf16.mxu0 %vm385_vm1, %v5119_v23  ;;  %v5136_v30 = vsel %vm385_vm1, %v5120_v25, 0 }
 0x1f5   : > { %5154 = vmatpush1.bf16.msra.mxu0 %v5130_v24 }
 0x1f6   : > { %v5110_v26 = vpop.permute.xlu1 %5109  ;;  %v5108_v28 = vpop.permute.xlu0 %5107 }
 0x1f7   : > { %v5121_v29 = vsel %vm5117_vm8, %v5106_v7, %v5108_v28  ;;  %v5122_v31 = vsel %vm5117_vm8, %v5108_v28, %v5110_v26  ;;  %v6904_v28 = vld [vmem:[%s8686_s0 + $0x60] sm:$0xf] }
 0x1f8   : > { %6880 = vmatprep.subr.msk.bf16.mxu1 %vm385_vm1, %v5121_v29  ;;  %6879 = vmatmul.mubr.msk.bf16.vlgmr.msra.gmra.mrb[0].mxu0 %vm381_vm2, %v6877_v27  ;;  %v5142_v35 = vsel %vm385_vm1, %v5122_v31, 0 }
 0x1f9   : > { %5195 = vmatpush1.bf16.msra.mxu1 %v5136_v30  ;;  %5267 = vmatprep.mubr.bf16.mxu0 %v7413_v0 }
 0x1fa   : > { %v5114_v32 = vpop.permute.xlu1 %5113  ;;  %v5112_v33 = vpop.permute.xlu0 %5111 }
 0x1fb   : > { %v5123_v34 = vsel %vm5117_vm8, %v5110_v26, %v5112_v33  ;;  %v5124_v36 = vsel %vm5117_vm8, %v5112_v33, %v5114_v32 }
 0x1fc   : > { %6882 = vmatprep.subr.msk.bf16.mxu0 %vm385_vm1, %v5123_v34  ;;  %6881 = vmatmul.mubr.msk.bf16.vlgmr.msra.gmra.mrb[0].mxu1 %vm381_vm2, %v6877_v27  ;;  %v5148_v40 = vsel %vm385_vm1, %v5124_v36, 0 }
 0x1fd   : > { %5236 = vmatpush1.bf16.msra.mxu0 %v5142_v35  ;;  %5308 = vmatprep.mubr.bf16.mxu1 %v7413_v0 }
 0x1fe   : > { %v5328_v37 = vpop.permute.xlu1 %5327  ;;  %v5116_v38 = vpop.permute.xlu0 %5115 }
 0x1ff   : > { %v5125_v39 = vsel %vm5117_vm8, %v5114_v32, %v5116_v38 }
 0x200   : > { %6884 = vmatprep.subr.msk.bf16.mxu1 %vm385_vm1, %v5125_v39  ;;  %6883 = vmatmul.mubr.msk.bf16.vlgmr.msra.gmra.mrb[4].mxu0 %vm381_vm2, %v6877_v27 }
 0x201   : > { %5277 = vmatpush1.bf16.msra.mxu1 %v5148_v40  ;;  %5413 = vmatprep.mubr.bf16.mxu0 %v7413_v0 }
 0x202   : > { %v5332_v41 = vpop.permute.xlu1 %5331  ;;  %v5330_v42 = vpop.permute.xlu0 %5329 }
 0x203   : > { %v5346_v43 = vsel %vm5345_vm9, %v5328_v37, %v5330_v42  ;;  %v5347_v44 = vsel %vm5345_vm9, %v5330_v42, %v5332_v41 }
 0x204   : > { %v5358_v45 = vsel %vm385_vm1, %v5346_v43, 0  ;;  %6887 = vmatprep.subr.msk.bf16.mxu0 %vm385_vm1, %v5347_v44  ;;  %6885 = vmatmul.mubr.msk.bf16.vlgmr.msra.gmra.mrb[4].mxu1 %vm381_vm2, %v6877_v27 }
 0x205   : > { %5382 = vmatpush1.bf16.msra.mxu0 %v5358_v45  ;;  %5454 = vmatprep.mubr.bf16.mxu1 %v7413_v0 }
 0x206   : > { %v5336_v46 = vpop.permute.xlu1 %5335  ;;  %v5334_v48 = vpop.permute.xlu0 %5333 }
 0x207   : > { %v5348_v49 = vsel %vm5345_vm9, %v5332_v41, %v5334_v48  ;;  %v5349_v51 = vsel %vm5345_vm9, %v5334_v48, %v5336_v46 }
 0x208   : > { %v5364_v53 = vsel %vm385_vm1, %v5348_v49, 0  ;;  %6889 = vmatprep.subr.msk.bf16.mxu1 %vm385_vm1, %v5349_v51  ;;  %6888 = vmatmul.mubr.msk.bf16.vlgmr.msra.gmra.mrb[0].mxu0 %vm381_vm2, %v6886_v47 }
 0x209   : > { %5423 = vmatpush1.bf16.msra.mxu1 %v5364_v53  ;;  %5495 = vmatprep.mubr.bf16.mxu0 %v7413_v0 }
 0x20a   : > { %v5340_v54 = vpop.permute.xlu1 %5339  ;;  %v5338_v55 = vpop.permute.xlu0 %5337 }
 0x20b   : > { %v5350_v5 = vsel %vm5345_vm9, %v5336_v46, %v5338_v55  ;;  %v5351_v56 = vsel %vm5345_vm9, %v5338_v55, %v5340_v54 }
 0x20c   : > { %v5370_v57 = vsel %vm385_vm1, %v5350_v5, 0  ;;  %6891 = vmatprep.subr.msk.bf16.mxu0 %vm385_vm1, %v5351_v56  ;;  %6890 = vmatmul.mubr.msk.bf16.vlgmr.msra.gmra.mrb[0].mxu1 %vm381_vm2, %v6886_v47 }
 0x20d   : > { %5464 = vmatpush1.bf16.msra.mxu0 %v5370_v57  ;;  %5536 = vmatprep.mubr.bf16.mxu1 %v7413_v0 }
 0x20e   : > { %v5344_v58 = vpop.permute.xlu1 %5343  ;;  %v5342_v59 = vpop.permute.xlu0 %5341 }
 0x20f   : > { %v5352_v8 = vsel %vm5345_vm9, %v5340_v54, %v5342_v59  ;;  %v5353_v10 = vsel %vm5345_vm9, %v5342_v59, %v5344_v58  ;;  %v6913_v54 = vld [vmem:[%s8686_s0 + $0x64] sm:$0xf] }
 0x210   : > { %v5376_v60 = vsel %vm385_vm1, %v5352_v8, 0  ;;  %6893 = vmatprep.subr.msk.bf16.mxu1 %vm385_vm1, %v5353_v10  ;;  %6892 = vmatmul.mubr.msk.bf16.vlgmr.msra.gmra.mrb[4].mxu0 %vm381_vm2, %v6886_v47 }
 0x211   : > { %5505 = vmatpush1.bf16.msra.mxu1 %v5376_v60  ;;  %5641 = vmatprep.mubr.bf16.mxu0 %v7413_v0 }
 0x212   : > { %v5558_v61 = vpop.permute.xlu1 %5557  ;;  %v5556_v62 = vpop.permute.xlu0 %5555 }
 0x213   : > { %v5574_v11 = vsel %vm5573_vm10, %v5556_v62, %v5558_v61 }
 0x214   : > { %6894 = vmatmul.mubr.msk.bf16.vlgmr.msra.gmra.mrb[4].mxu1 %vm381_vm2, %v6886_v47  ;;  %v5586_v6 = vsel %vm385_vm1, %v5574_v11, 0 }
 0x215   : > { %5682 = vmatprep.mubr.bf16.mxu1 %v7413_v0 }
 0x216   : > { %v5562_v12 = vpop.permute.xlu1 %5561  ;;  %v5560_v63 = vpop.permute.xlu0 %5559 }
 0x217   : > { %v5575_v1 = vsel %vm5573_vm10, %v5558_v61, %v5560_v63  ;;  %v5576_v3 = vsel %vm5573_vm10, %v5560_v63, %v5562_v12 }
 0x218   : > { %6896 = vmatprep.subr.msk.bf16.mxu0 %vm385_vm1, %v5575_v1  ;;  %v5592_v16 = vsel %vm385_vm1, %v5576_v3, 0 }
 0x219   : > { %5610 = vmatpush1.bf16.msra.mxu0 %v5586_v6 }
 0x21a   : > { %v5566_v14 = vpop.permute.xlu1 %5565  ;;  %v5564_v9 = vpop.permute.xlu0 %5563 }
 0x21b   : > { %v5577_v15 = vsel %vm5573_vm10, %v5562_v12, %v5564_v9  ;;  %v5578_v50 = vsel %vm5573_vm10, %v5564_v9, %v5566_v14  ;;  %v6922_v9 = vld [vmem:[%s8686_s0 + $0x68] sm:$0xf] }
 0x21c   : > { %6898 = vmatprep.subr.msk.bf16.mxu1 %vm385_vm1, %v5577_v15  ;;  %6897 = vmatmul.mubr.msk.bf16.vlgmr.msra.gmra.mrb[0].mxu0 %vm381_vm2, %v6895_v4  ;;  %v5598_v18 = vsel %vm385_vm1, %v5578_v50, 0 }
 0x21d   : > { %5651 = vmatpush1.bf16.msra.mxu1 %v5592_v16  ;;  %5723 = vmatprep.mubr.bf16.mxu0 %v7413_v0 }
 0x21e   : > { %v5570_v17 = vpop.permute.xlu1 %5569  ;;  %v5568_v52 = vpop.permute.xlu0 %5567 }
 0x21f   : > { %v5579_v13 = vsel %vm5573_vm10, %v5566_v14, %v5568_v52  ;;  %v5580_v19 = vsel %vm5573_vm10, %v5568_v52, %v5570_v17 }
 0x220   : > { %6900 = vmatprep.subr.msk.bf16.mxu0 %vm385_vm1, %v5579_v13  ;;  %6899 = vmatmul.mubr.msk.bf16.vlgmr.msra.gmra.mrb[0].mxu1 %vm381_vm2, %v6895_v4  ;;  %v5604_v7 = vsel %vm385_vm1, %v5580_v19, 0 }
 0x221   : > { %5692 = vmatpush1.bf16.msra.mxu0 %v5598_v18  ;;  %5764 = vmatprep.mubr.bf16.mxu1 %v7413_v0 }
 0x222   : > { %v5784_v20 = vpop.permute.xlu1 %5783  ;;  %v5572_v21 = vpop.permute.xlu0 %5571 }
 0x223   : > { %v5581_v2 = vsel %vm5573_vm10, %v5570_v17, %v5572_v21 }
 0x224   : > { %6902 = vmatprep.subr.msk.bf16.mxu1 %vm385_vm1, %v5581_v2  ;;  %6901 = vmatmul.mubr.msk.bf16.vlgmr.msra.gmra.mrb[4].mxu0 %vm381_vm2, %v6895_v4 }
 0x225   : > { %5733 = vmatpush1.bf16.msra.mxu1 %v5604_v7  ;;  %5869 = vmatprep.mubr.bf16.mxu0 %v7413_v0 }
 0x226   : > { %v5788_v22 = vpop.permute.xlu1 %5787  ;;  %v5786_v23 = vpop.permute.xlu0 %5785 }
 0x227   : > { %v5802_v24 = vsel %vm5801_vm11, %v5784_v20, %v5786_v23  ;;  %v5803_v25 = vsel %vm5801_vm11, %v5786_v23, %v5788_v22 }
 0x228   : > { %v5814_v26 = vsel %vm385_vm1, %v5802_v24, 0  ;;  %6905 = vmatprep.subr.msk.bf16.mxu0 %vm385_vm1, %v5803_v25  ;;  %6903 = vmatmul.mubr.msk.bf16.vlgmr.msra.gmra.mrb[4].mxu1 %vm381_vm2, %v6895_v4  ;;  %v6475_v24 = vlaneseq }
 0x229   : > { %5838 = vmatpush1.bf16.msra.mxu0 %v5814_v26  ;;  %5910 = vmatprep.mubr.bf16.mxu1 %v7413_v0  ;;  %v6473_v26 = vld [vmem:[%s302_s26] sm:$0xff] }
 0x22a   : > { %v5792_v27 = vpop.permute.xlu1 %5791  ;;  %v5790_v29 = vpop.permute.xlu0 %5789  ;;  %v6476_v25 = vshrl.u32 %v6475_v24, 7 }
 0x22b   : > { %v5804_v30 = vsel %vm5801_vm11, %v5788_v22, %v5790_v29  ;;  %v5805_v31 = vsel %vm5801_vm11, %v5790_v29, %v5792_v27 }
 0x22c   : > { %v5820_v32 = vsel %vm385_vm1, %v5804_v30, 0  ;;  %6907 = vmatprep.subr.msk.bf16.mxu1 %vm385_vm1, %v5805_v31  ;;  %6906 = vmatmul.mubr.msk.bf16.vlgmr.msra.gmra.mrb[0].mxu0 %vm381_vm2, %v6904_v28  ;;  %v6485_v29 = vsub.s32 2, %v6476_v25  ;;  %v6489_v31 = vsub.s32 3, %v6476_v25 }
 0x22d   : > { %5879 = vmatpush1.bf16.msra.mxu1 %v5820_v32  ;;  %5951 = vmatprep.mubr.bf16.mxu0 %v7413_v0 }
 0x22e   : > { %v5796_v33 = vpop.permute.xlu1 %5795  ;;  %v5794_v34 = vpop.permute.xlu0 %5793 }
 0x22f   : > { %v5806_v35 = vsel %vm5801_vm11, %v5792_v27, %v5794_v34  ;;  %v5807_v36 = vsel %vm5801_vm11, %v5794_v34, %v5796_v33  ;;  %v6481_v27 = vsub.s32 1, %v6476_v25 }
 0x230   : > { %v5826_v37 = vsel %vm385_vm1, %v5806_v35, 0  ;;  %6909 = vmatprep.subr.msk.bf16.mxu0 %vm385_vm1, %v5807_v36  ;;  %6908 = vmatmul.mubr.msk.bf16.vlgmr.msra.gmra.mrb[0].mxu1 %vm381_vm2, %v6904_v28  ;;  %v6486_v35 = vrot.slane %v6473_v26, %v6485_v29  ;;  %v6493_v36 = vsub.s32 4, %v6476_v25 }
 0x231   : > { %5920 = vmatpush1.bf16.msra.mxu0 %v5826_v37  ;;  %5992 = vmatprep.mubr.bf16.mxu1 %v7413_v0  ;;  %v6482_v30 = vrot.slane %v6473_v26, %v6481_v27 }
 0x232   : > { %v5800_v38 = vpop.permute.xlu1 %5799  ;;  %v5798_v39 = vpop.permute.xlu0 %5797 }
 0x233   : > { %v5808_v40 = vsel %vm5801_vm11, %v5796_v33, %v5798_v39  ;;  %v5809_v41 = vsel %vm5801_vm11, %v5798_v39, %v5800_v38  ;;  %v6490_v39 = vrot.slane %v6473_v26, %v6489_v31 }
 0x234   : > { %v5832_v42 = vsel %vm385_vm1, %v5808_v40, 0  ;;  %6911 = vmatprep.subr.msk.bf16.mxu1 %vm385_vm1, %v5809_v41  ;;  %6910 = vmatmul.mubr.msk.bf16.vlgmr.msra.gmra.mrb[4].mxu0 %vm381_vm2, %v6904_v28  ;;  %v6497_v40 = vsub.s32 5, %v6476_v25 }
 0x235   : > { %5961 = vmatpush1.bf16.msra.mxu1 %v5832_v42  ;;  %6097 = vmatprep.mubr.bf16.mxu0 %v7413_v0 }
 0x236   : > { %v6014_v43 = vpop.permute.xlu1 %6013  ;;  %v6012_v44 = vpop.permute.xlu0 %6011 }
 0x237   : > { %v6030_v45 = vsel %vm6029_vm12, %v6012_v44, %v6014_v43 }
 0x238   : > { %6912 = vmatmul.mubr.msk.bf16.vlgmr.msra.gmra.mrb[4].mxu1 %vm381_vm2, %v6904_v28  ;;  %v6042_v49 = vsel %vm385_vm1, %v6030_v45, 0 }
 0x239   : > { %6138 = vmatprep.mubr.bf16.mxu1 %v7413_v0 }
 0x23a   : > { %v6018_v46 = vpop.permute.xlu1 %6017  ;;  %v6016_v47 = vpop.permute.xlu0 %6015 }
 0x23b   : > { %v6031_v48 = vsel %vm6029_vm12, %v6014_v43, %v6016_v47  ;;  %v6032_v51 = vsel %vm6029_vm12, %v6016_v47, %v6018_v46 }
 0x23c   : > { %6914 = vmatprep.subr.msk.bf16.mxu0 %vm385_vm1, %v6031_v48  ;;  %v6048_v56 = vsel %vm385_vm1, %v6032_v51, 0  ;;  %v6494_v48 = vrot.slane %v6473_v26, %v6493_v36 }
 0x23d   : > { %6066 = vmatpush1.bf16.msra.mxu0 %v6042_v49  ;;  %v6501_v49 = vsub.s32 6, %v6476_v25 }
 0x23e   : > { %v6022_v53 = vpop.permute.xlu1 %6021  ;;  %v6020_v55 = vpop.permute.xlu0 %6019 }
 0x23f   : > { %v6033_v5 = vsel %vm6029_vm12, %v6018_v46, %v6020_v55  ;;  %v6034_v57 = vsel %vm6029_vm12, %v6020_v55, %v6022_v53  ;;  %v6498_v55 = vrot.slane %v6473_v26, %v6497_v40 }
 0x240   : > { %6915 = vmatmul.mubr.msk.bf16.vlgmr.msra.gmra.mrb[0].mxu0 %vm381_vm2, %v6913_v54  ;;  %6916 = vmatprep.subr.msk.bf16.mxu1 %vm385_vm1, %v6033_v5  ;;  %v6054_v10 = vsel %vm385_vm1, %v6034_v57, 0  ;;  %v6505_v5 = vsub.s32 7, %v6476_v25 }
 0x241   : > { %6107 = vmatpush1.bf16.msra.mxu1 %v6048_v56  ;;  %6179 = vmatprep.mubr.bf16.mxu0 %v7413_v0 }
 0x242   : > { %v6026_v58 = vpop.permute.xlu1 %6025  ;;  %v6024_v59 = vpop.permute.xlu0 %6023 }
 0x243   : > { %v6035_v8 = vsel %vm6029_vm12, %v6022_v53, %v6024_v59  ;;  %v6036_v60 = vsel %vm6029_vm12, %v6024_v59, %v6026_v58 }
 0x244   : > { %6917 = vmatmul.mubr.msk.bf16.vlgmr.msra.gmra.mrb[0].mxu1 %vm381_vm2, %v6913_v54  ;;  %6918 = vmatprep.subr.msk.bf16.mxu0 %vm385_vm1, %v6035_v8  ;;  %v6060_v12 = vsel %vm385_vm1, %v6036_v60, 0 }
 0x245   : > { %6148 = vmatpush1.bf16.msra.mxu0 %v6054_v10  ;;  %6220 = vmatprep.mubr.bf16.mxu1 %v7413_v0 }
 0x246   : > { %v6240_v61 = vpop.permute.xlu1 %6239  ;;  %v6028_v62 = vpop.permute.xlu0 %6027 }
 0x247   : > { %v6037_v11 = vsel %vm6029_vm12, %v6026_v58, %v6028_v62 }
 0x248   : > { %6919 = vmatmul.mubr.msk.bf16.vlgmr.msra.gmra.mrb[4].mxu0 %vm381_vm2, %v6913_v54  ;;  %6920 = vmatprep.subr.msk.bf16.mxu1 %vm385_vm1, %v6037_v11  ;;  %v6502_v11 = vrot.slane %v6473_v26, %v6501_v49 }
 0x249   : > { %6189 = vmatpush1.bf16.msra.mxu1 %v6060_v12  ;;  %6325 = vmatprep.mubr.bf16.mxu0 %v7413_v0 }
 0x24a   : > { %v6244_v63 = vpop.permute.xlu1 %6243  ;;  %v6242_v1 = vpop.permute.xlu0 %6241 }
 0x24b   : > { %v6258_v6 = vsel %vm6257_vm13, %v6240_v61, %v6242_v1  ;;  %v6259_v3 = vsel %vm6257_vm13, %v6242_v1, %v6244_v63  ;;  %v6506_v1 = vrot.slane %v6473_v26, %v6505_v5 }
 0x24c   : > { %v6270_v14 = vsel %vm385_vm1, %v6258_v6, 0  ;;  %6921 = vmatmul.mubr.msk.bf16.vlgmr.msra.gmra.mrb[4].mxu1 %vm381_vm2, %v6913_v54  ;;  %6923 = vmatprep.subr.msk.bf16.mxu0 %vm385_vm1, %v6259_v3 }
 0x24d   : > { %6294 = vmatpush1.bf16.msra.mxu0 %v6270_v14  ;;  %6366 = vmatprep.mubr.bf16.mxu1 %v7413_v0 }
 0x24e   : > { %v6248_v4 = vpop.permute.xlu1 %6247  ;;  %v6246_v15 = vpop.permute.xlu0 %6245 }
 0x24f   : > { %v6260_v16 = vsel %vm6257_vm13, %v6244_v63, %v6246_v15  ;;  %v6261_v50 = vsel %vm6257_vm13, %v6246_v15, %v6248_v4 }
 0x250   : > { %v6276_v17 = vsel %vm385_vm1, %v6260_v16, 0  ;;  %6924 = vmatmul.mubr.msk.bf16.vlgmr.msra.gmra.mrb[0].mxu0 %vm381_vm2, %v6922_v9  ;;  %6925 = vmatprep.subr.msk.bf16.mxu1 %vm385_vm1, %v6261_v50 }
 0x251   : > { %6335 = vmatpush1.bf16.msra.mxu1 %v6276_v17  ;;  %6407 = vmatprep.mubr.bf16.mxu0 %v7413_v0 }
 0x252   : > { %v6252_v52 = vpop.permute.xlu1 %6251  ;;  %v6250_v13 = vpop.permute.xlu0 %6249 }
 0x253   : > { %v6262_v18 = vsel %vm6257_vm13, %v6248_v4, %v6250_v13  ;;  %v6263_v19 = vsel %vm6257_vm13, %v6250_v13, %v6252_v52 }
 0x254   : > { %v6282_v20 = vsel %vm385_vm1, %v6262_v18, 0  ;;  %6926 = vmatmul.mubr.msk.bf16.vlgmr.msra.gmra.mrb[0].mxu1 %vm381_vm2, %v6922_v9  ;;  %6927 = vmatprep.subr.msk.bf16.mxu0 %vm385_vm1, %v6263_v19 }
 0x255   : > { %6376 = vmatpush1.bf16.msra.mxu0 %v6282_v20  ;;  %6448 = vmatprep.mubr.bf16.mxu1 %v7413_v0  ;;  %v6477_v0 = vsub.s32 0, %v6476_v25 }
 0x256   : > { %v6256_v21 = vpop.permute.xlu1 %6255  ;;  %v6254_v2 = vpop.permute.xlu0 %6253 }
 0x257   : > { %v6264_v7 = vsel %vm6257_vm13, %v6252_v52, %v6254_v2  ;;  %v6265_v22 = vsel %vm6257_vm13, %v6254_v2, %v6256_v21  ;;  %v6478_v28 = vrot.slane %v6473_v26, %v6477_v0 }
 0x258   : > { %v6288_v23 = vsel %vm385_vm1, %v6264_v7, 0  ;;  %6928 = vmatmul.mubr.msk.bf16.vlgmr.msra.gmra.mrb[4].mxu0 %vm381_vm2, %v6922_v9  ;;  %6929 = vmatprep.subr.msk.bf16.mxu1 %vm385_vm1, %v6265_v22  ;;  %vm6549_vm1 = vcmask 7168  }
 0x259   : > { %6417 = vmatpush1.bf16.msra.mxu1 %v6288_v23 }
 0x25c   : > { %6930 = vmatmul.mubr.msk.bf16.vlgmr.msra.gmra.mrb[4].mxu1 %vm381_vm2, %v6922_v9  ;;  %vm6551_vm2 = vcmask 15360  }
 0x323   : > { %v6327_v32 = vpop.f32.mrb[0].mxu0 }
 0x324   : > { %6465 = vst [vmem:[%s8668_s6] sm:$0xff] %v6327_v32  ;;  %v6515_v33 = vmul.f32 %v6478_v28, %v6327_v32  ;;  %v6329_v34 = vpop.f32.mrb[1].mxu0 }
 0x325   : > { %6466 = vst [vmem:[%s8668_s6 + $0x8] sm:$0xff] %v6329_v34  ;;  %v6516_v37 = vmul.f32 %v6482_v30, %v6329_v34  ;;  %v6331_v38 = vpop.f32.mrb[2].mxu0 }
 0x326   : > { %v6532_v41 = vmul.f32 %v6515_v33, %v6327_v32  ;;  %v6332_v42 = vpop.f32.mrb[3].mxu0 }
 0x327   : > { %v6523_v43 = vadd.f32 %v6516_v37, %v6515_v33  ;;  %v6533_v44 = vmul.f32 %v6516_v37, %v6329_v34  ;;  %v6368_v45 = vpop.f32.mrb[0].mxu1 }
 0x328   : > { %6467 = vst [vmem:[%s8668_s6 + $0x10] sm:$0xff] %v6368_v45  ;;  %v6517_v46 = vmul.f32 %v6486_v35, %v6368_v45  ;;  %v6370_v47 = vpop.f32.mrb[1].mxu1 }
 0x329   : > { %v6540_v51 = vadd.f32 %v6533_v44, %v6532_v41  ;;  %6468 = vst [vmem:[%s8668_s6 + $0x18] sm:$0xff] %v6370_v47  ;;  %v6518_v53 = vmul.f32 %v6490_v39, %v6370_v47  ;;  %v6372_v54 = vpop.f32.mrb[2].mxu1 }
 0x32a   : > { %v6524_v56 = vadd.f32 %v6523_v43, %v6517_v46  ;;  %v6534_v57 = vmul.f32 %v6517_v46, %v6368_v45  ;;  %v6373_v58 = vpop.f32.mrb[3].mxu1 }
 0x32b   : > { %v6535_v59 = vmul.f32 %v6518_v53, %v6370_v47  ;;  %v6409_v8 = vpop.f32.mrb[4].mxu0 }
 0x32c   : > { %v6541_v10 = vadd.f32 %v6540_v51, %v6534_v57  ;;  %v6525_v60 = vadd.f32 %v6524_v56, %v6518_v53  ;;  %6469 = vst [vmem:[%s8668_s6 + $0x20] sm:$0xff] %v6409_v8  ;;  %v6519_v61 = vmul.f32 %v6494_v48, %v6409_v8  ;;  %v6411_v62 = vpop.f32.mrb[5].mxu0 }
 0x32d   : > { %6470 = vst [vmem:[%s8668_s6 + $0x28] sm:$0xff] %v6411_v62  ;;  %v6520_v12 = vmul.f32 %v6498_v55, %v6411_v62  ;;  %v6413_v63 = vpop.f32.mrb[6].mxu0 }
 0x32e   : > { %v6542_v6 = vadd.f32 %v6541_v10, %v6535_v59  ;;  %v6526_v3 = vadd.f32 %v6525_v60, %v6519_v61  ;;  %v6536_v14 = vmul.f32 %v6519_v61, %v6409_v8  ;;  %v6414_v4 = vpop.f32.mrb[7].mxu0 }
 0x32f   : > { %v6537_v9 = vmul.f32 %v6520_v12, %v6411_v62  ;;  %v6450_v15 = vpop.f32.mrb[4].mxu1 }
 0x330   : > { %v6543_v16 = vadd.f32 %v6542_v6, %v6536_v14  ;;  %v6527_v50 = vadd.f32 %v6526_v3, %v6520_v12  ;;  %6471 = vst [vmem:[%s8668_s6 + $0x30] sm:$0xff] %v6450_v15  ;;  %v6521_v17 = vmul.f32 %v6502_v11, %v6450_v15  ;;  %v6452_v52 = vpop.f32.mrb[5].mxu1 }
 0x331   : > { %6472 = vst [vmem:[%s8668_s6 + $0x38] sm:$0xff] %v6452_v52  ;;  %v6522_v13 = vmul.f32 %v6506_v1, %v6452_v52  ;;  %v6454_v18 = vpop.f32.mrb[6].mxu1 }
 0x332   : > { %v6544_v19 = vadd.f32 %v6543_v16, %v6537_v9  ;;  %v6528_v20 = vadd.f32 %v6527_v50, %v6521_v17  ;;  %v6538_v21 = vmul.f32 %v6521_v17, %v6450_v15  ;;  %v6455_v2 = vpop.f32.mrb[7].mxu1 }
 0x333   : > { %v6539_v7 = vmul.f32 %v6522_v13, %v6452_v52 }
 0x334   : > { %v6545_v22 = vadd.f32 %v6544_v19, %v6538_v21  ;;  %v6529_v23 = vadd.f32 %v6528_v20, %v6522_v13 }
 0x336   : > { %6530 = vadd.xlane.f32.xlu0 %v6529_v23  ;;  %v6546_v24 = vadd.f32 %v6545_v22, %v6539_v7 }
 0x338   : > { %6547 = vadd.xlane.f32.xlu1 %v6546_v24 }
 0x3c3   : > { %v6531_v25 = vpop.xlane.xlu0 %6530 }
 0x3c5   : > { %v6548_v0 = vpop.xlane.xlu1 %6547 }
 0x3c6   : > { %v6550_v26 = vsel %vm6549_vm1, %v6531_v25, %v6548_v0 }
 0x3c7   : > { %6552 = vst.msk [vmem:[%s313_s8] sm:$0xff] %vm6551_vm2, %v6550_v26 }
 0x3c8 PF: > { %s16_s18 = sadd.s32 1, %s7411_s18  }
 0x3c9   : > { %p13_p7 = scmp.ge.s32.totalorder %s16_s18, 8  }
 0x3cb   :  { %15 = sbr.rel (!%p13_p7) target bundleno = 1 (0x1), region = 110 }

// kernel: resblock_forward.7
= control target key start
LH: loop header
LB: loop body
LE: loop exit
PB: predicated region body
PF: predicated region fallthrough
CT: control target
= control target key end

     0   :  { %s416_s15 = smov 0   ;;  %s447_s0 = inlined_call_operand.vmem [shape: f32[8,6144], index: 0, kind: input, shape index: {}]   ;;  %s448_s1 = inlined_call_operand.vmem [shape: f32[8,1], index: 1, kind: input, shape index: {}]   ;;  %s449_s2 = inlined_call_operand.vmem [shape: f32[8,1], index: 2, kind: input, shape index: {}]   ;;  %s450_s3 = inlined_call_operand.vmem [shape: f32[8,6144], index: 3, kind: input, shape index: {}]   ;;  %s451_s4 = inlined_call_operand.vmem [shape: f32[8,6144], index: 4, kind: output, shape index: {}]  }
   0x1 LB: > { %s359_s16 = sadd.s32 4294967295, %s388_s15   ;;  %p363_p0 = scmp.ge.s32.totalorder %s388_s15, 1  ;;  %s388_s15 = sphi %s416_s15, %s14_s15  }
   0x2   : > { %p174_p1 = scmp.lt.s32.totalorder %s388_s15, 7 }
   0x4   : > { %p175_p2 = pnand %p363_p0, %p174_p1 }
   0x5   : > { %v231_v0 = vld [vmem:[%s448_s1] sm:$0xff] (!%p175_p2)  ;;  %v390_v1 = vmov (!%p175_p2), 0   ;;  %s364_s21 = sshll.u32 (!%p175_p2), %s359_s16, 3 }
   0x6   : > { %178 = sbr.rel (%p175_p2) target bundleno = 149 (0x95), region = 36  ;;  %381 = vset.pattern.permute.xlu0 (!%p175_p2), %v390_v1  ;;  %v245_v2 = vld [vmem:[%s449_s2] sm:$0xff] (!%p175_p2)  ;;  %p206_p3 = scmp.lt.s32.totalorder (!%p175_p2), %s364_s21, 47 }
   0x7   : > { %234 = vperm.xlu0 (!%p175_p2), %381, %v231_v0  }
   0xb   : > { %248 = vperm.xlu0 (!%p175_p2), %381, %v245_v2  }
   0xd   : > { %s453_s21 = smov (!%p206_p3, %s364_s21), 47 }
   0xe   : > { %s430_s22 = sshll.u32 %s453_s21, 3 }
   0xf   : > { %s209_s25 = scalar_lea.vmem %s447_s0, %s430_s22  ;;  %s215_s28 = scalar_lea.vmem %s450_s3, %s430_s22 }
  0x10   : > { %v223_v3 = vld [vmem:[%s209_s25] sm:$0xff]  ;;  %v224_v4 = vld [vmem:[%s209_s25 + $0x8] sm:$0xff]  ;;  %v225_v6 = vld [vmem:[%s209_s25 + $0x10] sm:$0xff]  ;;  %s221_s5 = scalar_lea.vmem %s451_s4, %s430_s22 }
  0x11   : > { %v226_v7 = vld [vmem:[%s209_s25 + $0x18] sm:$0xff]  ;;  %v227_v8 = vld [vmem:[%s209_s25 + $0x20] sm:$0xff]  ;;  %v228_v9 = vld [vmem:[%s209_s25 + $0x28] sm:$0xff] }
  0x12   : > { %v229_v10 = vld [vmem:[%s209_s25 + $0x30] sm:$0xff]  ;;  %v230_v11 = vld [vmem:[%s209_s25 + $0x38] sm:$0xff]  ;;  %v259_v16 = vld [vmem:[%s215_s28] sm:$0xff] }
  0x13   : > { %v260_v17 = vld [vmem:[%s215_s28 + $0x8] sm:$0xff]  ;;  %v261_v23 = vld [vmem:[%s215_s28 + $0x10] sm:$0xff]  ;;  %v262_v24 = vld [vmem:[%s215_s28 + $0x18] sm:$0xff] }
  0x14   : > { %v263_v25 = vld [vmem:[%s215_s28 + $0x20] sm:$0xff]  ;;  %v264_v30 = vld [vmem:[%s215_s28 + $0x28] sm:$0xff]  ;;  %v265_v31 = vld [vmem:[%s215_s28 + $0x30] sm:$0xff] }
  0x15   : > { %v266_v32 = vld [vmem:[%s215_s28 + $0x38] sm:$0xff] }
  0x86   : > { %v235_v5 = vpop.permute.xlu0 %234 }
  0x87   : > { %v237_v12 = vmul.f32 %v235_v5, %v223_v3  ;;  %v238_v13 = vmul.f32 %v235_v5, %v224_v4  ;;  %v239_v14 = vmul.f32 %v235_v5, %v225_v6  ;;  %v240_v15 = vmul.f32 %v235_v5, %v226_v7 }
  0x88   : > { %v241_v19 = vmul.f32 %v235_v5, %v227_v8  ;;  %v242_v20 = vmul.f32 %v235_v5, %v228_v9  ;;  %v243_v21 = vmul.f32 %v235_v5, %v229_v10  ;;  %v244_v22 = vmul.f32 %v235_v5, %v230_v11 }
  0x8a   : > { %v249_v18 = vpop.permute.xlu0 %248 }
  0x8b   : > { %v251_v26 = vadd.f32 %v249_v18, %v237_v12  ;;  %v252_v27 = vadd.f32 %v249_v18, %v238_v13  ;;  %v253_v28 = vadd.f32 %v249_v18, %v239_v14  ;;  %v254_v29 = vadd.f32 %v249_v18, %v240_v15 }
  0x8c   : > { %v255_v33 = vadd.f32 %v249_v18, %v241_v19  ;;  %v256_v34 = vadd.f32 %v249_v18, %v242_v20  ;;  %v257_v35 = vadd.f32 %v249_v18, %v243_v21  ;;  %v258_v36 = vadd.f32 %v249_v18, %v244_v22 }
  0x8d   : > { %v267_v37 = vadd.f32 %v259_v16, %v251_v26  ;;  %v268_v38 = vadd.f32 %v260_v17, %v252_v27  ;;  %v269_v39 = vadd.f32 %v261_v23, %v253_v28  ;;  %v270_v40 = vadd.f32 %v262_v24, %v254_v29 }
  0x8e   : > { %v271_v41 = vadd.f32 %v263_v25, %v255_v33  ;;  %v272_v42 = vadd.f32 %v264_v30, %v256_v34  ;;  %v273_v43 = vadd.f32 %v265_v31, %v257_v35  ;;  %v274_v44 = vadd.f32 %v266_v32, %v258_v36 }
  0x8f   : > { %v275_v45 = vmax.f32 %v267_v37, 0.0  ;;  %v276_v46 = vmax.f32 %v268_v38, 0.0  ;;  %v277_v47 = vmax.f32 %v269_v39, 0.0  ;;  %v278_v48 = vmax.f32 %v270_v40, 0.0 }
  0x90   : > { %v279_v49 = vmax.f32 %v271_v41, 0.0  ;;  %v280_v50 = vmax.f32 %v272_v42, 0.0  ;;  %v281_v51 = vmax.f32 %v273_v43, 0.0  ;;  %v282_v52 = vmax.f32 %v274_v44, 0.0 }
  0x91   : > { %283 = vst [vmem:[%s221_s5] sm:$0xff] %v275_v45  ;;  %284 = vst [vmem:[%s221_s5 + $0x8] sm:$0xff] %v276_v46 }
  0x92   : > { %285 = vst [vmem:[%s221_s5 + $0x10] sm:$0xff] %v277_v47  ;;  %286 = vst [vmem:[%s221_s5 + $0x18] sm:$0xff] %v278_v48 }
  0x93   : > { %287 = vst [vmem:[%s221_s5 + $0x20] sm:$0xff] %v279_v49  ;;  %288 = vst [vmem:[%s221_s5 + $0x28] sm:$0xff] %v280_v50 }
  0x94   : > { %289 = vst [vmem:[%s221_s5 + $0x30] sm:$0xff] %v281_v51  ;;  %290 = vst [vmem:[%s221_s5 + $0x38] sm:$0xff] %v282_v52 }
  0x95 PF: > { %s14_s15 = sadd.s32 1, %s388_s15  }
  0x96   : > { %p11_p4 = scmp.ge.s32.totalorder %s14_s15, 8  }
  0x98   :  { %13 = sbr.rel (!%p11_p4) target bundleno = 1 (0x1), region = 69 }

</bundles_post_ra>
